<compile_context>
chip_gen: v7x
topology: tpu7x:2x2x1
jax: 0.10.0
libtpu: 0.0.40
codegen_flags: <defaults>
</compile_context>

<pallas_src>
import functools
import math

import jax
import jax.numpy as jnp
from jax import lax
from jax.experimental import pallas as pl
from jax.experimental.pallas import tpu as pltpu


# ------------------------------------------------------------------------------------
# Fused GRU helpers (used inside the DialogueRNN kernel).  The 6 gate matmuls of a
# torch.nn.GRUCell are fused into dots against packed (din, 3H) / (H, 3H) weights,
# and gates are taken with static lane slices.
# ------------------------------------------------------------------------------------
def _gru1(x, h, wi_ref, wh_ref, bi_ref, bh_ref):
    hid = wh_ref.shape[0]
    gi = jnp.dot(x, wi_ref[...], preferred_element_type=jnp.float32) + bi_ref[...]
    gh = jnp.dot(h, wh_ref[...], preferred_element_type=jnp.float32) + bh_ref[...]
    r = jax.nn.sigmoid(gi[:, :hid] + gh[:, :hid])
    z = jax.nn.sigmoid(gi[:, hid:2 * hid] + gh[:, hid:2 * hid])
    n = jnp.tanh(gi[:, 2 * hid:] + r * gh[:, 2 * hid:])
    return (1.0 - z) * n + z * h


def _gru2(x1, x2, h, wi_ref, wh_ref, bi_ref, bh_ref):
    """GRU whose input is the (virtual) concatenation [x1, x2]; the input weight is
    split by rows so no lane-axis concatenate is needed inside the kernel."""
    hid = wh_ref.shape[0]
    d1 = x1.shape[1]
    wi = wi_ref[...]
    gi = (jnp.dot(x1, wi[:d1, :], preferred_element_type=jnp.float32)
          + jnp.dot(x2, wi[d1:, :], preferred_element_type=jnp.float32)
          + bi_ref[...])
    gh = jnp.dot(h, wh_ref[...], preferred_element_type=jnp.float32) + bh_ref[...]
    r = jax.nn.sigmoid(gi[:, :hid] + gh[:, :hid])
    z = jax.nn.sigmoid(gi[:, hid:2 * hid] + gh[:, hid:2 * hid])
    n = jnp.tanh(gi[:, 2 * hid:] + r * gh[:, 2 * hid:])
    return (1.0 - z) * n + z * h


# ------------------------------------------------------------------------------------
# Pallas kernel 1: whole DialogueRNN recurrence, one grid step per timestep.
# ------------------------------------------------------------------------------------
_N_DRNN_W = 36   # 6 GRU cells * 4  +  4 att rows  +  msa1/msa2 (w,b)  +  dense1/dense2 (w,b)


def _drnn_kernel(*refs):
    ut_ref, ua_ref, qm_ref = refs[0:3]
    w = refs[3:3 + _N_DRNN_W]
    et_ref, ea_ref, alpha_ref = refs[3 + _N_DRNN_W:6 + _N_DRNN_W]
    ght_ref, gha_ref, qt_ref, qa_ref, ept_ref, epa_ref = refs[6 + _N_DRNN_W:]

    s_len, b_sz, _ = ght_ref.shape
    t = pl.program_id(0)

    @pl.when(t == 0)
    def _init():
        ght_ref[...] = jnp.zeros_like(ght_ref)
        gha_ref[...] = jnp.zeros_like(gha_ref)
        qt_ref[...] = jnp.zeros_like(qt_ref)
        qa_ref[...] = jnp.zeros_like(qa_ref)
        ept_ref[...] = jnp.zeros_like(ept_ref)
        epa_ref[...] = jnp.zeros_like(epa_ref)

    ut = ut_ref[0]                       # (B, D_m)  (dense_t already applied outside)
    ua = ua_ref[0]
    qm = qm_ref[0]                       # (B, P) one-hot speaker mask
    qm3 = qm[:, :, None]

    q_t0 = qt_ref[...]                   # (B, P, D_p)
    q_a0 = qa_ref[...]
    # one-hot select of the speaker's party state (replaces argmax + gather)
    sel_qt = jnp.sum(qm3 * q_t0, axis=1)
    sel_qa = jnp.sum(qm3 * q_a0, axis=1)

    tm1 = jnp.maximum(t - 1, 0)
    g_prev_t = ght_ref[tm1]              # zeros at t == 0 (scratch just initialised)
    g_prev_a = gha_ref[tm1]

    g_t = _gru2(ut, sel_qt, g_prev_t, w[0], w[1], w[2], w[3])
    g_a = _gru2(ua, sel_qa, g_prev_a, w[4], w[5], w[6], w[7])

    # --- SimpleAttention over the g history prefix (positions < t), 4 heads ---
    g_full_t = ght_ref[...]              # rows >= t are still zero
    g_full_a = gha_ref[...]
    s_idx = lax.broadcasted_iota(jnp.int32, (s_len, b_sz), 0)
    valid = s_idx < t
    validf = valid.astype(jnp.float32)

    def prefix_attn(g_full, w_row_ref):
        wv = w_row_ref[...]                                     # (1, D_g)
        scores = jnp.sum(g_full * wv[None, :, :], axis=-1)      # (S, B)
        sc = jnp.where(valid, scores, -1e9)
        mx = jnp.max(sc, axis=0, keepdims=True)
        ex = jnp.exp(sc - mx) * validf
        den = jnp.maximum(jnp.sum(ex, axis=0, keepdims=True), 1e-20)
        alpha = ex / den                                        # (S, B), zero at t==0
        c = jnp.sum(alpha[:, :, None] * g_full, axis=0)         # (B, D_g)
        return c, alpha

    c_tt, a_tt = prefix_attn(g_full_t, w[24])
    c_at, a_at = prefix_attn(g_full_t, w[25])
    c_ta, a_ta = prefix_attn(g_full_a, w[26])
    c_aa, a_aa = prefix_attn(g_full_a, w[27])
    alpha_sum = a_tt + a_ta + a_at + a_aa                       # (S, B)

    flag = jnp.where(t > 0, 1.0, 0.0)    # reference forces c_t = c_a = 0 at t == 0

    # SelfAttention('general2') on the 2-element bag + dense (softmax over BATCH axis,
    # faithful to the reference)
    def self_att_dense(c0, c1, wm_ref, bm_ref, wd_ref, bd_ref):
        wm = wm_ref[...]
        bm = bm_ref[...]
        s0 = jnp.dot(c0, wm, preferred_element_type=jnp.float32) + bm   # (B, 1)
        s1 = jnp.dot(c1, wm, preferred_element_type=jnp.float32) + bm

        def softmax_batch(s):
            m = jnp.max(s, axis=0, keepdims=True)
            e = jnp.exp(s - m)
            return e / jnp.sum(e, axis=0, keepdims=True)

        a0 = softmax_batch(s0)
        a1 = softmax_batch(s1)
        o0 = a0 * c0 + c0
        o1 = a1 * c1 + c1
        wd = wd_ref[...]
        dg = c0.shape[1]
        return (jnp.dot(o0, wd[:dg, :], preferred_element_type=jnp.float32)
                + jnp.dot(o1, wd[dg:, :], preferred_element_type=jnp.float32)
                + bd_ref[...])

    c_t = flag * self_att_dense(c_tt, c_ta, w[28], w[29], w[32], w[33])
    c_a = flag * self_att_dense(c_aa, c_at, w[30], w[31], w[34], w[35])

    # --- party state update: only the speaker row is computed, then scattered back ---
    qs_t = _gru2(ut, c_t, sel_qt, w[8], w[9], w[10], w[11])
    qs_a = _gru2(ua, c_a, sel_qa, w[12], w[13], w[14], w[15])
    qt_ref[...] = q_t0 * (1.0 - qm3) + qs_t[:, None, :] * qm3
    qa_ref[...] = q_a0 * (1.0 - qm3) + qs_a[:, None, :] * qm3

    # --- emotion GRUs ---
    e_t = _gru1(qs_t, ept_ref[...], w[16], w[17], w[18], w[19])
    e_a = _gru1(qs_a, epa_ref[...], w[20], w[21], w[22], w[23])
    ept_ref[...] = e_t
    epa_ref[...] = e_a

    # --- write history and per-step outputs ---
    ght_ref[t] = g_t
    gha_ref[t] = g_a
    et_ref[0] = e_t
    ea_ref[0] = e_a
    alpha_ref[0] = alpha_sum


def _resident_spec(arr):
    nd = arr.ndim
    return pl.BlockSpec(arr.shape, lambda t, _nd=nd: (0,) * _nd)


def dialogue_rnn_forward(p, ut_seq, ua_seq, qmask):
    """ut_seq, ua_seq: (S, B, *), qmask: (S, B, P).  Returns e (S, B, 2*D_e), alpha list."""
    s_len, b_sz, _ = ut_seq.shape
    n_party = qmask.shape[2]
    d_m = p['dense_t']['w'].shape[1]
    d_g = p['g_cell_t']['wh'].shape[0]
    d_p = p['p_cell_t']['wh'].shape[0]
    d_e = p['e_cell_t']['wh'].shape[0]

    # dense_t / dense_a applied to the whole sequence in one XLA matmul each
    ut = ut_seq @ p['dense_t']['w'] + p['dense_t']['b']
    ua = ua_seq @ p['dense_a']['w'] + p['dense_a']['b']

    def gru_w(name):
        c = p[name]
        return [c['wi'], c['wh'], c['bi'], c['bh']]

    weights = (gru_w('g_cell_t') + gru_w('g_cell_a')
               + gru_w('p_cell_t') + gru_w('p_cell_a')
               + gru_w('e_cell_t') + gru_w('e_cell_a')
               + [p['att1']['w'].T, p['att2']['w'].T, p['att3']['w'].T, p['att4']['w'].T,
                  p['msa1']['w'], p['msa1']['b'], p['msa2']['w'], p['msa2']['b'],
                  p['dense1']['w'], p['dense1']['b'], p['dense2']['w'], p['dense2']['b']])
    assert len(weights) == _N_DRNN_W

    in_specs = ([pl.BlockSpec((1, b_sz, d_m), lambda t: (t, 0, 0)),
                 pl.BlockSpec((1, b_sz, d_m), lambda t: (t, 0, 0)),
                 pl.BlockSpec((1, b_sz, n_party), lambda t: (t, 0, 0))]
                + [_resident_spec(wa) for wa in weights])

    out_specs = [pl.BlockSpec((1, b_sz, d_e), lambda t: (t, 0, 0)),
                 pl.BlockSpec((1, b_sz, d_e), lambda t: (t, 0, 0)),
                 pl.BlockSpec((1, s_len, b_sz), lambda t: (t, 0, 0))]
    out_shape = [jax.ShapeDtypeStruct((s_len, b_sz, d_e), jnp.float32),
                 jax.ShapeDtypeStruct((s_len, b_sz, d_e), jnp.float32),
                 jax.ShapeDtypeStruct((s_len, s_len, b_sz), jnp.float32)]
    scratch_shapes = [pltpu.VMEM((s_len, b_sz, d_g), jnp.float32),   # g history (text)
                      pltpu.VMEM((s_len, b_sz, d_g), jnp.float32),   # g history (audio)
                      pltpu.VMEM((b_sz, n_party, d_p), jnp.float32), # q_t
                      pltpu.VMEM((b_sz, n_party, d_p), jnp.float32), # q_a
                      pltpu.VMEM((b_sz, d_e), jnp.float32),          # e_t carry
                      pltpu.VMEM((b_sz, d_e), jnp.float32)]          # e_a carry

    et, ea, alpha_raw = pl.pallas_call(
        _drnn_kernel,
        grid=(s_len,),
        in_specs=in_specs,
        out_specs=out_specs,
        out_shape=out_shape,
        scratch_shapes=scratch_shapes,
        compiler_params=pltpu.CompilerParams(dimension_semantics=("arbitrary",)),
    )(ut, ua, qmask, *weights)

    # DialogueRNN tail: softmax over a size-1 axis is identically 1, so
    # e = e + e*score == 2*e  (mathematically identical to the reference).
    e = 2.0 * jnp.concatenate([et, ea], axis=-1)
    alpha_full = jnp.transpose(alpha_raw, (0, 2, 1))                 # (S, B, S)
    alpha_list = [alpha_full[ti, :, :ti] for ti in range(1, s_len)]
    return e, alpha_list


# ------------------------------------------------------------------------------------
# Pallas kernel 2: windowed MatchingAttention('general2') + linear + ReLU, all branches
# in one call; only the k-wide window is fetched per grid step.
# ------------------------------------------------------------------------------------
def _matchatt_kernel(mwin_ref, x_ref, wt_ref, bt_ref, wl_ref, bl_ref,
                     hid_ref, alpha_ref, *, seq_len, window):
    t = pl.program_id(1)
    half = window // 2
    m = mwin_ref[0]                        # (B, k, D)  window rows
    x = x_ref[0]                           # (B, D)
    b_sz = x.shape[0]

    xt = jnp.dot(x, wt_ref[...], preferred_element_type=jnp.float32) + bt_ref[...]
    scores = jnp.einsum('bqd,bkd->bqk', xt[:, None, :], m,
                        preferred_element_type=jnp.float32)[:, 0, :]          # (B, k)

    start = jnp.clip(t - half, 0, seq_len - window)
    lo = jnp.maximum(t - half, 0)
    hi = jnp.minimum(t + half, seq_len)
    pos = start + lax.broadcasted_iota(jnp.int32, (b_sz, window), 1)
    valid = (pos >= lo) & (pos < hi)

    sc = jnp.where(valid, scores, -1e9)
    mx = jnp.max(sc, axis=-1, keepdims=True)
    ex = jnp.exp(sc - mx)
    ex = jnp.where(valid, ex, 0.0)
    alpha = ex / jnp.sum(ex, axis=-1, keepdims=True)                           # (B, k)

    attn = jnp.einsum('bqk,bkd->bqd', alpha[:, None, :], m,
                      preferred_element_type=jnp.float32)[:, 0, :]             # (B, D)
    hid = jnp.maximum(jnp.dot(attn, wl_ref[...], preferred_element_type=jnp.float32)
                      + bl_ref[...], 0.0)
    hid_ref[0] = hid
    alpha_ref[0] = alpha


def _build_windows(m, k):
    """m: (S, B, D) -> (S, B, k, D) with window start clamped to [0, S-k]."""
    s_len = m.shape[0]
    starts = jnp.clip(jnp.arange(s_len) - k // 2, 0, s_len - k)
    idx = starts[:, None] + jnp.arange(k)[None, :]            # (S, k)
    win = m[idx]                                              # (S, k, B, D)
    return jnp.transpose(win, (0, 2, 1, 3))                   # (S, B, k, D)


def matchatt_linear_batched(m_list, x_list, matchatt_p, linear_p, k):
    nb = len(m_list)
    s_len, b_sz, d = m_list[0].shape
    assert s_len >= k
    d_out = linear_p['w'].shape[1]

    mwin = jnp.stack([_build_windows(m, k) for m in m_list], axis=0)
    mwin = mwin.reshape(nb * s_len, b_sz, k, d)
    xs = jnp.stack(x_list, axis=0).reshape(nb * s_len, b_sz, d)

    kern = functools.partial(_matchatt_kernel, seq_len=s_len, window=k)
    hid, alpha = pl.pallas_call(
        kern,
        grid=(nb, s_len),
        in_specs=[
            pl.BlockSpec((1, b_sz, k, d), lambda br, t: (br * s_len + t, 0, 0, 0)),
            pl.BlockSpec((1, b_sz, d), lambda br, t: (br * s_len + t, 0, 0)),
            pl.BlockSpec((d, d), lambda br, t: (0, 0)),
            pl.BlockSpec((1, d), lambda br, t: (0, 0)),
            pl.BlockSpec((d, d_out), lambda br, t: (0, 0)),
            pl.BlockSpec((1, d_out), lambda br, t: (0, 0)),
        ],
        out_specs=[
            pl.BlockSpec((1, b_sz, d_out), lambda br, t: (br * s_len + t, 0, 0)),
            pl.BlockSpec((1, b_sz, k), lambda br, t: (br * s_len + t, 0, 0)),
        ],
        out_shape=[
            jax.ShapeDtypeStruct((nb * s_len, b_sz, d_out), jnp.float32),
            jax.ShapeDtypeStruct((nb * s_len, b_sz, k), jnp.float32),
        ],
        compiler_params=pltpu.CompilerParams(
            dimension_semantics=("parallel", "parallel")),
    )(mwin, xs, matchatt_p['w'], matchatt_p['b'], linear_p['w'], linear_p['b'])
    return (hid.reshape(nb, s_len, b_sz, d_out),
            alpha.reshape(nb, s_len, b_sz, k))


# ------------------------------------------------------------------------------------
# Pallas kernel 3: final head (tanh -> per-group transform2 -> softmax over 4 groups ->
# rescale hidden -> smax_fc -> log_softmax).  Group ops are expressed as small matmuls.
# ------------------------------------------------------------------------------------
def _head_kernel(h_ref, w2g_ref, b2_ref, gmap_ref, wfc_ref, bfc_ref, o_ref):
    h = h_ref[...]                                                        # (N, feat)
    th = jnp.tanh(h)
    sc = jnp.dot(th, w2g_ref[...], preferred_element_type=jnp.float32) + b2_ref[...]
    mx = jnp.max(sc, axis=1, keepdims=True)
    ex = jnp.exp(sc - mx)
    sm = ex / jnp.sum(ex, axis=1, keepdims=True)                          # (N, groups)
    scale = jnp.dot(sm, gmap_ref[...], preferred_element_type=jnp.float32)  # (N, feat)
    hs = h * scale
    logits = jnp.dot(hs, wfc_ref[...], preferred_element_type=jnp.float32) + bfc_ref[...]
    lmx = jnp.max(logits, axis=1, keepdims=True)
    lse = lmx + jnp.log(jnp.sum(jnp.exp(logits - lmx), axis=1, keepdims=True))
    o_ref[...] = (logits - lse).astype(o_ref.dtype)


def head_forward(hidden, transform2_p, smax_p, groups=4):
    s_len, b_sz, feat = hidden.shape
    g = feat // groups
    n_cls = smax_p['w'].shape[1]
    w2 = transform2_p['w'][:, 0]
    eye = jnp.eye(groups, dtype=jnp.float32)
    w2g = jnp.kron(eye, w2[:, None])                       # (feat, groups) block-diagonal
    gmap = jnp.kron(eye, jnp.ones((1, g), jnp.float32))    # (groups, feat) indicator
    h2 = hidden.reshape(s_len * b_sz, feat)
    out = pl.pallas_call(
        _head_kernel,
        out_shape=jax.ShapeDtypeStruct((s_len * b_sz, n_cls), jnp.float32),
    )(h2, w2g, transform2_p['b'], gmap, smax_p['w'], smax_p['b'])
    return out.reshape(s_len, b_sz, n_cls)


# ------------------------------------------------------------------------------------
# Parameter init + plain-JAX glue
# ------------------------------------------------------------------------------------
def init_linear(key, din, dout, bias=True):
    k1, k2 = jax.random.split(key)
    bound = 1.0 / math.sqrt(din)
    p = {'w': jax.random.uniform(k1, (din, dout), jnp.float32, -bound, bound)}
    p['b'] = (jax.random.uniform(k2, (1, dout), jnp.float32, -bound, bound)
              if bias else None)
    return p


def init_gru(key, din, dh):
    ks = jax.random.split(key, 4)
    bound = 1.0 / math.sqrt(dh)
    return {'wi': jax.random.uniform(ks[0], (din, 3 * dh), jnp.float32, -bound, bound),
            'wh': jax.random.uniform(ks[1], (dh, 3 * dh), jnp.float32, -bound, bound),
            'bi': jax.random.uniform(ks[2], (1, 3 * dh), jnp.float32, -bound, bound),
            'bh': jax.random.uniform(ks[3], (1, 3 * dh), jnp.float32, -bound, bound)}


def init_dialogue_rnn(key, dim_t, dim_a, d_m, d_g, d_p, d_e):
    ks = jax.random.split(key, 16)
    return {
        'dense_t': init_linear(ks[0], dim_t, d_m),
        'dense_a': init_linear(ks[1], dim_a, d_m),
        'g_cell_t': init_gru(ks[2], d_m + d_p, d_g),
        'g_cell_a': init_gru(ks[3], d_m + d_p, d_g),
        'p_cell_t': init_gru(ks[4], d_m + d_g, d_p),
        'p_cell_a': init_gru(ks[5], d_m + d_g, d_p),
        'e_cell_t': init_gru(ks[6], d_p, d_e),
        'e_cell_a': init_gru(ks[7], d_p, d_e),
        'att1': init_linear(ks[8], d_g, 1, bias=False),
        'att2': init_linear(ks[9], d_g, 1, bias=False),
        'att3': init_linear(ks[10], d_g, 1, bias=False),
        'att4': init_linear(ks[11], d_g, 1, bias=False),
        'msa1': init_linear(ks[12], d_g, 1, bias=True),
        'msa2': init_linear(ks[13], d_g, 1, bias=True),
        'dense1': init_linear(ks[14], 2 * d_g, d_g),
        'dense2': init_linear(ks[15], 2 * d_g, d_g),
        # DialogueRNN.self_attention is a mathematical no-op (softmax over a size-1 axis);
        # its parameters never affect the output and are omitted.
    }


def init_our_model(key, d_m_t, d_m_a, d_g, d_p, d_e, d_h, n_classes):
    # TODO(synk): OurModel passes mis-ordered args to DialogueRNN in the reference; the
    # internal D_m is chosen = D_g and dims are wired consistently.
    d_m = d_g
    emo_dim = 4 * d_e   # fwd/bwd concat of the DialogueRNN output [e_t, e_a]
    ks = jax.random.split(key, 8)
    return {
        'drnn_f_T': init_dialogue_rnn(ks[0], d_m_t, d_m_a, d_m, d_g, d_p, d_e),
        'drnn_r_T': init_dialogue_rnn(ks[1], d_m_t, d_m_a, d_m, d_g, d_p, d_e),
        'drnn_f_A': init_dialogue_rnn(ks[2], d_m_a, d_m_t, d_m, d_g, d_p, d_e),
        'drnn_r_A': init_dialogue_rnn(ks[3], d_m_a, d_m_t, d_m, d_g, d_p, d_e),
        # TODO(synk): reference declares linear/matchatt on 2*D_e, but the emotion feature
        # dim after the fwd/bwd concat is 4*D_e; sized consistently here.
        'linear': init_linear(ks[4], emo_dim, 2 * d_h),
        'smax_fc': init_linear(ks[5], 8 * d_h, n_classes),
        'matchatt': init_linear(ks[6], emo_dim, emo_dim, bias=True),
        'transform2': init_linear(ks[7], 2 * d_h, 1, bias=True),
    }


def reverse_seq(x, umask):
    """x: (S, B, ...), umask: (B, S)."""
    s_len, b_sz = x.shape[0], x.shape[1]
    lengths = jnp.sum(umask, axis=1).astype(jnp.int32)
    s_idx = jnp.arange(s_len)[:, None]
    gather = lengths[None, :] - 1 - s_idx
    valid = gather >= 0
    gather = jnp.clip(gather, 0, s_len - 1)
    out = x[gather, jnp.arange(b_sz)[None, :]]
    # TODO(synk): torch pad_sequence trims to max(lengths); here the output keeps S rows.
    return out * valid.reshape(s_len, b_sz, *([1] * (x.ndim - 2))).astype(x.dtype)


def our_model_forward(params, t_feat, a_feat, qmask, umask, k=4):
    # TODO(synk): reference calls self.dialog_rnn_f_T(T, qmask) (wrong arity); both
    # modalities (T, A, qmask) are passed as DialogueRNN.forward expects.
    em_f_t, alpha_f1 = dialogue_rnn_forward(params['drnn_f_T'], t_feat, a_feat, qmask)
    rev_t = reverse_seq(t_feat, umask)
    rev_a = reverse_seq(a_feat, umask)
    rev_q = reverse_seq(qmask, umask)
    em_b_t, alpha_b1 = dialogue_rnn_forward(params['drnn_r_T'], rev_t, rev_a, rev_q)
    em_b_t = reverse_seq(em_b_t, umask)
    emotions_t = jnp.concatenate([em_f_t, em_b_t], axis=-1)

    em_f_a, alpha_f2 = dialogue_rnn_forward(params['drnn_f_A'], a_feat, t_feat, qmask)
    em_b_a, alpha_b2 = dialogue_rnn_forward(params['drnn_r_A'], rev_a, rev_t, rev_q)
    em_b_a = reverse_seq(em_b_a, umask)
    emotions_a = jnp.concatenate([em_f_a, em_b_a], axis=-1)

    alpha_fwd = alpha_f1 + alpha_f2
    alpha_bwd = alpha_b1 + alpha_b2

    # Reference's 4th matchatt branch (AtoA) uses exactly the same (emotions_T window,
    # emotions_A[t]) inputs as the 2nd branch (AtoT), so only 3 unique branches are run.
    hid, al = matchatt_linear_batched(
        [emotions_t, emotions_t, emotions_a],
        [emotions_t, emotions_a, emotions_a],
        params['matchatt'], params['linear'], k)
    hid_t2t, hid_a2t, hid_t2a = hid[0], hid[1], hid[2]
    hid_a2a = hid[1]

    s_len = emotions_t.shape[0]

    def per_t(a):
        return [a[ti] for ti in range(s_len)]

    alpha = per_t(al[0]) + per_t(al[1]) + per_t(al[2]) + per_t(al[1])

    hidden = jnp.concatenate([hid_a2a, hid_t2t, hid_a2t, hid_t2a], axis=-1)   # (S,B,8*D_h)
    # TODO(synk): reference hard-codes score.repeat(...,200) (i.e. D_h==100); generalized.
    log_prob = head_forward(hidden, params['transform2'], params['smax_fc'], groups=4)
    return log_prob, alpha, alpha_fwd, alpha_bwd


# ------------------------------------------------------------------------------------
if __name__ == "__main__":
    key = jax.random.PRNGKey(0)
    S, B, P = 8, 2, 2
    D_m_T, D_m_A = 16, 12
    D_g = D_p = D_e = D_h = 16
    n_classes = 7

    kp, kT, kA, kq = jax.random.split(key, 4)
    params = init_our_model(kp, D_m_T, D_m_A, D_g, D_p, D_e, D_h, n_classes)

    T = jax.random.normal(kT, (S, B, D_m_T), jnp.float32)
    A = jax.random.normal(kA, (S, B, D_m_A), jnp.float32)
    speaker = jax.random.randint(kq, (S, B), 0, P)
    qmask = jax.nn.one_hot(speaker, P, dtype=jnp.float32)     # (S, B, party)
    umask = jnp.ones((B, S), jnp.float32)

    fwd = jax.jit(functools.partial(our_model_forward, k=4))
    log_prob, alpha, alpha_f, alpha_b = fwd(params, T, A, qmask, umask)
    log_prob = jax.block_until_ready(log_prob)
    assert log_prob.shape == (S, B, n_classes)
    assert bool(jnp.all(jnp.isfinite(log_prob)))
    print("KERNEL_OK")
</pallas_src>

<mosaic_0001>
module attributes {stable_mosaic.version = 11 : i64} {
  func.func @_drnn_kernel(%arg0: i32, %arg1: memref<1x2x16xf32, #tpu.memory_space<vmem>>, %arg2: memref<1x2x16xf32, #tpu.memory_space<vmem>>, %arg3: memref<1x2x2xf32, #tpu.memory_space<vmem>>, %arg4: memref<32x48xf32, #tpu.memory_space<vmem>>, %arg5: memref<16x48xf32, #tpu.memory_space<vmem>>, %arg6: memref<1x48xf32, #tpu.memory_space<vmem>>, %arg7: memref<1x48xf32, #tpu.memory_space<vmem>>, %arg8: memref<32x48xf32, #tpu.memory_space<vmem>>, %arg9: memref<16x48xf32, #tpu.memory_space<vmem>>, %arg10: memref<1x48xf32, #tpu.memory_space<vmem>>, %arg11: memref<1x48xf32, #tpu.memory_space<vmem>>, %arg12: memref<32x48xf32, #tpu.memory_space<vmem>>, %arg13: memref<16x48xf32, #tpu.memory_space<vmem>>, %arg14: memref<1x48xf32, #tpu.memory_space<vmem>>, %arg15: memref<1x48xf32, #tpu.memory_space<vmem>>, %arg16: memref<32x48xf32, #tpu.memory_space<vmem>>, %arg17: memref<16x48xf32, #tpu.memory_space<vmem>>, %arg18: memref<1x48xf32, #tpu.memory_space<vmem>>, %arg19: memref<1x48xf32, #tpu.memory_space<vmem>>, %arg20: memref<16x48xf32, #tpu.memory_space<vmem>>, %arg21: memref<16x48xf32, #tpu.memory_space<vmem>>, %arg22: memref<1x48xf32, #tpu.memory_space<vmem>>, %arg23: memref<1x48xf32, #tpu.memory_space<vmem>>, %arg24: memref<16x48xf32, #tpu.memory_space<vmem>>, %arg25: memref<16x48xf32, #tpu.memory_space<vmem>>, %arg26: memref<1x48xf32, #tpu.memory_space<vmem>>, %arg27: memref<1x48xf32, #tpu.memory_space<vmem>>, %arg28: memref<1x16xf32, #tpu.memory_space<vmem>>, %arg29: memref<1x16xf32, #tpu.memory_space<vmem>>, %arg30: memref<1x16xf32, #tpu.memory_space<vmem>>, %arg31: memref<1x16xf32, #tpu.memory_space<vmem>>, %arg32: memref<16x1xf32, #tpu.memory_space<vmem>>, %arg33: memref<1x1xf32, #tpu.memory_space<vmem>>, %arg34: memref<16x1xf32, #tpu.memory_space<vmem>>, %arg35: memref<1x1xf32, #tpu.memory_space<vmem>>, %arg36: memref<32x16xf32, #tpu.memory_space<vmem>>, %arg37: memref<1x16xf32, #tpu.memory_space<vmem>>, %arg38: memref<32x16xf32, #tpu.memory_space<vmem>>, %arg39: memref<1x16xf32, #tpu.memory_space<vmem>>, %arg40: memref<1x2x16xf32, #tpu.memory_space<vmem>>, %arg41: memref<1x2x16xf32, #tpu.memory_space<vmem>>, %arg42: memref<1x8x2xf32, #tpu.memory_space<vmem>>, %arg43: memref<8x2x16xf32, #tpu.memory_space<vmem>>, %arg44: memref<8x2x16xf32, #tpu.memory_space<vmem>>, %arg45: memref<2x2x16xf32, #tpu.memory_space<vmem>>, %arg46: memref<2x2x16xf32, #tpu.memory_space<vmem>>, %arg47: memref<2x16xf32, #tpu.memory_space<vmem>>, %arg48: memref<2x16xf32, #tpu.memory_space<vmem>>) attributes {dimension_semantics = [#tpu.dimension_semantics<arbitrary>], iteration_bounds = array<i64: 8>, scalar_prefetch = 0 : i64, scratch_operands = 6 : i64, tpu.core_type = #tpu.core_type<tc>, window_params = [{transform_indices = @transform_0, window_bounds = array<i64: 1, 2, 16>}, {transform_indices = @transform_1, window_bounds = array<i64: 1, 2, 16>}, {transform_indices = @transform_2, window_bounds = array<i64: 1, 2, 2>}, {pipeline_mode = #tpu.pipeline_mode<synchronous>, transform_indices = @transform_3, window_bounds = array<i64: 32, 48>}, {pipeline_mode = #tpu.pipeline_mode<synchronous>, transform_indices = @transform_4, window_bounds = array<i64: 16, 48>}, {pipeline_mode = #tpu.pipeline_mode<synchronous>, transform_indices = @transform_5, window_bounds = array<i64: 1, 48>}, {pipeline_mode = #tpu.pipeline_mode<synchronous>, transform_indices = @transform_6, window_bounds = array<i64: 1, 48>}, {pipeline_mode = #tpu.pipeline_mode<synchronous>, transform_indices = @transform_7, window_bounds = array<i64: 32, 48>}, {pipeline_mode = #tpu.pipeline_mode<synchronous>, transform_indices = @transform_8, window_bounds = array<i64: 16, 48>}, {pipeline_mode = #tpu.pipeline_mode<synchronous>, transform_indices = @transform_9, window_bounds = array<i64: 1, 48>}, {pipeline_mode = #tpu.pipeline_mode<synchronous>, transform_indices = @transform_10, window_bounds = array<i64: 1, 48>}, {pipeline_mode = #tpu.pipeline_mode<synchronous>, transform_indices = @transform_11, window_bounds = array<i64: 32, 48>}, {pipeline_mode = #tpu.pipeline_mode<synchronous>, transform_indices = @transform_12, window_bounds = array<i64: 16, 48>}, {pipeline_mode = #tpu.pipeline_mode<synchronous>, transform_indices = @transform_13, window_bounds = array<i64: 1, 48>}, {pipeline_mode = #tpu.pipeline_mode<synchronous>, transform_indices = @transform_14, window_bounds = array<i64: 1, 48>}, {pipeline_mode = #tpu.pipeline_mode<synchronous>, transform_indices = @transform_15, window_bounds = array<i64: 32, 48>}, {pipeline_mode = #tpu.pipeline_mode<synchronous>, transform_indices = @transform_16, window_bounds = array<i64: 16, 48>}, {pipeline_mode = #tpu.pipeline_mode<synchronous>, transform_indices = @transform_17, window_bounds = array<i64: 1, 48>}, {pipeline_mode = #tpu.pipeline_mode<synchronous>, transform_indices = @transform_18, window_bounds = array<i64: 1, 48>}, {pipeline_mode = #tpu.pipeline_mode<synchronous>, transform_indices = @transform_19, window_bounds = array<i64: 16, 48>}, {pipeline_mode = #tpu.pipeline_mode<synchronous>, transform_indices = @transform_20, window_bounds = array<i64: 16, 48>}, {pipeline_mode = #tpu.pipeline_mode<synchronous>, transform_indices = @transform_21, window_bounds = array<i64: 1, 48>}, {pipeline_mode = #tpu.pipeline_mode<synchronous>, transform_indices = @transform_22, window_bounds = array<i64: 1, 48>}, {pipeline_mode = #tpu.pipeline_mode<synchronous>, transform_indices = @transform_23, window_bounds = array<i64: 16, 48>}, {pipeline_mode = #tpu.pipeline_mode<synchronous>, transform_indices = @transform_24, window_bounds = array<i64: 16, 48>}, {pipeline_mode = #tpu.pipeline_mode<synchronous>, transform_indices = @transform_25, window_bounds = array<i64: 1, 48>}, {pipeline_mode = #tpu.pipeline_mode<synchronous>, transform_indices = @transform_26, window_bounds = array<i64: 1, 48>}, {pipeline_mode = #tpu.pipeline_mode<synchronous>, transform_indices = @transform_27, window_bounds = array<i64: 1, 16>}, {pipeline_mode = #tpu.pipeline_mode<synchronous>, transform_indices = @transform_28, window_bounds = array<i64: 1, 16>}, {pipeline_mode = #tpu.pipeline_mode<synchronous>, transform_indices = @transform_29, window_bounds = array<i64: 1, 16>}, {pipeline_mode = #tpu.pipeline_mode<synchronous>, transform_indices = @transform_30, window_bounds = array<i64: 1, 16>}, {pipeline_mode = #tpu.pipeline_mode<synchronous>, transform_indices = @transform_31, window_bounds = array<i64: 16, 1>}, {pipeline_mode = #tpu.pipeline_mode<synchronous>, transform_indices = @transform_32, window_bounds = array<i64: 1, 1>}, {pipeline_mode = #tpu.pipeline_mode<synchronous>, transform_indices = @transform_33, window_bounds = array<i64: 16, 1>}, {pipeline_mode = #tpu.pipeline_mode<synchronous>, transform_indices = @transform_34, window_bounds = array<i64: 1, 1>}, {pipeline_mode = #tpu.pipeline_mode<synchronous>, transform_indices = @transform_35, window_bounds = array<i64: 32, 16>}, {pipeline_mode = #tpu.pipeline_mode<synchronous>, transform_indices = @transform_36, window_bounds = array<i64: 1, 16>}, {pipeline_mode = #tpu.pipeline_mode<synchronous>, transform_indices = @transform_37, window_bounds = array<i64: 32, 16>}, {pipeline_mode = #tpu.pipeline_mode<synchronous>, transform_indices = @transform_38, window_bounds = array<i64: 1, 16>}, {transform_indices = @transform_39, window_bounds = array<i64: 1, 2, 16>}, {transform_indices = @transform_40, window_bounds = array<i64: 1, 2, 16>}, {transform_indices = @transform_41, window_bounds = array<i64: 1, 8, 2>}]} {
    %c0_i32 = arith.constant 0 : i32
    %0 = arith.cmpi eq, %arg0, %c0_i32 : i32
    %1 = arith.extui %0 : i1 to i32
    %c0_i32_0 = arith.constant 0 : i32
    %2 = arith.cmpi ne, %1, %c0_i32_0 : i32
    scf.if %2 {
      %cst_205 = arith.constant 0.000000e+00 : f32
      %489 = vector.broadcast %cst_205 : f32 to vector<8x2x16xf32>
      %c0_206 = arith.constant 0 : index
      %c0_207 = arith.constant 0 : index
      %c0_208 = arith.constant 0 : index
      %490 = vector.load %arg43[%c0_206, %c0_207, %c0_208] : memref<8x2x16xf32, #tpu.memory_space<vmem>>, vector<8x2x16xf32>
      tpu.vector_store %arg43[%c0_206, %c0_207, %c0_208], %489 {strides = array<i32>} : memref<8x2x16xf32, #tpu.memory_space<vmem>>, vector<8x2x16xf32>,
      %cst_209 = arith.constant 0.000000e+00 : f32
      %491 = vector.broadcast %cst_209 : f32 to vector<8x2x16xf32>
      %c0_210 = arith.constant 0 : index
      %c0_211 = arith.constant 0 : index
      %c0_212 = arith.constant 0 : index
      %492 = vector.load %arg44[%c0_210, %c0_211, %c0_212] : memref<8x2x16xf32, #tpu.memory_space<vmem>>, vector<8x2x16xf32>
      tpu.vector_store %arg44[%c0_210, %c0_211, %c0_212], %491 {strides = array<i32>} : memref<8x2x16xf32, #tpu.memory_space<vmem>>, vector<8x2x16xf32>,
      %cst_213 = arith.constant 0.000000e+00 : f32
      %493 = vector.broadcast %cst_213 : f32 to vector<2x2x16xf32>
      %c0_214 = arith.constant 0 : index
      %c0_215 = arith.constant 0 : index
      %c0_216 = arith.constant 0 : index
      %494 = vector.load %arg45[%c0_214, %c0_215, %c0_216] : memref<2x2x16xf32, #tpu.memory_space<vmem>>, vector<2x2x16xf32>
      tpu.vector_store %arg45[%c0_214, %c0_215, %c0_216], %493 {strides = array<i32>} : memref<2x2x16xf32, #tpu.memory_space<vmem>>, vector<2x2x16xf32>,
      %cst_217 = arith.constant 0.000000e+00 : f32
      %495 = vector.broadcast %cst_217 : f32 to vector<2x2x16xf32>
      %c0_218 = arith.constant 0 : index
      %c0_219 = arith.constant 0 : index
      %c0_220 = arith.constant 0 : index
      %496 = vector.load %arg46[%c0_218, %c0_219, %c0_220] : memref<2x2x16xf32, #tpu.memory_space<vmem>>, vector<2x2x16xf32>
      tpu.vector_store %arg46[%c0_218, %c0_219, %c0_220], %495 {strides = array<i32>} : memref<2x2x16xf32, #tpu.memory_space<vmem>>, vector<2x2x16xf32>,
      %cst_221 = arith.constant 0.000000e+00 : f32
      %497 = vector.broadcast %cst_221 : f32 to vector<2x16xf32>
      %c0_222 = arith.constant 0 : index
      %c0_223 = arith.constant 0 : index
      %498 = vector.load %arg47[%c0_222, %c0_223] : memref<2x16xf32, #tpu.memory_space<vmem>>, vector<2x16xf32>
      tpu.vector_store %arg47[%c0_222, %c0_223], %497 {strides = array<i32>} : memref<2x16xf32, #tpu.memory_space<vmem>>, vector<2x16xf32>,
      %cst_224 = arith.constant 0.000000e+00 : f32
      %499 = vector.broadcast %cst_224 : f32 to vector<2x16xf32>
      %c0_225 = arith.constant 0 : index
      %c0_226 = arith.constant 0 : index
      %500 = vector.load %arg48[%c0_225, %c0_226] : memref<2x16xf32, #tpu.memory_space<vmem>>, vector<2x16xf32>
      tpu.vector_store %arg48[%c0_225, %c0_226], %499 {strides = array<i32>} : memref<2x16xf32, #tpu.memory_space<vmem>>, vector<2x16xf32>,
    } else {
    }
    %c0 = arith.constant 0 : index
    %c0_1 = arith.constant 0 : index
    %c0_2 = arith.constant 0 : index
    %3 = vector.load %arg1[%c0, %c0_1, %c0_2] : memref<1x2x16xf32, #tpu.memory_space<vmem>>, vector<1x2x16xf32>
    %4 = vector.shape_cast %3 : vector<1x2x16xf32> to vector<2x16xf32>
    %c0_3 = arith.constant 0 : index
    %c0_4 = arith.constant 0 : index
    %c0_5 = arith.constant 0 : index
    %5 = vector.load %arg2[%c0_3, %c0_4, %c0_5] : memref<1x2x16xf32, #tpu.memory_space<vmem>>, vector<1x2x16xf32>
    %6 = vector.shape_cast %5 : vector<1x2x16xf32> to vector<2x16xf32>
    %c0_6 = arith.constant 0 : index
    %c0_7 = arith.constant 0 : index
    %c0_8 = arith.constant 0 : index
    %7 = vector.load %arg3[%c0_6, %c0_7, %c0_8] : memref<1x2x2xf32, #tpu.memory_space<vmem>>, vector<1x2x2xf32>
    %8 = vector.shape_cast %7 : vector<1x2x2xf32> to vector<2x2xf32>
    %9 = vector.shape_cast %8 : vector<2x2xf32> to vector<2x2x1xf32>
    %c0_9 = arith.constant 0 : index
    %c0_10 = arith.constant 0 : index
    %c0_11 = arith.constant 0 : index
    %10 = vector.load %arg45[%c0_9, %c0_10, %c0_11] : memref<2x2x16xf32, #tpu.memory_space<vmem>>, vector<2x2x16xf32>
    %c0_12 = arith.constant 0 : index
    %c0_13 = arith.constant 0 : index
    %c0_14 = arith.constant 0 : index
    %11 = vector.load %arg46[%c0_12, %c0_13, %c0_14] : memref<2x2x16xf32, #tpu.memory_space<vmem>>, vector<2x2x16xf32>
    %12 = vector.broadcast %9 : vector<2x2x1xf32> to vector<2x2x16xf32>
    %13 = arith.mulf %12, %10 : vector<2x2x16xf32>
    %cst = arith.constant dense<0.000000e+00> : vector<2x16xf32>
    %14 = vector.multi_reduction <add>, %13, %cst [1] : vector<2x2x16xf32> to vector<2x16xf32>
    %15 = vector.broadcast %9 : vector<2x2x1xf32> to vector<2x2x16xf32>
    %16 = arith.mulf %15, %11 : vector<2x2x16xf32>
    %cst_15 = arith.constant dense<0.000000e+00> : vector<2x16xf32>
    %17 = vector.multi_reduction <add>, %16, %cst_15 [1] : vector<2x2x16xf32> to vector<2x16xf32>
    %c1_i32 = arith.constant 1 : i32
    %18 = arith.subi %arg0, %c1_i32 : i32
    %c0_i32_16 = arith.constant 0 : i32
    %19 = arith.maxsi %18, %c0_i32_16 : i32
    %20 = arith.index_cast %19 : i32 to index
    %c0_17 = arith.constant 0 : index
    %c0_18 = arith.constant 0 : index
    %21 = vector.load %arg43[%20, %c0_17, %c0_18] : memref<8x2x16xf32, #tpu.memory_space<vmem>>, vector<1x2x16xf32>
    %22 = vector.shape_cast %21 : vector<1x2x16xf32> to vector<2x16xf32>
    %23 = arith.index_cast %19 : i32 to index
    %c0_19 = arith.constant 0 : index
    %c0_20 = arith.constant 0 : index
    %24 = vector.load %arg44[%23, %c0_19, %c0_20] : memref<8x2x16xf32, #tpu.memory_space<vmem>>, vector<1x2x16xf32>
    %25 = vector.shape_cast %24 : vector<1x2x16xf32> to vector<2x16xf32>
    %c0_21 = arith.constant 0 : index
    %c0_22 = arith.constant 0 : index
    %26 = vector.load %arg4[%c0_21, %c0_22] : memref<32x48xf32, #tpu.memory_space<vmem>>, vector<32x48xf32>
    %27 = vector.extract_strided_slice %26 {offsets = [0, 0], sizes = [16, 48], strides = [1, 1]} : vector<32x48xf32> to vector<16x48xf32>
    %cst_23 = arith.constant dense<0.000000e+00> : vector<2x48xf32>
    %28 = tpu.matmul %4, %27, %cst_23 {dimension_numbers = #tpu.dot_dimension_numbers<[1], [0], [0], [1], [0, 0, 1, 1], [], []>} : vector<2x16xf32>, vector<16x48xf32>, vector<2x48xf32> -> vector<2x48xf32>
    %29 = vector.extract_strided_slice %26 {offsets = [16, 0], sizes = [16, 48], strides = [1, 1]} : vector<32x48xf32> to vector<16x48xf32>
    %cst_24 = arith.constant dense<0.000000e+00> : vector<2x48xf32>
    %30 = tpu.matmul %14, %29, %cst_24 {dimension_numbers = #tpu.dot_dimension_numbers<[1], [0], [0], [1], [0, 0, 1, 1], [], []>} : vector<2x16xf32>, vector<16x48xf32>, vector<2x48xf32> -> vector<2x48xf32>
    %31 = arith.addf %28, %30 : vector<2x48xf32>
    %c0_25 = arith.constant 0 : index
    %c0_26 = arith.constant 0 : index
    %32 = vector.load %arg6[%c0_25, %c0_26] : memref<1x48xf32, #tpu.memory_space<vmem>>, vector<1x48xf32>
    %33 = vector.broadcast %32 : vector<1x48xf32> to vector<2x48xf32>
    %34 = arith.addf %31, %33 : vector<2x48xf32>
    %c0_27 = arith.constant 0 : index
    %c0_28 = arith.constant 0 : index
    %35 = vector.load %arg5[%c0_27, %c0_28] : memref<16x48xf32, #tpu.memory_space<vmem>>, vector<16x48xf32>
    %cst_29 = arith.constant dense<0.000000e+00> : vector<2x48xf32>
    %36 = tpu.matmul %22, %35, %cst_29 {dimension_numbers = #tpu.dot_dimension_numbers<[1], [0], [0], [1], [0, 0, 1, 1], [], []>} : vector<2x16xf32>, vector<16x48xf32>, vector<2x48xf32> -> vector<2x48xf32>
    %c0_30 = arith.constant 0 : index
    %c0_31 = arith.constant 0 : index
    %37 = vector.load %arg7[%c0_30, %c0_31] : memref<1x48xf32, #tpu.memory_space<vmem>>, vector<1x48xf32>
    %38 = vector.broadcast %37 : vector<1x48xf32> to vector<2x48xf32>
    %39 = arith.addf %36, %38 : vector<2x48xf32>
    %40 = vector.extract_strided_slice %34 {offsets = [0, 0], sizes = [2, 16], strides = [1, 1]} : vector<2x48xf32> to vector<2x16xf32>
    %41 = vector.extract_strided_slice %39 {offsets = [0, 0], sizes = [2, 16], strides = [1, 1]} : vector<2x48xf32> to vector<2x16xf32>
    %42 = arith.addf %40, %41 : vector<2x16xf32>
    %43 = arith.negf %42 : vector<2x16xf32>
    %44 = math.exp %43 : vector<2x16xf32>
    %cst_32 = arith.constant 1.000000e+00 : f32
    %45 = vector.broadcast %cst_32 : f32 to vector<2x16xf32>
    %46 = arith.addf %45, %44 : vector<2x16xf32>
    %47 = arith.divf %45, %46 : vector<2x16xf32>
    %48 = vector.extract_strided_slice %34 {offsets = [0, 16], sizes = [2, 16], strides = [1, 1]} : vector<2x48xf32> to vector<2x16xf32>
    %49 = vector.extract_strided_slice %39 {offsets = [0, 16], sizes = [2, 16], strides = [1, 1]} : vector<2x48xf32> to vector<2x16xf32>
    %50 = arith.addf %48, %49 : vector<2x16xf32>
    %51 = arith.negf %50 : vector<2x16xf32>
    %52 = math.exp %51 : vector<2x16xf32>
    %cst_33 = arith.constant 1.000000e+00 : f32
    %53 = vector.broadcast %cst_33 : f32 to vector<2x16xf32>
    %54 = arith.addf %53, %52 : vector<2x16xf32>
    %55 = arith.divf %53, %54 : vector<2x16xf32>
    %56 = vector.extract_strided_slice %34 {offsets = [0, 32], sizes = [2, 16], strides = [1, 1]} : vector<2x48xf32> to vector<2x16xf32>
    %57 = vector.extract_strided_slice %39 {offsets = [0, 32], sizes = [2, 16], strides = [1, 1]} : vector<2x48xf32> to vector<2x16xf32>
    %58 = arith.mulf %47, %57 : vector<2x16xf32>
    %59 = arith.addf %56, %58 : vector<2x16xf32>
    %60 = math.tanh %59 : vector<2x16xf32>
    %cst_34 = arith.constant 1.000000e+00 : f32
    %61 = vector.broadcast %cst_34 : f32 to vector<2x16xf32>
    %62 = arith.subf %61, %55 : vector<2x16xf32>
    %63 = arith.mulf %62, %60 : vector<2x16xf32>
    %64 = arith.mulf %55, %22 : vector<2x16xf32>
    %65 = arith.addf %63, %64 : vector<2x16xf32>
    %c0_35 = arith.constant 0 : index
    %c0_36 = arith.constant 0 : index
    %66 = vector.load %arg8[%c0_35, %c0_36] : memref<32x48xf32, #tpu.memory_space<vmem>>, vector<32x48xf32>
    %67 = vector.extract_strided_slice %66 {offsets = [0, 0], sizes = [16, 48], strides = [1, 1]} : vector<32x48xf32> to vector<16x48xf32>
    %cst_37 = arith.constant dense<0.000000e+00> : vector<2x48xf32>
    %68 = tpu.matmul %6, %67, %cst_37 {dimension_numbers = #tpu.dot_dimension_numbers<[1], [0], [0], [1], [0, 0, 1, 1], [], []>} : vector<2x16xf32>, vector<16x48xf32>, vector<2x48xf32> -> vector<2x48xf32>
    %69 = vector.extract_strided_slice %66 {offsets = [16, 0], sizes = [16, 48], strides = [1, 1]} : vector<32x48xf32> to vector<16x48xf32>
    %cst_38 = arith.constant dense<0.000000e+00> : vector<2x48xf32>
    %70 = tpu.matmul %17, %69, %cst_38 {dimension_numbers = #tpu.dot_dimension_numbers<[1], [0], [0], [1], [0, 0, 1, 1], [], []>} : vector<2x16xf32>, vector<16x48xf32>, vector<2x48xf32> -> vector<2x48xf32>
    %71 = arith.addf %68, %70 : vector<2x48xf32>
    %c0_39 = arith.constant 0 : index
    %c0_40 = arith.constant 0 : index
    %72 = vector.load %arg10[%c0_39, %c0_40] : memref<1x48xf32, #tpu.memory_space<vmem>>, vector<1x48xf32>
    %73 = vector.broadcast %72 : vector<1x48xf32> to vector<2x48xf32>
    %74 = arith.addf %71, %73 : vector<2x48xf32>
    %c0_41 = arith.constant 0 : index
    %c0_42 = arith.constant 0 : index
    %75 = vector.load %arg9[%c0_41, %c0_42] : memref<16x48xf32, #tpu.memory_space<vmem>>, vector<16x48xf32>
    %cst_43 = arith.constant dense<0.000000e+00> : vector<2x48xf32>
    %76 = tpu.matmul %25, %75, %cst_43 {dimension_numbers = #tpu.dot_dimension_numbers<[1], [0], [0], [1], [0, 0, 1, 1], [], []>} : vector<2x16xf32>, vector<16x48xf32>, vector<2x48xf32> -> vector<2x48xf32>
    %c0_44 = arith.constant 0 : index
    %c0_45 = arith.constant 0 : index
    %77 = vector.load %arg11[%c0_44, %c0_45] : memref<1x48xf32, #tpu.memory_space<vmem>>, vector<1x48xf32>
    %78 = vector.broadcast %77 : vector<1x48xf32> to vector<2x48xf32>
    %79 = arith.addf %76, %78 : vector<2x48xf32>
    %80 = vector.extract_strided_slice %74 {offsets = [0, 0], sizes = [2, 16], strides = [1, 1]} : vector<2x48xf32> to vector<2x16xf32>
    %81 = vector.extract_strided_slice %79 {offsets = [0, 0], sizes = [2, 16], strides = [1, 1]} : vector<2x48xf32> to vector<2x16xf32>
    %82 = arith.addf %80, %81 : vector<2x16xf32>
    %83 = arith.negf %82 : vector<2x16xf32>
    %84 = math.exp %83 : vector<2x16xf32>
    %cst_46 = arith.constant 1.000000e+00 : f32
    %85 = vector.broadcast %cst_46 : f32 to vector<2x16xf32>
    %86 = arith.addf %85, %84 : vector<2x16xf32>
    %87 = arith.divf %85, %86 : vector<2x16xf32>
    %88 = vector.extract_strided_slice %74 {offsets = [0, 16], sizes = [2, 16], strides = [1, 1]} : vector<2x48xf32> to vector<2x16xf32>
    %89 = vector.extract_strided_slice %79 {offsets = [0, 16], sizes = [2, 16], strides = [1, 1]} : vector<2x48xf32> to vector<2x16xf32>
    %90 = arith.addf %88, %89 : vector<2x16xf32>
    %91 = arith.negf %90 : vector<2x16xf32>
    %92 = math.exp %91 : vector<2x16xf32>
    %cst_47 = arith.constant 1.000000e+00 : f32
    %93 = vector.broadcast %cst_47 : f32 to vector<2x16xf32>
    %94 = arith.addf %93, %92 : vector<2x16xf32>
    %95 = arith.divf %93, %94 : vector<2x16xf32>
    %96 = vector.extract_strided_slice %74 {offsets = [0, 32], sizes = [2, 16], strides = [1, 1]} : vector<2x48xf32> to vector<2x16xf32>
    %97 = vector.extract_strided_slice %79 {offsets = [0, 32], sizes = [2, 16], strides = [1, 1]} : vector<2x48xf32> to vector<2x16xf32>
    %98 = arith.mulf %87, %97 : vector<2x16xf32>
    %99 = arith.addf %96, %98 : vector<2x16xf32>
    %100 = math.tanh %99 : vector<2x16xf32>
    %cst_48 = arith.constant 1.000000e+00 : f32
    %101 = vector.broadcast %cst_48 : f32 to vector<2x16xf32>
    %102 = arith.subf %101, %95 : vector<2x16xf32>
    %103 = arith.mulf %102, %100 : vector<2x16xf32>
    %104 = arith.mulf %95, %25 : vector<2x16xf32>
    %105 = arith.addf %103, %104 : vector<2x16xf32>
    %c0_49 = arith.constant 0 : index
    %c0_50 = arith.constant 0 : index
    %c0_51 = arith.constant 0 : index
    %106 = vector.load %arg43[%c0_49, %c0_50, %c0_51] : memref<8x2x16xf32, #tpu.memory_space<vmem>>, vector<8x2x16xf32>
    %c0_52 = arith.constant 0 : index
    %c0_53 = arith.constant 0 : index
    %c0_54 = arith.constant 0 : index
    %107 = vector.load %arg44[%c0_52, %c0_53, %c0_54] : memref<8x2x16xf32, #tpu.memory_space<vmem>>, vector<8x2x16xf32>
    %108 = tpu.iota {dimensions = array<i32: 0>} : vector<8x2xi32>
    %109 = vector.broadcast %arg0 : i32 to vector<8x2xi32>
    %110 = arith.cmpi slt, %108, %109 : vector<8x2xi32>
    %111 = arith.extui %110 : vector<8x2xi1> to vector<8x2xi32>
    %112 = arith.sitofp %111 : vector<8x2xi32> to vector<8x2xf32>
    %c0_55 = arith.constant 0 : index
    %c0_56 = arith.constant 0 : index
    %113 = vector.load %arg28[%c0_55, %c0_56] : memref<1x16xf32, #tpu.memory_space<vmem>>, vector<1x16xf32>
    %114 = vector.shape_cast %113 : vector<1x16xf32> to vector<1x1x16xf32>
    %115 = vector.broadcast %114 : vector<1x1x16xf32> to vector<8x2x16xf32>
    %116 = arith.mulf %106, %115 : vector<8x2x16xf32>
    %cst_57 = arith.constant dense<0.000000e+00> : vector<8x2xf32>
    %117 = vector.multi_reduction <add>, %116, %cst_57 [2] : vector<8x2x16xf32> to vector<8x2xf32>
    %cst_58 = arith.constant -1.000000e+09 : f32
    %118 = vector.broadcast %cst_58 : f32 to vector<8x2xf32>
    %119 = arith.select %110, %117, %118 : vector<8x2xi1>, vector<8x2xf32>
    %cst_59 = arith.constant dense<0xFF800000> : vector<2xf32>
    %120 = vector.multi_reduction <maximumf>, %119, %cst_59 [0] : vector<8x2xf32> to vector<2xf32>
    %121 = vector.shape_cast %120 : vector<2xf32> to vector<1x2xf32>
    %122 = vector.broadcast %121 : vector<1x2xf32> to vector<8x2xf32>
    %123 = arith.subf %119, %122 : vector<8x2xf32>
    %124 = math.exp %123 : vector<8x2xf32>
    %125 = arith.mulf %124, %112 : vector<8x2xf32>
    %cst_60 = arith.constant dense<0.000000e+00> : vector<2xf32>
    %126 = vector.multi_reduction <add>, %125, %cst_60 [0] : vector<8x2xf32> to vector<2xf32>
    %127 = vector.shape_cast %126 : vector<2xf32> to vector<1x2xf32>
    %cst_61 = arith.constant 9.99999968E-21 : f32
    %128 = vector.broadcast %cst_61 : f32 to vector<1x2xf32>
    %129 = arith.maximumf %127, %128 : vector<1x2xf32>
    %130 = vector.broadcast %129 : vector<1x2xf32> to vector<8x2xf32>
    %131 = arith.divf %125, %130 : vector<8x2xf32>
    %132 = vector.shape_cast %131 : vector<8x2xf32> to vector<8x2x1xf32>
    %133 = vector.broadcast %132 : vector<8x2x1xf32> to vector<8x2x16xf32>
    %134 = arith.mulf %133, %106 : vector<8x2x16xf32>
    %cst_62 = arith.constant dense<0.000000e+00> : vector<2x16xf32>
    %135 = vector.multi_reduction <add>, %134, %cst_62 [0] : vector<8x2x16xf32> to vector<2x16xf32>
    %c0_63 = arith.constant 0 : index
    %c0_64 = arith.constant 0 : index
    %136 = vector.load %arg29[%c0_63, %c0_64] : memref<1x16xf32, #tpu.memory_space<vmem>>, vector<1x16xf32>
    %137 = vector.shape_cast %136 : vector<1x16xf32> to vector<1x1x16xf32>
    %138 = vector.broadcast %137 : vector<1x1x16xf32> to vector<8x2x16xf32>
    %139 = arith.mulf %106, %138 : vector<8x2x16xf32>
    %cst_65 = arith.constant dense<0.000000e+00> : vector<8x2xf32>
    %140 = vector.multi_reduction <add>, %139, %cst_65 [2] : vector<8x2x16xf32> to vector<8x2xf32>
    %cst_66 = arith.constant -1.000000e+09 : f32
    %141 = vector.broadcast %cst_66 : f32 to vector<8x2xf32>
    %142 = arith.select %110, %140, %141 : vector<8x2xi1>, vector<8x2xf32>
    %cst_67 = arith.constant dense<0xFF800000> : vector<2xf32>
    %143 = vector.multi_reduction <maximumf>, %142, %cst_67 [0] : vector<8x2xf32> to vector<2xf32>
    %144 = vector.shape_cast %143 : vector<2xf32> to vector<1x2xf32>
    %145 = vector.broadcast %144 : vector<1x2xf32> to vector<8x2xf32>
    %146 = arith.subf %142, %145 : vector<8x2xf32>
    %147 = math.exp %146 : vector<8x2xf32>
    %148 = arith.mulf %147, %112 : vector<8x2xf32>
    %cst_68 = arith.constant dense<0.000000e+00> : vector<2xf32>
    %149 = vector.multi_reduction <add>, %148, %cst_68 [0] : vector<8x2xf32> to vector<2xf32>
    %150 = vector.shape_cast %149 : vector<2xf32> to vector<1x2xf32>
    %cst_69 = arith.constant 9.99999968E-21 : f32
    %151 = vector.broadcast %cst_69 : f32 to vector<1x2xf32>
    %152 = arith.maximumf %150, %151 : vector<1x2xf32>
    %153 = vector.broadcast %152 : vector<1x2xf32> to vector<8x2xf32>
    %154 = arith.divf %148, %153 : vector<8x2xf32>
    %155 = vector.shape_cast %154 : vector<8x2xf32> to vector<8x2x1xf32>
    %156 = vector.broadcast %155 : vector<8x2x1xf32> to vector<8x2x16xf32>
    %157 = arith.mulf %156, %106 : vector<8x2x16xf32>
    %cst_70 = arith.constant dense<0.000000e+00> : vector<2x16xf32>
    %158 = vector.multi_reduction <add>, %157, %cst_70 [0] : vector<8x2x16xf32> to vector<2x16xf32>
    %c0_71 = arith.constant 0 : index
    %c0_72 = arith.constant 0 : index
    %159 = vector.load %arg30[%c0_71, %c0_72] : memref<1x16xf32, #tpu.memory_space<vmem>>, vector<1x16xf32>
    %160 = vector.shape_cast %159 : vector<1x16xf32> to vector<1x1x16xf32>
    %161 = vector.broadcast %160 : vector<1x1x16xf32> to vector<8x2x16xf32>
    %162 = arith.mulf %107, %161 : vector<8x2x16xf32>
    %cst_73 = arith.constant dense<0.000000e+00> : vector<8x2xf32>
    %163 = vector.multi_reduction <add>, %162, %cst_73 [2] : vector<8x2x16xf32> to vector<8x2xf32>
    %cst_74 = arith.constant -1.000000e+09 : f32
    %164 = vector.broadcast %cst_74 : f32 to vector<8x2xf32>
    %165 = arith.select %110, %163, %164 : vector<8x2xi1>, vector<8x2xf32>
    %cst_75 = arith.constant dense<0xFF800000> : vector<2xf32>
    %166 = vector.multi_reduction <maximumf>, %165, %cst_75 [0] : vector<8x2xf32> to vector<2xf32>
    %167 = vector.shape_cast %166 : vector<2xf32> to vector<1x2xf32>
    %168 = vector.broadcast %167 : vector<1x2xf32> to vector<8x2xf32>
    %169 = arith.subf %165, %168 : vector<8x2xf32>
    %170 = math.exp %169 : vector<8x2xf32>
    %171 = arith.mulf %170, %112 : vector<8x2xf32>
    %cst_76 = arith.constant dense<0.000000e+00> : vector<2xf32>
    %172 = vector.multi_reduction <add>, %171, %cst_76 [0] : vector<8x2xf32> to vector<2xf32>
    %173 = vector.shape_cast %172 : vector<2xf32> to vector<1x2xf32>
    %cst_77 = arith.constant 9.99999968E-21 : f32
    %174 = vector.broadcast %cst_77 : f32 to vector<1x2xf32>
    %175 = arith.maximumf %173, %174 : vector<1x2xf32>
    %176 = vector.broadcast %175 : vector<1x2xf32> to vector<8x2xf32>
    %177 = arith.divf %171, %176 : vector<8x2xf32>
    %178 = vector.shape_cast %177 : vector<8x2xf32> to vector<8x2x1xf32>
    %179 = vector.broadcast %178 : vector<8x2x1xf32> to vector<8x2x16xf32>
    %180 = arith.mulf %179, %107 : vector<8x2x16xf32>
    %cst_78 = arith.constant dense<0.000000e+00> : vector<2x16xf32>
    %181 = vector.multi_reduction <add>, %180, %cst_78 [0] : vector<8x2x16xf32> to vector<2x16xf32>
    %c0_79 = arith.constant 0 : index
    %c0_80 = arith.constant 0 : index
    %182 = vector.load %arg31[%c0_79, %c0_80] : memref<1x16xf32, #tpu.memory_space<vmem>>, vector<1x16xf32>
    %183 = vector.shape_cast %182 : vector<1x16xf32> to vector<1x1x16xf32>
    %184 = vector.broadcast %183 : vector<1x1x16xf32> to vector<8x2x16xf32>
    %185 = arith.mulf %107, %184 : vector<8x2x16xf32>
    %cst_81 = arith.constant dense<0.000000e+00> : vector<8x2xf32>
    %186 = vector.multi_reduction <add>, %185, %cst_81 [2] : vector<8x2x16xf32> to vector<8x2xf32>
    %cst_82 = arith.constant -1.000000e+09 : f32
    %187 = vector.broadcast %cst_82 : f32 to vector<8x2xf32>
    %188 = arith.select %110, %186, %187 : vector<8x2xi1>, vector<8x2xf32>
    %cst_83 = arith.constant dense<0xFF800000> : vector<2xf32>
    %189 = vector.multi_reduction <maximumf>, %188, %cst_83 [0] : vector<8x2xf32> to vector<2xf32>
    %190 = vector.shape_cast %189 : vector<2xf32> to vector<1x2xf32>
    %191 = vector.broadcast %190 : vector<1x2xf32> to vector<8x2xf32>
    %192 = arith.subf %188, %191 : vector<8x2xf32>
    %193 = math.exp %192 : vector<8x2xf32>
    %194 = arith.mulf %193, %112 : vector<8x2xf32>
    %cst_84 = arith.constant dense<0.000000e+00> : vector<2xf32>
    %195 = vector.multi_reduction <add>, %194, %cst_84 [0] : vector<8x2xf32> to vector<2xf32>
    %196 = vector.shape_cast %195 : vector<2xf32> to vector<1x2xf32>
    %cst_85 = arith.constant 9.99999968E-21 : f32
    %197 = vector.broadcast %cst_85 : f32 to vector<1x2xf32>
    %198 = arith.maximumf %196, %197 : vector<1x2xf32>
    %199 = vector.broadcast %198 : vector<1x2xf32> to vector<8x2xf32>
    %200 = arith.divf %194, %199 : vector<8x2xf32>
    %201 = vector.shape_cast %200 : vector<8x2xf32> to vector<8x2x1xf32>
    %202 = vector.broadcast %201 : vector<8x2x1xf32> to vector<8x2x16xf32>
    %203 = arith.mulf %202, %107 : vector<8x2x16xf32>
    %cst_86 = arith.constant dense<0.000000e+00> : vector<2x16xf32>
    %204 = vector.multi_reduction <add>, %203, %cst_86 [0] : vector<8x2x16xf32> to vector<2x16xf32>
    %205 = arith.addf %131, %177 : vector<8x2xf32>
    %206 = arith.addf %205, %154 : vector<8x2xf32>
    %207 = arith.addf %206, %200 : vector<8x2xf32>
    %c0_i32_87 = arith.constant 0 : i32
    %208 = arith.cmpi sgt, %arg0, %c0_i32_87 : i32
    %cst_88 = arith.constant 1.000000e+00 : f32
    %cst_89 = arith.constant 0.000000e+00 : f32
    %209 = arith.select %208, %cst_88, %cst_89 : f32
    %c0_90 = arith.constant 0 : index
    %c0_91 = arith.constant 0 : index
    %210 = vector.load %arg32[%c0_90, %c0_91] : memref<16x1xf32, #tpu.memory_space<vmem>>, vector<16x1xf32>
    %c0_92 = arith.constant 0 : index
    %c0_93 = arith.constant 0 : index
    %211 = vector.load %arg33[%c0_92, %c0_93] : memref<1x1xf32, #tpu.memory_space<vmem>>, vector<1x1xf32>
    %cst_94 = arith.constant dense<0.000000e+00> : vector<2x1xf32>
    %212 = tpu.matmul %135, %210, %cst_94 {dimension_numbers = #tpu.dot_dimension_numbers<[1], [0], [0], [1], [0, 0, 1, 1], [], []>} : vector<2x16xf32>, vector<16x1xf32>, vector<2x1xf32> -> vector<2x1xf32>
    %213 = vector.broadcast %211 : vector<1x1xf32> to vector<2x1xf32>
    %214 = arith.addf %212, %213 : vector<2x1xf32>
    %cst_95 = arith.constant dense<0.000000e+00> : vector<2x1xf32>
    %215 = tpu.matmul %181, %210, %cst_95 {dimension_numbers = #tpu.dot_dimension_numbers<[1], [0], [0], [1], [0, 0, 1, 1], [], []>} : vector<2x16xf32>, vector<16x1xf32>, vector<2x1xf32> -> vector<2x1xf32>
    %216 = vector.broadcast %211 : vector<1x1xf32> to vector<2x1xf32>
    %217 = arith.addf %215, %216 : vector<2x1xf32>
    %cst_96 = arith.constant dense<0xFF800000> : vector<1xf32>
    %218 = vector.multi_reduction <maximumf>, %214, %cst_96 [0] : vector<2x1xf32> to vector<1xf32>
    %219 = vector.shape_cast %218 : vector<1xf32> to vector<1x1xf32>
    %220 = vector.broadcast %219 : vector<1x1xf32> to vector<2x1xf32>
    %221 = arith.subf %214, %220 : vector<2x1xf32>
    %222 = math.exp %221 : vector<2x1xf32>
    %cst_97 = arith.constant dense<0.000000e+00> : vector<1xf32>
    %223 = vector.multi_reduction <add>, %222, %cst_97 [0] : vector<2x1xf32> to vector<1xf32>
    %224 = vector.shape_cast %223 : vector<1xf32> to vector<1x1xf32>
    %225 = vector.broadcast %224 : vector<1x1xf32> to vector<2x1xf32>
    %226 = arith.divf %222, %225 : vector<2x1xf32>
    %cst_98 = arith.constant dense<0xFF800000> : vector<1xf32>
    %227 = vector.multi_reduction <maximumf>, %217, %cst_98 [0] : vector<2x1xf32> to vector<1xf32>
    %228 = vector.shape_cast %227 : vector<1xf32> to vector<1x1xf32>
    %229 = vector.broadcast %228 : vector<1x1xf32> to vector<2x1xf32>
    %230 = arith.subf %217, %229 : vector<2x1xf32>
    %231 = math.exp %230 : vector<2x1xf32>
    %cst_99 = arith.constant dense<0.000000e+00> : vector<1xf32>
    %232 = vector.multi_reduction <add>, %231, %cst_99 [0] : vector<2x1xf32> to vector<1xf32>
    %233 = vector.shape_cast %232 : vector<1xf32> to vector<1x1xf32>
    %234 = vector.broadcast %233 : vector<1x1xf32> to vector<2x1xf32>
    %235 = arith.divf %231, %234 : vector<2x1xf32>
    %236 = vector.broadcast %226 : vector<2x1xf32> to vector<2x16xf32>
    %237 = arith.mulf %236, %135 : vector<2x16xf32>
    %238 = arith.addf %237, %135 : vector<2x16xf32>
    %239 = vector.broadcast %235 : vector<2x1xf32> to vector<2x16xf32>
    %240 = arith.mulf %239, %181 : vector<2x16xf32>
    %241 = arith.addf %240, %181 : vector<2x16xf32>
    %c0_100 = arith.constant 0 : index
    %c0_101 = arith.constant 0 : index
    %242 = vector.load %arg36[%c0_100, %c0_101] : memref<32x16xf32, #tpu.memory_space<vmem>>, vector<32x16xf32>
    %243 = vector.extract_strided_slice %242 {offsets = [0, 0], sizes = [16, 16], strides = [1, 1]} : vector<32x16xf32> to vector<16x16xf32>
    %cst_102 = arith.constant dense<0.000000e+00> : vector<2x16xf32>
    %244 = tpu.matmul %238, %243, %cst_102 {dimension_numbers = #tpu.dot_dimension_numbers<[1], [0], [0], [1], [0, 0, 1, 1], [], []>} : vector<2x16xf32>, vector<16x16xf32>, vector<2x16xf32> -> vector<2x16xf32>
    %245 = vector.extract_strided_slice %242 {offsets = [16, 0], sizes = [16, 16], strides = [1, 1]} : vector<32x16xf32> to vector<16x16xf32>
    %cst_103 = arith.constant dense<0.000000e+00> : vector<2x16xf32>
    %246 = tpu.matmul %241, %245, %cst_103 {dimension_numbers = #tpu.dot_dimension_numbers<[1], [0], [0], [1], [0, 0, 1, 1], [], []>} : vector<2x16xf32>, vector<16x16xf32>, vector<2x16xf32> -> vector<2x16xf32>
    %247 = arith.addf %244, %246 : vector<2x16xf32>
    %c0_104 = arith.constant 0 : index
    %c0_105 = arith.constant 0 : index
    %248 = vector.load %arg37[%c0_104, %c0_105] : memref<1x16xf32, #tpu.memory_space<vmem>>, vector<1x16xf32>
    %249 = vector.broadcast %248 : vector<1x16xf32> to vector<2x16xf32>
    %250 = arith.addf %247, %249 : vector<2x16xf32>
    %251 = vector.broadcast %209 : f32 to vector<2x16xf32>
    %252 = arith.mulf %251, %250 : vector<2x16xf32>
    %c0_106 = arith.constant 0 : index
    %c0_107 = arith.constant 0 : index
    %253 = vector.load %arg34[%c0_106, %c0_107] : memref<16x1xf32, #tpu.memory_space<vmem>>, vector<16x1xf32>
    %c0_108 = arith.constant 0 : index
    %c0_109 = arith.constant 0 : index
    %254 = vector.load %arg35[%c0_108, %c0_109] : memref<1x1xf32, #tpu.memory_space<vmem>>, vector<1x1xf32>
    %cst_110 = arith.constant dense<0.000000e+00> : vector<2x1xf32>
    %255 = tpu.matmul %204, %253, %cst_110 {dimension_numbers = #tpu.dot_dimension_numbers<[1], [0], [0], [1], [0, 0, 1, 1], [], []>} : vector<2x16xf32>, vector<16x1xf32>, vector<2x1xf32> -> vector<2x1xf32>
    %256 = vector.broadcast %254 : vector<1x1xf32> to vector<2x1xf32>
    %257 = arith.addf %255, %256 : vector<2x1xf32>
    %cst_111 = arith.constant dense<0.000000e+00> : vector<2x1xf32>
    %258 = tpu.matmul %158, %253, %cst_111 {dimension_numbers = #tpu.dot_dimension_numbers<[1], [0], [0], [1], [0, 0, 1, 1], [], []>} : vector<2x16xf32>, vector<16x1xf32>, vector<2x1xf32> -> vector<2x1xf32>
    %259 = vector.broadcast %254 : vector<1x1xf32> to vector<2x1xf32>
    %260 = arith.addf %258, %259 : vector<2x1xf32>
    %cst_112 = arith.constant dense<0xFF800000> : vector<1xf32>
    %261 = vector.multi_reduction <maximumf>, %257, %cst_112 [0] : vector<2x1xf32> to vector<1xf32>
    %262 = vector.shape_cast %261 : vector<1xf32> to vector<1x1xf32>
    %263 = vector.broadcast %262 : vector<1x1xf32> to vector<2x1xf32>
    %264 = arith.subf %257, %263 : vector<2x1xf32>
    %265 = math.exp %264 : vector<2x1xf32>
    %cst_113 = arith.constant dense<0.000000e+00> : vector<1xf32>
    %266 = vector.multi_reduction <add>, %265, %cst_113 [0] : vector<2x1xf32> to vector<1xf32>
    %267 = vector.shape_cast %266 : vector<1xf32> to vector<1x1xf32>
    %268 = vector.broadcast %267 : vector<1x1xf32> to vector<2x1xf32>
    %269 = arith.divf %265, %268 : vector<2x1xf32>
    %cst_114 = arith.constant dense<0xFF800000> : vector<1xf32>
    %270 = vector.multi_reduction <maximumf>, %260, %cst_114 [0] : vector<2x1xf32> to vector<1xf32>
    %271 = vector.shape_cast %270 : vector<1xf32> to vector<1x1xf32>
    %272 = vector.broadcast %271 : vector<1x1xf32> to vector<2x1xf32>
    %273 = arith.subf %260, %272 : vector<2x1xf32>
    %274 = math.exp %273 : vector<2x1xf32>
    %cst_115 = arith.constant dense<0.000000e+00> : vector<1xf32>
    %275 = vector.multi_reduction <add>, %274, %cst_115 [0] : vector<2x1xf32> to vector<1xf32>
    %276 = vector.shape_cast %275 : vector<1xf32> to vector<1x1xf32>
    %277 = vector.broadcast %276 : vector<1x1xf32> to vector<2x1xf32>
    %278 = arith.divf %274, %277 : vector<2x1xf32>
    %279 = vector.broadcast %269 : vector<2x1xf32> to vector<2x16xf32>
    %280 = arith.mulf %279, %204 : vector<2x16xf32>
    %281 = arith.addf %280, %204 : vector<2x16xf32>
    %282 = vector.broadcast %278 : vector<2x1xf32> to vector<2x16xf32>
    %283 = arith.mulf %282, %158 : vector<2x16xf32>
    %284 = arith.addf %283, %158 : vector<2x16xf32>
    %c0_116 = arith.constant 0 : index
    %c0_117 = arith.constant 0 : index
    %285 = vector.load %arg38[%c0_116, %c0_117] : memref<32x16xf32, #tpu.memory_space<vmem>>, vector<32x16xf32>
    %286 = vector.extract_strided_slice %285 {offsets = [0, 0], sizes = [16, 16], strides = [1, 1]} : vector<32x16xf32> to vector<16x16xf32>
    %cst_118 = arith.constant dense<0.000000e+00> : vector<2x16xf32>
    %287 = tpu.matmul %281, %286, %cst_118 {dimension_numbers = #tpu.dot_dimension_numbers<[1], [0], [0], [1], [0, 0, 1, 1], [], []>} : vector<2x16xf32>, vector<16x16xf32>, vector<2x16xf32> -> vector<2x16xf32>
    %288 = vector.extract_strided_slice %285 {offsets = [16, 0], sizes = [16, 16], strides = [1, 1]} : vector<32x16xf32> to vector<16x16xf32>
    %cst_119 = arith.constant dense<0.000000e+00> : vector<2x16xf32>
    %289 = tpu.matmul %284, %288, %cst_119 {dimension_numbers = #tpu.dot_dimension_numbers<[1], [0], [0], [1], [0, 0, 1, 1], [], []>} : vector<2x16xf32>, vector<16x16xf32>, vector<2x16xf32> -> vector<2x16xf32>
    %290 = arith.addf %287, %289 : vector<2x16xf32>
    %c0_120 = arith.constant 0 : index
    %c0_121 = arith.constant 0 : index
    %291 = vector.load %arg39[%c0_120, %c0_121] : memref<1x16xf32, #tpu.memory_space<vmem>>, vector<1x16xf32>
    %292 = vector.broadcast %291 : vector<1x16xf32> to vector<2x16xf32>
    %293 = arith.addf %290, %292 : vector<2x16xf32>
    %294 = vector.broadcast %209 : f32 to vector<2x16xf32>
    %295 = arith.mulf %294, %293 : vector<2x16xf32>
    %c0_122 = arith.constant 0 : index
    %c0_123 = arith.constant 0 : index
    %296 = vector.load %arg12[%c0_122, %c0_123] : memref<32x48xf32, #tpu.memory_space<vmem>>, vector<32x48xf32>
    %297 = vector.extract_strided_slice %296 {offsets = [0, 0], sizes = [16, 48], strides = [1, 1]} : vector<32x48xf32> to vector<16x48xf32>
    %cst_124 = arith.constant dense<0.000000e+00> : vector<2x48xf32>
    %298 = tpu.matmul %4, %297, %cst_124 {dimension_numbers = #tpu.dot_dimension_numbers<[1], [0], [0], [1], [0, 0, 1, 1], [], []>} : vector<2x16xf32>, vector<16x48xf32>, vector<2x48xf32> -> vector<2x48xf32>
    %299 = vector.extract_strided_slice %296 {offsets = [16, 0], sizes = [16, 48], strides = [1, 1]} : vector<32x48xf32> to vector<16x48xf32>
    %cst_125 = arith.constant dense<0.000000e+00> : vector<2x48xf32>
    %300 = tpu.matmul %252, %299, %cst_125 {dimension_numbers = #tpu.dot_dimension_numbers<[1], [0], [0], [1], [0, 0, 1, 1], [], []>} : vector<2x16xf32>, vector<16x48xf32>, vector<2x48xf32> -> vector<2x48xf32>
    %301 = arith.addf %298, %300 : vector<2x48xf32>
    %c0_126 = arith.constant 0 : index
    %c0_127 = arith.constant 0 : index
    %302 = vector.load %arg14[%c0_126, %c0_127] : memref<1x48xf32, #tpu.memory_space<vmem>>, vector<1x48xf32>
    %303 = vector.broadcast %302 : vector<1x48xf32> to vector<2x48xf32>
    %304 = arith.addf %301, %303 : vector<2x48xf32>
    %c0_128 = arith.constant 0 : index
    %c0_129 = arith.constant 0 : index
    %305 = vector.load %arg13[%c0_128, %c0_129] : memref<16x48xf32, #tpu.memory_space<vmem>>, vector<16x48xf32>
    %cst_130 = arith.constant dense<0.000000e+00> : vector<2x48xf32>
    %306 = tpu.matmul %14, %305, %cst_130 {dimension_numbers = #tpu.dot_dimension_numbers<[1], [0], [0], [1], [0, 0, 1, 1], [], []>} : vector<2x16xf32>, vector<16x48xf32>, vector<2x48xf32> -> vector<2x48xf32>
    %c0_131 = arith.constant 0 : index
    %c0_132 = arith.constant 0 : index
    %307 = vector.load %arg15[%c0_131, %c0_132] : memref<1x48xf32, #tpu.memory_space<vmem>>, vector<1x48xf32>
    %308 = vector.broadcast %307 : vector<1x48xf32> to vector<2x48xf32>
    %309 = arith.addf %306, %308 : vector<2x48xf32>
    %310 = vector.extract_strided_slice %304 {offsets = [0, 0], sizes = [2, 16], strides = [1, 1]} : vector<2x48xf32> to vector<2x16xf32>
    %311 = vector.extract_strided_slice %309 {offsets = [0, 0], sizes = [2, 16], strides = [1, 1]} : vector<2x48xf32> to vector<2x16xf32>
    %312 = arith.addf %310, %311 : vector<2x16xf32>
    %313 = arith.negf %312 : vector<2x16xf32>
    %314 = math.exp %313 : vector<2x16xf32>
    %cst_133 = arith.constant 1.000000e+00 : f32
    %315 = vector.broadcast %cst_133 : f32 to vector<2x16xf32>
    %316 = arith.addf %315, %314 : vector<2x16xf32>
    %317 = arith.divf %315, %316 : vector<2x16xf32>
    %318 = vector.extract_strided_slice %304 {offsets = [0, 16], sizes = [2, 16], strides = [1, 1]} : vector<2x48xf32> to vector<2x16xf32>
    %319 = vector.extract_strided_slice %309 {offsets = [0, 16], sizes = [2, 16], strides = [1, 1]} : vector<2x48xf32> to vector<2x16xf32>
    %320 = arith.addf %318, %319 : vector<2x16xf32>
    %321 = arith.negf %320 : vector<2x16xf32>
    %322 = math.exp %321 : vector<2x16xf32>
    %cst_134 = arith.constant 1.000000e+00 : f32
    %323 = vector.broadcast %cst_134 : f32 to vector<2x16xf32>
    %324 = arith.addf %323, %322 : vector<2x16xf32>
    %325 = arith.divf %323, %324 : vector<2x16xf32>
    %326 = vector.extract_strided_slice %304 {offsets = [0, 32], sizes = [2, 16], strides = [1, 1]} : vector<2x48xf32> to vector<2x16xf32>
    %327 = vector.extract_strided_slice %309 {offsets = [0, 32], sizes = [2, 16], strides = [1, 1]} : vector<2x48xf32> to vector<2x16xf32>
    %328 = arith.mulf %317, %327 : vector<2x16xf32>
    %329 = arith.addf %326, %328 : vector<2x16xf32>
    %330 = math.tanh %329 : vector<2x16xf32>
    %cst_135 = arith.constant 1.000000e+00 : f32
    %331 = vector.broadcast %cst_135 : f32 to vector<2x16xf32>
    %332 = arith.subf %331, %325 : vector<2x16xf32>
    %333 = arith.mulf %332, %330 : vector<2x16xf32>
    %334 = arith.mulf %325, %14 : vector<2x16xf32>
    %335 = arith.addf %333, %334 : vector<2x16xf32>
    %c0_136 = arith.constant 0 : index
    %c0_137 = arith.constant 0 : index
    %336 = vector.load %arg16[%c0_136, %c0_137] : memref<32x48xf32, #tpu.memory_space<vmem>>, vector<32x48xf32>
    %337 = vector.extract_strided_slice %336 {offsets = [0, 0], sizes = [16, 48], strides = [1, 1]} : vector<32x48xf32> to vector<16x48xf32>
    %cst_138 = arith.constant dense<0.000000e+00> : vector<2x48xf32>
    %338 = tpu.matmul %6, %337, %cst_138 {dimension_numbers = #tpu.dot_dimension_numbers<[1], [0], [0], [1], [0, 0, 1, 1], [], []>} : vector<2x16xf32>, vector<16x48xf32>, vector<2x48xf32> -> vector<2x48xf32>
    %339 = vector.extract_strided_slice %336 {offsets = [16, 0], sizes = [16, 48], strides = [1, 1]} : vector<32x48xf32> to vector<16x48xf32>
    %cst_139 = arith.constant dense<0.000000e+00> : vector<2x48xf32>
    %340 = tpu.matmul %295, %339, %cst_139 {dimension_numbers = #tpu.dot_dimension_numbers<[1], [0], [0], [1], [0, 0, 1, 1], [], []>} : vector<2x16xf32>, vector<16x48xf32>, vector<2x48xf32> -> vector<2x48xf32>
    %341 = arith.addf %338, %340 : vector<2x48xf32>
    %c0_140 = arith.constant 0 : index
    %c0_141 = arith.constant 0 : index
    %342 = vector.load %arg18[%c0_140, %c0_141] : memref<1x48xf32, #tpu.memory_space<vmem>>, vector<1x48xf32>
    %343 = vector.broadcast %342 : vector<1x48xf32> to vector<2x48xf32>
    %344 = arith.addf %341, %343 : vector<2x48xf32>
    %c0_142 = arith.constant 0 : index
    %c0_143 = arith.constant 0 : index
    %345 = vector.load %arg17[%c0_142, %c0_143] : memref<16x48xf32, #tpu.memory_space<vmem>>, vector<16x48xf32>
    %cst_144 = arith.constant dense<0.000000e+00> : vector<2x48xf32>
    %346 = tpu.matmul %17, %345, %cst_144 {dimension_numbers = #tpu.dot_dimension_numbers<[1], [0], [0], [1], [0, 0, 1, 1], [], []>} : vector<2x16xf32>, vector<16x48xf32>, vector<2x48xf32> -> vector<2x48xf32>
    %c0_145 = arith.constant 0 : index
    %c0_146 = arith.constant 0 : index
    %347 = vector.load %arg19[%c0_145, %c0_146] : memref<1x48xf32, #tpu.memory_space<vmem>>, vector<1x48xf32>
    %348 = vector.broadcast %347 : vector<1x48xf32> to vector<2x48xf32>
    %349 = arith.addf %346, %348 : vector<2x48xf32>
    %350 = vector.extract_strided_slice %344 {offsets = [0, 0], sizes = [2, 16], strides = [1, 1]} : vector<2x48xf32> to vector<2x16xf32>
    %351 = vector.extract_strided_slice %349 {offsets = [0, 0], sizes = [2, 16], strides = [1, 1]} : vector<2x48xf32> to vector<2x16xf32>
    %352 = arith.addf %350, %351 : vector<2x16xf32>
    %353 = arith.negf %352 : vector<2x16xf32>
    %354 = math.exp %353 : vector<2x16xf32>
    %cst_147 = arith.constant 1.000000e+00 : f32
    %355 = vector.broadcast %cst_147 : f32 to vector<2x16xf32>
    %356 = arith.addf %355, %354 : vector<2x16xf32>
    %357 = arith.divf %355, %356 : vector<2x16xf32>
    %358 = vector.extract_strided_slice %344 {offsets = [0, 16], sizes = [2, 16], strides = [1, 1]} : vector<2x48xf32> to vector<2x16xf32>
    %359 = vector.extract_strided_slice %349 {offsets = [0, 16], sizes = [2, 16], strides = [1, 1]} : vector<2x48xf32> to vector<2x16xf32>
    %360 = arith.addf %358, %359 : vector<2x16xf32>
    %361 = arith.negf %360 : vector<2x16xf32>
    %362 = math.exp %361 : vector<2x16xf32>
    %cst_148 = arith.constant 1.000000e+00 : f32
    %363 = vector.broadcast %cst_148 : f32 to vector<2x16xf32>
    %364 = arith.addf %363, %362 : vector<2x16xf32>
    %365 = arith.divf %363, %364 : vector<2x16xf32>
    %366 = vector.extract_strided_slice %344 {offsets = [0, 32], sizes = [2, 16], strides = [1, 1]} : vector<2x48xf32> to vector<2x16xf32>
    %367 = vector.extract_strided_slice %349 {offsets = [0, 32], sizes = [2, 16], strides = [1, 1]} : vector<2x48xf32> to vector<2x16xf32>
    %368 = arith.mulf %357, %367 : vector<2x16xf32>
    %369 = arith.addf %366, %368 : vector<2x16xf32>
    %370 = math.tanh %369 : vector<2x16xf32>
    %cst_149 = arith.constant 1.000000e+00 : f32
    %371 = vector.broadcast %cst_149 : f32 to vector<2x16xf32>
    %372 = arith.subf %371, %365 : vector<2x16xf32>
    %373 = arith.mulf %372, %370 : vector<2x16xf32>
    %374 = arith.mulf %365, %17 : vector<2x16xf32>
    %375 = arith.addf %373, %374 : vector<2x16xf32>
    %cst_150 = arith.constant 1.000000e+00 : f32
    %376 = vector.broadcast %cst_150 : f32 to vector<2x2x1xf32>
    %377 = arith.subf %376, %9 : vector<2x2x1xf32>
    %378 = vector.broadcast %377 : vector<2x2x1xf32> to vector<2x2x16xf32>
    %379 = arith.mulf %10, %378 : vector<2x2x16xf32>
    %380 = vector.shape_cast %335 : vector<2x16xf32> to vector<2x1x16xf32>
    %381 = vector.broadcast %380 : vector<2x1x16xf32> to vector<2x2x16xf32>
    %382 = vector.broadcast %9 : vector<2x2x1xf32> to vector<2x2x16xf32>
    %383 = arith.mulf %381, %382 : vector<2x2x16xf32>
    %384 = arith.addf %379, %383 : vector<2x2x16xf32>
    %c0_151 = arith.constant 0 : index
    %c0_152 = arith.constant 0 : index
    %c0_153 = arith.constant 0 : index
    %385 = vector.load %arg45[%c0_151, %c0_152, %c0_153] : memref<2x2x16xf32, #tpu.memory_space<vmem>>, vector<2x2x16xf32>
    tpu.vector_store %arg45[%c0_151, %c0_152, %c0_153], %384 {strides = array<i32>} : memref<2x2x16xf32, #tpu.memory_space<vmem>>, vector<2x2x16xf32>,
    %cst_154 = arith.constant 1.000000e+00 : f32
    %386 = vector.broadcast %cst_154 : f32 to vector<2x2x1xf32>
    %387 = arith.subf %386, %9 : vector<2x2x1xf32>
    %388 = vector.broadcast %387 : vector<2x2x1xf32> to vector<2x2x16xf32>
    %389 = arith.mulf %11, %388 : vector<2x2x16xf32>
    %390 = vector.shape_cast %375 : vector<2x16xf32> to vector<2x1x16xf32>
    %391 = vector.broadcast %390 : vector<2x1x16xf32> to vector<2x2x16xf32>
    %392 = vector.broadcast %9 : vector<2x2x1xf32> to vector<2x2x16xf32>
    %393 = arith.mulf %391, %392 : vector<2x2x16xf32>
    %394 = arith.addf %389, %393 : vector<2x2x16xf32>
    %c0_155 = arith.constant 0 : index
    %c0_156 = arith.constant 0 : index
    %c0_157 = arith.constant 0 : index
    %395 = vector.load %arg46[%c0_155, %c0_156, %c0_157] : memref<2x2x16xf32, #tpu.memory_space<vmem>>, vector<2x2x16xf32>
    tpu.vector_store %arg46[%c0_155, %c0_156, %c0_157], %394 {strides = array<i32>} : memref<2x2x16xf32, #tpu.memory_space<vmem>>, vector<2x2x16xf32>,
    %c0_158 = arith.constant 0 : index
    %c0_159 = arith.constant 0 : index
    %396 = vector.load %arg47[%c0_158, %c0_159] : memref<2x16xf32, #tpu.memory_space<vmem>>, vector<2x16xf32>
    %c0_160 = arith.constant 0 : index
    %c0_161 = arith.constant 0 : index
    %397 = vector.load %arg20[%c0_160, %c0_161] : memref<16x48xf32, #tpu.memory_space<vmem>>, vector<16x48xf32>
    %cst_162 = arith.constant dense<0.000000e+00> : vector<2x48xf32>
    %398 = tpu.matmul %335, %397, %cst_162 {dimension_numbers = #tpu.dot_dimension_numbers<[1], [0], [0], [1], [0, 0, 1, 1], [], []>} : vector<2x16xf32>, vector<16x48xf32>, vector<2x48xf32> -> vector<2x48xf32>
    %c0_163 = arith.constant 0 : index
    %c0_164 = arith.constant 0 : index
    %399 = vector.load %arg22[%c0_163, %c0_164] : memref<1x48xf32, #tpu.memory_space<vmem>>, vector<1x48xf32>
    %400 = vector.broadcast %399 : vector<1x48xf32> to vector<2x48xf32>
    %401 = arith.addf %398, %400 : vector<2x48xf32>
    %c0_165 = arith.constant 0 : index
    %c0_166 = arith.constant 0 : index
    %402 = vector.load %arg21[%c0_165, %c0_166] : memref<16x48xf32, #tpu.memory_space<vmem>>, vector<16x48xf32>
    %cst_167 = arith.constant dense<0.000000e+00> : vector<2x48xf32>
    %403 = tpu.matmul %396, %402, %cst_167 {dimension_numbers = #tpu.dot_dimension_numbers<[1], [0], [0], [1], [0, 0, 1, 1], [], []>} : vector<2x16xf32>, vector<16x48xf32>, vector<2x48xf32> -> vector<2x48xf32>
    %c0_168 = arith.constant 0 : index
    %c0_169 = arith.constant 0 : index
    %404 = vector.load %arg23[%c0_168, %c0_169] : memref<1x48xf32, #tpu.memory_space<vmem>>, vector<1x48xf32>
    %405 = vector.broadcast %404 : vector<1x48xf32> to vector<2x48xf32>
    %406 = arith.addf %403, %405 : vector<2x48xf32>
    %407 = vector.extract_strided_slice %401 {offsets = [0, 0], sizes = [2, 16], strides = [1, 1]} : vector<2x48xf32> to vector<2x16xf32>
    %408 = vector.extract_strided_slice %406 {offsets = [0, 0], sizes = [2, 16], strides = [1, 1]} : vector<2x48xf32> to vector<2x16xf32>
    %409 = arith.addf %407, %408 : vector<2x16xf32>
    %410 = arith.negf %409 : vector<2x16xf32>
    %411 = math.exp %410 : vector<2x16xf32>
    %cst_170 = arith.constant 1.000000e+00 : f32
    %412 = vector.broadcast %cst_170 : f32 to vector<2x16xf32>
    %413 = arith.addf %412, %411 : vector<2x16xf32>
    %414 = arith.divf %412, %413 : vector<2x16xf32>
    %415 = vector.extract_strided_slice %401 {offsets = [0, 16], sizes = [2, 16], strides = [1, 1]} : vector<2x48xf32> to vector<2x16xf32>
    %416 = vector.extract_strided_slice %406 {offsets = [0, 16], sizes = [2, 16], strides = [1, 1]} : vector<2x48xf32> to vector<2x16xf32>
    %417 = arith.addf %415, %416 : vector<2x16xf32>
    %418 = arith.negf %417 : vector<2x16xf32>
    %419 = math.exp %418 : vector<2x16xf32>
    %cst_171 = arith.constant 1.000000e+00 : f32
    %420 = vector.broadcast %cst_171 : f32 to vector<2x16xf32>
    %421 = arith.addf %420, %419 : vector<2x16xf32>
    %422 = arith.divf %420, %421 : vector<2x16xf32>
    %423 = vector.extract_strided_slice %401 {offsets = [0, 32], sizes = [2, 16], strides = [1, 1]} : vector<2x48xf32> to vector<2x16xf32>
    %424 = vector.extract_strided_slice %406 {offsets = [0, 32], sizes = [2, 16], strides = [1, 1]} : vector<2x48xf32> to vector<2x16xf32>
    %425 = arith.mulf %414, %424 : vector<2x16xf32>
    %426 = arith.addf %423, %425 : vector<2x16xf32>
    %427 = math.tanh %426 : vector<2x16xf32>
    %cst_172 = arith.constant 1.000000e+00 : f32
    %428 = vector.broadcast %cst_172 : f32 to vector<2x16xf32>
    %429 = arith.subf %428, %422 : vector<2x16xf32>
    %430 = arith.mulf %429, %427 : vector<2x16xf32>
    %431 = arith.mulf %422, %396 : vector<2x16xf32>
    %432 = arith.addf %430, %431 : vector<2x16xf32>
    %c0_173 = arith.constant 0 : index
    %c0_174 = arith.constant 0 : index
    %433 = vector.load %arg48[%c0_173, %c0_174] : memref<2x16xf32, #tpu.memory_space<vmem>>, vector<2x16xf32>
    %c0_175 = arith.constant 0 : index
    %c0_176 = arith.constant 0 : index
    %434 = vector.load %arg24[%c0_175, %c0_176] : memref<16x48xf32, #tpu.memory_space<vmem>>, vector<16x48xf32>
    %cst_177 = arith.constant dense<0.000000e+00> : vector<2x48xf32>
    %435 = tpu.matmul %375, %434, %cst_177 {dimension_numbers = #tpu.dot_dimension_numbers<[1], [0], [0], [1], [0, 0, 1, 1], [], []>} : vector<2x16xf32>, vector<16x48xf32>, vector<2x48xf32> -> vector<2x48xf32>
    %c0_178 = arith.constant 0 : index
    %c0_179 = arith.constant 0 : index
    %436 = vector.load %arg26[%c0_178, %c0_179] : memref<1x48xf32, #tpu.memory_space<vmem>>, vector<1x48xf32>
    %437 = vector.broadcast %436 : vector<1x48xf32> to vector<2x48xf32>
    %438 = arith.addf %435, %437 : vector<2x48xf32>
    %c0_180 = arith.constant 0 : index
    %c0_181 = arith.constant 0 : index
    %439 = vector.load %arg25[%c0_180, %c0_181] : memref<16x48xf32, #tpu.memory_space<vmem>>, vector<16x48xf32>
    %cst_182 = arith.constant dense<0.000000e+00> : vector<2x48xf32>
    %440 = tpu.matmul %433, %439, %cst_182 {dimension_numbers = #tpu.dot_dimension_numbers<[1], [0], [0], [1], [0, 0, 1, 1], [], []>} : vector<2x16xf32>, vector<16x48xf32>, vector<2x48xf32> -> vector<2x48xf32>
    %c0_183 = arith.constant 0 : index
    %c0_184 = arith.constant 0 : index
    %441 = vector.load %arg27[%c0_183, %c0_184] : memref<1x48xf32, #tpu.memory_space<vmem>>, vector<1x48xf32>
    %442 = vector.broadcast %441 : vector<1x48xf32> to vector<2x48xf32>
    %443 = arith.addf %440, %442 : vector<2x48xf32>
    %444 = vector.extract_strided_slice %438 {offsets = [0, 0], sizes = [2, 16], strides = [1, 1]} : vector<2x48xf32> to vector<2x16xf32>
    %445 = vector.extract_strided_slice %443 {offsets = [0, 0], sizes = [2, 16], strides = [1, 1]} : vector<2x48xf32> to vector<2x16xf32>
    %446 = arith.addf %444, %445 : vector<2x16xf32>
    %447 = arith.negf %446 : vector<2x16xf32>
    %448 = math.exp %447 : vector<2x16xf32>
    %cst_185 = arith.constant 1.000000e+00 : f32
    %449 = vector.broadcast %cst_185 : f32 to vector<2x16xf32>
    %450 = arith.addf %449, %448 : vector<2x16xf32>
    %451 = arith.divf %449, %450 : vector<2x16xf32>
    %452 = vector.extract_strided_slice %438 {offsets = [0, 16], sizes = [2, 16], strides = [1, 1]} : vector<2x48xf32> to vector<2x16xf32>
    %453 = vector.extract_strided_slice %443 {offsets = [0, 16], sizes = [2, 16], strides = [1, 1]} : vector<2x48xf32> to vector<2x16xf32>
    %454 = arith.addf %452, %453 : vector<2x16xf32>
    %455 = arith.negf %454 : vector<2x16xf32>
    %456 = math.exp %455 : vector<2x16xf32>
    %cst_186 = arith.constant 1.000000e+00 : f32
    %457 = vector.broadcast %cst_186 : f32 to vector<2x16xf32>
    %458 = arith.addf %457, %456 : vector<2x16xf32>
    %459 = arith.divf %457, %458 : vector<2x16xf32>
    %460 = vector.extract_strided_slice %438 {offsets = [0, 32], sizes = [2, 16], strides = [1, 1]} : vector<2x48xf32> to vector<2x16xf32>
    %461 = vector.extract_strided_slice %443 {offsets = [0, 32], sizes = [2, 16], strides = [1, 1]} : vector<2x48xf32> to vector<2x16xf32>
    %462 = arith.mulf %451, %461 : vector<2x16xf32>
    %463 = arith.addf %460, %462 : vector<2x16xf32>
    %464 = math.tanh %463 : vector<2x16xf32>
    %cst_187 = arith.constant 1.000000e+00 : f32
    %465 = vector.broadcast %cst_187 : f32 to vector<2x16xf32>
    %466 = arith.subf %465, %459 : vector<2x16xf32>
    %467 = arith.mulf %466, %464 : vector<2x16xf32>
    %468 = arith.mulf %459, %433 : vector<2x16xf32>
    %469 = arith.addf %467, %468 : vector<2x16xf32>
    %c0_188 = arith.constant 0 : index
    %c0_189 = arith.constant 0 : index
    %470 = vector.load %arg47[%c0_188, %c0_189] : memref<2x16xf32, #tpu.memory_space<vmem>>, vector<2x16xf32>
    tpu.vector_store %arg47[%c0_188, %c0_189], %432 {strides = array<i32>} : memref<2x16xf32, #tpu.memory_space<vmem>>, vector<2x16xf32>,
    %c0_190 = arith.constant 0 : index
    %c0_191 = arith.constant 0 : index
    %471 = vector.load %arg48[%c0_190, %c0_191] : memref<2x16xf32, #tpu.memory_space<vmem>>, vector<2x16xf32>
    tpu.vector_store %arg48[%c0_190, %c0_191], %469 {strides = array<i32>} : memref<2x16xf32, #tpu.memory_space<vmem>>, vector<2x16xf32>,
    %472 = arith.index_cast %arg0 : i32 to index
    %c0_192 = arith.constant 0 : index
    %c0_193 = arith.constant 0 : index
    %473 = vector.load %arg43[%472, %c0_192, %c0_193] : memref<8x2x16xf32, #tpu.memory_space<vmem>>, vector<1x2x16xf32>
    %474 = vector.shape_cast %473 : vector<1x2x16xf32> to vector<2x16xf32>
    %475 = vector.shape_cast %65 : vector<2x16xf32> to vector<1x2x16xf32>
    tpu.vector_store %arg43[%472, %c0_192, %c0_193], %475 {strides = array<i32>} : memref<8x2x16xf32, #tpu.memory_space<vmem>>, vector<1x2x16xf32>,
    %476 = arith.index_cast %arg0 : i32 to index
    %c0_194 = arith.constant 0 : index
    %c0_195 = arith.constant 0 : index
    %477 = vector.load %arg44[%476, %c0_194, %c0_195] : memref<8x2x16xf32, #tpu.memory_space<vmem>>, vector<1x2x16xf32>
    %478 = vector.shape_cast %477 : vector<1x2x16xf32> to vector<2x16xf32>
    %479 = vector.shape_cast %105 : vector<2x16xf32> to vector<1x2x16xf32>
    tpu.vector_store %arg44[%476, %c0_194, %c0_195], %479 {strides = array<i32>} : memref<8x2x16xf32, #tpu.memory_space<vmem>>, vector<1x2x16xf32>,
    %c0_196 = arith.constant 0 : index
    %c0_197 = arith.constant 0 : index
    %c0_198 = arith.constant 0 : index
    %480 = vector.load %arg40[%c0_196, %c0_197, %c0_198] : memref<1x2x16xf32, #tpu.memory_space<vmem>>, vector<1x2x16xf32>
    %481 = vector.shape_cast %480 : vector<1x2x16xf32> to vector<2x16xf32>
    %482 = vector.shape_cast %432 : vector<2x16xf32> to vector<1x2x16xf32>
    tpu.vector_store %arg40[%c0_196, %c0_197, %c0_198], %482 {strides = array<i32>} : memref<1x2x16xf32, #tpu.memory_space<vmem>>, vector<1x2x16xf32>,
    %c0_199 = arith.constant 0 : index
    %c0_200 = arith.constant 0 : index
    %c0_201 = arith.constant 0 : index
    %483 = vector.load %arg41[%c0_199, %c0_200, %c0_201] : memref<1x2x16xf32, #tpu.memory_space<vmem>>, vector<1x2x16xf32>
    %484 = vector.shape_cast %483 : vector<1x2x16xf32> to vector<2x16xf32>
    %485 = vector.shape_cast %469 : vector<2x16xf32> to vector<1x2x16xf32>
    tpu.vector_store %arg41[%c0_199, %c0_200, %c0_201], %485 {strides = array<i32>} : memref<1x2x16xf32, #tpu.memory_space<vmem>>, vector<1x2x16xf32>,
    %c0_202 = arith.constant 0 : index
    %c0_203 = arith.constant 0 : index
    %c0_204 = arith.constant 0 : index
    %486 = vector.load %arg42[%c0_202, %c0_203, %c0_204] : memref<1x8x2xf32, #tpu.memory_space<vmem>>, vector<1x8x2xf32>
    %487 = vector.shape_cast %486 : vector<1x8x2xf32> to vector<8x2xf32>
    %488 = vector.shape_cast %207 : vector<8x2xf32> to vector<1x8x2xf32>
    tpu.vector_store %arg42[%c0_202, %c0_203, %c0_204], %488 {strides = array<i32>} : memref<1x8x2xf32, #tpu.memory_space<vmem>>, vector<1x8x2xf32>,
    return
  }
  func.func @transform_0(%arg0: i32) -> (i32, i32, i32) {
    %c0_i32 = arith.constant 0 : i32
    %c0_i32_0 = arith.constant 0 : i32
    %c0_i32_1 = arith.constant 0 : i32
    return %arg0, %c0_i32, %c0_i32_0 : i32, i32, i32
  }
  func.func @transform_1(%arg0: i32) -> (i32, i32, i32) {
    %c0_i32 = arith.constant 0 : i32
    %c0_i32_0 = arith.constant 0 : i32
    %c0_i32_1 = arith.constant 0 : i32
    return %arg0, %c0_i32, %c0_i32_0 : i32, i32, i32
  }
  func.func @transform_2(%arg0: i32) -> (i32, i32, i32) {
    %c0_i32 = arith.constant 0 : i32
    %c0_i32_0 = arith.constant 0 : i32
    %c0_i32_1 = arith.constant 0 : i32
    return %arg0, %c0_i32, %c0_i32_0 : i32, i32, i32
  }
  func.func @transform_3(%arg0: i32) -> (i32, i32) {
    %c0_i32 = arith.constant 0 : i32
    %c0_i32_0 = arith.constant 0 : i32
    %c0_i32_1 = arith.constant 0 : i32
    return %c0_i32, %c0_i32_0 : i32, i32
  }
  func.func @transform_4(%arg0: i32) -> (i32, i32) {
    %c0_i32 = arith.constant 0 : i32
    %c0_i32_0 = arith.constant 0 : i32
    %c0_i32_1 = arith.constant 0 : i32
    return %c0_i32, %c0_i32_0 : i32, i32
  }
  func.func @transform_5(%arg0: i32) -> (i32, i32) {
    %c0_i32 = arith.constant 0 : i32
    %c0_i32_0 = arith.constant 0 : i32
    %c0_i32_1 = arith.constant 0 : i32
    return %c0_i32, %c0_i32_0 : i32, i32
  }
  func.func @transform_6(%arg0: i32) -> (i32, i32) {
    %c0_i32 = arith.constant 0 : i32
    %c0_i32_0 = arith.constant 0 : i32
    %c0_i32_1 = arith.constant 0 : i32
    return %c0_i32, %c0_i32_0 : i32, i32
  }
  func.func @transform_7(%arg0: i32) -> (i32, i32) {
    %c0_i32 = arith.constant 0 : i32
    %c0_i32_0 = arith.constant 0 : i32
    %c0_i32_1 = arith.constant 0 : i32
    return %c0_i32, %c0_i32_0 : i32, i32
  }
  func.func @transform_8(%arg0: i32) -> (i32, i32) {
    %c0_i32 = arith.constant 0 : i32
    %c0_i32_0 = arith.constant 0 : i32
    %c0_i32_1 = arith.constant 0 : i32
    return %c0_i32, %c0_i32_0 : i32, i32
  }
  func.func @transform_9(%arg0: i32) -> (i32, i32) {
    %c0_i32 = arith.constant 0 : i32
    %c0_i32_0 = arith.constant 0 : i32
    %c0_i32_1 = arith.constant 0 : i32
    return %c0_i32, %c0_i32_0 : i32, i32
  }
  func.func @transform_10(%arg0: i32) -> (i32, i32) {
    %c0_i32 = arith.constant 0 : i32
    %c0_i32_0 = arith.constant 0 : i32
    %c0_i32_1 = arith.constant 0 : i32
    return %c0_i32, %c0_i32_0 : i32, i32
  }
  func.func @transform_11(%arg0: i32) -> (i32, i32) {
    %c0_i32 = arith.constant 0 : i32
    %c0_i32_0 = arith.constant 0 : i32
    %c0_i32_1 = arith.constant 0 : i32
    return %c0_i32, %c0_i32_0 : i32, i32
  }
  func.func @transform_12(%arg0: i32) -> (i32, i32) {
    %c0_i32 = arith.constant 0 : i32
    %c0_i32_0 = arith.constant 0 : i32
    %c0_i32_1 = arith.constant 0 : i32
    return %c0_i32, %c0_i32_0 : i32, i32
  }
  func.func @transform_13(%arg0: i32) -> (i32, i32) {
    %c0_i32 = arith.constant 0 : i32
    %c0_i32_0 = arith.constant 0 : i32
    %c0_i32_1 = arith.constant 0 : i32
    return %c0_i32, %c0_i32_0 : i32, i32
  }
  func.func @transform_14(%arg0: i32) -> (i32, i32) {
    %c0_i32 = arith.constant 0 : i32
    %c0_i32_0 = arith.constant 0 : i32
    %c0_i32_1 = arith.constant 0 : i32
    return %c0_i32, %c0_i32_0 : i32, i32
  }
  func.func @transform_15(%arg0: i32) -> (i32, i32) {
    %c0_i32 = arith.constant 0 : i32
    %c0_i32_0 = arith.constant 0 : i32
    %c0_i32_1 = arith.constant 0 : i32
    return %c0_i32, %c0_i32_0 : i32, i32
  }
  func.func @transform_16(%arg0: i32) -> (i32, i32) {
    %c0_i32 = arith.constant 0 : i32
    %c0_i32_0 = arith.constant 0 : i32
    %c0_i32_1 = arith.constant 0 : i32
    return %c0_i32, %c0_i32_0 : i32, i32
  }
  func.func @transform_17(%arg0: i32) -> (i32, i32) {
    %c0_i32 = arith.constant 0 : i32
    %c0_i32_0 = arith.constant 0 : i32
    %c0_i32_1 = arith.constant 0 : i32
    return %c0_i32, %c0_i32_0 : i32, i32
  }
  func.func @transform_18(%arg0: i32) -> (i32, i32) {
    %c0_i32 = arith.constant 0 : i32
    %c0_i32_0 = arith.constant 0 : i32
    %c0_i32_1 = arith.constant 0 : i32
    return %c0_i32, %c0_i32_0 : i32, i32
  }
  func.func @transform_19(%arg0: i32) -> (i32, i32) {
    %c0_i32 = arith.constant 0 : i32
    %c0_i32_0 = arith.constant 0 : i32
    %c0_i32_1 = arith.constant 0 : i32
    return %c0_i32, %c0_i32_0 : i32, i32
  }
  func.func @transform_20(%arg0: i32) -> (i32, i32) {
    %c0_i32 = arith.constant 0 : i32
    %c0_i32_0 = arith.constant 0 : i32
    %c0_i32_1 = arith.constant 0 : i32
    return %c0_i32, %c0_i32_0 : i32, i32
  }
  func.func @transform_21(%arg0: i32) -> (i32, i32) {
    %c0_i32 = arith.constant 0 : i32
    %c0_i32_0 = arith.constant 0 : i32
    %c0_i32_1 = arith.constant 0 : i32
    return %c0_i32, %c0_i32_0 : i32, i32
  }
  func.func @transform_22(%arg0: i32) -> (i32, i32) {
    %c0_i32 = arith.constant 0 : i32
    %c0_i32_0 = arith.constant 0 : i32
    %c0_i32_1 = arith.constant 0 : i32
    return %c0_i32, %c0_i32_0 : i32, i32
  }
  func.func @transform_23(%arg0: i32) -> (i32, i32) {
    %c0_i32 = arith.constant 0 : i32
    %c0_i32_0 = arith.constant 0 : i32
    %c0_i32_1 = arith.constant 0 : i32
    return %c0_i32, %c0_i32_0 : i32, i32
  }
  func.func @transform_24(%arg0: i32) -> (i32, i32) {
    %c0_i32 = arith.constant 0 : i32
    %c0_i32_0 = arith.constant 0 : i32
    %c0_i32_1 = arith.constant 0 : i32
    return %c0_i32, %c0_i32_0 : i32, i32
  }
  func.func @transform_25(%arg0: i32) -> (i32, i32) {
    %c0_i32 = arith.constant 0 : i32
    %c0_i32_0 = arith.constant 0 : i32
    %c0_i32_1 = arith.constant 0 : i32
    return %c0_i32, %c0_i32_0 : i32, i32
  }
  func.func @transform_26(%arg0: i32) -> (i32, i32) {
    %c0_i32 = arith.constant 0 : i32
    %c0_i32_0 = arith.constant 0 : i32
    %c0_i32_1 = arith.constant 0 : i32
    return %c0_i32, %c0_i32_0 : i32, i32
  }
  func.func @transform_27(%arg0: i32) -> (i32, i32) {
    %c0_i32 = arith.constant 0 : i32
    %c0_i32_0 = arith.constant 0 : i32
    %c0_i32_1 = arith.constant 0 : i32
    return %c0_i32, %c0_i32_0 : i32, i32
  }
  func.func @transform_28(%arg0: i32) -> (i32, i32) {
    %c0_i32 = arith.constant 0 : i32
    %c0_i32_0 = arith.constant 0 : i32
    %c0_i32_1 = arith.constant 0 : i32
    return %c0_i32, %c0_i32_0 : i32, i32
  }
  func.func @transform_29(%arg0: i32) -> (i32, i32) {
    %c0_i32 = arith.constant 0 : i32
    %c0_i32_0 = arith.constant 0 : i32
    %c0_i32_1 = arith.constant 0 : i32
    return %c0_i32, %c0_i32_0 : i32, i32
  }
  func.func @transform_30(%arg0: i32) -> (i32, i32) {
    %c0_i32 = arith.constant 0 : i32
    %c0_i32_0 = arith.constant 0 : i32
    %c0_i32_1 = arith.constant 0 : i32
    return %c0_i32, %c0_i32_0 : i32, i32
  }
  func.func @transform_31(%arg0: i32) -> (i32, i32) {
    %c0_i32 = arith.constant 0 : i32
    %c0_i32_0 = arith.constant 0 : i32
    %c0_i32_1 = arith.constant 0 : i32
    return %c0_i32, %c0_i32_0 : i32, i32
  }
  func.func @transform_32(%arg0: i32) -> (i32, i32) {
    %c0_i32 = arith.constant 0 : i32
    %c0_i32_0 = arith.constant 0 : i32
    %c0_i32_1 = arith.constant 0 : i32
    return %c0_i32, %c0_i32_0 : i32, i32
  }
  func.func @transform_33(%arg0: i32) -> (i32, i32) {
    %c0_i32 = arith.constant 0 : i32
    %c0_i32_0 = arith.constant 0 : i32
    %c0_i32_1 = arith.constant 0 : i32
    return %c0_i32, %c0_i32_0 : i32, i32
  }
  func.func @transform_34(%arg0: i32) -> (i32, i32) {
    %c0_i32 = arith.constant 0 : i32
    %c0_i32_0 = arith.constant 0 : i32
    %c0_i32_1 = arith.constant 0 : i32
    return %c0_i32, %c0_i32_0 : i32, i32
  }
  func.func @transform_35(%arg0: i32) -> (i32, i32) {
    %c0_i32 = arith.constant 0 : i32
    %c0_i32_0 = arith.constant 0 : i32
    %c0_i32_1 = arith.constant 0 : i32
    return %c0_i32, %c0_i32_0 : i32, i32
  }
  func.func @transform_36(%arg0: i32) -> (i32, i32) {
    %c0_i32 = arith.constant 0 : i32
    %c0_i32_0 = arith.constant 0 : i32
    %c0_i32_1 = arith.constant 0 : i32
    return %c0_i32, %c0_i32_0 : i32, i32
  }
  func.func @transform_37(%arg0: i32) -> (i32, i32) {
    %c0_i32 = arith.constant 0 : i32
    %c0_i32_0 = arith.constant 0 : i32
    %c0_i32_1 = arith.constant 0 : i32
    return %c0_i32, %c0_i32_0 : i32, i32
  }
  func.func @transform_38(%arg0: i32) -> (i32, i32) {
    %c0_i32 = arith.constant 0 : i32
    %c0_i32_0 = arith.constant 0 : i32
    %c0_i32_1 = arith.constant 0 : i32
    return %c0_i32, %c0_i32_0 : i32, i32
  }
  func.func @transform_39(%arg0: i32) -> (i32, i32, i32) {
    %c0_i32 = arith.constant 0 : i32
    %c0_i32_0 = arith.constant 0 : i32
    %c0_i32_1 = arith.constant 0 : i32
    return %arg0, %c0_i32, %c0_i32_0 : i32, i32, i32
  }
  func.func @transform_40(%arg0: i32) -> (i32, i32, i32) {
    %c0_i32 = arith.constant 0 : i32
    %c0_i32_0 = arith.constant 0 : i32
    %c0_i32_1 = arith.constant 0 : i32
    return %arg0, %c0_i32, %c0_i32_0 : i32, i32, i32
  }
  func.func @transform_41(%arg0: i32) -> (i32, i32, i32) {
    %c0_i32 = arith.constant 0 : i32
    %c0_i32_0 = arith.constant 0 : i32
    %c0_i32_1 = arith.constant 0 : i32
    return %arg0, %c0_i32, %c0_i32_0 : i32, i32, i32
  }
}

module attributes {stable_mosaic.version = 11 : i64} {
  func.func @_drnn_kernel(%arg0: i32, %arg1: memref<1x2x16xf32, #tpu.memory_space<vmem>>, %arg2: memref<1x2x16xf32, #tpu.memory_space<vmem>>, %arg3: memref<1x2x2xf32, #tpu.memory_space<vmem>>, %arg4: memref<32x48xf32, #tpu.memory_space<vmem>>, %arg5: memref<16x48xf32, #tpu.memory_space<vmem>>, %arg6: memref<1x48xf32, #tpu.memory_space<vmem>>, %arg7: memref<1x48xf32, #tpu.memory_space<vmem>>, %arg8: memref<32x48xf32, #tpu.memory_space<vmem>>, %arg9: memref<16x48xf32, #tpu.memory_space<vmem>>, %arg10: memref<1x48xf32, #tpu.memory_space<vmem>>, %arg11: memref<1x48xf32, #tpu.memory_space<vmem>>, %arg12: memref<32x48xf32, #tpu.memory_space<vmem>>, %arg13: memref<16x48xf32, #tpu.memory_space<vmem>>, %arg14: memref<1x48xf32, #tpu.memory_space<vmem>>, %arg15: memref<1x48xf32, #tpu.memory_space<vmem>>, %arg16: memref<32x48xf32, #tpu.memory_space<vmem>>, %arg17: memref<16x48xf32, #tpu.memory_space<vmem>>, %arg18: memref<1x48xf32, #tpu.memory_space<vmem>>, %arg19: memref<1x48xf32, #tpu.memory_space<vmem>>, %arg20: memref<16x48xf32, #tpu.memory_space<vmem>>, %arg21: memref<16x48xf32, #tpu.memory_space<vmem>>, %arg22: memref<1x48xf32, #tpu.memory_space<vmem>>, %arg23: memref<1x48xf32, #tpu.memory_space<vmem>>, %arg24: memref<16x48xf32, #tpu.memory_space<vmem>>, %arg25: memref<16x48xf32, #tpu.memory_space<vmem>>, %arg26: memref<1x48xf32, #tpu.memory_space<vmem>>, %arg27: memref<1x48xf32, #tpu.memory_space<vmem>>, %arg28: memref<1x16xf32, #tpu.memory_space<vmem>>, %arg29: memref<1x16xf32, #tpu.memory_space<vmem>>, %arg30: memref<1x16xf32, #tpu.memory_space<vmem>>, %arg31: memref<1x16xf32, #tpu.memory_space<vmem>>, %arg32: memref<16x1xf32, #tpu.memory_space<vmem>>, %arg33: memref<1x1xf32, #tpu.memory_space<vmem>>, %arg34: memref<16x1xf32, #tpu.memory_space<vmem>>, %arg35: memref<1x1xf32, #tpu.memory_space<vmem>>, %arg36: memref<32x16xf32, #tpu.memory_space<vmem>>, %arg37: memref<1x16xf32, #tpu.memory_space<vmem>>, %arg38: memref<32x16xf32, #tpu.memory_space<vmem>>, %arg39: memref<1x16xf32, #tpu.memory_space<vmem>>, %arg40: memref<1x2x16xf32, #tpu.memory_space<vmem>>, %arg41: memref<1x2x16xf32, #tpu.memory_space<vmem>>, %arg42: memref<1x8x2xf32, #tpu.memory_space<vmem>>, %arg43: memref<8x2x16xf32, #tpu.memory_space<vmem>>, %arg44: memref<8x2x16xf32, #tpu.memory_space<vmem>>, %arg45: memref<2x2x16xf32, #tpu.memory_space<vmem>>, %arg46: memref<2x2x16xf32, #tpu.memory_space<vmem>>, %arg47: memref<2x16xf32, #tpu.memory_space<vmem>>, %arg48: memref<2x16xf32, #tpu.memory_space<vmem>>) attributes {dimension_semantics = [#tpu.dimension_semantics<arbitrary>], iteration_bounds = array<i64: 8>, scalar_prefetch = 0 : i64, scratch_operands = 6 : i64, tpu.core_type = #tpu.core_type<tc>, window_params = [{transform_indices = @transform_0, window_bounds = array<i64: 1, 2, 16>}, {transform_indices = @transform_1, window_bounds = array<i64: 1, 2, 16>}, {transform_indices = @transform_2, window_bounds = array<i64: 1, 2, 2>}, {pipeline_mode = #tpu.pipeline_mode<synchronous>, transform_indices = @transform_3, window_bounds = array<i64: 32, 48>}, {pipeline_mode = #tpu.pipeline_mode<synchronous>, transform_indices = @transform_4, window_bounds = array<i64: 16, 48>}, {pipeline_mode = #tpu.pipeline_mode<synchronous>, transform_indices = @transform_5, window_bounds = array<i64: 1, 48>}, {pipeline_mode = #tpu.pipeline_mode<synchronous>, transform_indices = @transform_6, window_bounds = array<i64: 1, 48>}, {pipeline_mode = #tpu.pipeline_mode<synchronous>, transform_indices = @transform_7, window_bounds = array<i64: 32, 48>}, {pipeline_mode = #tpu.pipeline_mode<synchronous>, transform_indices = @transform_8, window_bounds = array<i64: 16, 48>}, {pipeline_mode = #tpu.pipeline_mode<synchronous>, transform_indices = @transform_9, window_bounds = array<i64: 1, 48>}, {pipeline_mode = #tpu.pipeline_mode<synchronous>, transform_indices = @transform_10, window_bounds = array<i64: 1, 48>}, {pipeline_mode = #tpu.pipeline_mode<synchronous>, transform_indices = @transform_11, window_bounds = array<i64: 32, 48>}, {pipeline_mode = #tpu.pipeline_mode<synchronous>, transform_indices = @transform_12, window_bounds = array<i64: 16, 48>}, {pipeline_mode = #tpu.pipeline_mode<synchronous>, transform_indices = @transform_13, window_bounds = array<i64: 1, 48>}, {pipeline_mode = #tpu.pipeline_mode<synchronous>, transform_indices = @transform_14, window_bounds = array<i64: 1, 48>}, {pipeline_mode = #tpu.pipeline_mode<synchronous>, transform_indices = @transform_15, window_bounds = array<i64: 32, 48>}, {pipeline_mode = #tpu.pipeline_mode<synchronous>, transform_indices = @transform_16, window_bounds = array<i64: 16, 48>}, {pipeline_mode = #tpu.pipeline_mode<synchronous>, transform_indices = @transform_17, window_bounds = array<i64: 1, 48>}, {pipeline_mode = #tpu.pipeline_mode<synchronous>, transform_indices = @transform_18, window_bounds = array<i64: 1, 48>}, {pipeline_mode = #tpu.pipeline_mode<synchronous>, transform_indices = @transform_19, window_bounds = array<i64: 16, 48>}, {pipeline_mode = #tpu.pipeline_mode<synchronous>, transform_indices = @transform_20, window_bounds = array<i64: 16, 48>}, {pipeline_mode = #tpu.pipeline_mode<synchronous>, transform_indices = @transform_21, window_bounds = array<i64: 1, 48>}, {pipeline_mode = #tpu.pipeline_mode<synchronous>, transform_indices = @transform_22, window_bounds = array<i64: 1, 48>}, {pipeline_mode = #tpu.pipeline_mode<synchronous>, transform_indices = @transform_23, window_bounds = array<i64: 16, 48>}, {pipeline_mode = #tpu.pipeline_mode<synchronous>, transform_indices = @transform_24, window_bounds = array<i64: 16, 48>}, {pipeline_mode = #tpu.pipeline_mode<synchronous>, transform_indices = @transform_25, window_bounds = array<i64: 1, 48>}, {pipeline_mode = #tpu.pipeline_mode<synchronous>, transform_indices = @transform_26, window_bounds = array<i64: 1, 48>}, {pipeline_mode = #tpu.pipeline_mode<synchronous>, transform_indices = @transform_27, window_bounds = array<i64: 1, 16>}, {pipeline_mode = #tpu.pipeline_mode<synchronous>, transform_indices = @transform_28, window_bounds = array<i64: 1, 16>}, {pipeline_mode = #tpu.pipeline_mode<synchronous>, transform_indices = @transform_29, window_bounds = array<i64: 1, 16>}, {pipeline_mode = #tpu.pipeline_mode<synchronous>, transform_indices = @transform_30, window_bounds = array<i64: 1, 16>}, {pipeline_mode = #tpu.pipeline_mode<synchronous>, transform_indices = @transform_31, window_bounds = array<i64: 16, 1>}, {pipeline_mode = #tpu.pipeline_mode<synchronous>, transform_indices = @transform_32, window_bounds = array<i64: 1, 1>}, {pipeline_mode = #tpu.pipeline_mode<synchronous>, transform_indices = @transform_33, window_bounds = array<i64: 16, 1>}, {pipeline_mode = #tpu.pipeline_mode<synchronous>, transform_indices = @transform_34, window_bounds = array<i64: 1, 1>}, {pipeline_mode = #tpu.pipeline_mode<synchronous>, transform_indices = @transform_35, window_bounds = array<i64: 32, 16>}, {pipeline_mode = #tpu.pipeline_mode<synchronous>, transform_indices = @transform_36, window_bounds = array<i64: 1, 16>}, {pipeline_mode = #tpu.pipeline_mode<synchronous>, transform_indices = @transform_37, window_bounds = array<i64: 32, 16>}, {pipeline_mode = #tpu.pipeline_mode<synchronous>, transform_indices = @transform_38, window_bounds = array<i64: 1, 16>}, {transform_indices = @transform_39, window_bounds = array<i64: 1, 2, 16>}, {transform_indices = @transform_40, window_bounds = array<i64: 1, 2, 16>}, {transform_indices = @transform_41, window_bounds = array<i64: 1, 8, 2>}]} {
    %c0_i32 = arith.constant 0 : i32
    %0 = arith.cmpi eq, %arg0, %c0_i32 : i32
    %1 = arith.extui %0 : i1 to i32
    %c0_i32_0 = arith.constant 0 : i32
    %2 = arith.cmpi ne, %1, %c0_i32_0 : i32
    scf.if %2 {
      %cst_205 = arith.constant 0.000000e+00 : f32
      %489 = vector.broadcast %cst_205 : f32 to vector<8x2x16xf32>
      %c0_206 = arith.constant 0 : index
      %c0_207 = arith.constant 0 : index
      %c0_208 = arith.constant 0 : index
      %490 = vector.load %arg43[%c0_206, %c0_207, %c0_208] : memref<8x2x16xf32, #tpu.memory_space<vmem>>, vector<8x2x16xf32>
      tpu.vector_store %arg43[%c0_206, %c0_207, %c0_208], %489 {strides = array<i32>} : memref<8x2x16xf32, #tpu.memory_space<vmem>>, vector<8x2x16xf32>,
      %cst_209 = arith.constant 0.000000e+00 : f32
      %491 = vector.broadcast %cst_209 : f32 to vector<8x2x16xf32>
      %c0_210 = arith.constant 0 : index
      %c0_211 = arith.constant 0 : index
      %c0_212 = arith.constant 0 : index
      %492 = vector.load %arg44[%c0_210, %c0_211, %c0_212] : memref<8x2x16xf32, #tpu.memory_space<vmem>>, vector<8x2x16xf32>
      tpu.vector_store %arg44[%c0_210, %c0_211, %c0_212], %491 {strides = array<i32>} : memref<8x2x16xf32, #tpu.memory_space<vmem>>, vector<8x2x16xf32>,
      %cst_213 = arith.constant 0.000000e+00 : f32
      %493 = vector.broadcast %cst_213 : f32 to vector<2x2x16xf32>
      %c0_214 = arith.constant 0 : index
      %c0_215 = arith.constant 0 : index
      %c0_216 = arith.constant 0 : index
      %494 = vector.load %arg45[%c0_214, %c0_215, %c0_216] : memref<2x2x16xf32, #tpu.memory_space<vmem>>, vector<2x2x16xf32>
      tpu.vector_store %arg45[%c0_214, %c0_215, %c0_216], %493 {strides = array<i32>} : memref<2x2x16xf32, #tpu.memory_space<vmem>>, vector<2x2x16xf32>,
      %cst_217 = arith.constant 0.000000e+00 : f32
      %495 = vector.broadcast %cst_217 : f32 to vector<2x2x16xf32>
      %c0_218 = arith.constant 0 : index
      %c0_219 = arith.constant 0 : index
      %c0_220 = arith.constant 0 : index
      %496 = vector.load %arg46[%c0_218, %c0_219, %c0_220] : memref<2x2x16xf32, #tpu.memory_space<vmem>>, vector<2x2x16xf32>
      tpu.vector_store %arg46[%c0_218, %c0_219, %c0_220], %495 {strides = array<i32>} : memref<2x2x16xf32, #tpu.memory_space<vmem>>, vector<2x2x16xf32>,
      %cst_221 = arith.constant 0.000000e+00 : f32
      %497 = vector.broadcast %cst_221 : f32 to vector<2x16xf32>
      %c0_222 = arith.constant 0 : index
      %c0_223 = arith.constant 0 : index
      %498 = vector.load %arg47[%c0_222, %c0_223] : memref<2x16xf32, #tpu.memory_space<vmem>>, vector<2x16xf32>
      tpu.vector_store %arg47[%c0_222, %c0_223], %497 {strides = array<i32>} : memref<2x16xf32, #tpu.memory_space<vmem>>, vector<2x16xf32>,
      %cst_224 = arith.constant 0.000000e+00 : f32
      %499 = vector.broadcast %cst_224 : f32 to vector<2x16xf32>
      %c0_225 = arith.constant 0 : index
      %c0_226 = arith.constant 0 : index
      %500 = vector.load %arg48[%c0_225, %c0_226] : memref<2x16xf32, #tpu.memory_space<vmem>>, vector<2x16xf32>
      tpu.vector_store %arg48[%c0_225, %c0_226], %499 {strides = array<i32>} : memref<2x16xf32, #tpu.memory_space<vmem>>, vector<2x16xf32>,
    } else {
    }
    %c0 = arith.constant 0 : index
    %c0_1 = arith.constant 0 : index
    %c0_2 = arith.constant 0 : index
    %3 = vector.load %arg1[%c0, %c0_1, %c0_2] : memref<1x2x16xf32, #tpu.memory_space<vmem>>, vector<1x2x16xf32>
    %4 = vector.shape_cast %3 : vector<1x2x16xf32> to vector<2x16xf32>
    %c0_3 = arith.constant 0 : index
    %c0_4 = arith.constant 0 : index
    %c0_5 = arith.constant 0 : index
    %5 = vector.load %arg2[%c0_3, %c0_4, %c0_5] : memref<1x2x16xf32, #tpu.memory_space<vmem>>, vector<1x2x16xf32>
    %6 = vector.shape_cast %5 : vector<1x2x16xf32> to vector<2x16xf32>
    %c0_6 = arith.constant 0 : index
    %c0_7 = arith.constant 0 : index
    %c0_8 = arith.constant 0 : index
    %7 = vector.load %arg3[%c0_6, %c0_7, %c0_8] : memref<1x2x2xf32, #tpu.memory_space<vmem>>, vector<1x2x2xf32>
    %8 = vector.shape_cast %7 : vector<1x2x2xf32> to vector<2x2xf32>
    %9 = vector.shape_cast %8 : vector<2x2xf32> to vector<2x2x1xf32>
    %c0_9 = arith.constant 0 : index
    %c0_10 = arith.constant 0 : index
    %c0_11 = arith.constant 0 : index
    %10 = vector.load %arg45[%c0_9, %c0_10, %c0_11] : memref<2x2x16xf32, #tpu.memory_space<vmem>>, vector<2x2x16xf32>
    %c0_12 = arith.constant 0 : index
    %c0_13 = arith.constant 0 : index
    %c0_14 = arith.constant 0 : index
    %11 = vector.load %arg46[%c0_12, %c0_13, %c0_14] : memref<2x2x16xf32, #tpu.memory_space<vmem>>, vector<2x2x16xf32>
    %12 = vector.broadcast %9 : vector<2x2x1xf32> to vector<2x2x16xf32>
    %13 = arith.mulf %12, %10 : vector<2x2x16xf32>
    %cst = arith.constant dense<0.000000e+00> : vector<2x16xf32>
    %14 = vector.multi_reduction <add>, %13, %cst [1] : vector<2x2x16xf32> to vector<2x16xf32>
    %15 = vector.broadcast %9 : vector<2x2x1xf32> to vector<2x2x16xf32>
    %16 = arith.mulf %15, %11 : vector<2x2x16xf32>
    %cst_15 = arith.constant dense<0.000000e+00> : vector<2x16xf32>
    %17 = vector.multi_reduction <add>, %16, %cst_15 [1] : vector<2x2x16xf32> to vector<2x16xf32>
    %c1_i32 = arith.constant 1 : i32
    %18 = arith.subi %arg0, %c1_i32 : i32
    %c0_i32_16 = arith.constant 0 : i32
    %19 = arith.maxsi %18, %c0_i32_16 : i32
    %20 = arith.index_cast %19 : i32 to index
    %c0_17 = arith.constant 0 : index
    %c0_18 = arith.constant 0 : index
    %21 = vector.load %arg43[%20, %c0_17, %c0_18] : memref<8x2x16xf32, #tpu.memory_space<vmem>>, vector<1x2x16xf32>
    %22 = vector.shape_cast %21 : vector<1x2x16xf32> to vector<2x16xf32>
    %23 = arith.index_cast %19 : i32 to index
    %c0_19 = arith.constant 0 : index
    %c0_20 = arith.constant 0 : index
    %24 = vector.load %arg44[%23, %c0_19, %c0_20] : memref<8x2x16xf32, #tpu.memory_space<vmem>>, vector<1x2x16xf32>
    %25 = vector.shape_cast %24 : vector<1x2x16xf32> to vector<2x16xf32>
    %c0_21 = arith.constant 0 : index
    %c0_22 = arith.constant 0 : index
    %26 = vector.load %arg4[%c0_21, %c0_22] : memref<32x48xf32, #tpu.memory_space<vmem>>, vector<32x48xf32>
    %27 = vector.extract_strided_slice %26 {offsets = [0, 0], sizes = [16, 48], strides = [1, 1]} : vector<32x48xf32> to vector<16x48xf32>
    %cst_23 = arith.constant dense<0.000000e+00> : vector<2x48xf32>
    %28 = tpu.matmul %4, %27, %cst_23 {dimension_numbers = #tpu.dot_dimension_numbers<[1], [0], [0], [1], [0, 0, 1, 1], [], []>} : vector<2x16xf32>, vector<16x48xf32>, vector<2x48xf32> -> vector<2x48xf32>
    %29 = vector.extract_strided_slice %26 {offsets = [16, 0], sizes = [16, 48], strides = [1, 1]} : vector<32x48xf32> to vector<16x48xf32>
    %cst_24 = arith.constant dense<0.000000e+00> : vector<2x48xf32>
    %30 = tpu.matmul %14, %29, %cst_24 {dimension_numbers = #tpu.dot_dimension_numbers<[1], [0], [0], [1], [0, 0, 1, 1], [], []>} : vector<2x16xf32>, vector<16x48xf32>, vector<2x48xf32> -> vector<2x48xf32>
    %31 = arith.addf %28, %30 : vector<2x48xf32>
    %c0_25 = arith.constant 0 : index
    %c0_26 = arith.constant 0 : index
    %32 = vector.load %arg6[%c0_25, %c0_26] : memref<1x48xf32, #tpu.memory_space<vmem>>, vector<1x48xf32>
    %33 = vector.broadcast %32 : vector<1x48xf32> to vector<2x48xf32>
    %34 = arith.addf %31, %33 : vector<2x48xf32>
    %c0_27 = arith.constant 0 : index
    %c0_28 = arith.constant 0 : index
    %35 = vector.load %arg5[%c0_27, %c0_28] : memref<16x48xf32, #tpu.memory_space<vmem>>, vector<16x48xf32>
    %cst_29 = arith.constant dense<0.000000e+00> : vector<2x48xf32>
    %36 = tpu.matmul %22, %35, %cst_29 {dimension_numbers = #tpu.dot_dimension_numbers<[1], [0], [0], [1], [0, 0, 1, 1], [], []>} : vector<2x16xf32>, vector<16x48xf32>, vector<2x48xf32> -> vector<2x48xf32>
    %c0_30 = arith.constant 0 : index
    %c0_31 = arith.constant 0 : index
    %37 = vector.load %arg7[%c0_30, %c0_31] : memref<1x48xf32, #tpu.memory_space<vmem>>, vector<1x48xf32>
    %38 = vector.broadcast %37 : vector<1x48xf32> to vector<2x48xf32>
    %39 = arith.addf %36, %38 : vector<2x48xf32>
    %40 = vector.extract_strided_slice %34 {offsets = [0, 0], sizes = [2, 16], strides = [1, 1]} : vector<2x48xf32> to vector<2x16xf32>
    %41 = vector.extract_strided_slice %39 {offsets = [0, 0], sizes = [2, 16], strides = [1, 1]} : vector<2x48xf32> to vector<2x16xf32>
    %42 = arith.addf %40, %41 : vector<2x16xf32>
    %43 = arith.negf %42 : vector<2x16xf32>
    %44 = math.exp %43 : vector<2x16xf32>
    %cst_32 = arith.constant 1.000000e+00 : f32
    %45 = vector.broadcast %cst_32 : f32 to vector<2x16xf32>
    %46 = arith.addf %45, %44 : vector<2x16xf32>
    %47 = arith.divf %45, %46 : vector<2x16xf32>
    %48 = vector.extract_strided_slice %34 {offsets = [0, 16], sizes = [2, 16], strides = [1, 1]} : vector<2x48xf32> to vector<2x16xf32>
    %49 = vector.extract_strided_slice %39 {offsets = [0, 16], sizes = [2, 16], strides = [1, 1]} : vector<2x48xf32> to vector<2x16xf32>
    %50 = arith.addf %48, %49 : vector<2x16xf32>
    %51 = arith.negf %50 : vector<2x16xf32>
    %52 = math.exp %51 : vector<2x16xf32>
    %cst_33 = arith.constant 1.000000e+00 : f32
    %53 = vector.broadcast %cst_33 : f32 to vector<2x16xf32>
    %54 = arith.addf %53, %52 : vector<2x16xf32>
    %55 = arith.divf %53, %54 : vector<2x16xf32>
    %56 = vector.extract_strided_slice %34 {offsets = [0, 32], sizes = [2, 16], strides = [1, 1]} : vector<2x48xf32> to vector<2x16xf32>
    %57 = vector.extract_strided_slice %39 {offsets = [0, 32], sizes = [2, 16], strides = [1, 1]} : vector<2x48xf32> to vector<2x16xf32>
    %58 = arith.mulf %47, %57 : vector<2x16xf32>
    %59 = arith.addf %56, %58 : vector<2x16xf32>
    %60 = math.tanh %59 : vector<2x16xf32>
    %cst_34 = arith.constant 1.000000e+00 : f32
    %61 = vector.broadcast %cst_34 : f32 to vector<2x16xf32>
    %62 = arith.subf %61, %55 : vector<2x16xf32>
    %63 = arith.mulf %62, %60 : vector<2x16xf32>
    %64 = arith.mulf %55, %22 : vector<2x16xf32>
    %65 = arith.addf %63, %64 : vector<2x16xf32>
    %c0_35 = arith.constant 0 : index
    %c0_36 = arith.constant 0 : index
    %66 = vector.load %arg8[%c0_35, %c0_36] : memref<32x48xf32, #tpu.memory_space<vmem>>, vector<32x48xf32>
    %67 = vector.extract_strided_slice %66 {offsets = [0, 0], sizes = [16, 48], strides = [1, 1]} : vector<32x48xf32> to vector<16x48xf32>
    %cst_37 = arith.constant dense<0.000000e+00> : vector<2x48xf32>
    %68 = tpu.matmul %6, %67, %cst_37 {dimension_numbers = #tpu.dot_dimension_numbers<[1], [0], [0], [1], [0, 0, 1, 1], [], []>} : vector<2x16xf32>, vector<16x48xf32>, vector<2x48xf32> -> vector<2x48xf32>
    %69 = vector.extract_strided_slice %66 {offsets = [16, 0], sizes = [16, 48], strides = [1, 1]} : vector<32x48xf32> to vector<16x48xf32>
    %cst_38 = arith.constant dense<0.000000e+00> : vector<2x48xf32>
    %70 = tpu.matmul %17, %69, %cst_38 {dimension_numbers = #tpu.dot_dimension_numbers<[1], [0], [0], [1], [0, 0, 1, 1], [], []>} : vector<2x16xf32>, vector<16x48xf32>, vector<2x48xf32> -> vector<2x48xf32>
    %71 = arith.addf %68, %70 : vector<2x48xf32>
    %c0_39 = arith.constant 0 : index
    %c0_40 = arith.constant 0 : index
    %72 = vector.load %arg10[%c0_39, %c0_40] : memref<1x48xf32, #tpu.memory_space<vmem>>, vector<1x48xf32>
    %73 = vector.broadcast %72 : vector<1x48xf32> to vector<2x48xf32>
    %74 = arith.addf %71, %73 : vector<2x48xf32>
    %c0_41 = arith.constant 0 : index
    %c0_42 = arith.constant 0 : index
    %75 = vector.load %arg9[%c0_41, %c0_42] : memref<16x48xf32, #tpu.memory_space<vmem>>, vector<16x48xf32>
    %cst_43 = arith.constant dense<0.000000e+00> : vector<2x48xf32>
    %76 = tpu.matmul %25, %75, %cst_43 {dimension_numbers = #tpu.dot_dimension_numbers<[1], [0], [0], [1], [0, 0, 1, 1], [], []>} : vector<2x16xf32>, vector<16x48xf32>, vector<2x48xf32> -> vector<2x48xf32>
    %c0_44 = arith.constant 0 : index
    %c0_45 = arith.constant 0 : index
    %77 = vector.load %arg11[%c0_44, %c0_45] : memref<1x48xf32, #tpu.memory_space<vmem>>, vector<1x48xf32>
    %78 = vector.broadcast %77 : vector<1x48xf32> to vector<2x48xf32>
    %79 = arith.addf %76, %78 : vector<2x48xf32>
    %80 = vector.extract_strided_slice %74 {offsets = [0, 0], sizes = [2, 16], strides = [1, 1]} : vector<2x48xf32> to vector<2x16xf32>
    %81 = vector.extract_strided_slice %79 {offsets = [0, 0], sizes = [2, 16], strides = [1, 1]} : vector<2x48xf32> to vector<2x16xf32>
    %82 = arith.addf %80, %81 : vector<2x16xf32>
    %83 = arith.negf %82 : vector<2x16xf32>
    %84 = math.exp %83 : vector<2x16xf32>
    %cst_46 = arith.constant 1.000000e+00 : f32
    %85 = vector.broadcast %cst_46 : f32 to vector<2x16xf32>
    %86 = arith.addf %85, %84 : vector<2x16xf32>
    %87 = arith.divf %85, %86 : vector<2x16xf32>
    %88 = vector.extract_strided_slice %74 {offsets = [0, 16], sizes = [2, 16], strides = [1, 1]} : vector<2x48xf32> to vector<2x16xf32>
    %89 = vector.extract_strided_slice %79 {offsets = [0, 16], sizes = [2, 16], strides = [1, 1]} : vector<2x48xf32> to vector<2x16xf32>
    %90 = arith.addf %88, %89 : vector<2x16xf32>
    %91 = arith.negf %90 : vector<2x16xf32>
    %92 = math.exp %91 : vector<2x16xf32>
    %cst_47 = arith.constant 1.000000e+00 : f32
    %93 = vector.broadcast %cst_47 : f32 to vector<2x16xf32>
    %94 = arith.addf %93, %92 : vector<2x16xf32>
    %95 = arith.divf %93, %94 : vector<2x16xf32>
    %96 = vector.extract_strided_slice %74 {offsets = [0, 32], sizes = [2, 16], strides = [1, 1]} : vector<2x48xf32> to vector<2x16xf32>
    %97 = vector.extract_strided_slice %79 {offsets = [0, 32], sizes = [2, 16], strides = [1, 1]} : vector<2x48xf32> to vector<2x16xf32>
    %98 = arith.mulf %87, %97 : vector<2x16xf32>
    %99 = arith.addf %96, %98 : vector<2x16xf32>
    %100 = math.tanh %99 : vector<2x16xf32>
    %cst_48 = arith.constant 1.000000e+00 : f32
    %101 = vector.broadcast %cst_48 : f32 to vector<2x16xf32>
    %102 = arith.subf %101, %95 : vector<2x16xf32>
    %103 = arith.mulf %102, %100 : vector<2x16xf32>
    %104 = arith.mulf %95, %25 : vector<2x16xf32>
    %105 = arith.addf %103, %104 : vector<2x16xf32>
    %c0_49 = arith.constant 0 : index
    %c0_50 = arith.constant 0 : index
    %c0_51 = arith.constant 0 : index
    %106 = vector.load %arg43[%c0_49, %c0_50, %c0_51] : memref<8x2x16xf32, #tpu.memory_space<vmem>>, vector<8x2x16xf32>
    %c0_52 = arith.constant 0 : index
    %c0_53 = arith.constant 0 : index
    %c0_54 = arith.constant 0 : index
    %107 = vector.load %arg44[%c0_52, %c0_53, %c0_54] : memref<8x2x16xf32, #tpu.memory_space<vmem>>, vector<8x2x16xf32>
    %108 = tpu.iota {dimensions = array<i32: 0>} : vector<8x2xi32>
    %109 = vector.broadcast %arg0 : i32 to vector<8x2xi32>
    %110 = arith.cmpi slt, %108, %109 : vector<8x2xi32>
    %111 = arith.extui %110 : vector<8x2xi1> to vector<8x2xi32>
    %112 = arith.sitofp %111 : vector<8x2xi32> to vector<8x2xf32>
    %c0_55 = arith.constant 0 : index
    %c0_56 = arith.constant 0 : index
    %113 = vector.load %arg28[%c0_55, %c0_56] : memref<1x16xf32, #tpu.memory_space<vmem>>, vector<1x16xf32>
    %114 = vector.shape_cast %113 : vector<1x16xf32> to vector<1x1x16xf32>
    %115 = vector.broadcast %114 : vector<1x1x16xf32> to vector<8x2x16xf32>
    %116 = arith.mulf %106, %115 : vector<8x2x16xf32>
    %cst_57 = arith.constant dense<0.000000e+00> : vector<8x2xf32>
    %117 = vector.multi_reduction <add>, %116, %cst_57 [2] : vector<8x2x16xf32> to vector<8x2xf32>
    %cst_58 = arith.constant -1.000000e+09 : f32
    %118 = vector.broadcast %cst_58 : f32 to vector<8x2xf32>
    %119 = arith.select %110, %117, %118 : vector<8x2xi1>, vector<8x2xf32>
    %cst_59 = arith.constant dense<0xFF800000> : vector<2xf32>
    %120 = vector.multi_reduction <maximumf>, %119, %cst_59 [0] : vector<8x2xf32> to vector<2xf32>
    %121 = vector.shape_cast %120 : vector<2xf32> to vector<1x2xf32>
    %122 = vector.broadcast %121 : vector<1x2xf32> to vector<8x2xf32>
    %123 = arith.subf %119, %122 : vector<8x2xf32>
    %124 = math.exp %123 : vector<8x2xf32>
    %125 = arith.mulf %124, %112 : vector<8x2xf32>
    %cst_60 = arith.constant dense<0.000000e+00> : vector<2xf32>
    %126 = vector.multi_reduction <add>, %125, %cst_60 [0] : vector<8x2xf32> to vector<2xf32>
    %127 = vector.shape_cast %126 : vector<2xf32> to vector<1x2xf32>
    %cst_61 = arith.constant 9.99999968E-21 : f32
    %128 = vector.broadcast %cst_61 : f32 to vector<1x2xf32>
    %129 = arith.maximumf %127, %128 : vector<1x2xf32>
    %130 = vector.broadcast %129 : vector<1x2xf32> to vector<8x2xf32>
    %131 = arith.divf %125, %130 : vector<8x2xf32>
    %132 = vector.shape_cast %131 : vector<8x2xf32> to vector<8x2x1xf32>
    %133 = vector.broadcast %132 : vector<8x2x1xf32> to vector<8x2x16xf32>
    %134 = arith.mulf %133, %106 : vector<8x2x16xf32>
    %cst_62 = arith.constant dense<0.000000e+00> : vector<2x16xf32>
    %135 = vector.multi_reduction <add>, %134, %cst_62 [0] : vector<8x2x16xf32> to vector<2x16xf32>
    %c0_63 = arith.constant 0 : index
    %c0_64 = arith.constant 0 : index
    %136 = vector.load %arg29[%c0_63, %c0_64] : memref<1x16xf32, #tpu.memory_space<vmem>>, vector<1x16xf32>
    %137 = vector.shape_cast %136 : vector<1x16xf32> to vector<1x1x16xf32>
    %138 = vector.broadcast %137 : vector<1x1x16xf32> to vector<8x2x16xf32>
    %139 = arith.mulf %106, %138 : vector<8x2x16xf32>
    %cst_65 = arith.constant dense<0.000000e+00> : vector<8x2xf32>
    %140 = vector.multi_reduction <add>, %139, %cst_65 [2] : vector<8x2x16xf32> to vector<8x2xf32>
    %cst_66 = arith.constant -1.000000e+09 : f32
    %141 = vector.broadcast %cst_66 : f32 to vector<8x2xf32>
    %142 = arith.select %110, %140, %141 : vector<8x2xi1>, vector<8x2xf32>
    %cst_67 = arith.constant dense<0xFF800000> : vector<2xf32>
    %143 = vector.multi_reduction <maximumf>, %142, %cst_67 [0] : vector<8x2xf32> to vector<2xf32>
    %144 = vector.shape_cast %143 : vector<2xf32> to vector<1x2xf32>
    %145 = vector.broadcast %144 : vector<1x2xf32> to vector<8x2xf32>
    %146 = arith.subf %142, %145 : vector<8x2xf32>
    %147 = math.exp %146 : vector<8x2xf32>
    %148 = arith.mulf %147, %112 : vector<8x2xf32>
    %cst_68 = arith.constant dense<0.000000e+00> : vector<2xf32>
    %149 = vector.multi_reduction <add>, %148, %cst_68 [0] : vector<8x2xf32> to vector<2xf32>
    %150 = vector.shape_cast %149 : vector<2xf32> to vector<1x2xf32>
    %cst_69 = arith.constant 9.99999968E-21 : f32
    %151 = vector.broadcast %cst_69 : f32 to vector<1x2xf32>
    %152 = arith.maximumf %150, %151 : vector<1x2xf32>
    %153 = vector.broadcast %152 : vector<1x2xf32> to vector<8x2xf32>
    %154 = arith.divf %148, %153 : vector<8x2xf32>
    %155 = vector.shape_cast %154 : vector<8x2xf32> to vector<8x2x1xf32>
    %156 = vector.broadcast %155 : vector<8x2x1xf32> to vector<8x2x16xf32>
    %157 = arith.mulf %156, %106 : vector<8x2x16xf32>
    %cst_70 = arith.constant dense<0.000000e+00> : vector<2x16xf32>
    %158 = vector.multi_reduction <add>, %157, %cst_70 [0] : vector<8x2x16xf32> to vector<2x16xf32>
    %c0_71 = arith.constant 0 : index
    %c0_72 = arith.constant 0 : index
    %159 = vector.load %arg30[%c0_71, %c0_72] : memref<1x16xf32, #tpu.memory_space<vmem>>, vector<1x16xf32>
    %160 = vector.shape_cast %159 : vector<1x16xf32> to vector<1x1x16xf32>
    %161 = vector.broadcast %160 : vector<1x1x16xf32> to vector<8x2x16xf32>
    %162 = arith.mulf %107, %161 : vector<8x2x16xf32>
    %cst_73 = arith.constant dense<0.000000e+00> : vector<8x2xf32>
    %163 = vector.multi_reduction <add>, %162, %cst_73 [2] : vector<8x2x16xf32> to vector<8x2xf32>
    %cst_74 = arith.constant -1.000000e+09 : f32
    %164 = vector.broadcast %cst_74 : f32 to vector<8x2xf32>
    %165 = arith.select %110, %163, %164 : vector<8x2xi1>, vector<8x2xf32>
    %cst_75 = arith.constant dense<0xFF800000> : vector<2xf32>
    %166 = vector.multi_reduction <maximumf>, %165, %cst_75 [0] : vector<8x2xf32> to vector<2xf32>
    %167 = vector.shape_cast %166 : vector<2xf32> to vector<1x2xf32>
    %168 = vector.broadcast %167 : vector<1x2xf32> to vector<8x2xf32>
    %169 = arith.subf %165, %168 : vector<8x2xf32>
    %170 = math.exp %169 : vector<8x2xf32>
    %171 = arith.mulf %170, %112 : vector<8x2xf32>
    %cst_76 = arith.constant dense<0.000000e+00> : vector<2xf32>
    %172 = vector.multi_reduction <add>, %171, %cst_76 [0] : vector<8x2xf32> to vector<2xf32>
    %173 = vector.shape_cast %172 : vector<2xf32> to vector<1x2xf32>
    %cst_77 = arith.constant 9.99999968E-21 : f32
    %174 = vector.broadcast %cst_77 : f32 to vector<1x2xf32>
    %175 = arith.maximumf %173, %174 : vector<1x2xf32>
    %176 = vector.broadcast %175 : vector<1x2xf32> to vector<8x2xf32>
    %177 = arith.divf %171, %176 : vector<8x2xf32>
    %178 = vector.shape_cast %177 : vector<8x2xf32> to vector<8x2x1xf32>
    %179 = vector.broadcast %178 : vector<8x2x1xf32> to vector<8x2x16xf32>
    %180 = arith.mulf %179, %107 : vector<8x2x16xf32>
    %cst_78 = arith.constant dense<0.000000e+00> : vector<2x16xf32>
    %181 = vector.multi_reduction <add>, %180, %cst_78 [0] : vector<8x2x16xf32> to vector<2x16xf32>
    %c0_79 = arith.constant 0 : index
    %c0_80 = arith.constant 0 : index
    %182 = vector.load %arg31[%c0_79, %c0_80] : memref<1x16xf32, #tpu.memory_space<vmem>>, vector<1x16xf32>
    %183 = vector.shape_cast %182 : vector<1x16xf32> to vector<1x1x16xf32>
    %184 = vector.broadcast %183 : vector<1x1x16xf32> to vector<8x2x16xf32>
    %185 = arith.mulf %107, %184 : vector<8x2x16xf32>
    %cst_81 = arith.constant dense<0.000000e+00> : vector<8x2xf32>
    %186 = vector.multi_reduction <add>, %185, %cst_81 [2] : vector<8x2x16xf32> to vector<8x2xf32>
    %cst_82 = arith.constant -1.000000e+09 : f32
    %187 = vector.broadcast %cst_82 : f32 to vector<8x2xf32>
    %188 = arith.select %110, %186, %187 : vector<8x2xi1>, vector<8x2xf32>
    %cst_83 = arith.constant dense<0xFF800000> : vector<2xf32>
    %189 = vector.multi_reduction <maximumf>, %188, %cst_83 [0] : vector<8x2xf32> to vector<2xf32>
    %190 = vector.shape_cast %189 : vector<2xf32> to vector<1x2xf32>
    %191 = vector.broadcast %190 : vector<1x2xf32> to vector<8x2xf32>
    %192 = arith.subf %188, %191 : vector<8x2xf32>
    %193 = math.exp %192 : vector<8x2xf32>
    %194 = arith.mulf %193, %112 : vector<8x2xf32>
    %cst_84 = arith.constant dense<0.000000e+00> : vector<2xf32>
    %195 = vector.multi_reduction <add>, %194, %cst_84 [0] : vector<8x2xf32> to vector<2xf32>
    %196 = vector.shape_cast %195 : vector<2xf32> to vector<1x2xf32>
    %cst_85 = arith.constant 9.99999968E-21 : f32
    %197 = vector.broadcast %cst_85 : f32 to vector<1x2xf32>
    %198 = arith.maximumf %196, %197 : vector<1x2xf32>
    %199 = vector.broadcast %198 : vector<1x2xf32> to vector<8x2xf32>
    %200 = arith.divf %194, %199 : vector<8x2xf32>
    %201 = vector.shape_cast %200 : vector<8x2xf32> to vector<8x2x1xf32>
    %202 = vector.broadcast %201 : vector<8x2x1xf32> to vector<8x2x16xf32>
    %203 = arith.mulf %202, %107 : vector<8x2x16xf32>
    %cst_86 = arith.constant dense<0.000000e+00> : vector<2x16xf32>
    %204 = vector.multi_reduction <add>, %203, %cst_86 [0] : vector<8x2x16xf32> to vector<2x16xf32>
    %205 = arith.addf %131, %177 : vector<8x2xf32>
    %206 = arith.addf %205, %154 : vector<8x2xf32>
    %207 = arith.addf %206, %200 : vector<8x2xf32>
    %c0_i32_87 = arith.constant 0 : i32
    %208 = arith.cmpi sgt, %arg0, %c0_i32_87 : i32
    %cst_88 = arith.constant 1.000000e+00 : f32
    %cst_89 = arith.constant 0.000000e+00 : f32
    %209 = arith.select %208, %cst_88, %cst_89 : f32
    %c0_90 = arith.constant 0 : index
    %c0_91 = arith.constant 0 : index
    %210 = vector.load %arg32[%c0_90, %c0_91] : memref<16x1xf32, #tpu.memory_space<vmem>>, vector<16x1xf32>
    %c0_92 = arith.constant 0 : index
    %c0_93 = arith.constant 0 : index
    %211 = vector.load %arg33[%c0_92, %c0_93] : memref<1x1xf32, #tpu.memory_space<vmem>>, vector<1x1xf32>
    %cst_94 = arith.constant dense<0.000000e+00> : vector<2x1xf32>
    %212 = tpu.matmul %135, %210, %cst_94 {dimension_numbers = #tpu.dot_dimension_numbers<[1], [0], [0], [1], [0, 0, 1, 1], [], []>} : vector<2x16xf32>, vector<16x1xf32>, vector<2x1xf32> -> vector<2x1xf32>
    %213 = vector.broadcast %211 : vector<1x1xf32> to vector<2x1xf32>
    %214 = arith.addf %212, %213 : vector<2x1xf32>
    %cst_95 = arith.constant dense<0.000000e+00> : vector<2x1xf32>
    %215 = tpu.matmul %181, %210, %cst_95 {dimension_numbers = #tpu.dot_dimension_numbers<[1], [0], [0], [1], [0, 0, 1, 1], [], []>} : vector<2x16xf32>, vector<16x1xf32>, vector<2x1xf32> -> vector<2x1xf32>
    %216 = vector.broadcast %211 : vector<1x1xf32> to vector<2x1xf32>
    %217 = arith.addf %215, %216 : vector<2x1xf32>
    %cst_96 = arith.constant dense<0xFF800000> : vector<1xf32>
    %218 = vector.multi_reduction <maximumf>, %214, %cst_96 [0] : vector<2x1xf32> to vector<1xf32>
    %219 = vector.shape_cast %218 : vector<1xf32> to vector<1x1xf32>
    %220 = vector.broadcast %219 : vector<1x1xf32> to vector<2x1xf32>
    %221 = arith.subf %214, %220 : vector<2x1xf32>
    %222 = math.exp %221 : vector<2x1xf32>
    %cst_97 = arith.constant dense<0.000000e+00> : vector<1xf32>
    %223 = vector.multi_reduction <add>, %222, %cst_97 [0] : vector<2x1xf32> to vector<1xf32>
    %224 = vector.shape_cast %223 : vector<1xf32> to vector<1x1xf32>
    %225 = vector.broadcast %224 : vector<1x1xf32> to vector<2x1xf32>
    %226 = arith.divf %222, %225 : vector<2x1xf32>
    %cst_98 = arith.constant dense<0xFF800000> : vector<1xf32>
    %227 = vector.multi_reduction <maximumf>, %217, %cst_98 [0] : vector<2x1xf32> to vector<1xf32>
    %228 = vector.shape_cast %227 : vector<1xf32> to vector<1x1xf32>
    %229 = vector.broadcast %228 : vector<1x1xf32> to vector<2x1xf32>
    %230 = arith.subf %217, %229 : vector<2x1xf32>
    %231 = math.exp %230 : vector<2x1xf32>
    %cst_99 = arith.constant dense<0.000000e+00> : vector<1xf32>
    %232 = vector.multi_reduction <add>, %231, %cst_99 [0] : vector<2x1xf32> to vector<1xf32>
    %233 = vector.shape_cast %232 : vector<1xf32> to vector<1x1xf32>
    %234 = vector.broadcast %233 : vector<1x1xf32> to vector<2x1xf32>
    %235 = arith.divf %231, %234 : vector<2x1xf32>
    %236 = vector.broadcast %226 : vector<2x1xf32> to vector<2x16xf32>
    %237 = arith.mulf %236, %135 : vector<2x16xf32>
    %238 = arith.addf %237, %135 : vector<2x16xf32>
    %239 = vector.broadcast %235 : vector<2x1xf32> to vector<2x16xf32>
    %240 = arith.mulf %239, %181 : vector<2x16xf32>
    %241 = arith.addf %240, %181 : vector<2x16xf32>
    %c0_100 = arith.constant 0 : index
    %c0_101 = arith.constant 0 : index
    %242 = vector.load %arg36[%c0_100, %c0_101] : memref<32x16xf32, #tpu.memory_space<vmem>>, vector<32x16xf32>
    %243 = vector.extract_strided_slice %242 {offsets = [0, 0], sizes = [16, 16], strides = [1, 1]} : vector<32x16xf32> to vector<16x16xf32>
    %cst_102 = arith.constant dense<0.000000e+00> : vector<2x16xf32>
    %244 = tpu.matmul %238, %243, %cst_102 {dimension_numbers = #tpu.dot_dimension_numbers<[1], [0], [0], [1], [0, 0, 1, 1], [], []>} : vector<2x16xf32>, vector<16x16xf32>, vector<2x16xf32> -> vector<2x16xf32>
    %245 = vector.extract_strided_slice %242 {offsets = [16, 0], sizes = [16, 16], strides = [1, 1]} : vector<32x16xf32> to vector<16x16xf32>
    %cst_103 = arith.constant dense<0.000000e+00> : vector<2x16xf32>
    %246 = tpu.matmul %241, %245, %cst_103 {dimension_numbers = #tpu.dot_dimension_numbers<[1], [0], [0], [1], [0, 0, 1, 1], [], []>} : vector<2x16xf32>, vector<16x16xf32>, vector<2x16xf32> -> vector<2x16xf32>
    %247 = arith.addf %244, %246 : vector<2x16xf32>
    %c0_104 = arith.constant 0 : index
    %c0_105 = arith.constant 0 : index
    %248 = vector.load %arg37[%c0_104, %c0_105] : memref<1x16xf32, #tpu.memory_space<vmem>>, vector<1x16xf32>
    %249 = vector.broadcast %248 : vector<1x16xf32> to vector<2x16xf32>
    %250 = arith.addf %247, %249 : vector<2x16xf32>
    %251 = vector.broadcast %209 : f32 to vector<2x16xf32>
    %252 = arith.mulf %251, %250 : vector<2x16xf32>
    %c0_106 = arith.constant 0 : index
    %c0_107 = arith.constant 0 : index
    %253 = vector.load %arg34[%c0_106, %c0_107] : memref<16x1xf32, #tpu.memory_space<vmem>>, vector<16x1xf32>
    %c0_108 = arith.constant 0 : index
    %c0_109 = arith.constant 0 : index
    %254 = vector.load %arg35[%c0_108, %c0_109] : memref<1x1xf32, #tpu.memory_space<vmem>>, vector<1x1xf32>
    %cst_110 = arith.constant dense<0.000000e+00> : vector<2x1xf32>
    %255 = tpu.matmul %204, %253, %cst_110 {dimension_numbers = #tpu.dot_dimension_numbers<[1], [0], [0], [1], [0, 0, 1, 1], [], []>} : vector<2x16xf32>, vector<16x1xf32>, vector<2x1xf32> -> vector<2x1xf32>
    %256 = vector.broadcast %254 : vector<1x1xf32> to vector<2x1xf32>
    %257 = arith.addf %255, %256 : vector<2x1xf32>
    %cst_111 = arith.constant dense<0.000000e+00> : vector<2x1xf32>
    %258 = tpu.matmul %158, %253, %cst_111 {dimension_numbers = #tpu.dot_dimension_numbers<[1], [0], [0], [1], [0, 0, 1, 1], [], []>} : vector<2x16xf32>, vector<16x1xf32>, vector<2x1xf32> -> vector<2x1xf32>
    %259 = vector.broadcast %254 : vector<1x1xf32> to vector<2x1xf32>
    %260 = arith.addf %258, %259 : vector<2x1xf32>
    %cst_112 = arith.constant dense<0xFF800000> : vector<1xf32>
    %261 = vector.multi_reduction <maximumf>, %257, %cst_112 [0] : vector<2x1xf32> to vector<1xf32>
    %262 = vector.shape_cast %261 : vector<1xf32> to vector<1x1xf32>
    %263 = vector.broadcast %262 : vector<1x1xf32> to vector<2x1xf32>
    %264 = arith.subf %257, %263 : vector<2x1xf32>
    %265 = math.exp %264 : vector<2x1xf32>
    %cst_113 = arith.constant dense<0.000000e+00> : vector<1xf32>
    %266 = vector.multi_reduction <add>, %265, %cst_113 [0] : vector<2x1xf32> to vector<1xf32>
    %267 = vector.shape_cast %266 : vector<1xf32> to vector<1x1xf32>
    %268 = vector.broadcast %267 : vector<1x1xf32> to vector<2x1xf32>
    %269 = arith.divf %265, %268 : vector<2x1xf32>
    %cst_114 = arith.constant dense<0xFF800000> : vector<1xf32>
    %270 = vector.multi_reduction <maximumf>, %260, %cst_114 [0] : vector<2x1xf32> to vector<1xf32>
    %271 = vector.shape_cast %270 : vector<1xf32> to vector<1x1xf32>
    %272 = vector.broadcast %271 : vector<1x1xf32> to vector<2x1xf32>
    %273 = arith.subf %260, %272 : vector<2x1xf32>
    %274 = math.exp %273 : vector<2x1xf32>
    %cst_115 = arith.constant dense<0.000000e+00> : vector<1xf32>
    %275 = vector.multi_reduction <add>, %274, %cst_115 [0] : vector<2x1xf32> to vector<1xf32>
    %276 = vector.shape_cast %275 : vector<1xf32> to vector<1x1xf32>
    %277 = vector.broadcast %276 : vector<1x1xf32> to vector<2x1xf32>
    %278 = arith.divf %274, %277 : vector<2x1xf32>
    %279 = vector.broadcast %269 : vector<2x1xf32> to vector<2x16xf32>
    %280 = arith.mulf %279, %204 : vector<2x16xf32>
    %281 = arith.addf %280, %204 : vector<2x16xf32>
    %282 = vector.broadcast %278 : vector<2x1xf32> to vector<2x16xf32>
    %283 = arith.mulf %282, %158 : vector<2x16xf32>
    %284 = arith.addf %283, %158 : vector<2x16xf32>
    %c0_116 = arith.constant 0 : index
    %c0_117 = arith.constant 0 : index
    %285 = vector.load %arg38[%c0_116, %c0_117] : memref<32x16xf32, #tpu.memory_space<vmem>>, vector<32x16xf32>
    %286 = vector.extract_strided_slice %285 {offsets = [0, 0], sizes = [16, 16], strides = [1, 1]} : vector<32x16xf32> to vector<16x16xf32>
    %cst_118 = arith.constant dense<0.000000e+00> : vector<2x16xf32>
    %287 = tpu.matmul %281, %286, %cst_118 {dimension_numbers = #tpu.dot_dimension_numbers<[1], [0], [0], [1], [0, 0, 1, 1], [], []>} : vector<2x16xf32>, vector<16x16xf32>, vector<2x16xf32> -> vector<2x16xf32>
    %288 = vector.extract_strided_slice %285 {offsets = [16, 0], sizes = [16, 16], strides = [1, 1]} : vector<32x16xf32> to vector<16x16xf32>
    %cst_119 = arith.constant dense<0.000000e+00> : vector<2x16xf32>
    %289 = tpu.matmul %284, %288, %cst_119 {dimension_numbers = #tpu.dot_dimension_numbers<[1], [0], [0], [1], [0, 0, 1, 1], [], []>} : vector<2x16xf32>, vector<16x16xf32>, vector<2x16xf32> -> vector<2x16xf32>
    %290 = arith.addf %287, %289 : vector<2x16xf32>
    %c0_120 = arith.constant 0 : index
    %c0_121 = arith.constant 0 : index
    %291 = vector.load %arg39[%c0_120, %c0_121] : memref<1x16xf32, #tpu.memory_space<vmem>>, vector<1x16xf32>
    %292 = vector.broadcast %291 : vector<1x16xf32> to vector<2x16xf32>
    %293 = arith.addf %290, %292 : vector<2x16xf32>
    %294 = vector.broadcast %209 : f32 to vector<2x16xf32>
    %295 = arith.mulf %294, %293 : vector<2x16xf32>
    %c0_122 = arith.constant 0 : index
    %c0_123 = arith.constant 0 : index
    %296 = vector.load %arg12[%c0_122, %c0_123] : memref<32x48xf32, #tpu.memory_space<vmem>>, vector<32x48xf32>
    %297 = vector.extract_strided_slice %296 {offsets = [0, 0], sizes = [16, 48], strides = [1, 1]} : vector<32x48xf32> to vector<16x48xf32>
    %cst_124 = arith.constant dense<0.000000e+00> : vector<2x48xf32>
    %298 = tpu.matmul %4, %297, %cst_124 {dimension_numbers = #tpu.dot_dimension_numbers<[1], [0], [0], [1], [0, 0, 1, 1], [], []>} : vector<2x16xf32>, vector<16x48xf32>, vector<2x48xf32> -> vector<2x48xf32>
    %299 = vector.extract_strided_slice %296 {offsets = [16, 0], sizes = [16, 48], strides = [1, 1]} : vector<32x48xf32> to vector<16x48xf32>
    %cst_125 = arith.constant dense<0.000000e+00> : vector<2x48xf32>
    %300 = tpu.matmul %252, %299, %cst_125 {dimension_numbers = #tpu.dot_dimension_numbers<[1], [0], [0], [1], [0, 0, 1, 1], [], []>} : vector<2x16xf32>, vector<16x48xf32>, vector<2x48xf32> -> vector<2x48xf32>
    %301 = arith.addf %298, %300 : vector<2x48xf32>
    %c0_126 = arith.constant 0 : index
    %c0_127 = arith.constant 0 : index
    %302 = vector.load %arg14[%c0_126, %c0_127] : memref<1x48xf32, #tpu.memory_space<vmem>>, vector<1x48xf32>
    %303 = vector.broadcast %302 : vector<1x48xf32> to vector<2x48xf32>
    %304 = arith.addf %301, %303 : vector<2x48xf32>
    %c0_128 = arith.constant 0 : index
    %c0_129 = arith.constant 0 : index
    %305 = vector.load %arg13[%c0_128, %c0_129] : memref<16x48xf32, #tpu.memory_space<vmem>>, vector<16x48xf32>
    %cst_130 = arith.constant dense<0.000000e+00> : vector<2x48xf32>
    %306 = tpu.matmul %14, %305, %cst_130 {dimension_numbers = #tpu.dot_dimension_numbers<[1], [0], [0], [1], [0, 0, 1, 1], [], []>} : vector<2x16xf32>, vector<16x48xf32>, vector<2x48xf32> -> vector<2x48xf32>
    %c0_131 = arith.constant 0 : index
    %c0_132 = arith.constant 0 : index
    %307 = vector.load %arg15[%c0_131, %c0_132] : memref<1x48xf32, #tpu.memory_space<vmem>>, vector<1x48xf32>
    %308 = vector.broadcast %307 : vector<1x48xf32> to vector<2x48xf32>
    %309 = arith.addf %306, %308 : vector<2x48xf32>
    %310 = vector.extract_strided_slice %304 {offsets = [0, 0], sizes = [2, 16], strides = [1, 1]} : vector<2x48xf32> to vector<2x16xf32>
    %311 = vector.extract_strided_slice %309 {offsets = [0, 0], sizes = [2, 16], strides = [1, 1]} : vector<2x48xf32> to vector<2x16xf32>
    %312 = arith.addf %310, %311 : vector<2x16xf32>
    %313 = arith.negf %312 : vector<2x16xf32>
    %314 = math.exp %313 : vector<2x16xf32>
    %cst_133 = arith.constant 1.000000e+00 : f32
    %315 = vector.broadcast %cst_133 : f32 to vector<2x16xf32>
    %316 = arith.addf %315, %314 : vector<2x16xf32>
    %317 = arith.divf %315, %316 : vector<2x16xf32>
    %318 = vector.extract_strided_slice %304 {offsets = [0, 16], sizes = [2, 16], strides = [1, 1]} : vector<2x48xf32> to vector<2x16xf32>
    %319 = vector.extract_strided_slice %309 {offsets = [0, 16], sizes = [2, 16], strides = [1, 1]} : vector<2x48xf32> to vector<2x16xf32>
    %320 = arith.addf %318, %319 : vector<2x16xf32>
    %321 = arith.negf %320 : vector<2x16xf32>
    %322 = math.exp %321 : vector<2x16xf32>
    %cst_134 = arith.constant 1.000000e+00 : f32
    %323 = vector.broadcast %cst_134 : f32 to vector<2x16xf32>
    %324 = arith.addf %323, %322 : vector<2x16xf32>
    %325 = arith.divf %323, %324 : vector<2x16xf32>
    %326 = vector.extract_strided_slice %304 {offsets = [0, 32], sizes = [2, 16], strides = [1, 1]} : vector<2x48xf32> to vector<2x16xf32>
    %327 = vector.extract_strided_slice %309 {offsets = [0, 32], sizes = [2, 16], strides = [1, 1]} : vector<2x48xf32> to vector<2x16xf32>
    %328 = arith.mulf %317, %327 : vector<2x16xf32>
    %329 = arith.addf %326, %328 : vector<2x16xf32>
    %330 = math.tanh %329 : vector<2x16xf32>
    %cst_135 = arith.constant 1.000000e+00 : f32
    %331 = vector.broadcast %cst_135 : f32 to vector<2x16xf32>
    %332 = arith.subf %331, %325 : vector<2x16xf32>
    %333 = arith.mulf %332, %330 : vector<2x16xf32>
    %334 = arith.mulf %325, %14 : vector<2x16xf32>
    %335 = arith.addf %333, %334 : vector<2x16xf32>
    %c0_136 = arith.constant 0 : index
    %c0_137 = arith.constant 0 : index
    %336 = vector.load %arg16[%c0_136, %c0_137] : memref<32x48xf32, #tpu.memory_space<vmem>>, vector<32x48xf32>
    %337 = vector.extract_strided_slice %336 {offsets = [0, 0], sizes = [16, 48], strides = [1, 1]} : vector<32x48xf32> to vector<16x48xf32>
    %cst_138 = arith.constant dense<0.000000e+00> : vector<2x48xf32>
    %338 = tpu.matmul %6, %337, %cst_138 {dimension_numbers = #tpu.dot_dimension_numbers<[1], [0], [0], [1], [0, 0, 1, 1], [], []>} : vector<2x16xf32>, vector<16x48xf32>, vector<2x48xf32> -> vector<2x48xf32>
    %339 = vector.extract_strided_slice %336 {offsets = [16, 0], sizes = [16, 48], strides = [1, 1]} : vector<32x48xf32> to vector<16x48xf32>
    %cst_139 = arith.constant dense<0.000000e+00> : vector<2x48xf32>
    %340 = tpu.matmul %295, %339, %cst_139 {dimension_numbers = #tpu.dot_dimension_numbers<[1], [0], [0], [1], [0, 0, 1, 1], [], []>} : vector<2x16xf32>, vector<16x48xf32>, vector<2x48xf32> -> vector<2x48xf32>
    %341 = arith.addf %338, %340 : vector<2x48xf32>
    %c0_140 = arith.constant 0 : index
    %c0_141 = arith.constant 0 : index
    %342 = vector.load %arg18[%c0_140, %c0_141] : memref<1x48xf32, #tpu.memory_space<vmem>>, vector<1x48xf32>
    %343 = vector.broadcast %342 : vector<1x48xf32> to vector<2x48xf32>
    %344 = arith.addf %341, %343 : vector<2x48xf32>
    %c0_142 = arith.constant 0 : index
    %c0_143 = arith.constant 0 : index
    %345 = vector.load %arg17[%c0_142, %c0_143] : memref<16x48xf32, #tpu.memory_space<vmem>>, vector<16x48xf32>
    %cst_144 = arith.constant dense<0.000000e+00> : vector<2x48xf32>
    %346 = tpu.matmul %17, %345, %cst_144 {dimension_numbers = #tpu.dot_dimension_numbers<[1], [0], [0], [1], [0, 0, 1, 1], [], []>} : vector<2x16xf32>, vector<16x48xf32>, vector<2x48xf32> -> vector<2x48xf32>
    %c0_145 = arith.constant 0 : index
    %c0_146 = arith.constant 0 : index
    %347 = vector.load %arg19[%c0_145, %c0_146] : memref<1x48xf32, #tpu.memory_space<vmem>>, vector<1x48xf32>
    %348 = vector.broadcast %347 : vector<1x48xf32> to vector<2x48xf32>
    %349 = arith.addf %346, %348 : vector<2x48xf32>
    %350 = vector.extract_strided_slice %344 {offsets = [0, 0], sizes = [2, 16], strides = [1, 1]} : vector<2x48xf32> to vector<2x16xf32>
    %351 = vector.extract_strided_slice %349 {offsets = [0, 0], sizes = [2, 16], strides = [1, 1]} : vector<2x48xf32> to vector<2x16xf32>
    %352 = arith.addf %350, %351 : vector<2x16xf32>
    %353 = arith.negf %352 : vector<2x16xf32>
    %354 = math.exp %353 : vector<2x16xf32>
    %cst_147 = arith.constant 1.000000e+00 : f32
    %355 = vector.broadcast %cst_147 : f32 to vector<2x16xf32>
    %356 = arith.addf %355, %354 : vector<2x16xf32>
    %357 = arith.divf %355, %356 : vector<2x16xf32>
    %358 = vector.extract_strided_slice %344 {offsets = [0, 16], sizes = [2, 16], strides = [1, 1]} : vector<2x48xf32> to vector<2x16xf32>
    %359 = vector.extract_strided_slice %349 {offsets = [0, 16], sizes = [2, 16], strides = [1, 1]} : vector<2x48xf32> to vector<2x16xf32>
    %360 = arith.addf %358, %359 : vector<2x16xf32>
    %361 = arith.negf %360 : vector<2x16xf32>
    %362 = math.exp %361 : vector<2x16xf32>
    %cst_148 = arith.constant 1.000000e+00 : f32
    %363 = vector.broadcast %cst_148 : f32 to vector<2x16xf32>
    %364 = arith.addf %363, %362 : vector<2x16xf32>
    %365 = arith.divf %363, %364 : vector<2x16xf32>
    %366 = vector.extract_strided_slice %344 {offsets = [0, 32], sizes = [2, 16], strides = [1, 1]} : vector<2x48xf32> to vector<2x16xf32>
    %367 = vector.extract_strided_slice %349 {offsets = [0, 32], sizes = [2, 16], strides = [1, 1]} : vector<2x48xf32> to vector<2x16xf32>
    %368 = arith.mulf %357, %367 : vector<2x16xf32>
    %369 = arith.addf %366, %368 : vector<2x16xf32>
    %370 = math.tanh %369 : vector<2x16xf32>
    %cst_149 = arith.constant 1.000000e+00 : f32
    %371 = vector.broadcast %cst_149 : f32 to vector<2x16xf32>
    %372 = arith.subf %371, %365 : vector<2x16xf32>
    %373 = arith.mulf %372, %370 : vector<2x16xf32>
    %374 = arith.mulf %365, %17 : vector<2x16xf32>
    %375 = arith.addf %373, %374 : vector<2x16xf32>
    %cst_150 = arith.constant 1.000000e+00 : f32
    %376 = vector.broadcast %cst_150 : f32 to vector<2x2x1xf32>
    %377 = arith.subf %376, %9 : vector<2x2x1xf32>
    %378 = vector.broadcast %377 : vector<2x2x1xf32> to vector<2x2x16xf32>
    %379 = arith.mulf %10, %378 : vector<2x2x16xf32>
    %380 = vector.shape_cast %335 : vector<2x16xf32> to vector<2x1x16xf32>
    %381 = vector.broadcast %380 : vector<2x1x16xf32> to vector<2x2x16xf32>
    %382 = vector.broadcast %9 : vector<2x2x1xf32> to vector<2x2x16xf32>
    %383 = arith.mulf %381, %382 : vector<2x2x16xf32>
    %384 = arith.addf %379, %383 : vector<2x2x16xf32>
    %c0_151 = arith.constant 0 : index
    %c0_152 = arith.constant 0 : index
    %c0_153 = arith.constant 0 : index
    %385 = vector.load %arg45[%c0_151, %c0_152, %c0_153] : memref<2x2x16xf32, #tpu.memory_space<vmem>>, vector<2x2x16xf32>
    tpu.vector_store %arg45[%c0_151, %c0_152, %c0_153], %384 {strides = array<i32>} : memref<2x2x16xf32, #tpu.memory_space<vmem>>, vector<2x2x16xf32>,
    %cst_154 = arith.constant 1.000000e+00 : f32
    %386 = vector.broadcast %cst_154 : f32 to vector<2x2x1xf32>
    %387 = arith.subf %386, %9 : vector<2x2x1xf32>
    %388 = vector.broadcast %387 : vector<2x2x1xf32> to vector<2x2x16xf32>
    %389 = arith.mulf %11, %388 : vector<2x2x16xf32>
    %390 = vector.shape_cast %375 : vector<2x16xf32> to vector<2x1x16xf32>
    %391 = vector.broadcast %390 : vector<2x1x16xf32> to vector<2x2x16xf32>
    %392 = vector.broadcast %9 : vector<2x2x1xf32> to vector<2x2x16xf32>
    %393 = arith.mulf %391, %392 : vector<2x2x16xf32>
    %394 = arith.addf %389, %393 : vector<2x2x16xf32>
    %c0_155 = arith.constant 0 : index
    %c0_156 = arith.constant 0 : index
    %c0_157 = arith.constant 0 : index
    %395 = vector.load %arg46[%c0_155, %c0_156, %c0_157] : memref<2x2x16xf32, #tpu.memory_space<vmem>>, vector<2x2x16xf32>
    tpu.vector_store %arg46[%c0_155, %c0_156, %c0_157], %394 {strides = array<i32>} : memref<2x2x16xf32, #tpu.memory_space<vmem>>, vector<2x2x16xf32>,
    %c0_158 = arith.constant 0 : index
    %c0_159 = arith.constant 0 : index
    %396 = vector.load %arg47[%c0_158, %c0_159] : memref<2x16xf32, #tpu.memory_space<vmem>>, vector<2x16xf32>
    %c0_160 = arith.constant 0 : index
    %c0_161 = arith.constant 0 : index
    %397 = vector.load %arg20[%c0_160, %c0_161] : memref<16x48xf32, #tpu.memory_space<vmem>>, vector<16x48xf32>
    %cst_162 = arith.constant dense<0.000000e+00> : vector<2x48xf32>
    %398 = tpu.matmul %335, %397, %cst_162 {dimension_numbers = #tpu.dot_dimension_numbers<[1], [0], [0], [1], [0, 0, 1, 1], [], []>} : vector<2x16xf32>, vector<16x48xf32>, vector<2x48xf32> -> vector<2x48xf32>
    %c0_163 = arith.constant 0 : index
    %c0_164 = arith.constant 0 : index
    %399 = vector.load %arg22[%c0_163, %c0_164] : memref<1x48xf32, #tpu.memory_space<vmem>>, vector<1x48xf32>
    %400 = vector.broadcast %399 : vector<1x48xf32> to vector<2x48xf32>
    %401 = arith.addf %398, %400 : vector<2x48xf32>
    %c0_165 = arith.constant 0 : index
    %c0_166 = arith.constant 0 : index
    %402 = vector.load %arg21[%c0_165, %c0_166] : memref<16x48xf32, #tpu.memory_space<vmem>>, vector<16x48xf32>
    %cst_167 = arith.constant dense<0.000000e+00> : vector<2x48xf32>
    %403 = tpu.matmul %396, %402, %cst_167 {dimension_numbers = #tpu.dot_dimension_numbers<[1], [0], [0], [1], [0, 0, 1, 1], [], []>} : vector<2x16xf32>, vector<16x48xf32>, vector<2x48xf32> -> vector<2x48xf32>
    %c0_168 = arith.constant 0 : index
    %c0_169 = arith.constant 0 : index
    %404 = vector.load %arg23[%c0_168, %c0_169] : memref<1x48xf32, #tpu.memory_space<vmem>>, vector<1x48xf32>
    %405 = vector.broadcast %404 : vector<1x48xf32> to vector<2x48xf32>
    %406 = arith.addf %403, %405 : vector<2x48xf32>
    %407 = vector.extract_strided_slice %401 {offsets = [0, 0], sizes = [2, 16], strides = [1, 1]} : vector<2x48xf32> to vector<2x16xf32>
    %408 = vector.extract_strided_slice %406 {offsets = [0, 0], sizes = [2, 16], strides = [1, 1]} : vector<2x48xf32> to vector<2x16xf32>
    %409 = arith.addf %407, %408 : vector<2x16xf32>
    %410 = arith.negf %409 : vector<2x16xf32>
    %411 = math.exp %410 : vector<2x16xf32>
    %cst_170 = arith.constant 1.000000e+00 : f32
    %412 = vector.broadcast %cst_170 : f32 to vector<2x16xf32>
    %413 = arith.addf %412, %411 : vector<2x16xf32>
    %414 = arith.divf %412, %413 : vector<2x16xf32>
    %415 = vector.extract_strided_slice %401 {offsets = [0, 16], sizes = [2, 16], strides = [1, 1]} : vector<2x48xf32> to vector<2x16xf32>
    %416 = vector.extract_strided_slice %406 {offsets = [0, 16], sizes = [2, 16], strides = [1, 1]} : vector<2x48xf32> to vector<2x16xf32>
    %417 = arith.addf %415, %416 : vector<2x16xf32>
    %418 = arith.negf %417 : vector<2x16xf32>
    %419 = math.exp %418 : vector<2x16xf32>
    %cst_171 = arith.constant 1.000000e+00 : f32
    %420 = vector.broadcast %cst_171 : f32 to vector<2x16xf32>
    %421 = arith.addf %420, %419 : vector<2x16xf32>
    %422 = arith.divf %420, %421 : vector<2x16xf32>
    %423 = vector.extract_strided_slice %401 {offsets = [0, 32], sizes = [2, 16], strides = [1, 1]} : vector<2x48xf32> to vector<2x16xf32>
    %424 = vector.extract_strided_slice %406 {offsets = [0, 32], sizes = [2, 16], strides = [1, 1]} : vector<2x48xf32> to vector<2x16xf32>
    %425 = arith.mulf %414, %424 : vector<2x16xf32>
    %426 = arith.addf %423, %425 : vector<2x16xf32>
    %427 = math.tanh %426 : vector<2x16xf32>
    %cst_172 = arith.constant 1.000000e+00 : f32
    %428 = vector.broadcast %cst_172 : f32 to vector<2x16xf32>
    %429 = arith.subf %428, %422 : vector<2x16xf32>
    %430 = arith.mulf %429, %427 : vector<2x16xf32>
    %431 = arith.mulf %422, %396 : vector<2x16xf32>
    %432 = arith.addf %430, %431 : vector<2x16xf32>
    %c0_173 = arith.constant 0 : index
    %c0_174 = arith.constant 0 : index
    %433 = vector.load %arg48[%c0_173, %c0_174] : memref<2x16xf32, #tpu.memory_space<vmem>>, vector<2x16xf32>
    %c0_175 = arith.constant 0 : index
    %c0_176 = arith.constant 0 : index
    %434 = vector.load %arg24[%c0_175, %c0_176] : memref<16x48xf32, #tpu.memory_space<vmem>>, vector<16x48xf32>
    %cst_177 = arith.constant dense<0.000000e+00> : vector<2x48xf32>
    %435 = tpu.matmul %375, %434, %cst_177 {dimension_numbers = #tpu.dot_dimension_numbers<[1], [0], [0], [1], [0, 0, 1, 1], [], []>} : vector<2x16xf32>, vector<16x48xf32>, vector<2x48xf32> -> vector<2x48xf32>
    %c0_178 = arith.constant 0 : index
    %c0_179 = arith.constant 0 : index
    %436 = vector.load %arg26[%c0_178, %c0_179] : memref<1x48xf32, #tpu.memory_space<vmem>>, vector<1x48xf32>
    %437 = vector.broadcast %436 : vector<1x48xf32> to vector<2x48xf32>
    %438 = arith.addf %435, %437 : vector<2x48xf32>
    %c0_180 = arith.constant 0 : index
    %c0_181 = arith.constant 0 : index
    %439 = vector.load %arg25[%c0_180, %c0_181] : memref<16x48xf32, #tpu.memory_space<vmem>>, vector<16x48xf32>
    %cst_182 = arith.constant dense<0.000000e+00> : vector<2x48xf32>
    %440 = tpu.matmul %433, %439, %cst_182 {dimension_numbers = #tpu.dot_dimension_numbers<[1], [0], [0], [1], [0, 0, 1, 1], [], []>} : vector<2x16xf32>, vector<16x48xf32>, vector<2x48xf32> -> vector<2x48xf32>
    %c0_183 = arith.constant 0 : index
    %c0_184 = arith.constant 0 : index
    %441 = vector.load %arg27[%c0_183, %c0_184] : memref<1x48xf32, #tpu.memory_space<vmem>>, vector<1x48xf32>
    %442 = vector.broadcast %441 : vector<1x48xf32> to vector<2x48xf32>
    %443 = arith.addf %440, %442 : vector<2x48xf32>
    %444 = vector.extract_strided_slice %438 {offsets = [0, 0], sizes = [2, 16], strides = [1, 1]} : vector<2x48xf32> to vector<2x16xf32>
    %445 = vector.extract_strided_slice %443 {offsets = [0, 0], sizes = [2, 16], strides = [1, 1]} : vector<2x48xf32> to vector<2x16xf32>
    %446 = arith.addf %444, %445 : vector<2x16xf32>
    %447 = arith.negf %446 : vector<2x16xf32>
    %448 = math.exp %447 : vector<2x16xf32>
    %cst_185 = arith.constant 1.000000e+00 : f32
    %449 = vector.broadcast %cst_185 : f32 to vector<2x16xf32>
    %450 = arith.addf %449, %448 : vector<2x16xf32>
    %451 = arith.divf %449, %450 : vector<2x16xf32>
    %452 = vector.extract_strided_slice %438 {offsets = [0, 16], sizes = [2, 16], strides = [1, 1]} : vector<2x48xf32> to vector<2x16xf32>
    %453 = vector.extract_strided_slice %443 {offsets = [0, 16], sizes = [2, 16], strides = [1, 1]} : vector<2x48xf32> to vector<2x16xf32>
    %454 = arith.addf %452, %453 : vector<2x16xf32>
    %455 = arith.negf %454 : vector<2x16xf32>
    %456 = math.exp %455 : vector<2x16xf32>
    %cst_186 = arith.constant 1.000000e+00 : f32
    %457 = vector.broadcast %cst_186 : f32 to vector<2x16xf32>
    %458 = arith.addf %457, %456 : vector<2x16xf32>
    %459 = arith.divf %457, %458 : vector<2x16xf32>
    %460 = vector.extract_strided_slice %438 {offsets = [0, 32], sizes = [2, 16], strides = [1, 1]} : vector<2x48xf32> to vector<2x16xf32>
    %461 = vector.extract_strided_slice %443 {offsets = [0, 32], sizes = [2, 16], strides = [1, 1]} : vector<2x48xf32> to vector<2x16xf32>
    %462 = arith.mulf %451, %461 : vector<2x16xf32>
    %463 = arith.addf %460, %462 : vector<2x16xf32>
    %464 = math.tanh %463 : vector<2x16xf32>
    %cst_187 = arith.constant 1.000000e+00 : f32
    %465 = vector.broadcast %cst_187 : f32 to vector<2x16xf32>
    %466 = arith.subf %465, %459 : vector<2x16xf32>
    %467 = arith.mulf %466, %464 : vector<2x16xf32>
    %468 = arith.mulf %459, %433 : vector<2x16xf32>
    %469 = arith.addf %467, %468 : vector<2x16xf32>
    %c0_188 = arith.constant 0 : index
    %c0_189 = arith.constant 0 : index
    %470 = vector.load %arg47[%c0_188, %c0_189] : memref<2x16xf32, #tpu.memory_space<vmem>>, vector<2x16xf32>
    tpu.vector_store %arg47[%c0_188, %c0_189], %432 {strides = array<i32>} : memref<2x16xf32, #tpu.memory_space<vmem>>, vector<2x16xf32>,
    %c0_190 = arith.constant 0 : index
    %c0_191 = arith.constant 0 : index
    %471 = vector.load %arg48[%c0_190, %c0_191] : memref<2x16xf32, #tpu.memory_space<vmem>>, vector<2x16xf32>
    tpu.vector_store %arg48[%c0_190, %c0_191], %469 {strides = array<i32>} : memref<2x16xf32, #tpu.memory_space<vmem>>, vector<2x16xf32>,
    %472 = arith.index_cast %arg0 : i32 to index
    %c0_192 = arith.constant 0 : index
    %c0_193 = arith.constant 0 : index
    %473 = vector.load %arg43[%472, %c0_192, %c0_193] : memref<8x2x16xf32, #tpu.memory_space<vmem>>, vector<1x2x16xf32>
    %474 = vector.shape_cast %473 : vector<1x2x16xf32> to vector<2x16xf32>
    %475 = vector.shape_cast %65 : vector<2x16xf32> to vector<1x2x16xf32>
    tpu.vector_store %arg43[%472, %c0_192, %c0_193], %475 {strides = array<i32>} : memref<8x2x16xf32, #tpu.memory_space<vmem>>, vector<1x2x16xf32>,
    %476 = arith.index_cast %arg0 : i32 to index
    %c0_194 = arith.constant 0 : index
    %c0_195 = arith.constant 0 : index
    %477 = vector.load %arg44[%476, %c0_194, %c0_195] : memref<8x2x16xf32, #tpu.memory_space<vmem>>, vector<1x2x16xf32>
    %478 = vector.shape_cast %477 : vector<1x2x16xf32> to vector<2x16xf32>
    %479 = vector.shape_cast %105 : vector<2x16xf32> to vector<1x2x16xf32>
    tpu.vector_store %arg44[%476, %c0_194, %c0_195], %479 {strides = array<i32>} : memref<8x2x16xf32, #tpu.memory_space<vmem>>, vector<1x2x16xf32>,
    %c0_196 = arith.constant 0 : index
    %c0_197 = arith.constant 0 : index
    %c0_198 = arith.constant 0 : index
    %480 = vector.load %arg40[%c0_196, %c0_197, %c0_198] : memref<1x2x16xf32, #tpu.memory_space<vmem>>, vector<1x2x16xf32>
    %481 = vector.shape_cast %480 : vector<1x2x16xf32> to vector<2x16xf32>
    %482 = vector.shape_cast %432 : vector<2x16xf32> to vector<1x2x16xf32>
    tpu.vector_store %arg40[%c0_196, %c0_197, %c0_198], %482 {strides = array<i32>} : memref<1x2x16xf32, #tpu.memory_space<vmem>>, vector<1x2x16xf32>,
    %c0_199 = arith.constant 0 : index
    %c0_200 = arith.constant 0 : index
    %c0_201 = arith.constant 0 : index
    %483 = vector.load %arg41[%c0_199, %c0_200, %c0_201] : memref<1x2x16xf32, #tpu.memory_space<vmem>>, vector<1x2x16xf32>
    %484 = vector.shape_cast %483 : vector<1x2x16xf32> to vector<2x16xf32>
    %485 = vector.shape_cast %469 : vector<2x16xf32> to vector<1x2x16xf32>
    tpu.vector_store %arg41[%c0_199, %c0_200, %c0_201], %485 {strides = array<i32>} : memref<1x2x16xf32, #tpu.memory_space<vmem>>, vector<1x2x16xf32>,
    %c0_202 = arith.constant 0 : index
    %c0_203 = arith.constant 0 : index
    %c0_204 = arith.constant 0 : index
    %486 = vector.load %arg42[%c0_202, %c0_203, %c0_204] : memref<1x8x2xf32, #tpu.memory_space<vmem>>, vector<1x8x2xf32>
    %487 = vector.shape_cast %486 : vector<1x8x2xf32> to vector<8x2xf32>
    %488 = vector.shape_cast %207 : vector<8x2xf32> to vector<1x8x2xf32>
    tpu.vector_store %arg42[%c0_202, %c0_203, %c0_204], %488 {strides = array<i32>} : memref<1x8x2xf32, #tpu.memory_space<vmem>>, vector<1x8x2xf32>,
    return
  }
  func.func @transform_0(%arg0: i32) -> (i32, i32, i32) {
    %c0_i32 = arith.constant 0 : i32
    %c0_i32_0 = arith.constant 0 : i32
    %c0_i32_1 = arith.constant 0 : i32
    return %arg0, %c0_i32, %c0_i32_0 : i32, i32, i32
  }
  func.func @transform_1(%arg0: i32) -> (i32, i32, i32) {
    %c0_i32 = arith.constant 0 : i32
    %c0_i32_0 = arith.constant 0 : i32
    %c0_i32_1 = arith.constant 0 : i32
    return %arg0, %c0_i32, %c0_i32_0 : i32, i32, i32
  }
  func.func @transform_2(%arg0: i32) -> (i32, i32, i32) {
    %c0_i32 = arith.constant 0 : i32
    %c0_i32_0 = arith.constant 0 : i32
    %c0_i32_1 = arith.constant 0 : i32
    return %arg0, %c0_i32, %c0_i32_0 : i32, i32, i32
  }
  func.func @transform_3(%arg0: i32) -> (i32, i32) {
    %c0_i32 = arith.constant 0 : i32
    %c0_i32_0 = arith.constant 0 : i32
    %c0_i32_1 = arith.constant 0 : i32
    return %c0_i32, %c0_i32_0 : i32, i32
  }
  func.func @transform_4(%arg0: i32) -> (i32, i32) {
    %c0_i32 = arith.constant 0 : i32
    %c0_i32_0 = arith.constant 0 : i32
    %c0_i32_1 = arith.constant 0 : i32
    return %c0_i32, %c0_i32_0 : i32, i32
  }
  func.func @transform_5(%arg0: i32) -> (i32, i32) {
    %c0_i32 = arith.constant 0 : i32
    %c0_i32_0 = arith.constant 0 : i32
    %c0_i32_1 = arith.constant 0 : i32
    return %c0_i32, %c0_i32_0 : i32, i32
  }
  func.func @transform_6(%arg0: i32) -> (i32, i32) {
    %c0_i32 = arith.constant 0 : i32
    %c0_i32_0 = arith.constant 0 : i32
    %c0_i32_1 = arith.constant 0 : i32
    return %c0_i32, %c0_i32_0 : i32, i32
  }
  func.func @transform_7(%arg0: i32) -> (i32, i32) {
    %c0_i32 = arith.constant 0 : i32
    %c0_i32_0 = arith.constant 0 : i32
    %c0_i32_1 = arith.constant 0 : i32
    return %c0_i32, %c0_i32_0 : i32, i32
  }
  func.func @transform_8(%arg0: i32) -> (i32, i32) {
    %c0_i32 = arith.constant 0 : i32
    %c0_i32_0 = arith.constant 0 : i32
    %c0_i32_1 = arith.constant 0 : i32
    return %c0_i32, %c0_i32_0 : i32, i32
  }
  func.func @transform_9(%arg0: i32) -> (i32, i32) {
    %c0_i32 = arith.constant 0 : i32
    %c0_i32_0 = arith.constant 0 : i32
    %c0_i32_1 = arith.constant 0 : i32
    return %c0_i32, %c0_i32_0 : i32, i32
  }
  func.func @transform_10(%arg0: i32) -> (i32, i32) {
    %c0_i32 = arith.constant 0 : i32
    %c0_i32_0 = arith.constant 0 : i32
    %c0_i32_1 = arith.constant 0 : i32
    return %c0_i32, %c0_i32_0 : i32, i32
  }
  func.func @transform_11(%arg0: i32) -> (i32, i32) {
    %c0_i32 = arith.constant 0 : i32
    %c0_i32_0 = arith.constant 0 : i32
    %c0_i32_1 = arith.constant 0 : i32
    return %c0_i32, %c0_i32_0 : i32, i32
  }
  func.func @transform_12(%arg0: i32) -> (i32, i32) {
    %c0_i32 = arith.constant 0 : i32
    %c0_i32_0 = arith.constant 0 : i32
    %c0_i32_1 = arith.constant 0 : i32
    return %c0_i32, %c0_i32_0 : i32, i32
  }
  func.func @transform_13(%arg0: i32) -> (i32, i32) {
    %c0_i32 = arith.constant 0 : i32
    %c0_i32_0 = arith.constant 0 : i32
    %c0_i32_1 = arith.constant 0 : i32
    return %c0_i32, %c0_i32_0 : i32, i32
  }
  func.func @transform_14(%arg0: i32) -> (i32, i32) {
    %c0_i32 = arith.constant 0 : i32
    %c0_i32_0 = arith.constant 0 : i32
    %c0_i32_1 = arith.constant 0 : i32
    return %c0_i32, %c0_i32_0 : i32, i32
  }
  func.func @transform_15(%arg0: i32) -> (i32, i32) {
    %c0_i32 = arith.constant 0 : i32
    %c0_i32_0 = arith.constant 0 : i32
    %c0_i32_1 = arith.constant 0 : i32
    return %c0_i32, %c0_i32_0 : i32, i32
  }
  func.func @transform_16(%arg0: i32) -> (i32, i32) {
    %c0_i32 = arith.constant 0 : i32
    %c0_i32_0 = arith.constant 0 : i32
    %c0_i32_1 = arith.constant 0 : i32
    return %c0_i32, %c0_i32_0 : i32, i32
  }
  func.func @transform_17(%arg0: i32) -> (i32, i32) {
    %c0_i32 = arith.constant 0 : i32
    %c0_i32_0 = arith.constant 0 : i32
    %c0_i32_1 = arith.constant 0 : i32
    return %c0_i32, %c0_i32_0 : i32, i32
  }
  func.func @transform_18(%arg0: i32) -> (i32, i32) {
    %c0_i32 = arith.constant 0 : i32
    %c0_i32_0 = arith.constant 0 : i32
    %c0_i32_1 = arith.constant 0 : i32
    return %c0_i32, %c0_i32_0 : i32, i32
  }
  func.func @transform_19(%arg0: i32) -> (i32, i32) {
    %c0_i32 = arith.constant 0 : i32
    %c0_i32_0 = arith.constant 0 : i32
    %c0_i32_1 = arith.constant 0 : i32
    return %c0_i32, %c0_i32_0 : i32, i32
  }
  func.func @transform_20(%arg0: i32) -> (i32, i32) {
    %c0_i32 = arith.constant 0 : i32
    %c0_i32_0 = arith.constant 0 : i32
    %c0_i32_1 = arith.constant 0 : i32
    return %c0_i32, %c0_i32_0 : i32, i32
  }
  func.func @transform_21(%arg0: i32) -> (i32, i32) {
    %c0_i32 = arith.constant 0 : i32
    %c0_i32_0 = arith.constant 0 : i32
    %c0_i32_1 = arith.constant 0 : i32
    return %c0_i32, %c0_i32_0 : i32, i32
  }
  func.func @transform_22(%arg0: i32) -> (i32, i32) {
    %c0_i32 = arith.constant 0 : i32
    %c0_i32_0 = arith.constant 0 : i32
    %c0_i32_1 = arith.constant 0 : i32
    return %c0_i32, %c0_i32_0 : i32, i32
  }
  func.func @transform_23(%arg0: i32) -> (i32, i32) {
    %c0_i32 = arith.constant 0 : i32
    %c0_i32_0 = arith.constant 0 : i32
    %c0_i32_1 = arith.constant 0 : i32
    return %c0_i32, %c0_i32_0 : i32, i32
  }
  func.func @transform_24(%arg0: i32) -> (i32, i32) {
    %c0_i32 = arith.constant 0 : i32
    %c0_i32_0 = arith.constant 0 : i32
    %c0_i32_1 = arith.constant 0 : i32
    return %c0_i32, %c0_i32_0 : i32, i32
  }
  func.func @transform_25(%arg0: i32) -> (i32, i32) {
    %c0_i32 = arith.constant 0 : i32
    %c0_i32_0 = arith.constant 0 : i32
    %c0_i32_1 = arith.constant 0 : i32
    return %c0_i32, %c0_i32_0 : i32, i32
  }
  func.func @transform_26(%arg0: i32) -> (i32, i32) {
    %c0_i32 = arith.constant 0 : i32
    %c0_i32_0 = arith.constant 0 : i32
    %c0_i32_1 = arith.constant 0 : i32
    return %c0_i32, %c0_i32_0 : i32, i32
  }
  func.func @transform_27(%arg0: i32) -> (i32, i32) {
    %c0_i32 = arith.constant 0 : i32
    %c0_i32_0 = arith.constant 0 : i32
    %c0_i32_1 = arith.constant 0 : i32
    return %c0_i32, %c0_i32_0 : i32, i32
  }
  func.func @transform_28(%arg0: i32) -> (i32, i32) {
    %c0_i32 = arith.constant 0 : i32
    %c0_i32_0 = arith.constant 0 : i32
    %c0_i32_1 = arith.constant 0 : i32
    return %c0_i32, %c0_i32_0 : i32, i32
  }
  func.func @transform_29(%arg0: i32) -> (i32, i32) {
    %c0_i32 = arith.constant 0 : i32
    %c0_i32_0 = arith.constant 0 : i32
    %c0_i32_1 = arith.constant 0 : i32
    return %c0_i32, %c0_i32_0 : i32, i32
  }
  func.func @transform_30(%arg0: i32) -> (i32, i32) {
    %c0_i32 = arith.constant 0 : i32
    %c0_i32_0 = arith.constant 0 : i32
    %c0_i32_1 = arith.constant 0 : i32
    return %c0_i32, %c0_i32_0 : i32, i32
  }
  func.func @transform_31(%arg0: i32) -> (i32, i32) {
    %c0_i32 = arith.constant 0 : i32
    %c0_i32_0 = arith.constant 0 : i32
    %c0_i32_1 = arith.constant 0 : i32
    return %c0_i32, %c0_i32_0 : i32, i32
  }
  func.func @transform_32(%arg0: i32) -> (i32, i32) {
    %c0_i32 = arith.constant 0 : i32
    %c0_i32_0 = arith.constant 0 : i32
    %c0_i32_1 = arith.constant 0 : i32
    return %c0_i32, %c0_i32_0 : i32, i32
  }
  func.func @transform_33(%arg0: i32) -> (i32, i32) {
    %c0_i32 = arith.constant 0 : i32
    %c0_i32_0 = arith.constant 0 : i32
    %c0_i32_1 = arith.constant 0 : i32
    return %c0_i32, %c0_i32_0 : i32, i32
  }
  func.func @transform_34(%arg0: i32) -> (i32, i32) {
    %c0_i32 = arith.constant 0 : i32
    %c0_i32_0 = arith.constant 0 : i32
    %c0_i32_1 = arith.constant 0 : i32
    return %c0_i32, %c0_i32_0 : i32, i32
  }
  func.func @transform_35(%arg0: i32) -> (i32, i32) {
    %c0_i32 = arith.constant 0 : i32
    %c0_i32_0 = arith.constant 0 : i32
    %c0_i32_1 = arith.constant 0 : i32
    return %c0_i32, %c0_i32_0 : i32, i32
  }
  func.func @transform_36(%arg0: i32) -> (i32, i32) {
    %c0_i32 = arith.constant 0 : i32
    %c0_i32_0 = arith.constant 0 : i32
    %c0_i32_1 = arith.constant 0 : i32
    return %c0_i32, %c0_i32_0 : i32, i32
  }
  func.func @transform_37(%arg0: i32) -> (i32, i32) {
    %c0_i32 = arith.constant 0 : i32
    %c0_i32_0 = arith.constant 0 : i32
    %c0_i32_1 = arith.constant 0 : i32
    return %c0_i32, %c0_i32_0 : i32, i32
  }
  func.func @transform_38(%arg0: i32) -> (i32, i32) {
    %c0_i32 = arith.constant 0 : i32
    %c0_i32_0 = arith.constant 0 : i32
    %c0_i32_1 = arith.constant 0 : i32
    return %c0_i32, %c0_i32_0 : i32, i32
  }
  func.func @transform_39(%arg0: i32) -> (i32, i32, i32) {
    %c0_i32 = arith.constant 0 : i32
    %c0_i32_0 = arith.constant 0 : i32
    %c0_i32_1 = arith.constant 0 : i32
    return %arg0, %c0_i32, %c0_i32_0 : i32, i32, i32
  }
  func.func @transform_40(%arg0: i32) -> (i32, i32, i32) {
    %c0_i32 = arith.constant 0 : i32
    %c0_i32_0 = arith.constant 0 : i32
    %c0_i32_1 = arith.constant 0 : i32
    return %arg0, %c0_i32, %c0_i32_0 : i32, i32, i32
  }
  func.func @transform_41(%arg0: i32) -> (i32, i32, i32) {
    %c0_i32 = arith.constant 0 : i32
    %c0_i32_0 = arith.constant 0 : i32
    %c0_i32_1 = arith.constant 0 : i32
    return %arg0, %c0_i32, %c0_i32_0 : i32, i32, i32
  }
}

module attributes {stable_mosaic.version = 11 : i64} {
  func.func @_matchatt_kernel(%arg0: i32, %arg1: i32, %arg2: memref<1x2x4x64xf32, #tpu.memory_space<vmem>>, %arg3: memref<1x2x64xf32, #tpu.memory_space<vmem>>, %arg4: memref<64x64xf32, #tpu.memory_space<vmem>>, %arg5: memref<1x64xf32, #tpu.memory_space<vmem>>, %arg6: memref<64x32xf32, #tpu.memory_space<vmem>>, %arg7: memref<1x32xf32, #tpu.memory_space<vmem>>, %arg8: memref<1x2x32xf32, #tpu.memory_space<vmem>>, %arg9: memref<1x2x4xf32, #tpu.memory_space<vmem>>) attributes {dimension_semantics = [#tpu.dimension_semantics<parallel>, #tpu.dimension_semantics<parallel>], iteration_bounds = array<i64: 3, 8>, scalar_prefetch = 0 : i64, scratch_operands = 0 : i64, tpu.core_type = #tpu.core_type<tc>, window_params = [{transform_indices = @transform_0, window_bounds = array<i64: 1, 2, 4, 64>}, {transform_indices = @transform_1, window_bounds = array<i64: 1, 2, 64>}, {pipeline_mode = #tpu.pipeline_mode<synchronous>, transform_indices = @transform_2, window_bounds = array<i64: 64, 64>}, {pipeline_mode = #tpu.pipeline_mode<synchronous>, transform_indices = @transform_3, window_bounds = array<i64: 1, 64>}, {pipeline_mode = #tpu.pipeline_mode<synchronous>, transform_indices = @transform_4, window_bounds = array<i64: 64, 32>}, {pipeline_mode = #tpu.pipeline_mode<synchronous>, transform_indices = @transform_5, window_bounds = array<i64: 1, 32>}, {transform_indices = @transform_6, window_bounds = array<i64: 1, 2, 32>}, {transform_indices = @transform_7, window_bounds = array<i64: 1, 2, 4>}]} {
    %c0 = arith.constant 0 : index
    %c0_0 = arith.constant 0 : index
    %c0_1 = arith.constant 0 : index
    %c0_2 = arith.constant 0 : index
    %0 = vector.load %arg2[%c0, %c0_0, %c0_1, %c0_2] : memref<1x2x4x64xf32, #tpu.memory_space<vmem>>, vector<1x2x4x64xf32>
    %1 = vector.shape_cast %0 : vector<1x2x4x64xf32> to vector<2x4x64xf32>
    %c0_3 = arith.constant 0 : index
    %c0_4 = arith.constant 0 : index
    %c0_5 = arith.constant 0 : index
    %2 = vector.load %arg3[%c0_3, %c0_4, %c0_5] : memref<1x2x64xf32, #tpu.memory_space<vmem>>, vector<1x2x64xf32>
    %3 = vector.shape_cast %2 : vector<1x2x64xf32> to vector<2x64xf32>
    %c0_6 = arith.constant 0 : index
    %c0_7 = arith.constant 0 : index
    %4 = vector.load %arg4[%c0_6, %c0_7] : memref<64x64xf32, #tpu.memory_space<vmem>>, vector<64x64xf32>
    %cst = arith.constant dense<0.000000e+00> : vector<2x64xf32>
    %5 = tpu.matmul %3, %4, %cst {dimension_numbers = #tpu.dot_dimension_numbers<[1], [0], [0], [1], [0, 0, 1, 1], [], []>} : vector<2x64xf32>, vector<64x64xf32>, vector<2x64xf32> -> vector<2x64xf32>
    %c0_8 = arith.constant 0 : index
    %c0_9 = arith.constant 0 : index
    %6 = vector.load %arg5[%c0_8, %c0_9] : memref<1x64xf32, #tpu.memory_space<vmem>>, vector<1x64xf32>
    %7 = vector.broadcast %6 : vector<1x64xf32> to vector<2x64xf32>
    %8 = arith.addf %5, %7 : vector<2x64xf32>
    %9 = vector.shape_cast %8 : vector<2x64xf32> to vector<2x1x64xf32>
    "tpu.trace_start"() <{level = 10 : i32, message = "bqd,bkd->bqk"}> : () -> ()
    %cst_10 = arith.constant dense<0.000000e+00> : vector<2x1x4xf32>
    %10 = tpu.matmul %9, %1, %cst_10 {dimension_numbers = #tpu.dot_dimension_numbers<[2], [2], [1], [1], [0, 0, 0, 1, 1, 1], [0], [0]>} : vector<2x1x64xf32>, vector<2x4x64xf32>, vector<2x1x4xf32> -> vector<2x1x4xf32>
    "tpu.trace_stop"() : () -> ()
    %11 = vector.shape_cast %10 : vector<2x1x4xf32> to vector<2x4xf32>
    %c2_i32 = arith.constant 2 : i32
    %12 = arith.subi %arg1, %c2_i32 : i32
    %c0_i32 = arith.constant 0 : i32
    %c4_i32 = arith.constant 4 : i32
    %13 = arith.maxsi %c0_i32, %12 : i32
    %14 = arith.minsi %c4_i32, %13 : i32
    %c2_i32_11 = arith.constant 2 : i32
    %15 = arith.subi %arg1, %c2_i32_11 : i32
    %c0_i32_12 = arith.constant 0 : i32
    %16 = arith.maxsi %15, %c0_i32_12 : i32
    %c2_i32_13 = arith.constant 2 : i32
    %17 = arith.addi %arg1, %c2_i32_13 : i32
    %c8_i32 = arith.constant 8 : i32
    %18 = arith.minsi %17, %c8_i32 : i32
    %19 = tpu.iota {dimensions = array<i32: 1>} : vector<2x4xi32>
    %20 = vector.broadcast %14 : i32 to vector<2x4xi32>
    %21 = arith.addi %20, %19 : vector<2x4xi32>
    %22 = vector.broadcast %16 : i32 to vector<2x4xi32>
    %23 = arith.cmpi sge, %21, %22 : vector<2x4xi32>
    %24 = vector.broadcast %18 : i32 to vector<2x4xi32>
    %25 = arith.cmpi slt, %21, %24 : vector<2x4xi32>
    %26 = arith.andi %23, %25 : vector<2x4xi1>
    %cst_14 = arith.constant -1.000000e+09 : f32
    %27 = vector.broadcast %cst_14 : f32 to vector<2x4xf32>
    %28 = arith.select %26, %11, %27 : vector<2x4xi1>, vector<2x4xf32>
    %cst_15 = arith.constant dense<0xFF800000> : vector<2xf32>
    %29 = vector.multi_reduction <maximumf>, %28, %cst_15 [1] : vector<2x4xf32> to vector<2xf32>
    %30 = vector.shape_cast %29 : vector<2xf32> to vector<2x1xf32>
    %31 = vector.broadcast %30 : vector<2x1xf32> to vector<2x4xf32>
    %32 = arith.subf %28, %31 : vector<2x4xf32>
    %33 = math.exp %32 : vector<2x4xf32>
    %cst_16 = arith.constant 0.000000e+00 : f32
    %34 = vector.broadcast %cst_16 : f32 to vector<2x4xf32>
    %35 = arith.select %26, %33, %34 : vector<2x4xi1>, vector<2x4xf32>
    %cst_17 = arith.constant dense<0.000000e+00> : vector<2xf32>
    %36 = vector.multi_reduction <add>, %35, %cst_17 [1] : vector<2x4xf32> to vector<2xf32>
    %37 = vector.shape_cast %36 : vector<2xf32> to vector<2x1xf32>
    %38 = vector.broadcast %37 : vector<2x1xf32> to vector<2x4xf32>
    %39 = arith.divf %35, %38 : vector<2x4xf32>
    %40 = vector.shape_cast %39 : vector<2x4xf32> to vector<2x1x4xf32>
    "tpu.trace_start"() <{level = 10 : i32, message = "bqk,bkd->bqd"}> : () -> ()
    %cst_18 = arith.constant dense<0.000000e+00> : vector<2x1x64xf32>
    %41 = tpu.matmul %40, %1, %cst_18 {dimension_numbers = #tpu.dot_dimension_numbers<[2], [1], [1], [2], [0, 0, 0, 1, 1, 2], [0], [0]>} : vector<2x1x4xf32>, vector<2x4x64xf32>, vector<2x1x64xf32> -> vector<2x1x64xf32>
    "tpu.trace_stop"() : () -> ()
    %42 = vector.shape_cast %41 : vector<2x1x64xf32> to vector<2x64xf32>
    %c0_19 = arith.constant 0 : index
    %c0_20 = arith.constant 0 : index
    %43 = vector.load %arg6[%c0_19, %c0_20] : memref<64x32xf32, #tpu.memory_space<vmem>>, vector<64x32xf32>
    %cst_21 = arith.constant dense<0.000000e+00> : vector<2x32xf32>
    %44 = tpu.matmul %42, %43, %cst_21 {dimension_numbers = #tpu.dot_dimension_numbers<[1], [0], [0], [1], [0, 0, 1, 1], [], []>} : vector<2x64xf32>, vector<64x32xf32>, vector<2x32xf32> -> vector<2x32xf32>
    %c0_22 = arith.constant 0 : index
    %c0_23 = arith.constant 0 : index
    %45 = vector.load %arg7[%c0_22, %c0_23] : memref<1x32xf32, #tpu.memory_space<vmem>>, vector<1x32xf32>
    %46 = vector.broadcast %45 : vector<1x32xf32> to vector<2x32xf32>
    %47 = arith.addf %44, %46 : vector<2x32xf32>
    %cst_24 = arith.constant 0.000000e+00 : f32
    %48 = vector.broadcast %cst_24 : f32 to vector<2x32xf32>
    %49 = arith.maximumf %47, %48 : vector<2x32xf32>
    %c0_25 = arith.constant 0 : index
    %c0_26 = arith.constant 0 : index
    %c0_27 = arith.constant 0 : index
    %50 = vector.load %arg8[%c0_25, %c0_26, %c0_27] : memref<1x2x32xf32, #tpu.memory_space<vmem>>, vector<1x2x32xf32>
    %51 = vector.shape_cast %50 : vector<1x2x32xf32> to vector<2x32xf32>
    %52 = vector.shape_cast %49 : vector<2x32xf32> to vector<1x2x32xf32>
    tpu.vector_store %arg8[%c0_25, %c0_26, %c0_27], %52 {strides = array<i32>} : memref<1x2x32xf32, #tpu.memory_space<vmem>>, vector<1x2x32xf32>,
    %c0_28 = arith.constant 0 : index
    %c0_29 = arith.constant 0 : index
    %c0_30 = arith.constant 0 : index
    %53 = vector.load %arg9[%c0_28, %c0_29, %c0_30] : memref<1x2x4xf32, #tpu.memory_space<vmem>>, vector<1x2x4xf32>
    %54 = vector.shape_cast %53 : vector<1x2x4xf32> to vector<2x4xf32>
    %55 = vector.shape_cast %39 : vector<2x4xf32> to vector<1x2x4xf32>
    tpu.vector_store %arg9[%c0_28, %c0_29, %c0_30], %55 {strides = array<i32>} : memref<1x2x4xf32, #tpu.memory_space<vmem>>, vector<1x2x4xf32>,
    return
  }
  func.func @transform_0(%arg0: i32, %arg1: i32) -> (i32, i32, i32, i32) {
    %c8_i32 = arith.constant 8 : i32
    %0 = arith.muli %arg0, %c8_i32 : i32
    %1 = arith.addi %0, %arg1 : i32
    %c0_i32 = arith.constant 0 : i32
    %c0_i32_0 = arith.constant 0 : i32
    %c0_i32_1 = arith.constant 0 : i32
    %c0_i32_2 = arith.constant 0 : i32
    return %1, %c0_i32, %c0_i32_0, %c0_i32_1 : i32, i32, i32, i32
  }
  func.func @transform_1(%arg0: i32, %arg1: i32) -> (i32, i32, i32) {
    %c8_i32 = arith.constant 8 : i32
    %0 = arith.muli %arg0, %c8_i32 : i32
    %1 = arith.addi %0, %arg1 : i32
    %c0_i32 = arith.constant 0 : i32
    %c0_i32_0 = arith.constant 0 : i32
    %c0_i32_1 = arith.constant 0 : i32
    return %1, %c0_i32, %c0_i32_0 : i32, i32, i32
  }
  func.func @transform_2(%arg0: i32, %arg1: i32) -> (i32, i32) {
    %c0_i32 = arith.constant 0 : i32
    %c0_i32_0 = arith.constant 0 : i32
    %c0_i32_1 = arith.constant 0 : i32
    return %c0_i32, %c0_i32_0 : i32, i32
  }
  func.func @transform_3(%arg0: i32, %arg1: i32) -> (i32, i32) {
    %c0_i32 = arith.constant 0 : i32
    %c0_i32_0 = arith.constant 0 : i32
    %c0_i32_1 = arith.constant 0 : i32
    return %c0_i32, %c0_i32_0 : i32, i32
  }
  func.func @transform_4(%arg0: i32, %arg1: i32) -> (i32, i32) {
    %c0_i32 = arith.constant 0 : i32
    %c0_i32_0 = arith.constant 0 : i32
    %c0_i32_1 = arith.constant 0 : i32
    return %c0_i32, %c0_i32_0 : i32, i32
  }
  func.func @transform_5(%arg0: i32, %arg1: i32) -> (i32, i32) {
    %c0_i32 = arith.constant 0 : i32
    %c0_i32_0 = arith.constant 0 : i32
    %c0_i32_1 = arith.constant 0 : i32
    return %c0_i32, %c0_i32_0 : i32, i32
  }
  func.func @transform_6(%arg0: i32, %arg1: i32) -> (i32, i32, i32) {
    %c8_i32 = arith.constant 8 : i32
    %0 = arith.muli %arg0, %c8_i32 : i32
    %1 = arith.addi %0, %arg1 : i32
    %c0_i32 = arith.constant 0 : i32
    %c0_i32_0 = arith.constant 0 : i32
    %c0_i32_1 = arith.constant 0 : i32
    return %1, %c0_i32, %c0_i32_0 : i32, i32, i32
  }
  func.func @transform_7(%arg0: i32, %arg1: i32) -> (i32, i32, i32) {
    %c8_i32 = arith.constant 8 : i32
    %0 = arith.muli %arg0, %c8_i32 : i32
    %1 = arith.addi %0, %arg1 : i32
    %c0_i32 = arith.constant 0 : i32
    %c0_i32_0 = arith.constant 0 : i32
    %c0_i32_1 = arith.constant 0 : i32
    return %1, %c0_i32, %c0_i32_0 : i32, i32, i32
  }
}

module attributes {stable_mosaic.version = 11 : i64} {
  func.func @_head_kernel(%arg0: memref<16x128xf32, #tpu.memory_space<vmem>>, %arg1: memref<128x4xf32, #tpu.memory_space<vmem>>, %arg2: memref<1x1xf32, #tpu.memory_space<vmem>>, %arg3: memref<4x128xf32, #tpu.memory_space<vmem>>, %arg4: memref<128x7xf32, #tpu.memory_space<vmem>>, %arg5: memref<1x7xf32, #tpu.memory_space<vmem>>, %arg6: memref<16x7xf32, #tpu.memory_space<vmem>>) attributes {dimension_semantics = [], scalar_prefetch = 0 : i64, scratch_operands = 0 : i64, tpu.core_type = #tpu.core_type<tc>} {
    %c0 = arith.constant 0 : index
    %c0_0 = arith.constant 0 : index
    %0 = vector.load %arg0[%c0, %c0_0] : memref<16x128xf32, #tpu.memory_space<vmem>>, vector<16x128xf32>
    %1 = math.tanh %0 : vector<16x128xf32>
    %c0_1 = arith.constant 0 : index
    %c0_2 = arith.constant 0 : index
    %2 = vector.load %arg1[%c0_1, %c0_2] : memref<128x4xf32, #tpu.memory_space<vmem>>, vector<128x4xf32>
    %cst = arith.constant dense<0.000000e+00> : vector<16x4xf32>
    %3 = tpu.matmul %1, %2, %cst {dimension_numbers = #tpu.dot_dimension_numbers<[1], [0], [0], [1], [0, 0, 1, 1], [], []>} : vector<16x128xf32>, vector<128x4xf32>, vector<16x4xf32> -> vector<16x4xf32>
    %c0_3 = arith.constant 0 : index
    %c0_4 = arith.constant 0 : index
    %4 = vector.load %arg2[%c0_3, %c0_4] : memref<1x1xf32, #tpu.memory_space<vmem>>, vector<1x1xf32>
    %5 = vector.broadcast %4 : vector<1x1xf32> to vector<16x4xf32>
    %6 = arith.addf %3, %5 : vector<16x4xf32>
    %cst_5 = arith.constant dense<0xFF800000> : vector<16xf32>
    %7 = vector.multi_reduction <maximumf>, %6, %cst_5 [1] : vector<16x4xf32> to vector<16xf32>
    %8 = vector.shape_cast %7 : vector<16xf32> to vector<16x1xf32>
    %9 = vector.broadcast %8 : vector<16x1xf32> to vector<16x4xf32>
    %10 = arith.subf %6, %9 : vector<16x4xf32>
    %11 = math.exp %10 : vector<16x4xf32>
    %cst_6 = arith.constant dense<0.000000e+00> : vector<16xf32>
    %12 = vector.multi_reduction <add>, %11, %cst_6 [1] : vector<16x4xf32> to vector<16xf32>
    %13 = vector.shape_cast %12 : vector<16xf32> to vector<16x1xf32>
    %14 = vector.broadcast %13 : vector<16x1xf32> to vector<16x4xf32>
    %15 = arith.divf %11, %14 : vector<16x4xf32>
    %c0_7 = arith.constant 0 : index
    %c0_8 = arith.constant 0 : index
    %16 = vector.load %arg3[%c0_7, %c0_8] : memref<4x128xf32, #tpu.memory_space<vmem>>, vector<4x128xf32>
    %cst_9 = arith.constant dense<0.000000e+00> : vector<16x128xf32>
    %17 = tpu.matmul %15, %16, %cst_9 {dimension_numbers = #tpu.dot_dimension_numbers<[1], [0], [0], [1], [0, 0, 1, 1], [], []>} : vector<16x4xf32>, vector<4x128xf32>, vector<16x128xf32> -> vector<16x128xf32>
    %18 = arith.mulf %0, %17 : vector<16x128xf32>
    %c0_10 = arith.constant 0 : index
    %c0_11 = arith.constant 0 : index
    %19 = vector.load %arg4[%c0_10, %c0_11] : memref<128x7xf32, #tpu.memory_space<vmem>>, vector<128x7xf32>
    %cst_12 = arith.constant dense<0.000000e+00> : vector<16x7xf32>
    %20 = tpu.matmul %18, %19, %cst_12 {dimension_numbers = #tpu.dot_dimension_numbers<[1], [0], [0], [1], [0, 0, 1, 1], [], []>} : vector<16x128xf32>, vector<128x7xf32>, vector<16x7xf32> -> vector<16x7xf32>
    %c0_13 = arith.constant 0 : index
    %c0_14 = arith.constant 0 : index
    %21 = vector.load %arg5[%c0_13, %c0_14] : memref<1x7xf32, #tpu.memory_space<vmem>>, vector<1x7xf32>
    %22 = vector.broadcast %21 : vector<1x7xf32> to vector<16x7xf32>
    %23 = arith.addf %20, %22 : vector<16x7xf32>
    %cst_15 = arith.constant dense<0xFF800000> : vector<16xf32>
    %24 = vector.multi_reduction <maximumf>, %23, %cst_15 [1] : vector<16x7xf32> to vector<16xf32>
    %25 = vector.shape_cast %24 : vector<16xf32> to vector<16x1xf32>
    %26 = vector.broadcast %25 : vector<16x1xf32> to vector<16x7xf32>
    %27 = arith.subf %23, %26 : vector<16x7xf32>
    %28 = math.exp %27 : vector<16x7xf32>
    %cst_16 = arith.constant dense<0.000000e+00> : vector<16xf32>
    %29 = vector.multi_reduction <add>, %28, %cst_16 [1] : vector<16x7xf32> to vector<16xf32>
    %30 = vector.shape_cast %29 : vector<16xf32> to vector<16x1xf32>
    %31 = math.log %30 : vector<16x1xf32>
    %32 = arith.addf %25, %31 : vector<16x1xf32>
    %33 = vector.broadcast %32 : vector<16x1xf32> to vector<16x7xf32>
    %34 = arith.subf %23, %33 : vector<16x7xf32>
    %c0_17 = arith.constant 0 : index
    %c0_18 = arith.constant 0 : index
    %35 = vector.load %arg6[%c0_17, %c0_18] : memref<16x7xf32, #tpu.memory_space<vmem>>, vector<16x7xf32>
    tpu.vector_store %arg6[%c0_17, %c0_18], %34 {strides = array<i32>} : memref<16x7xf32, #tpu.memory_space<vmem>>, vector<16x7xf32>,
    return
  }
}

</mosaic_0001>

<bundles_post_ra>
// kernel: our_model_forward.10
= control target key start
LH: loop header
LB: loop body
LE: loop exit
PB: predicated region body
PF: predicated region fallthrough
CT: control target
= control target key end

     0   :  { %s1340_s24 = smov 0   ;;  %s1342_s25 = smov 0   ;;  %s1522_s0 = inlined_call_operand.vmem [shape: f32[24,2,4,64], index: 0, kind: input, shape index: {}]   ;;  %s1523_s1 = inlined_call_operand.vmem [shape: f32[24,2,64], index: 1, kind: input, shape index: {}]   ;;  %s1524_s2 = inlined_call_operand.vmem [shape: f32[64,64], index: 2, kind: input, shape index: {}]   ;;  %s1525_s3 = inlined_call_operand.vmem [shape: f32[1,64], index: 3, kind: input, shape index: {}]   ;;  %s1526_s4 = inlined_call_operand.vmem [shape: f32[64,32], index: 4, kind: input, shape index: {}]   ;;  %s1527_s5 = inlined_call_operand.vmem [shape: f32[1,32], index: 5, kind: input, shape index: {}]   ;;  %s1528_s6 = inlined_call_operand.vmem [shape: f32[24,2,32], index: 6, kind: output, shape index: {0}]   ;;  %s1529_s7 = inlined_call_operand.vmem [shape: f32[24,2,4], index: 7, kind: output, shape index: {1}]  }
   0x1   :  { %s1344_s26 = smov 0   ;;  %s1346_s27 = smov 0  }
   0x2   :  { %s1348_s28 = smov 0  }
   0x3 LB: > { %s27_s29 = sadd.s32 1, %s1286_s26  ;;  %s30_s30 = sadd.s32 1, %s1290_s27  ;;  %s1294_s28 = sphi %s1348_s28, %s18_s28   ;;  %s1290_s27 = sphi %s1346_s27, %s1537_s27   ;;  %s1286_s26 = sphi %s1344_s26, %s1536_s26   ;;  %s1282_s25 = sphi %s1342_s25, %s1535_s25   ;;  %s1278_s24 = sphi %s1340_s24, %s1534_s24  }
   0x4   : > { %p28_p0 = scmp.ge.s32.totalorder %s27_s29, 8  ;;  %p1067_p1 = scmp.ge.s32.totalorder %s1294_s28, 1 }
   0x5   : > { %p285_p2 = scmp.lt.s32.totalorder %s1294_s28, 25 }
   0x6   : > { %s1539_s29 = smov (%p28_p0, %s27_s29), 0  ;;  %s1541_s30 = smov (!%p28_p0, %s30_s30), %s1290_s27 }
   0x7   : > { %p286_p3 = pnand %p1067_p1, %p285_p2  ;;  %p32_p4 = scmp.ge.s32.totalorder %s1541_s30, 3 }
   0x8   : > { %v368_v0 = vld [vmem:[%s1524_s2] sm:$0xff] (!%p286_p3)  ;;  %v369_v1 = vld [vmem:[%s1524_s2 + $0x8] sm:$0xff] (!%p286_p3)  ;;  %v370_v2 = vld [vmem:[%s1524_s2 + $0x10] sm:$0xff] (!%p286_p3)  ;;  %v1296_v3 = vmov (!%p286_p3), 0.0|0.0   ;;  %vm1297_vm0 = vmmov (!%p286_p3), 0   ;;  %v1298_v6 = vmov (!%p286_p3), 0.0   ;;  %v461_v18 = vlaneseq (!%p286_p3) }
   0x9   : > { %s1543_s30 = smov (%p32_p4, %s1541_s30), 0  ;;  %289 = sbr.rel (%p286_p3) target bundleno = 1220 (0x4c4), region = 44 }
   0xa   : > { %1184 = vmatprep.subr.bf16.mxu0 (!%p286_p3), %v1296_v3  ;;  %v1185_v4 = vpack.c.bf16 (!%p286_p3), %v369_v1, %v368_v0  ;;  %v371_v5 = vld [vmem:[%s1524_s2 + $0x18] sm:$0xff] (!%p286_p3)  ;;  %1142 = vmatprep.mubr.msk.f32.mxu0 (!%p286_p3), %vm1297_vm0, %v1298_v6  ;;  %s1068_s16 = sshll.u32 (!%p286_p3), %s1282_s25, 3  ;;  %v372_v8 = vld [vmem:[%s1524_s2 + $0x20] sm:$0xff] (!%p286_p3)  ;;  %v373_v9 = vld [vmem:[%s1524_s2 + $0x28] sm:$0xff] (!%p286_p3)  ;;  %vm383_vm1 = vcmask (!%p286_p3), 523264   ;;  %v462_v20 = vshrl.u32 (!%p286_p3), %v461_v18, 7 }
   0xb   : > { %s333_s17 = sadd.s32 (!%p286_p3), %s1278_s24, %s1068_s16  ;;  %1145 = vmatprep.subr.mxu1 (!%p286_p3), %v1298_v6  ;;  %1147 = vmatprep.mubr.msk.f32.mxu1 (!%p286_p3), %vm1297_vm0, %v1298_v6  ;;  %v1188_v7 = vpack.c.bf16 (!%p286_p3), %v371_v5, %v370_v2  ;;  %v1191_v10 = vpack.c.bf16 (!%p286_p3), %v373_v9, %v372_v8  ;;  %v374_v11 = vld [vmem:[%s1524_s2 + $0x30] sm:$0xff] (!%p286_p3)  ;;  %v375_v12 = vld [vmem:[%s1524_s2 + $0x38] sm:$0xff] (!%p286_p3)  ;;  %v1299_v16 = vmov (!%p286_p3), 1966171168   ;;  %v1077_v21 = vld [vmem:[%s1525_s3] ss:$0 sm:$0xff] (!%p286_p3) }
   0xc   : > { %1186 = vmatpush3.bf16.msra.mxu0 (!%p286_p3), %v1185_v4  ;;  %p334_p5 = scmp.lt.s32.totalorder (!%p286_p3), %s333_s17, 23  ;;  %v1194_v13 = vpack.c.bf16 (!%p286_p3), %v375_v12, %v374_v11  ;;  %v459_v17 = vunpack.c.l.s4 (!%p286_p3), %v1299_v16  ;;  %s635_s21 = sadd.s32 (!%p286_p3), 2, %s1278_s24  ;;  %v639_v31 = vand.u32 (!%p286_p3), 127, %v461_v18  ;;  %vm650_vm4 = vcmask (!%p286_p3), 1041409   ;;  %v840_v52 = vld [vmem:[%s1526_s4] sm:$0xff] (!%p286_p3)  ;;  %v841_v53 = vld [vmem:[%s1526_s4 + $0x8] sm:$0xff] (!%p286_p3) }
   0xd   : > { %1187 = vmatprep.subr.bf16.mxu0 (!%p286_p3), %v1296_v3  ;;  %p636_p8 = scmp.lt.s32.totalorder (!%p286_p3), %s635_s21, 8  ;;  %vm654_vm6 = vcmask (!%p286_p3), 25600   ;;  %vm693_vm7 = vcmask (!%p286_p3), 1043456   ;;  %v842_v54 = vld [vmem:[%s1526_s4 + $0x10] sm:$0xff] (!%p286_p3)  ;;  %v1197_v55 = vpack.c.bf16 (!%p286_p3), %v841_v53, %v840_v52  ;;  %v843_v56 = vld [vmem:[%s1526_s4 + $0x18] sm:$0xff] (!%p286_p3)  ;;  %vm690_vm8 = vcmask (!%p286_p3), 31744  }
   0xe   : > { %v460_v19 = vunpack.c.0.s8 (!%p286_p3), %v459_v17  ;;  %v1200_v57 = vpack.c.bf16 (!%p286_p3), %v843_v56, %v842_v54  ;;  %v844_v1 = vld [vmem:[%s1526_s4 + $0x20] sm:$0xff] (!%p286_p3)  ;;  %v845_v2 = vld [vmem:[%s1526_s4 + $0x28] sm:$0xff] (!%p286_p3)  ;;  %v846_v5 = vld [vmem:[%s1526_s4 + $0x30] sm:$0xff] (!%p286_p3)  ;;  %vm932_vm9 = vcmask (!%p286_p3), 254976  }
   0xf   : > { %v1203_v4 = vpack.c.bf16 (!%p286_p3), %v845_v2, %v844_v1 }
  0x10   : > { %s1545_s17 = smov (!%p334_p5, %s333_s17), 23  ;;  %1189 = vmatpush3.bf16.msra.mxu0 %v1188_v7  ;;  %v1424_v22 = vsub.s32 %v460_v19, %v462_v20  ;;  %s1547_s21 = smov (!%p636_p8, %s635_s21), 8 }
  0x11   : > { %1190 = vmatprep.subr.bf16.mxu0 %v1296_v3  ;;  %s1405_s9 = sshll.u32 %s1545_s17, 1  ;;  %s1097_s13 = sshll.u32 %s1545_s17, 3  ;;  %v644_v35 = vstv %s1547_s21 }
  0x12   : > { %s346_s12 = scalar_lea.vmem %s1523_s1, %s1405_s9  ;;  %s338_s16 = scalar_lea.vmem %s1522_s0, %s1097_s13 }
  0x13   : > { %v367_v14 = vld [vmem:[%s346_s12] sm:$0x3]  ;;  %v1428_v29 = vld [vmem:[%s338_s16 + $0x4] sm:$0xf]  ;;  %s1083_s17 = sadd.s32 4294967294, %s1278_s24  ;;  %s354_s12 = scalar_lea.vmem %s1528_s6, %s1405_s9 }
  0x14   : > { %1192 = vmatpush3.bf16.msra.mxu0 %v1191_v10  ;;  %v365_v15 = vld [vmem:[%s338_s16] sm:$0xf]  ;;  %p631_p6 = scmp.gt.s32.totalorder %s1083_s17, 0  ;;  %p1084_p7 = scmp.lt.s32.totalorder %s1083_s17, 4 }
  0x15   : > { %1193 = vmatprep.subr.bf16.mxu0 %v1296_v3  ;;  %1146 = vmatpush3.xpose.msk.msra.mxu1 %vm383_vm1, %v365_v15  ;;  %s362_s16 = scalar_lea.vmem %s1529_s7, %s1405_s9 }
  0x16   : > { %1150 = vmatprep.subr.mxu1 %v1298_v6  ;;  %s632_s20 = scalar_select %p631_p6, %s1083_s17, 0 }
  0x18   : > { %1195 = vmatpush3.bf16.msra.mxu0 %v1194_v13  ;;  %s1099_s22 = scalar_select %p1084_p7, %s632_s20, 4  ;;  %v642_v34 = vstv %s632_s20 }
  0x19   : > { %1196 = vmatprep.subr.bf16.mxu0 %v1296_v3 }
  0x1a   : > { %v640_v32 = vstv %s1099_s22 }
  0x1b   : > { %1143 = vmatmul.mubr.msk.f32.vlgmr.msra.gmra.mrb[0].mxu0 %vm383_vm1, %v367_v14  ;;  %v641_v33 = vadd.s32 %v640_v32, %v639_v31 }
  0x1c   : > { %1181 = vmatprep.mubr.msk.f32.mxu0 %vm1297_vm0, %v1298_v6  ;;  %1198 = vmatpush3.bf16.msra.mxu0 %v1197_v55 }
  0x1d   : > { %vm1442_vm2 = vcmp.ge.s32.totalorder %v641_v33, %v642_v34  ;;  %vm1446_vm3 = vcmp.lt.s32.totalorder %v641_v33, %v644_v35  ;;  %1199 = vmatprep.subr.bf16.mxu0 %v1296_v3 }
  0x1e   : > { %vm646_vm5 = vmand %vm1442_vm2, %vm1446_vm3 }
  0x20   : > { %1201 = vmatpush3.bf16.msra.mxu0 %v1200_v57 }
  0x21   : > { %1202 = vmatprep.subr.bf16.mxu0 %v1296_v3 }
  0x24   : > { %1204 = vmatpush3.bf16.msra.mxu0 %v1203_v4 }
  0x25   : > { %1205 = vmatprep.subr.bf16.mxu0 %v1296_v3  ;;  %v1093_v3 = vld [vmem:[%s1527_s5] ss:$0 sm:$0xff] }
  0xee   : > { %v453_v23 = vpop.f32.mrb[0].mxu0 }
  0xef   : > { %v454_v24 = vadd.f32 %v1077_v21, %v453_v23  ;;  %v1144_v25 = vpop.f32.mrb[1].mxu0 }
  0xf1   : > { %v464_v26 = vrot.slane %v454_v24, %v1424_v22 }
  0xf3   : > { %v465_v27 = vcombine.high %v464_v26, %v464_v26  ;;  %v472_v28 = vrot.slane %v464_v26, %v1424_v22 }
  0xf5   : > { %1148 = vmatmul.mubr.msk.f32.vlgmr.msra.gmra.mrb[0].mxu1 %vm383_vm1, %v472_v28  ;;  %v479_v30 = vrot.slane %v465_v27, %v1424_v22 }
  0xf6   : > { %1151 = vmatpush3.xpose.msk.msra.mxu1 %vm383_vm1, %v1428_v29  ;;  %1152 = vmatprep.mubr.msk.f32.mxu1 %vm1297_vm0, %v1298_v6 }
  0xf7   : > { %1155 = vmatprep.subr.mxu1 %v1298_v6 }
  0xf9   : > { %1153 = vmatmul.mubr.msk.f32.vlgmr.msra.gmra.mrb[2].mxu1 %vm383_vm1, %v479_v30 }
  0xfa   : > { %1157 = vmatprep.mubr.msk.f32.mxu1 %vm1297_vm0, %v1298_v6  ;;  %1156 = vmatpush3.msk.msra.mxu1 %vm693_vm7, %v365_v15 }
  0xfb   : > { %1160 = vmatprep.subr.mxu1 %v1298_v6 }
 0x1c8   : > { %v551_v36 = vpop.f32.mrb[0].mxu1 }
 0x1c9   : > { %v1149_v37 = vpop.f32.mrb[1].mxu1 }
 0x1cc   : > { %v626_v40 = vpop.f32.mrb[2].mxu1 }
 0x1cd   : > { %v649_v41 = vrot.slane %v626_v40, 7  ;;  %v1154_v42 = vpop.f32.mrb[3].mxu1 }
 0x1cf   : > { %v651_v43 = vsel %vm650_vm4, %v649_v41, %v551_v36 }
 0x1d0   : > { %v653_v44 = vsel %vm646_vm5, %v651_v43, -1e+09 }
 0x1d1   : > { %v655_v45 = vsel %vm654_vm6, %v653_v44, -inf }
 0x1d2   : > { %656 = vmax.xlane.f32.xlu0 %v655_v45 }
 0x25f   : > { %v657_v46 = vpop.xlane.xlu0 %656 }
 0x260   : > { %v658_v47 = vsub.f32 %v653_v44, %v657_v46 }
 0x262   : > { %v659_v48 = vmul.f32 1.442695, %v658_v47 }
 0x264   : > { %1252 = vpow2.f32 %v659_v48 }
 0x26e   : > { %v1253_v49 = vpop.eup %1252 }
 0x26f   : > { %v661_v50 = vsel %vm646_vm5, %v1253_v49, 0.0 }
 0x270   : > { %v662_v51 = vsel %vm654_vm6, %v661_v50, 0.0 }
 0x271   : > { %663 = vadd.xlane.f32.xlu0 %v662_v51 }
 0x2fe   : > { %v664_v58 = vpop.xlane.xlu0 %663 }
 0x2ff   : > { %1254 = vrcp.f32 %v664_v58 }
 0x309   : > { %v1255_v59 = vpop.eup %1254 }
 0x30a   : > { %v666_v60 = vmul.f32 %v1255_v59, %v661_v50 }
 0x30c   : > { %v674_v61 = vrot.slane %v666_v60, %v1424_v22  ;;  %934 = vst.msk [vmem:[%s362_s16] sm:$0x3] %vm654_vm6, %v666_v60 }
 0x30e   : > { %v682_v62 = vrot.slane %v674_v61, %v1424_v22  ;;  %v675_v63 = vcombine.high %v674_v61, %v674_v61 }
 0x310   : > { %1158 = vmatmul.mubr.msk.f32.vlgmr.msra.gmra.mrb[4].mxu1 %vm690_vm8, %v682_v62  ;;  %v689_v0 = vrot.slane %v675_v63, %v1424_v22 }
 0x311   : > { %1161 = vmatpush3.msk.msra.mxu1 %vm693_vm7, %v1428_v29  ;;  %1162 = vmatprep.mubr.msk.f32.mxu1 %vm1297_vm0, %v1298_v6  ;;  %v847_v6 = vld [vmem:[%s1526_s4 + $0x38] sm:$0xff] }
 0x312   : > { %v1206_v7 = vpack.c.bf16 %v847_v6, %v846_v5 }
 0x314   : > { %1163 = vmatmul.mubr.msk.f32.vlgmr.msra.gmra.mrb[6].mxu1 %vm690_vm8, %v689_v0  ;;  %1207 = vmatpush3.bf16.msra.mxu0 %v1206_v7 }
 0x3e3   : > { %v762_v8 = vpop.f32.mrb[4].mxu1 }
 0x3e4   : > { %v1159_v9 = vpop.f32.mrb[5].mxu1 }
 0x3e7   : > { %v836_v10 = vpop.f32.mrb[6].mxu1 }
 0x3e8   : > { %v857_v11 = vrot.slane %v836_v10, 7  ;;  %v1164_v12 = vpop.f32.mrb[7].mxu1 }
 0x3ea   : > { %v858_v13 = vsel %vm650_vm4, %v857_v11, %v762_v8 }
 0x3eb   : > { %1182 = vmatmul.mubr.msk.f32.vlgmr.msra.gmra.mrb[2].mxu0 %vm383_vm1, %v858_v13 }
 0x4be   : > { %v927_v14 = vpop.f32.mrb[2].mxu0 }
 0x4bf   : > { %v928_v15 = vadd.f32 %v1093_v3, %v927_v14  ;;  %v1183_v16 = vpop.f32.mrb[3].mxu0 }
 0x4c1   : > { %v931_v17 = vmax.f32 %v928_v15, 0.0 }
 0x4c3   : > { %933 = vst.msk [vmem:[%s354_s12] sm:$0x3] %vm932_vm9, %v931_v17 }
 0x4c4 PF: > { %s18_s28 = sadd.s32 1, %s1294_s28   ;;  %s1534_s24 = smov %s1286_s26 }
 0x4c5   : > { %p15_p9 = scmp.ge.s32.totalorder %s18_s28, 26   ;;  %s1535_s25 = smov %s1290_s27 }
 0x4c6   : > { %s1536_s26 = smov %s1539_s29  ;;  %s1537_s27 = smov %s1543_s30 }
 0x4c7   :  { %17 = sbr.rel (!%p15_p9) target bundleno = 3 (0x3), region = 89 }

// kernel: our_model_forward.8
= control target key start
LH: loop header
LB: loop body
LE: loop exit
PB: predicated region body
PF: predicated region fallthrough
CT: control target
= control target key end

     0   :  { %s5219_s6 = smov 1   ;;  %s5220_s10 = smov 2   ;;  %s6226_s0 = inlined_call_operand.smem [shape: u32[42], index: -1, kind: input, shape index: {}] }
   0x1   :  { %s5278_s5 = sld [smem:[%s6226_s0]]   ;;  %s5221_s14 = smov 3  }
   0x2   :  { %s5283_s9 = sld [smem:[%s6226_s0 + %s5219_s6]]   ;;  %s5222_s18 = smov 4  }
   0x3   :  { %s5288_s13 = sld [smem:[%s6226_s0 + %s5220_s10]]   ;;  %s5223_s22 = smov 5  }
   0x4   :  { %s5293_s17 = sld [smem:[%s6226_s0 + %s5221_s14]]   ;;  %s5224_s26 = smov 6  }
   0x5   :  { %s5298_s21 = sld [smem:[%s6226_s0 + %s5222_s18]]   ;;  %s5225_s30 = smov 7  }
   0x6   :  { %s5303_s25 = sld [smem:[%s6226_s0 + %s5223_s22]]   ;;  %s5226_s4 = smov 8  }
   0x7   :  { %6248 = sst [smem:[#allocation10_spill]] %s5278_s5  ;;  %s5227_s10 = smov 9  }
   0x8   :  { %s5308_s29 = sld [smem:[%s6226_s0 + %s5224_s26]]   ;;  %s5228_s15 = smov 10  }
   0x9   :  { %s5313_s3 = sld [smem:[%s6226_s0 + %s5225_s30]]   ;;  %s5229_s20 = smov 11  }
   0xa   :  { %s5318_s8 = sld [smem:[%s6226_s0 + %s5226_s4]]   ;;  %s5230_s26 = smov 12  }
   0xb   :  { %s5323_s14 = sld [smem:[%s6226_s0 + %s5227_s10]]   ;;  %s5231_s1 = smov 13  }
   0xc   :  { %6249 = sst [smem:[#allocation11_spill]] %s5303_s25  ;;  %s5232_s7 = smov 14  }
   0xd   :  { %s5328_s19 = sld [smem:[%s6226_s0 + %s5228_s15]]   ;;  %s5233_s15 = smov 15  }
   0xe   :  { %6250 = sst [smem:[#allocation12_spill]] %s5308_s29  ;;  %s5234_s22 = smov 16  }
   0xf   :  { %6251 = sst [smem:[#allocation13_spill]] %s5313_s3  ;;  %s5235_s28 = smov 17  }
  0x10   :  { %6252 = sst [smem:[#allocation14_spill]] %s5318_s8  ;;  %s5252_s10 = smov 35  }
  0x11   :  { %6253 = sst [smem:[#allocation15_spill]] %s5323_s14  ;;  %s5253_s16 = smov 36  }
  0x12   :  { %s5333_s24 = sld [smem:[%s6226_s0 + %s5229_s20]]   ;;  %s5254_s23 = smov 37  }
  0x13   :  { %6254 = sst [smem:[#allocation16_spill]] %s5328_s19 }
  0x14   :  { %s5338_s30 = sld [smem:[%s6226_s0 + %s5230_s26]]  }
  0x15   :  { %s5343_s6 = sld [smem:[%s6226_s0 + %s5231_s1]]   ;;  %s5251_s1 = smov 33  }
  0x16   :  { %s5348_s12 = sld [smem:[%s6226_s0 + %s5232_s7]]   ;;  %s5236_s7 = smov 18  }
  0x17   :  { %s5353_s20 = sld [smem:[%s6226_s0 + %s5233_s15]]   ;;  %s5237_s15 = smov 19  }
  0x18   :  { %6255 = sst [smem:[#allocation17_spill]] %s5333_s24 }
  0x19   :  { %s5358_s27 = sld [smem:[%s6226_s0 + %s5234_s22]]   ;;  %s5238_s22 = smov 20  }
  0x1a   :  { %6256 = sst [smem:[#allocation18_spill]] %s5338_s30 }
  0x1b   :  { %6257 = sst [smem:[#allocation19_spill]] %s5343_s6 }
  0x1c   :  { %6258 = sst [smem:[#allocation20_spill]] %s5348_s12 }
  0x1d   :  { %6259 = sst [smem:[#allocation21_spill]] %s5353_s20 }
  0x1e   :  { %s5363_s4 = sld [smem:[%s6226_s0 + %s5235_s28]]   ;;  %s5239_s28 = smov 21  }
  0x1f   :  { %6260 = sst [smem:[#allocation22_spill]] %s5358_s27 }
  0x20   :  { %s5368_s14 = sld [smem:[%s6226_s0 + %s5236_s7]]   ;;  %s5240_s7 = smov 22  }
  0x21   :  { %s5373_s19 = sld [smem:[%s6226_s0 + %s5237_s15]]   ;;  %s5241_s15 = smov 23  }
  0x22   :  { %s5378_s25 = sld [smem:[%s6226_s0 + %s5238_s22]]   ;;  %s5242_s22 = smov 24  }
  0x23   :  { %s5383_s29 = sld [smem:[%s6226_s0 + %s5239_s28]]   ;;  %s5243_s28 = smov 25  }
  0x24   :  { %6261 = sst [smem:[#allocation23_spill]] %s5363_s4 }
  0x25   :  { %s5388_s4 = sld [smem:[%s6226_s0 + %s5240_s7]]   ;;  %s5244_s7 = smov 26  }
  0x26   :  { %6262 = sst [smem:[#allocation24_spill]] %s5368_s14 }
  0x27   :  { %6263 = sst [smem:[#allocation25_spill]] %s5373_s19 }
  0x28   :  { %6264 = sst [smem:[#allocation26_spill]] %s5378_s25 }
  0x29   :  { %6265 = sst [smem:[#allocation27_spill]] %s5383_s29 }
  0x2a   :  { %s5393_s19 = sld [smem:[%s6226_s0 + %s5241_s15]]   ;;  %s5245_s15 = smov 27  }
  0x2b   :  { %6266 = sst [smem:[#allocation28_spill]] %s5388_s4 }
  0x2c   :  { %s5398_s25 = sld [smem:[%s6226_s0 + %s5242_s22]]   ;;  %s5246_s22 = smov 28  }
  0x2d   :  { %s5403_s29 = sld [smem:[%s6226_s0 + %s5243_s28]]   ;;  %s5247_s28 = smov 29  }
  0x2e   :  { %s5408_s4 = sld [smem:[%s6226_s0 + %s5244_s7]]   ;;  %s5248_s7 = smov 30  }
  0x2f   :  { %s5441_s12 = sld [smem:[%s6226_s0 + %s5251_s1]]   ;;  %s5255_s1 = smov 38  }
  0x30   :  { %6267 = sst [smem:[#allocation29_spill]] %s5393_s19 }
  0x31   :  { %s5413_s19 = sld [smem:[%s6226_s0 + %s5245_s15]]   ;;  %s5249_s15 = smov 31  }
  0x32   :  { %6268 = sst [smem:[#allocation30_spill]] %s5398_s25 }
  0x33   :  { %6269 = sst [smem:[#allocation31_spill]] %s5403_s29 }
  0x34   :  { %6270 = sst [smem:[#allocation32_spill]] %s5408_s4 }
  0x35   :  { %s5418_s25 = sld [smem:[%s6226_s0 + %s5246_s22]]   ;;  %s5250_s22 = smov 32  }
  0x36   :  { %s5423_s29 = sld [smem:[%s6226_s0 + %s5247_s28]]   ;;  %s5259_s28 = smov 34  }
  0x37   :  { %s5428_s4 = sld [smem:[%s6226_s0 + %s5248_s7]]  }
  0x38   :  { %s5433_s14 = sld [smem:[%s6226_s0 + %s5249_s15]]  }
  0x39   :  { %s4668_s6 = sld [smem:[%s6226_s0 + %s5250_s22]]  }
  0x3a   :  { %6272 = sst [smem:[#allocation34_spill]] %s5441_s12 }
  0x3b   :  { %s5446_s27 = sld [smem:[%s6226_s0 + %s5252_s10]]   ;;  %s5256_s10 = smov 39  }
  0x3c   :  { %s5451_s20 = sld [smem:[%s6226_s0 + %s5253_s16]]   ;;  %s5257_s16 = smov 40  }
  0x3d   :  { %6271 = sst [smem:[#allocation33_spill]] %s5428_s4 }
  0x3e   :  { %s5456_s30 = sld [smem:[%s6226_s0 + %s5254_s23]]   ;;  %s5258_s23 = smov 41  }
  0x3f   :  { %s5461_s24 = sld [smem:[%s6226_s0 + %s5255_s1]]   ;;  %v89_v0 = vstv %s4668_s6  ;;  %s5481_s6 = smov 0  }
  0x40   :  { %s5466_s12 = sld [smem:[%s6226_s0 + %s5256_s10]]   ;;  %90 = vst [vmem:[#allocation8] sm:$0x1] %v89_v0 }
  0x41   :  { %s5471_s22 = sld [smem:[%s6226_s0 + %s5257_s16]]  }
  0x42   :  { %6273 = sst [smem:[#allocation35_spill]] %s5451_s20 }
  0x43   :  { %s5476_s1 = sld [smem:[%s6226_s0 + %s5258_s23]]  }
  0x44   :  { %s4670_s10 = sld [smem:[%s6226_s0 + %s5259_s28]]  }
  0x45   :  { %6274 = sst [smem:[#allocation36_spill]] %s5461_s24 }
  0x49   :  { %6275 = sst [smem:[#allocation37_spill]] %s5476_s1 }
  0x4a   :  { %v91_v1 = vstv %s4670_s10 }
  0x4b   :  { %92 = vst [vmem:[#allocation9] sm:$0x1] %v91_v1 }
  0x4c LB: > { %s6276_s8 = sld [smem:[#allocation14_spill]]  ;;  %s6277_s3 = sld [smem:[#allocation13_spill]]  ;;  %s5217_s6 = sphi %s5481_s6, %s98_s6  }
  0x4d   : > { %s5487_s20 = sadd.s32 4294967295, %s5217_s6   ;;  %p4682_p0 = scmp.ge.s32.totalorder %s5217_s6, 1 }
  0x4e   : > { %p1155_p1 = scmp.lt.s32.totalorder %s5217_s6, 9 }
  0x50   : > { %p1156_p2 = pnand %p4682_p0, %p1155_p1 }
  0x51   : > { %s6278_s5 = sld [smem:[#allocation10_spill]] (!%p1156_p2)  ;;  %s6279_s1 = sld [smem:[#allocation37_spill]] (!%p1156_p2) }
  0x52   : > { %1159 = sbr.rel (%p1156_p2) target bundleno = 2837 (0xb15), region = 176  ;;  %p1269_p3 = scmp.lt.s32.totalorder (!%p1156_p2), %s5487_s20, 7 }
  0x53   : > { %p4689_p4 = scmp.ne.s32.totalorder (!%p1156_p2), %s5487_s20, 0 }
  0x59   : > { %s1270_s0 = scalar_select %p1269_p3, %s5487_s20, 7 }
  0x5a   : > { %1296 = sbr.rel (%p4689_p4) target bundleno = 102 (0x66), region = 180  ;;  %vm1297_vm0 = vcmask (!%p4689_p4), 123904   ;;  %v5260_v2 = vmov (!%p4689_p4), 0.0  }
  0x5b   : > { %s5493_s24 = sshll.u32 %s1270_s0, 1  ;;  %s4688_s7 = sshll.u32 %s1270_s0, 3  ;;  %1298 = vst.msk [vmem:[#allocation2] sm:$0x3] (!%p4689_p4), %vm1297_vm0, %v5260_v2  ;;  %1299 = vst.msk [vmem:[#allocation2 + $0x2] sm:$0x3] (!%p4689_p4), %vm1297_vm0, %v5260_v2 }
  0x5c   : > { %s5497_s11 = scalar_lea.vmem %s6278_s5, %s5493_s24  ;;  %s5501_s16 = scalar_lea.vmem %s5283_s9, %s5493_s24  ;;  %1300 = vst.msk [vmem:[#allocation2 + $0x4] sm:$0x3] (!%p4689_p4), %vm1297_vm0, %v5260_v2  ;;  %1301 = vst.msk [vmem:[#allocation2 + $0x6] sm:$0x3] (!%p4689_p4), %vm1297_vm0, %v5260_v2 }
  0x5d   : > { %s1280_s15 = scalar_lea.vmem %s5288_s13, %s5493_s24  ;;  %s5510_s26 = scalar_lea.vmem %s6279_s1, %s4688_s7  ;;  %1302 = vst.msk [vmem:[#allocation2 + $0x8] sm:$0x3] (!%p4689_p4), %vm1297_vm0, %v5260_v2  ;;  %1303 = vst.msk [vmem:[#allocation2 + $0xa] sm:$0x3] (!%p4689_p4), %vm1297_vm0, %v5260_v2 }
  0x5e   : > { %1304 = vst.msk [vmem:[#allocation2 + $0xc] sm:$0x3] (!%p4689_p4), %vm1297_vm0, %v5260_v2  ;;  %1305 = vst.msk [vmem:[#allocation2 + $0xe] sm:$0x3] (!%p4689_p4), %vm1297_vm0, %v5260_v2 }
  0x5f   : > { %1306 = vst.msk [vmem:[#allocation3] sm:$0x3] (!%p4689_p4), %vm1297_vm0, %v5260_v2  ;;  %1307 = vst.msk [vmem:[#allocation3 + $0x2] sm:$0x3] (!%p4689_p4), %vm1297_vm0, %v5260_v2 }
  0x60   : > { %1308 = vst.msk [vmem:[#allocation3 + $0x4] sm:$0x3] (!%p4689_p4), %vm1297_vm0, %v5260_v2  ;;  %1309 = vst.msk [vmem:[#allocation3 + $0x6] sm:$0x3] (!%p4689_p4), %vm1297_vm0, %v5260_v2 }
  0x61   : > { %1310 = vst.msk [vmem:[#allocation3 + $0x8] sm:$0x3] %vm1297_vm0, %v5260_v2  ;;  %1311 = vst.msk [vmem:[#allocation3 + $0xa] sm:$0x3] %vm1297_vm0, %v5260_v2 }
  0x62   : > { %1312 = vst.msk [vmem:[#allocation3 + $0xc] sm:$0x3] %vm1297_vm0, %v5260_v2  ;;  %1313 = vst.msk [vmem:[#allocation3 + $0xe] sm:$0x3] %vm1297_vm0, %v5260_v2 }
  0x63   : > { %1314 = vst.msk [vmem:[#allocation4] sm:$0x3] %vm1297_vm0, %v5260_v2  ;;  %1315 = vst.msk [vmem:[#allocation4 + $0x2] sm:$0x3] %vm1297_vm0, %v5260_v2 }
  0x64   : > { %1316 = vst.msk [vmem:[#allocation5] sm:$0x3] %vm1297_vm0, %v5260_v2  ;;  %1317 = vst.msk [vmem:[#allocation5 + $0x2] sm:$0x3] %vm1297_vm0, %v5260_v2 }
  0x65   : > { %1318 = vst.msk [vmem:[#allocation6] sm:$0x3] %vm1297_vm0, %v5260_v2  ;;  %1319 = vst.msk [vmem:[#allocation7] sm:$0x3] %vm1297_vm0, %v5260_v2 }
  0x66 PF: > { %vm1343_vm1 = vcmask 123904   ;;  %v4707_v4 = vld [vmem:[%s5423_s29] ss:$0 sm:$0xff]  ;;  %v1323_v53 = vlaneseq  ;;  %vm1388_vm2 = vcmask 1041409   ;;  %vm2030_vm3 = vcmask 1042434   ;;  %s4690_s28 = sadd.s32 4294967295, %s5487_s20 }
  0x67   : > { %v5539_v6 = vld [vmem:[#allocation2] sm:$0x3]  ;;  %v5546_v11 = vld [vmem:[#allocation2 + $0x2] sm:$0x3]  ;;  %vm2032_vm4 = vcmask 1043459   ;;  %vm2034_vm5 = vcmask 1044484  }
  0x68   : > { %v4705_v7 = vld [vmem:[%s5413_s19] ss:$0 sm:$0xff]  ;;  %v5552_v15 = vld [vmem:[#allocation2 + $0x4] sm:$0x3]  ;;  %v5561_v22 = vld [vmem:[#allocation2 + $0x6] sm:$0x3] }
  0x69   : > { %v1955_v9 = vmul.f32 %v4705_v7, %v5539_v6  ;;  %v1956_v14 = vmul.f32 %v4705_v7, %v5546_v11  ;;  %v1957_v20 = vmul.f32 %v4705_v7, %v5552_v15  ;;  %v1958_v26 = vmul.f32 %v4705_v7, %v5561_v22  ;;  %v5569_v28 = vld [vmem:[#allocation2 + $0x8] sm:$0x3]  ;;  %v5577_v34 = vld [vmem:[#allocation2 + $0xa] sm:$0x3]  ;;  %v5583_v39 = vld [vmem:[#allocation3 + $0xc] sm:$0x3] }
  0x6a   : > { %v1959_v32 = vmul.f32 %v4705_v7, %v5569_v28  ;;  %v1960_v38 = vmul.f32 %v4705_v7, %v5577_v34  ;;  %v5585_v40 = vld [vmem:[#allocation2 + $0xc] sm:$0x3]  ;;  %v2346_v42 = vmul.f32 %v4707_v4, %v5583_v39  ;;  %v5591_v45 = vld [vmem:[#allocation3 + $0xe] sm:$0x3]  ;;  %v5593_v46 = vld [vmem:[#allocation2 + $0xe] sm:$0x3] }
  0x6b   : > { %v5535_v3 = vld [vmem:[#allocation3] sm:$0x3]  ;;  %v5542_v8 = vld [vmem:[#allocation3 + $0x2] sm:$0x3]  ;;  %v1963_v16 = vsel %vm1343_vm1, %v1955_v9, 0.0  ;;  %v1966_v19 = vsel %vm1343_vm1, %v1956_v14, 0.0  ;;  %v1961_v44 = vmul.f32 %v4705_v7, %v5585_v40  ;;  %v2347_v48 = vmul.f32 %v4707_v4, %v5591_v45 }
  0x6c   : > { %v2340_v5 = vmul.f32 %v4707_v4, %v5535_v3  ;;  %v2341_v10 = vmul.f32 %v4707_v4, %v5542_v8  ;;  %v5548_v12 = vld [vmem:[#allocation3 + $0x4] sm:$0x3]  ;;  %1964 = vadd.xlane.f32.xlu0 %v1963_v16  ;;  %v5559_v21 = vld [vmem:[#allocation3 + $0x6] sm:$0x3]  ;;  %v1969_v25 = vsel %vm1343_vm1, %v1957_v20, 0.0  ;;  %v1972_v31 = vsel %vm1343_vm1, %v1958_v26, 0.0 }
  0x6d   : > { %v2342_v18 = vmul.f32 %v4707_v4, %v5548_v12  ;;  %v2343_v24 = vmul.f32 %v4707_v4, %v5559_v21  ;;  %v5567_v27 = vld [vmem:[#allocation3 + $0x8] sm:$0x3]  ;;  %v5575_v33 = vld [vmem:[#allocation3 + $0xa] sm:$0x3]  ;;  %v1975_v37 = vsel %vm1343_vm1, %v1959_v32, 0.0  ;;  %v1978_v43 = vsel %vm1343_vm1, %v1960_v38, 0.0 }
  0x6e   : > { %v2348_v13 = vsel %vm1343_vm1, %v2340_v5, 0.0  ;;  %v2351_v17 = vsel %vm1343_vm1, %v2341_v10, 0.0  ;;  %v2344_v30 = vmul.f32 %v4707_v4, %v5567_v27  ;;  %v2345_v36 = vmul.f32 %v4707_v4, %v5575_v33  ;;  %v1322_v57 = vld [vmem:[%s1280_s15] sm:$0x3]  ;;  %p1375_p5 = scmp.gt.s32.totalorder %s4690_s28, 0  ;;  %s6282_s4 = sld [smem:[#allocation33_spill]] }
  0x6f   : > { %2349 = vadd.xlane.f32.xlu1 %v2348_v13  ;;  %v2354_v23 = vsel %vm1343_vm1, %v2342_v18, 0.0  ;;  %v2357_v29 = vsel %vm1343_vm1, %v2343_v24, 0.0  ;;  %v2366_v47 = vsel %vm1343_vm1, %v2346_v42, 0.0  ;;  %v1981_v49 = vsel %vm1343_vm1, %v1961_v44, 0.0  ;;  %s6283_s7 = sld [smem:[#allocation34_spill]]  ;;  %s6284_s15 = sld [smem:[#allocation17_spill]] }
  0x70   : > { %1967 = vadd.xlane.f32.xlu0 %v1966_v19  ;;  %v2360_v35 = vsel %vm1343_vm1, %v2344_v30, 0.0  ;;  %v2363_v41 = vsel %vm1343_vm1, %v2345_v36, 0.0  ;;  %v1962_v50 = vmul.f32 %v4705_v7, %v5593_v46  ;;  %v2369_v51 = vsel %vm1343_vm1, %v2347_v48, 0.0  ;;  %s6313_s28 = smov (!%p1375_p5, %s4690_s28), 0  ;;  %p2712_p6 = scmp.gt.s32.totalorder %s5487_s20, 0 }
  0x71   : > { %v5601_v54 = vshrl.u32 %v1323_v53, 7  ;;  %v1996_v4 = vand.u32 127, %v1323_v53  ;;  %vm2036_vm6 = vcmask 1045509   ;;  %v1944_v36 = vstv %s5487_s20  ;;  %s4691_s2 = sshll.u32 %s6313_s28, 1  ;;  %s6286_s28 = sld [smem:[#allocation18_spill]] }
  0x72   : > { %v1984_v52 = vsel %vm1343_vm1, %v1962_v50, 0.0  ;;  %vm2038_vm7 = vcmask 1046534   ;;  %vm2040_vm8 = vcmask 1047559   ;;  %vm2044_vm10 = vcmask 15360   ;;  %s5720_s10 = scalar_lea.vmem [#allocation2], %s4691_s2  ;;  %s5750_s0 = scalar_lea.vmem [#allocation3], %s4691_s2 }
  0x73   : > { %2352 = vadd.xlane.f32.xlu1 %v2351_v17  ;;  %v5604_v55 = vsub.s32 1, %v5601_v54  ;;  %v5607_v56 = vsub.s32 0, %v5601_v54  ;;  %v5615_v9 = vsub.s32 %v1996_v4, %v5601_v54  ;;  %vm5642_vm9 = vcmp.lt.s32.totalorder %v5601_v54, %v1944_v36  ;;  %v1338_v36 = vld [vmem:[#allocation4 + $0x2] sm:$0x3]  ;;  %s6036_s2 = scalar_select %p2712_p6, 1.0, 0.0 }
  0x74   : > { %1970 = vadd.xlane.f32.xlu0 %v1969_v25  ;;  %vm5263_vm11 = vmmov 0   ;;  %vm1390_vm12 = vcmask 130048   ;;  %vm2869_vm13 = vcmask 1024   ;;  %s6287_s23 = sld [smem:[#allocation21_spill]]  ;;  %s6293_s18 = sld [smem:[#allocation26_spill]] }
  0x75   : > { %v1333_v58 = vrot.slane %v1322_v57, %v5604_v55  ;;  %v1326_v59 = vrot.slane %v1322_v57, %v5607_v56  ;;  %s6295_s1 = sld [smem:[#allocation23_spill]]  ;;  %s6243_s5 = smov 16  }
  0x77   : > { %2355 = vadd.xlane.f32.xlu1 %v2354_v23 }
  0x78   : > { %1973 = vadd.xlane.f32.xlu0 %v1972_v31 }
  0x7b   : > { %2358 = vadd.xlane.f32.xlu1 %v2357_v29 }
  0x7c   : > { %1976 = vadd.xlane.f32.xlu0 %v1975_v37 }
  0x7f   : > { %2361 = vadd.xlane.f32.xlu1 %v2360_v35 }
  0x80   : > { %1979 = vadd.xlane.f32.xlu0 %v1978_v43 }
  0x83   : > { %2364 = vadd.xlane.f32.xlu1 %v2363_v41 }
  0x84   : > { %1982 = vadd.xlane.f32.xlu0 %v1981_v49 }
  0x87   : > { %2367 = vadd.xlane.f32.xlu1 %v2366_v47 }
  0x88   : > { %1985 = vadd.xlane.f32.xlu0 %v1984_v52 }
  0x8b   : > { %2370 = vadd.xlane.f32.xlu1 %v2369_v51 }
  0x9c   : > { %1335 = vbcast.lane.b32.xlu1 %v1333_v58, 256 }
  0x9e   : > { %1328 = vbcast.lane.b32.xlu0 %v1326_v59, 256 }
  0xf9   : > { %v1965_v61 = vpop.xlane.xlu0 %1964 }
  0xfa   : > { %v2000_v25 = vrot.slane %v1965_v61, %v5615_v9 }
  0xfc   : > { %v2350_v60 = vpop.xlane.xlu1 %2349 }
  0xfd   : > { %v1968_v63 = vpop.xlane.xlu0 %1967  ;;  %v2383_v13 = vrot.slane %v2350_v60, %v5615_v9 }
  0xfe   : > { %v2004_v18 = vrot.slane %v1968_v63, %v5615_v9 }
 0x100   : > { %v2353_v62 = vpop.xlane.xlu1 %2352  ;;  %v2029_v37 = vsel %vm1388_vm2, %v2004_v18, %v2000_v25 }
 0x101   : > { %v1971_v1 = vpop.xlane.xlu0 %1970  ;;  %v2387_v14 = vrot.slane %v2353_v62, %v5615_v9 }
 0x102   : > { %v2008_v23 = vrot.slane %v1971_v1, %v5615_v9 }
 0x103   : > { %v2412_v20 = vsel %vm1388_vm2, %v2387_v14, %v2383_v13 }
 0x104   : > { %v2356_v0 = vpop.xlane.xlu1 %2355  ;;  %v2031_v43 = vsel %vm2030_vm3, %v2008_v23, %v2029_v37  ;;  %v1340_v37 = vld [vmem:[#allocation5 + $0x2] sm:$0x3] }
 0x105   : > { %v1974_v5 = vpop.xlane.xlu0 %1973  ;;  %v2391_v19 = vrot.slane %v2356_v0, %v5615_v9 }
 0x106   : > { %v2012_v26 = vrot.slane %v1974_v5, %v5615_v9 }
 0x107   : > { %v2413_v38 = vsel %vm2030_vm3, %v2391_v19, %v2412_v20 }
 0x108   : > { %v2359_v2 = vpop.xlane.xlu1 %2358  ;;  %v2033_v48 = vsel %vm2032_vm4, %v2012_v26, %v2031_v43  ;;  %v1337_v43 = vld [vmem:[#allocation4] sm:$0x3] }
 0x109   : > { %v1977_v10 = vpop.xlane.xlu0 %1976  ;;  %v2395_v24 = vrot.slane %v2359_v2, %v5615_v9 }
 0x10a   : > { %v2016_v31 = vrot.slane %v1977_v10, %v5615_v9 }
 0x10b   : > { %v2414_v44 = vsel %vm2032_vm4, %v2395_v24, %v2413_v38  ;;  %v1384_v38 = vld [vmem:[%s5293_s17 + $0x10] sm:$0xff] }
 0x10c   : > { %v2362_v7 = vpop.xlane.xlu1 %2361  ;;  %v2035_v51 = vsel %vm2034_vm5, %v2016_v31, %v2033_v48  ;;  %v1382_v48 = vld [vmem:[%s5293_s17] sm:$0xff] }
 0x10d   : > { %v1980_v17 = vpop.xlane.xlu0 %1979  ;;  %v2399_v29 = vrot.slane %v2362_v7, %v5615_v9 }
 0x10e   : > { %v2020_v41 = vrot.slane %v1980_v17, %v5615_v9 }
 0x10f   : > { %v2415_v49 = vsel %vm2034_vm5, %v2399_v29, %v2414_v44  ;;  %v5262_v44 = vmov 0.0|0.0  }
 0x110   : > { %v2365_v16 = vpop.xlane.xlu1 %2364  ;;  %v2037_v59 = vsel %vm2036_vm6, %v2020_v41, %v2035_v51  ;;  %v1385_v41 = vld [vmem:[%s5293_s17 + $0x18] sm:$0xff]  ;;  %4986 = vmatprep.subr.bf16.mxu0 %v5262_v44  ;;  %4989 = vmatprep.subr.bf16.mxu1 %v5262_v44 }
 0x111   : > { %v2403_v32 = vrot.slane %v2365_v16, %v5615_v9  ;;  %v1983_v35 = vpop.xlane.xlu0 %1982 }
 0x112   : > { %v2024_v47 = vrot.slane %v1983_v35, %v5615_v9 }
 0x113   : > { %v2416_v52 = vsel %vm2036_vm6, %v2403_v32, %v2415_v49  ;;  %v5261_v32 = vmov 0.0   ;;  %v1383_v49 = vld [vmem:[%s5293_s17 + $0x8] sm:$0xff] }
 0x114   : > { %v2368_v30 = vpop.xlane.xlu1 %2367  ;;  %v2039_v62 = vsel %vm2038_vm7, %v2024_v47, %v2037_v59  ;;  %v5662_v35 = vsel %vm5642_vm9, 1.0, %v5261_v32  ;;  %v4987_v47 = vpack.c.bf16 %v1385_v41, %v1384_v38  ;;  %4822 = vmatprep.mubr.msk.f32.mxu0 %vm5263_vm11, %v5261_v32  ;;  %4829 = vmatprep.mubr.msk.f32.mxu1 %vm5263_vm11, %v5261_v32 }
 0x115   : > { %v2407_v42 = vrot.slane %v2368_v30, %v5615_v9  ;;  %v1986_v58 = vpop.xlane.xlu0 %1985 }
 0x116   : > { %v2028_v61 = vrot.slane %v1986_v58, %v5615_v9  ;;  %4988 = vmatpush3.bf16.msra.mxu0 %v4987_v47 }
 0x117   : > { %v2417_v60 = vsel %vm2038_vm7, %v2407_v42, %v2416_v52  ;;  %v1339_v52 = vld [vmem:[#allocation5] sm:$0x3]  ;;  %4992 = vmatprep.subr.bf16.mxu0 %v5262_v44 }
 0x118   : > { %v2371_v50 = vpop.xlane.xlu1 %2370  ;;  %v2041_v1 = vsel %vm2040_vm8, %v2028_v61, %v2039_v62 }
 0x119   : > { %v2411_v57 = vrot.slane %v2371_v50, %v5615_v9  ;;  %v2043_v4 = vsel %vm5642_vm9, %v2041_v1, -1e+09 }
 0x11a   : > { %v2045_v7 = vsel %vm2044_vm10, %v2043_v4, -inf }
 0x11b   : > { %v2418_v63 = vsel %vm2040_vm8, %v2411_v57, %v2417_v60  ;;  %v2046_v10 = vrot.slane %v2045_v7, 4  ;;  %v4990_v57 = vpack.c.bf16 %v1383_v49, %v1382_v48  ;;  %v5682_v60 = vpop.permute.xlu0 %1328 }
 0x11c   : > { %v2420_v0 = vsel %vm5642_vm9, %v2418_v63, -1e+09  ;;  %v5680_v59 = vpop.permute.xlu1 %1335 }
 0x11d   : > { %v2421_v2 = vsel %vm2044_vm10, %v2420_v0, -inf  ;;  %v2047_v14 = vmax.f32 %v2045_v7, %v2046_v10  ;;  %v1342_v62 = vmul.f32 %v1338_v36, %v5680_v59  ;;  %v1359_v63 = vmul.f32 %v1340_v37, %v5680_v59  ;;  %4991 = vmatpush3.bf16.msra.mxu1 %v4990_v57 }
 0x11e   : > { %v2422_v5 = vrot.slane %v2421_v2, 4  ;;  %4995 = vmatprep.subr.bf16.mxu1 %v5262_v44 }
 0x11f   : > { %v2048_v17 = vrot.slane %v2047_v14, 2  ;;  %v1351_v7 = vsel %vm1343_vm1, %v1342_v62, 0.0 }
 0x120   : > { %v2423_v13 = vmax.f32 %v2421_v2, %v2422_v5 }
 0x121   : > { %v2049_v19 = vmax.f32 %v2047_v14, %v2048_v17  ;;  %v1352_v14 = vrot.slane %v1351_v7, 4 }
 0x122   : > { %v2424_v16 = vrot.slane %v2423_v13, 2 }
 0x123   : > { %v2050_v23 = vrot.slane %v2049_v19, 1 }
 0x124   : > { %v2425_v18 = vmax.f32 %v2423_v13, %v2424_v16  ;;  %v1367_v16 = vsel %vm1343_vm1, %v1359_v63, 0.0 }
 0x125   : > { %v2051_v25 = vmax.f32 %v2049_v19, %v2050_v23  ;;  %v1353_v23 = vadd.f32 %v1352_v14, %v1351_v7  ;;  %v1545_v7 = vld [vmem:[%s5298_s21 + $0x8] sm:$0xff] }
 0x126   : > { %v2426_v20 = vrot.slane %v2425_v18, 1 }
 0x127   : > { %v2052_v29 = vsub.f32 %v2043_v4, %v2051_v25  ;;  %v1358_v4 = vmul.f32 %v1339_v52, %v5682_v60  ;;  %v1354_v36 = vrot.slane %v1353_v23, 2 }
 0x128   : > { %v2427_v24 = vmax.f32 %v2425_v18, %v2426_v20 }
 0x129   : > { %v2053_v31 = vmul.f32 1.442695, %v2052_v29  ;;  %v1360_v19 = vsel %vm1343_vm1, %v1358_v4, 0.0 }
 0x12a   : > { %v2428_v26 = vsub.f32 %v2420_v0, %v2427_v24  ;;  %v1341_v0 = vmul.f32 %v1337_v43, %v5682_v60  ;;  %v1361_v29 = vrot.slane %v1360_v19, 4 }
 0x12c   : > { %v2429_v30 = vmul.f32 1.442695, %v2428_v26  ;;  %v1344_v10 = vsel %vm1343_vm1, %v1341_v0, 0.0  ;;  %v1368_v26 = vrot.slane %v1367_v16, 4  ;;  %v1362_v48 = vadd.f32 %v1361_v29, %v1360_v19 }
 0x12d   : > { %v1345_v17 = vrot.slane %v1344_v10, 4 }
 0x12e   : > { %5119 = vpow2.f32 %v2429_v30  ;;  %v1369_v47 = vadd.f32 %v1368_v26, %v1367_v16  ;;  %v1657_v16 = vld [vmem:[%s6277_s3 + $0x10] sm:$0xff]  ;;  %v1379_v26 = vld [vmem:[%s5720_s10] sm:$0x3] }
 0x12f   : > { %5121 = vpow2.f32 %v2053_v31  ;;  %v1346_v24 = vadd.f32 %v1345_v17, %v1344_v10  ;;  %v1658_v17 = vld [vmem:[%s6277_s3 + $0x18] sm:$0xff] }
 0x130   : > { %v4996_v19 = vpack.c.bf16 %v1658_v17, %v1657_v16  ;;  %v2714_v16 = vld [vmem:[%s5433_s14] sm:$0xff]  ;;  %v2715_v17 = vld [vmem:[%s5433_s14 + $0x8] sm:$0xff] }
 0x131   : > { %v1347_v31 = vrot.slane %v1346_v24, 2 }
 0x133   : > { %v1348_v41 = vadd.f32 %v1347_v31, %v1346_v24  ;;  %v1655_v24 = vld [vmem:[%s6277_s3] sm:$0xff] }
 0x138   : > { %v5120_v42 = vpop.eup %5119 }
 0x139   : > { %v5122_v50 = vpop.eup %5121  ;;  %v5671_v51 = vmul.f32 %v5120_v42, %v5662_v35  ;;  %v1355_v42 = vadd.f32 %v1354_v36, %v1353_v23  ;;  %v1815_v36 = vld [vmem:[%s6276_s8] sm:$0xff] }
 0x13a   : > { %v5678_v58 = vmul.f32 %v5122_v50, %v5662_v35  ;;  %v1349_v50 = vrot.slane %v1348_v41, 1 }
 0x13b   : > { %v2432_v61 = vsel %vm2044_vm10, %v5671_v51, 0.0  ;;  %v1356_v52 = vrot.slane %v1355_v42, 1 }
 0x13c   : > { %v2433_v1 = vrot.slane %v2432_v61, 4  ;;  %v2056_v2 = vsel %vm2044_vm10, %v5678_v58, 0.0  ;;  %v1350_v62 = vadd.f32 %v1349_v50, %v1348_v41 }
 0x13d   : > { %v2057_v5 = vrot.slane %v2056_v2, 4  ;;  %v1357_v63 = vadd.f32 %v1356_v52, %v1355_v42  ;;  %v5746_v52 = vsub.s32 2, %v5601_v54 }
 0x13e   : > { %v2434_v13 = vadd.f32 %v2433_v1, %v2432_v61  ;;  %v1370_v1 = vrot.slane %v1369_v47, 2 }
 0x13f   : > { %v2058_v18 = vadd.f32 %v2057_v5, %v2056_v2  ;;  %v1363_v2 = vrot.slane %v1362_v48, 2  ;;  %v5699_v4 = vsel %vm1388_vm2, %v1357_v63, %v1350_v62  ;;  %v1544_v5 = vld [vmem:[%s5298_s21] sm:$0xff]  ;;  %v5761_v62 = vsub.s32 3, %v5601_v54 }
 0x140   : > { %v2435_v20 = vrot.slane %v2434_v13, 2  ;;  %4823 = vmatmul.mubr.msk.f32.vlgmr.msra.gmra.mrb[0].mxu0 %vm1390_vm12, %v5699_v4  ;;  %v4993_v10 = vpack.c.bf16 %v1545_v7, %v1544_v5  ;;  %v1371_v14 = vadd.f32 %v1370_v1, %v1369_v47  ;;  %v5768_v1 = vsub.s32 4, %v5601_v54 }
 0x141   : > { %v2059_v25 = vrot.slane %v2058_v18, 2  ;;  %4836 = vmatprep.mubr.msk.f32.mxu0 %vm5263_vm11, %v5261_v32  ;;  %v5773_v7 = vsub.s32 5, %v5601_v54 }
 0x142   : > { %v2436_v30 = vadd.f32 %v2435_v20, %v2434_v13  ;;  %v1364_v13 = vadd.f32 %v1363_v2, %v1362_v48  ;;  %4994 = vmatpush3.bf16.msra.mxu0 %v4993_v10  ;;  %v1372_v23 = vrot.slane %v1371_v14, 1  ;;  %v1321_v48 = vld [vmem:[%s5501_s16] sm:$0x3] }
 0x143   : > { %v2060_v37 = vadd.f32 %v2059_v25, %v2058_v18  ;;  %v1320_v18 = vld [vmem:[%s5497_s11] sm:$0x3]  ;;  %4998 = vmatprep.subr.bf16.mxu0 %v5262_v44  ;;  %v1656_v25 = vld [vmem:[%s6277_s3 + $0x8] sm:$0xff]  ;;  %s6297_s3 = sld [smem:[#allocation25_spill]] }
 0x144   : > { %v2437_v38 = vrot.slane %v2436_v30, 1  ;;  %v1365_v20 = vrot.slane %v1364_v13, 1  ;;  %4830 = vmatmul.mubr.msk.f32.vlgmr.msra.gmra.mrb[0].mxu1 %vm1390_vm12, %v1320_v18  ;;  %v4999_v29 = vpack.c.bf16 %v1656_v25, %v1655_v24  ;;  %v1373_v31 = vadd.f32 %v1372_v23, %v1371_v14 }
 0x145   : > { %v2061_v43 = vrot.slane %v2060_v37, 1  ;;  %4997 = vmatpush3.bf16.msra.mxu1 %v4996_v19  ;;  %4843 = vmatprep.mubr.msk.f32.mxu1 %vm5263_vm11, %v5261_v32  ;;  %v5778_v14 = vsub.s32 6, %v5601_v54  ;;  %v5005_v19 = vpack.c.bf16 %v2715_v17, %v2714_v16  ;;  %v5785_v23 = vsub.s32 7, %v5601_v54 }
 0x146   : > { %v2438_v49 = vadd.f32 %v2437_v38, %v2436_v30  ;;  %v1366_v30 = vadd.f32 %v1365_v20, %v1364_v13  ;;  %4837 = vmatmul.mubr.msk.f32.vlgmr.msra.gmra.mrb[2].mxu0 %vm1390_vm12, %v1379_v26  ;;  %5001 = vmatprep.subr.bf16.mxu1 %v5262_v44 }
 0x147   : > { %v2062_v57 = vadd.f32 %v2061_v43, %v2060_v37  ;;  %v1816_v37 = vld [vmem:[%s6276_s8 + $0x8] sm:$0xff]  ;;  %5000 = vmatpush3.bf16.msra.mxu0 %v4999_v29  ;;  %4850 = vmatprep.mubr.msk.f32.mxu0 %vm5263_vm11, %v5261_v32  ;;  %s6304_s8 = sld [smem:[#allocation16_spill]] }
 0x148   : > { %v2439_v61 = vmax.f32 %v2438_v49, 1e-20  ;;  %v5730_v38 = vsel %vm1388_vm2, %v1373_v31, %v1366_v30  ;;  %v5002_v41 = vpack.c.bf16 %v1816_v37, %v1815_v36  ;;  %5004 = vmatprep.subr.bf16.mxu0 %v5262_v44  ;;  %v4706_v31 = vld [vmem:[%s5418_s25] ss:$0 sm:$0xff] }
 0x149   : > { %v2063_v0 = vmax.f32 %v2062_v57, 1e-20  ;;  %4844 = vmatmul.mubr.msk.f32.vlgmr.msra.gmra.mrb[2].mxu1 %vm1390_vm12, %v5730_v38  ;;  %v2152_v36 = vmul.f32 %v4706_v31, %v5539_v6  ;;  %v4708_v37 = vld [vmem:[%s6282_s4] ss:$0 sm:$0xff]  ;;  %v2157_v16 = vmul.f32 %v4706_v31, %v5577_v34  ;;  %s6298_s4 = smov 32  }
 0x14a   : > { %5123 = vrcp.f32 %v2439_v61  ;;  %5003 = vmatpush3.bf16.msra.mxu1 %v5002_v41  ;;  %4857 = vmatprep.mubr.msk.f32.mxu1 %vm5263_vm11, %v5261_v32 }
 0x14b   : > { %5125 = vrcp.f32 %v2063_v0  ;;  %4851 = vmatmul.mubr.msk.f32.vlgmr.msra.gmra.mrb[4].mxu0 %vm1390_vm12, %v1321_v48  ;;  %5007 = vmatprep.subr.bf16.mxu1 %v5262_v44  ;;  %v2160_v41 = vsel %vm1343_vm1, %v2152_v36, 0.0  ;;  %v2529_v48 = vmul.f32 %v4708_v37, %v5542_v8  ;;  %v2534_v36 = vmul.f32 %v4708_v37, %v5583_v39 }
 0x14c   : > { %4864 = vmatprep.mubr.msk.f32.mxu0 %vm5263_vm11, %v5261_v32  ;;  %5006 = vmatpush3.bf16.msra.mxu0 %v5005_v19 }
 0x14d   : > { %5010 = vmatprep.subr.bf16.mxu0 %v5262_v44 }
 0x154   : > { %v5124_v42 = vpop.eup %5123 }
 0x155   : > { %v5126_v43 = vpop.eup %5125  ;;  %v2441_v47 = vmul.f32 %v5124_v42, %v5671_v51  ;;  %v1381_v51 = vld [vmem:[%s5750_s0] sm:$0x3]  ;;  %v2528_v42 = vmul.f32 %v4708_v37, %v5535_v3 }
 0x156   : > { %v2065_v49 = vmul.f32 %v5126_v43, %v5678_v58  ;;  %4858 = vmatmul.mubr.msk.f32.vlgmr.msra.gmra.mrb[4].mxu1 %vm1390_vm12, %v1381_v51 }
 0x157   : > { %v2445_v50 = vrot.slane %v2441_v47, %v5607_v56  ;;  %4871 = vmatprep.mubr.msk.f32.mxu1 %vm5263_vm11, %v5261_v32  ;;  %v2452_v2 = vrot.slane %v2441_v47, %v5604_v55  ;;  %v2459_v10 = vrot.slane %v2441_v47, %v5746_v52  ;;  %v2466_v18 = vrot.slane %v2441_v47, %v5761_v62 }
 0x158   : > { %v5755_v57 = vadd.f32 %v2441_v47, %v2065_v49  ;;  %v2069_v58 = vrot.slane %v2065_v49, %v5607_v56  ;;  %v2083_v61 = vrot.slane %v2065_v49, %v5746_v52  ;;  %v2076_v63 = vrot.slane %v2065_v49, %v5604_v55  ;;  %5009 = vmatpush3.bf16.msra.mxu1 %v5005_v19 }
 0x159   : > { %2447 = vbcast.lane.b32.xlu0 %v2445_v50, 256  ;;  %v2090_v0 = vrot.slane %v2065_v49, %v5761_v62  ;;  %v2097_v5 = vrot.slane %v2065_v49, %v5768_v1  ;;  %v2104_v13 = vrot.slane %v2065_v49, %v5773_v7  ;;  %v2111_v20 = vrot.slane %v2065_v49, %v5778_v14 }
 0x15a   : > { %2071 = vbcast.lane.b32.xlu1 %v2069_v58, 256  ;;  %v2473_v24 = vrot.slane %v2441_v47, %v5768_v1  ;;  %5013 = vmatprep.subr.bf16.mxu1 %v5262_v44  ;;  %v2118_v25 = vrot.slane %v2065_v49, %v5785_v23  ;;  %v2480_v26 = vrot.slane %v2441_v47, %v5773_v7  ;;  %v2536_v43 = vsel %vm1343_vm1, %v2528_v42, 0.0 }
 0x15b   : > { %v2487_v29 = vrot.slane %v2441_v47, %v5778_v14  ;;  %v2494_v30 = vrot.slane %v2441_v47, %v5785_v23  ;;  %v2539_v49 = vsel %vm1343_vm1, %v2529_v48, 0.0  ;;  %v2154_v50 = vmul.f32 %v4706_v31, %v5552_v15 }
 0x15c   : > { %v2153_v47 = vmul.f32 %v4706_v31, %v5546_v11  ;;  %v2155_v58 = vmul.f32 %v4706_v31, %v5561_v22  ;;  %v2175_v19 = vsel %vm1343_vm1, %v2157_v16, 0.0  ;;  %v2554_v42 = vsel %vm1343_vm1, %v2534_v36, 0.0 }
 0x15d   : > { %2085 = vbcast.lane.b32.xlu0 %v2083_v61, 256  ;;  %v2166_v51 = vsel %vm1343_vm1, %v2154_v50, 0.0 }
 0x15e   : > { %2078 = vbcast.lane.b32.xlu1 %v2076_v63, 256  ;;  %v2163_v61 = vsel %vm1343_vm1, %v2153_v47, 0.0  ;;  %v2530_v63 = vmul.f32 %v4708_v37, %v5548_v12 }
 0x161   : > { %2092 = vbcast.lane.b32.xlu0 %v2090_v0, 256  ;;  %v2169_v0 = vsel %vm1343_vm1, %v2155_v58, 0.0 }
 0x162   : > { %2454 = vbcast.lane.b32.xlu1 %v2452_v2, 256  ;;  %v2156_v2 = vmul.f32 %v4706_v31, %v5569_v28 }
 0x165   : > { %2099 = vbcast.lane.b32.xlu0 %v2097_v5, 256  ;;  %v2542_v5 = vsel %vm1343_vm1, %v2530_v63, 0.0 }
 0x166   : > { %2461 = vbcast.lane.b32.xlu1 %v2459_v10, 256  ;;  %v2531_v10 = vmul.f32 %v4708_v37, %v5559_v21 }
 0x168   : > { %v2545_v17 = vsel %vm1343_vm1, %v2531_v10, 0.0 }
 0x169   : > { %2106 = vbcast.lane.b32.xlu0 %v2104_v13, 256  ;;  %v2172_v13 = vsel %vm1343_vm1, %v2156_v2, 0.0 }
 0x16a   : > { %2468 = vbcast.lane.b32.xlu1 %v2466_v18, 256  ;;  %v2532_v18 = vmul.f32 %v4708_v37, %v5567_v27 }
 0x16d   : > { %2113 = vbcast.lane.b32.xlu0 %v2111_v20, 256  ;;  %v2158_v20 = vmul.f32 %v4706_v31, %v5585_v40 }
 0x16e   : > { %2475 = vbcast.lane.b32.xlu1 %v2473_v24, 256  ;;  %v2548_v24 = vsel %vm1343_vm1, %v2532_v18, 0.0 }
 0x171   : > { %2120 = vbcast.lane.b32.xlu0 %v2118_v25, 256  ;;  %v2533_v25 = vmul.f32 %v4708_v37, %v5575_v33 }
 0x172   : > { %2482 = vbcast.lane.b32.xlu1 %v2480_v26, 256  ;;  %v2178_v26 = vsel %vm1343_vm1, %v2158_v20, 0.0 }
 0x176   : > { %2489 = vbcast.lane.b32.xlu1 %v2487_v29, 256  ;;  %v2159_v29 = vmul.f32 %v4706_v31, %v5593_v46 }
 0x17a   : > { %2496 = vbcast.lane.b32.xlu1 %v2494_v30, 256  ;;  %v2551_v30 = vsel %vm1343_vm1, %v2533_v25, 0.0 }
 0x190   : > { %2161 = vadd.xlane.f32.xlu0 %v2160_v41  ;;  %v2181_v41 = vsel %vm1343_vm1, %v2159_v29, 0.0 }
 0x194   : > { %2537 = vadd.xlane.f32.xlu0 %v2536_v43  ;;  %v2535_v43 = vmul.f32 %v4708_v37, %v5591_v45 }
 0x196   : > { %v2557_v48 = vsel %vm1343_vm1, %v2535_v43, 0.0 }
 0x198   : > { %2540 = vadd.xlane.f32.xlu0 %v2539_v49 }
 0x19c   : > { %2167 = vadd.xlane.f32.xlu0 %v2166_v51 }
 0x19e   : > { %2164 = vadd.xlane.f32.xlu1 %v2163_v61 }
 0x1a0   : > { %2170 = vadd.xlane.f32.xlu0 %v2169_v0 }
 0x1a2   : > { %2543 = vadd.xlane.f32.xlu1 %v2542_v5 }
 0x1a4   : > { %2173 = vadd.xlane.f32.xlu0 %v2172_v13 }
 0x1a6   : > { %2546 = vadd.xlane.f32.xlu1 %v2545_v17 }
 0x1a8   : > { %2176 = vadd.xlane.f32.xlu0 %v2175_v19 }
 0x1aa   : > { %2549 = vadd.xlane.f32.xlu1 %v2548_v24 }
 0x1ac   : > { %2179 = vadd.xlane.f32.xlu0 %v2178_v26 }
 0x1ae   : > { %2552 = vadd.xlane.f32.xlu1 %v2551_v30 }
 0x1b0   : > { %2182 = vadd.xlane.f32.xlu0 %v2181_v41 }
 0x1b2   : > { %2555 = vadd.xlane.f32.xlu1 %v2554_v42 }
 0x1b6   : > { %2558 = vadd.xlane.f32.xlu1 %v2557_v48 }
 0x1cb   : > { %v2448_v49 = vpop.permute.xlu0 %2447 }
 0x1cc   : > { %v2072_v31 = vpop.permute.xlu1 %2071  ;;  %v2498_v26 = vmul.f32 %v2448_v49, %v5535_v3 }
 0x1cd   : > { %v2122_v58 = vmul.f32 %v2072_v31, %v5539_v6 }
 0x1ce   : > { %v2506_v48 = vsel %vm1343_vm1, %v2498_v26, 0.0 }
 0x1cf   : > { %v2086_v50 = vpop.permute.xlu0 %2085  ;;  %v2130_v2 = vsel %vm1343_vm1, %v2122_v58, 0.0 }
 0x1d0   : > { %v2079_v47 = vpop.permute.xlu1 %2078  ;;  %v2124_v37 = vmul.f32 %v2086_v50, %v5552_v15 }
 0x1d1   : > { %v2123_v51 = vmul.f32 %v2079_v47, %v5546_v11 }
 0x1d2   : > { %v2133_v17 = vsel %vm1343_vm1, %v2124_v37, 0.0 }
 0x1d3   : > { %v2093_v61 = vpop.permute.xlu0 %2092  ;;  %v2131_v63 = vsel %vm1343_vm1, %v2123_v51, 0.0 }
 0x1d4   : > { %v2455_v0 = vpop.permute.xlu1 %2454  ;;  %v2132_v5 = vadd.f32 %v2131_v63, %v2130_v2  ;;  %v2125_v13 = vmul.f32 %v2093_v61, %v5561_v22 }
 0x1d5   : > { %v2499_v25 = vmul.f32 %v2455_v0, %v5542_v8 }
 0x1d6   : > { %v2134_v11 = vadd.f32 %v2133_v17, %v2132_v5  ;;  %v2135_v6 = vsel %vm1343_vm1, %v2125_v13, 0.0 }
 0x1d7   : > { %v2100_v10 = vpop.permute.xlu0 %2099  ;;  %v2507_v42 = vsel %vm1343_vm1, %v2499_v25, 0.0 }
 0x1d8   : > { %v2462_v16 = vpop.permute.xlu1 %2461  ;;  %v2126_v18 = vmul.f32 %v2100_v10, %v5569_v28  ;;  %v2136_v29 = vadd.f32 %v2135_v6, %v2134_v11  ;;  %v2508_v50 = vadd.f32 %v2507_v42, %v2506_v48 }
 0x1d9   : > { %v2500_v22 = vmul.f32 %v2462_v16, %v5548_v12 }
 0x1da   : > { %v2137_v15 = vsel %vm1343_vm1, %v2126_v18, 0.0 }
 0x1db   : > { %v2107_v19 = vpop.permute.xlu0 %2106  ;;  %v2138_v43 = vadd.f32 %v2137_v15, %v2136_v29  ;;  %v2509_v3 = vsel %vm1343_vm1, %v2500_v22, 0.0 }
 0x1dc   : > { %v2469_v20 = vpop.permute.xlu1 %2468  ;;  %v2127_v24 = vmul.f32 %v2107_v19, %v5577_v34 }
 0x1dd   : > { %v2501_v34 = vmul.f32 %v2469_v20, %v5559_v21  ;;  %v2510_v21 = vadd.f32 %v2509_v3, %v2508_v50 }
 0x1de   : > { %v2139_v36 = vsel %vm1343_vm1, %v2127_v24, 0.0 }
 0x1df   : > { %v2114_v30 = vpop.permute.xlu0 %2113  ;;  %v2140_v49 = vadd.f32 %v2139_v36, %v2138_v43 }
 0x1e0   : > { %v2476_v28 = vpop.permute.xlu1 %2475  ;;  %v2128_v41 = vmul.f32 %v2114_v30, %v5585_v40  ;;  %v2511_v40 = vsel %vm1343_vm1, %v2501_v34, 0.0 }
 0x1e1   : > { %v2502_v12 = vmul.f32 %v2476_v28, %v5567_v27  ;;  %v2512_v37 = vadd.f32 %v2511_v40, %v2510_v21 }
 0x1e2   : > { %v2141_v8 = vsel %vm1343_vm1, %v2128_v41, 0.0 }
 0x1e3   : > { %v2121_v31 = vpop.permute.xlu0 %2120  ;;  %v2142_v58 = vadd.f32 %v2141_v8, %v2140_v49  ;;  %v2513_v0 = vsel %vm1343_vm1, %v2502_v12, 0.0 }
 0x1e4   : > { %v2483_v47 = vpop.permute.xlu1 %2482  ;;  %v2129_v51 = vmul.f32 %v2121_v31, %v5593_v46  ;;  %v2514_v46 = vadd.f32 %v2513_v0, %v2512_v37 }
 0x1e5   : > { %v2503_v61 = vmul.f32 %v2483_v47, %v5575_v33 }
 0x1e6   : > { %v2143_v63 = vsel %vm1343_vm1, %v2129_v51, 0.0 }
 0x1e7   : > { %v5855_v2 = vadd.f32 %v2143_v63, %v2142_v58  ;;  %v2515_v27 = vsel %vm1343_vm1, %v2503_v61, 0.0 }
 0x1e8   : > { %v2490_v5 = vpop.permute.xlu1 %2489  ;;  %v2516_v13 = vadd.f32 %v2515_v27, %v2514_v46 }
 0x1e9   : > { %v2504_v10 = vmul.f32 %v2490_v5, %v5583_v39  ;;  %4865 = vmatmul.mubr.msk.f32.vlgmr.msra.gmra.mrb[6].mxu0 %vm1390_vm12, %v5855_v2 }
 0x1ea   : > { %4878 = vmatprep.mubr.msk.f32.mxu0 %vm5263_vm11, %v5261_v32 }
 0x1eb   : > { %v2517_v33 = vsel %vm1343_vm1, %v2504_v10, 0.0 }
 0x1ec   : > { %v2497_v16 = vpop.permute.xlu1 %2496  ;;  %v2518_v18 = vadd.f32 %v2517_v33, %v2516_v13 }
 0x1ed   : > { %v2505_v17 = vmul.f32 %v2497_v16, %v5591_v45 }
 0x1ef   : > { %v2519_v11 = vsel %vm1343_vm1, %v2505_v17, 0.0 }
 0x1f0   : > { %v5866_v19 = vadd.f32 %v2519_v11, %v2518_v18 }
 0x1f2   : > { %4872 = vmatmul.mubr.msk.f32.vlgmr.msra.gmra.mrb[6].mxu1 %vm1390_vm12, %v5866_v19 }
 0x1f3   : > { %4885 = vmatprep.mubr.msk.f32.mxu1 %vm5263_vm11, %v5261_v32 }
 0x213   : > { %v1459_v6 = vpop.f32.mrb[0].mxu0 }
 0x214   : > { %v4824_v20 = vpop.f32.mrb[1].mxu0 }
 0x217   : > { %v1532_v25 = vpop.f32.mrb[0].mxu1 }
 0x218   : > { %v5872_v15 = vadd.f32 %v1532_v25, %v1459_v6  ;;  %v4831_v26 = vpop.f32.mrb[1].mxu1 }
 0x219   : > { %v5874_v29 = vpop.f32.mrb[2].mxu0 }
 0x21a   : > { %v4838_v22 = vpop.f32.mrb[3].mxu0 }
 0x21c   : > { %v1730_v30 = vpop.f32.mrb[2].mxu1 }
 0x21d   : > { %v2162_v39 = vpop.xlane.xlu0 %2161  ;;  %v4845_v36 = vpop.f32.mrb[3].mxu1 }
 0x21e   : > { %v1803_v41 = vpop.f32.mrb[4].mxu0  ;;  %v2195_v42 = vrot.slane %v2162_v39, %v5615_v9 }
 0x21f   : > { %v5877_v43 = vadd.f32 %v1803_v41, %v1730_v30  ;;  %v4852_v34 = vpop.f32.mrb[5].mxu0 }
 0x221   : > { %v2538_v24 = vpop.xlane.xlu0 %2537 }
 0x222   : > { %v2571_v51 = vrot.slane %v2538_v24, %v5615_v9 }
 0x225   : > { %v2541_v45 = vpop.xlane.xlu0 %2540 }
 0x226   : > { %v2575_v40 = vrot.slane %v2541_v45, %v5615_v9 }
 0x228   : > { %v2600_v5 = vsel %vm1388_vm2, %v2575_v40, %v2571_v51 }
 0x229   : > { %v2168_v28 = vpop.xlane.xlu0 %2167  ;;  %v5879_v48 = vpop.f32.mrb[4].mxu1 }
 0x22a   : > { %v4859_v49 = vpop.f32.mrb[5].mxu1  ;;  %v2203_v12 = vrot.slane %v2168_v28, %v5615_v9 }
 0x22b   : > { %v2165_v8 = vpop.xlane.xlu1 %2164 }
 0x22c   : > { %v2199_v3 = vrot.slane %v2165_v8, %v5615_v9 }
 0x22d   : > { %v2171_v31 = vpop.xlane.xlu0 %2170 }
 0x22e   : > { %v2224_v50 = vsel %vm1388_vm2, %v2199_v3, %v2195_v42  ;;  %v2207_v58 = vrot.slane %v2171_v31, %v5615_v9 }
 0x22f   : > { %v2544_v47 = vpop.xlane.xlu1 %2543  ;;  %v2225_v61 = vsel %vm2030_vm3, %v2203_v12, %v2224_v50 }
 0x230   : > { %v2579_v63 = vrot.slane %v2544_v47, %v5615_v9  ;;  %v2226_v27 = vsel %vm2032_vm4, %v2207_v58, %v2225_v61 }
 0x231   : > { %v2174_v21 = vpop.xlane.xlu0 %2173 }
 0x232   : > { %v2211_v0 = vrot.slane %v2174_v21, %v5615_v9  ;;  %v2601_v13 = vsel %vm2030_vm3, %v2579_v63, %v2600_v5 }
 0x233   : > { %v2547_v37 = vpop.xlane.xlu1 %2546 }
 0x234   : > { %v2583_v46 = vrot.slane %v2547_v37, %v5615_v9  ;;  %v2227_v16 = vsel %vm2034_vm5, %v2211_v0, %v2226_v27 }
 0x235   : > { %v2177_v10 = vpop.xlane.xlu0 %2176 }
 0x236   : > { %v2215_v33 = vrot.slane %v2177_v10, %v5615_v9  ;;  %v2602_v39 = vsel %vm2032_vm4, %v2583_v46, %v2601_v13 }
 0x237   : > { %v2550_v17 = vpop.xlane.xlu1 %2549 }
 0x238   : > { %v2587_v18 = vrot.slane %v2550_v17, %v5615_v9  ;;  %v2228_v6 = vsel %vm2036_vm6, %v2215_v33, %v2227_v16 }
 0x239   : > { %v2180_v11 = vpop.xlane.xlu0 %2179 }
 0x23a   : > { %v2219_v20 = vrot.slane %v2180_v11, %v5615_v9  ;;  %v2603_v26 = vsel %vm2034_vm5, %v2587_v18, %v2602_v39 }
 0x23b   : > { %v2553_v24 = vpop.xlane.xlu1 %2552 }
 0x23c   : > { %v2591_v25 = vrot.slane %v2553_v24, %v5615_v9  ;;  %v2229_v45 = vsel %vm2038_vm7, %v2219_v20, %v2228_v6 }
 0x23d   : > { %v2183_v22 = vpop.xlane.xlu0 %2182 }
 0x23e   : > { %v2223_v30 = vrot.slane %v2183_v22, %v5615_v9  ;;  %v2604_v28 = vsel %vm2036_vm6, %v2591_v25, %v2603_v26 }
 0x23f   : > { %v2556_v36 = vpop.xlane.xlu1 %2555 }
 0x240   : > { %v2230_v41 = vsel %vm2040_vm8, %v2223_v30, %v2229_v45  ;;  %v2595_v42 = vrot.slane %v2556_v36, %v5615_v9  ;;  %v5264_v36 = vmov 0  }
 0x241   : > { %v2232_v34 = vsel %vm5642_vm9, %v2230_v41, -1e+09  ;;  %5117 = vset.pattern.permute.xlu0 %v5264_v36  ;;  %5118 = vset.pattern.permute.xlu1 %v5264_v36 }
 0x242   : > { %v2233_v8 = vsel %vm2044_vm10, %v2232_v34, -inf  ;;  %v2605_v49 = vsel %vm2038_vm7, %v2595_v42, %v2604_v28 }
 0x243   : > { %v2234_v3 = vrot.slane %v2233_v8, 4  ;;  %v2559_v12 = vpop.xlane.xlu1 %2558 }
 0x244   : > { %v2599_v31 = vrot.slane %v2559_v12, %v5615_v9 }
 0x245   : > { %v2235_v50 = vmax.f32 %v2233_v8, %v2234_v3 }
 0x246   : > { %v2606_v47 = vsel %vm2040_vm8, %v2599_v31, %v2605_v49 }
 0x247   : > { %v2236_v51 = vrot.slane %v2235_v50, 2  ;;  %v2608_v40 = vsel %vm5642_vm9, %v2606_v47, -1e+09 }
 0x248   : > { %v2609_v58 = vsel %vm2044_vm10, %v2608_v40, -inf }
 0x249   : > { %v2237_v61 = vmax.f32 %v2235_v50, %v2236_v51  ;;  %v2610_v21 = vrot.slane %v2609_v58, 4 }
 0x24b   : > { %v2238_v63 = vrot.slane %v2237_v61, 1  ;;  %v2611_v0 = vmax.f32 %v2609_v58, %v2610_v21 }
 0x24d   : > { %v2239_v37 = vmax.f32 %v2237_v61, %v2238_v63  ;;  %v2612_v5 = vrot.slane %v2611_v0, 2 }
 0x24f   : > { %v2240_v27 = vsub.f32 %v2232_v34, %v2239_v37  ;;  %v2613_v10 = vmax.f32 %v2611_v0, %v2612_v5 }
 0x251   : > { %v2241_v46 = vmul.f32 1.442695, %v2240_v27  ;;  %v2614_v33 = vrot.slane %v2613_v10, 1 }
 0x253   : > { %5127 = vpow2.f32 %v2241_v46  ;;  %v2615_v9 = vmax.f32 %v2613_v10, %v2614_v33  ;;  %v4709_v10 = vld [vmem:[#allocation8] ss:$0 sm:$0xff] }
 0x255   : > { %v2616_v13 = vsub.f32 %v2608_v40, %v2615_v9 }
 0x257   : > { %v2617_v16 = vmul.f32 1.442695, %v2616_v13 }
 0x259   : > { %5129 = vpow2.f32 %v2617_v16 }
 0x25d   : > { %v5128_v17 = vpop.eup %5127 }
 0x25e   : > { %v2243_v53 = vmul.f32 %v5128_v17, %v5662_v35 }
 0x260   : > { %v2244_v18 = vsel %vm2044_vm10, %v2243_v53, 0.0 }
 0x261   : > { %v2245_v11 = vrot.slane %v2244_v18, 4 }
 0x263   : > { %v5130_v39 = vpop.eup %5129  ;;  %v2246_v6 = vadd.f32 %v2245_v11, %v2244_v18 }
 0x264   : > { %v2619_v20 = vmul.f32 %v5130_v39, %v5662_v35 }
 0x265   : > { %v2247_v24 = vrot.slane %v2246_v6, 2 }
 0x266   : > { %v2620_v25 = vsel %vm2044_vm10, %v2619_v20, 0.0 }
 0x267   : > { %v2248_v26 = vadd.f32 %v2247_v24, %v2246_v6  ;;  %v2621_v45 = vrot.slane %v2620_v25, 4 }
 0x269   : > { %v2249_v22 = vrot.slane %v2248_v26, 1  ;;  %v2622_v30 = vadd.f32 %v2621_v45, %v2620_v25 }
 0x26b   : > { %v2250_v28 = vadd.f32 %v2249_v22, %v2248_v26  ;;  %v2623_v41 = vrot.slane %v2622_v30, 2 }
 0x26d   : > { %v2251_v42 = vmax.f32 %v2250_v28, 1e-20  ;;  %v2624_v34 = vadd.f32 %v2623_v41, %v2622_v30 }
 0x26f   : > { %5131 = vrcp.f32 %v2251_v42  ;;  %v2625_v8 = vrot.slane %v2624_v34, 1 }
 0x271   : > { %v2626_v3 = vadd.f32 %v2625_v8, %v2624_v34 }
 0x273   : > { %v2627_v49 = vmax.f32 %v2626_v3, 1e-20 }
 0x275   : > { %5133 = vrcp.f32 %v2627_v49 }
 0x279   : > { %v5132_v35 = vpop.eup %5131 }
 0x27a   : > { %v5920_v12 = vmul.f32 %v5132_v35, %v2243_v53 }
 0x27c   : > { %v2264_v31 = vrot.slane %v5920_v12, %v5604_v55  ;;  %v2257_v50 = vrot.slane %v5920_v12, %v5607_v56  ;;  %v2271_v47 = vrot.slane %v5920_v12, %v5746_v52  ;;  %v2710_v40 = vadd.f32 %v5755_v57, %v5920_v12 }
 0x27d   : > { %v2278_v5 = vrot.slane %v5920_v12, %v5761_v62  ;;  %v2285_v27 = vrot.slane %v5920_v12, %v5768_v1 }
 0x27e   : > { %2266 = vbcast.lane.b32.xlu1 %v2264_v31, 256  ;;  %2259 = vbcast.lane.b32.xlu0 %v2257_v50, 256 }
 0x27f   : > { %v5134_v51 = vpop.eup %5133 }
 0x280   : > { %v5930_v58 = vmul.f32 %v5134_v51, %v2619_v20 }
 0x282   : > { %v2711_v61 = vadd.f32 %v2710_v40, %v5930_v58  ;;  %v2633_v21 = vrot.slane %v5930_v58, %v5607_v56  ;;  %2273 = vbcast.lane.b32.xlu0 %v2271_v47, 256  ;;  %v2654_v63 = vrot.slane %v5930_v58, %v5761_v62  ;;  %v2640_v0 = vrot.slane %v5930_v58, %v5604_v55 }
 0x283   : > { %v2661_v57 = vrot.slane %v5930_v58, %v5768_v1  ;;  %v2647_v37 = vrot.slane %v5930_v58, %v5746_v52 }
 0x284   : > { %4489 = vst.msk [vmem:[%s5510_s26] sm:$0xff] %vm2044_vm10, %v2711_v61  ;;  %2635 = vbcast.lane.b32.xlu1 %v2633_v21, 256  ;;  %s6285_s26 = sld [smem:[#allocation35_spill]] }
 0x286   : > { %2656 = vbcast.lane.b32.xlu0 %v2654_v63, 256 }
 0x288   : > { %2642 = vbcast.lane.b32.xlu1 %v2640_v0, 256 }
 0x28a   : > { %2663 = vbcast.lane.b32.xlu0 %v2661_v57, 256 }
 0x28c   : > { %2649 = vbcast.lane.b32.xlu1 %v2647_v37, 256 }
 0x290   : > { %2280 = vbcast.lane.b32.xlu1 %v2278_v5, 256  ;;  %v2668_v5 = vrot.slane %v5930_v58, %v5773_v7 }
 0x294   : > { %2287 = vbcast.lane.b32.xlu1 %v2285_v27, 256  ;;  %v2922_v27 = vld [vmem:[%s5446_s27] sm:$0xff] }
 0x2bc   : > { %v2792_v55 = vpop.f32.mrb[6].mxu0 }
 0x2bd   : > { %v2793_v46 = vadd.f32 %v4709_v10, %v2792_v55  ;;  %v4866_v33 = vpop.f32.mrb[7].mxu0 }
 0x2be   : > { %v2675_v33 = vrot.slane %v5930_v58, %v5778_v14 }
 0x2bf   : > { %v2870_v9 = vsel %vm2869_vm13, %v2793_v46, -inf }
 0x2c0   : > { %v2871_v13 = vrot.slane %v2870_v9, 4 }
 0x2c2   : > { %v2872_v16 = vmax.f32 %v2870_v9, %v2871_v13  ;;  %v2682_v13 = vrot.slane %v5930_v58, %v5785_v23 }
 0x2c4   : > { %v2873_v52 = vrot.slane %v2872_v16, 2 }
 0x2c5   : > { %v2865_v17 = vpop.f32.mrb[6].mxu1 }
 0x2c6   : > { %v2874_v53 = vmax.f32 %v2872_v16, %v2873_v52  ;;  %v2866_v18 = vadd.f32 %v4709_v10, %v2865_v17  ;;  %v4873_v11 = vpop.f32.mrb[7].mxu1  ;;  %v2923_v10 = vld [vmem:[%s5446_s27 + $0x8] sm:$0xff]  ;;  %v2924_v16 = vld [vmem:[%s5446_s27 + $0x10] sm:$0xff]  ;;  %v2925_v52 = vld [vmem:[%s5446_s27 + $0x18] sm:$0xff]  ;;  %v2292_v17 = vrot.slane %v5920_v12, %v5773_v7 }
 0x2c7   : > { %v5014_v55 = vpack.c.bf16 %v2923_v10, %v2922_v27  ;;  %v2306_v11 = vrot.slane %v5920_v12, %v5785_v23 }
 0x2c8   : > { %v2875_v62 = vrot.slane %v2874_v53, 1  ;;  %v2889_v39 = vsel %vm2869_vm13, %v2866_v18, -inf }
 0x2c9   : > { %v2890_v6 = vrot.slane %v2889_v39, 4  ;;  %5015 = vmatpush3.bf16.msra.mxu1 %v5014_v55 }
 0x2ca   : > { %v2876_v1 = vmax.f32 %v2874_v53, %v2875_v62  ;;  %5019 = vmatprep.subr.bf16.mxu1 %v5262_v44  ;;  %v5011_v53 = vpack.c.bf16 %v2925_v52, %v2924_v16  ;;  %v5196_v52 = vld [vmem:[#allocation2 + $0x6] sm:$0x3] }
 0x2cb   : > { %v2891_v20 = vmax.f32 %v2889_v39, %v2890_v6 }
 0x2cc   : > { %v2877_v24 = vsub.f32 %v2793_v46, %v2876_v1  ;;  %5012 = vmatpush3.bf16.msra.mxu0 %v5011_v53 }
 0x2cd   : > { %v2892_v25 = vrot.slane %v2891_v20, 2  ;;  %5016 = vmatprep.subr.bf16.mxu0 %v5262_v44 }
 0x2ce   : > { %v2878_v26 = vmul.f32 1.442695, %v2877_v24 }
 0x2cf   : > { %v2893_v45 = vmax.f32 %v2891_v20, %v2892_v25  ;;  %v5187_v20 = vld [vmem:[#allocation3] sm:$0x3]  ;;  %v5188_v25 = vld [vmem:[#allocation3 + $0x2] sm:$0x3] }
 0x2d0   : > { %5135 = vpow2.f32 %v2878_v26 }
 0x2d1   : > { %v2894_v22 = vrot.slane %v2893_v45, 1 }
 0x2d3   : > { %v2895_v30 = vmax.f32 %v2893_v45, %v2894_v22 }
 0x2d5   : > { %v2896_v36 = vsub.f32 %v2866_v18, %v2895_v30  ;;  %v2299_v18 = vrot.slane %v5920_v12, %v5778_v14  ;;  %v5189_v30 = vld [vmem:[#allocation3 + $0x4] sm:$0x3] }
 0x2d7   : > { %v2897_v28 = vmul.f32 1.442695, %v2896_v36 }
 0x2d9   : > { %5137 = vpow2.f32 %v2897_v28 }
 0x2da   : > { %v5136_v41 = vpop.eup %5135 }
 0x2db   : > { %v2880_v42 = vsel %vm2869_vm13, %v5136_v41, 0.0 }
 0x2dc   : > { %v2881_v34 = vrot.slane %v2880_v42, 4 }
 0x2de   : > { %v2882_v8 = vadd.f32 %v2881_v34, %v2880_v42  ;;  %v5190_v42 = vld [vmem:[#allocation3 + $0x6] sm:$0x3] }
 0x2e0   : > { %v2883_v3 = vrot.slane %v2882_v8, 2 }
 0x2e2   : > { %v2884_v49 = vadd.f32 %v2883_v3, %v2882_v8  ;;  %v5191_v8 = vld [vmem:[#allocation2 + $0x2] sm:$0x3] }
 0x2e3   : > { %v5138_v35 = vpop.eup %5137 }
 0x2e4   : > { %v2899_v31 = vsel %vm2869_vm13, %v5138_v35, 0.0  ;;  %v2885_v50 = vrot.slane %v2884_v49, 1 }
 0x2e5   : > { %v2900_v47 = vrot.slane %v2899_v31, 4 }
 0x2e6   : > { %v2886_v51 = vadd.f32 %v2885_v50, %v2884_v49  ;;  %v5192_v49 = vld [vmem:[#allocation2] sm:$0x3] }
 0x2e7   : > { %v2901_v40 = vadd.f32 %v2900_v47, %v2899_v31  ;;  %v3082_v47 = vld [vmem:[%s6283_s7] sm:$0xff] }
 0x2e8   : > { %5139 = vrcp.f32 %v2886_v51  ;;  %v3083_v51 = vld [vmem:[%s6283_s7 + $0x8] sm:$0xff]  ;;  %s6302_s7 = smov 112  }
 0x2e9   : > { %v2902_v61 = vrot.slane %v2901_v40, 2  ;;  %v5017_v55 = vpack.c.bf16 %v3083_v51, %v3082_v47 }
 0x2eb   : > { %v2903_v21 = vadd.f32 %v2902_v61, %v2901_v40 }
 0x2ed   : > { %v2904_v63 = vrot.slane %v2903_v21, 1 }
 0x2ef   : > { %v2905_v0 = vadd.f32 %v2904_v63, %v2903_v21  ;;  %v5193_v21 = vld [vmem:[#allocation3 + $0x8] sm:$0x3] }
 0x2f0   : > { %v2267_v58 = vpop.permute.xlu1 %2266  ;;  %v2260_v62 = vpop.permute.xlu0 %2259 }
 0x2f1   : > { %5141 = vrcp.f32 %v2905_v0  ;;  %v2311_v3 = vmul.f32 %v5191_v8, %v2267_v58  ;;  %v5197_v58 = vld [vmem:[#allocation3 + $0xc] sm:$0x3] }
 0x2f2   : > { %v5140_v57 = vpop.eup %5139 }
 0x2f3   : > { %v2888_v37 = vmul.f32 %v5140_v57, %v5136_v41  ;;  %v2319_v57 = vsel %vm1343_vm1, %v2311_v3, 0.0 }
 0x2f4   : > { %v2274_v6 = vpop.permute.xlu0 %2273 }
 0x2f5   : > { %2910 = vperm.xlu0 %5117, %v2888_v37  }
 0x2f6   : > { %v2636_v39 = vpop.permute.xlu1 %2635 }
 0x2f7   : > { %v2686_v24 = vmul.f32 %v5187_v20, %v2636_v39 }
 0x2f8   : > { %v2657_v7 = vpop.permute.xlu0 %2656 }
 0x2f9   : > { %2670 = vbcast.lane.b32.xlu0 %v2668_v5, 256  ;;  %v2694_v22 = vsel %vm1343_vm1, %v2686_v24, 0.0  ;;  %v2689_v34 = vmul.f32 %v5190_v42, %v2657_v7  ;;  %v5194_v5 = vld [vmem:[#allocation2 + $0x4] sm:$0x3] }
 0x2fa   : > { %v2643_v1 = vpop.permute.xlu1 %2642  ;;  %v2312_v27 = vmul.f32 %v5194_v5, %v2274_v6 }
 0x2fb   : > { %v5142_v46 = vpop.eup %5141  ;;  %v2687_v26 = vmul.f32 %v5188_v25, %v2643_v1  ;;  %v2699_v61 = vsel %vm1343_vm1, %v2689_v34, 0.0  ;;  %v5198_v25 = vld [vmem:[#allocation2 + $0x8] sm:$0x3] }
 0x2fc   : > { %v2907_v9 = vmul.f32 %v5142_v46, %v5138_v35  ;;  %v2664_v12 = vpop.permute.xlu0 %2663  ;;  %v2310_v35 = vmul.f32 %v5192_v49, %v2260_v62  ;;  %v2321_v53 = vsel %vm1343_vm1, %v2312_v27, 0.0 }
 0x2fd   : > { %2677 = vbcast.lane.b32.xlu0 %v2675_v33, 256  ;;  %v2695_v14 = vsel %vm1343_vm1, %v2687_v26, 0.0  ;;  %v2690_v63 = vmul.f32 %v5193_v21, %v2664_v12  ;;  %v5195_v33 = vld [vmem:[#allocation3 + $0xa] sm:$0x3] }
 0x2fe   : > { %2917 = vperm.xlu1 %5118, %v2907_v9   ;;  %v2650_v45 = vpop.permute.xlu1 %2649  ;;  %v2696_v36 = vadd.f32 %v2695_v14, %v2694_v22  ;;  %v2318_v37 = vsel %vm1343_vm1, %v2310_v35, 0.0  ;;  %v5201_v35 = vld [vmem:[#allocation2 + $0xc] sm:$0x3] }
 0x2ff   : > { %v2688_v23 = vmul.f32 %v5189_v30, %v2650_v45  ;;  %v2320_v16 = vadd.f32 %v2319_v57, %v2318_v37  ;;  %v5199_v30 = vld [vmem:[#allocation3 + $0xe] sm:$0x3] }
 0x301   : > { %2684 = vbcast.lane.b32.xlu0 %v2682_v13, 256  ;;  %v2697_v28 = vsel %vm1343_vm1, %v2688_v23, 0.0  ;;  %v2322_v7 = vadd.f32 %v2321_v53, %v2320_v16 }
 0x302   : > { %2294 = vbcast.lane.b32.xlu1 %v2292_v17, 256  ;;  %v2281_v41 = vpop.permute.xlu1 %2280  ;;  %v2698_v40 = vadd.f32 %v2697_v28, %v2696_v36  ;;  %v5200_v28 = vld [vmem:[#allocation2 + $0xa] sm:$0x3] }
 0x303   : > { %v2313_v17 = vmul.f32 %v5196_v52, %v2281_v41 }
 0x304   : > { %v2700_v13 = vadd.f32 %v2699_v61, %v2698_v40  ;;  %v5202_v61 = vld [vmem:[#allocation2 + $0xe] sm:$0x3] }
 0x305   : > { %v2323_v24 = vsel %vm1343_vm1, %v2313_v17, 0.0 }
 0x306   : > { %2301 = vbcast.lane.b32.xlu1 %v2299_v18, 256  ;;  %v2288_v46 = vpop.permute.xlu1 %2287  ;;  %v2324_v42 = vadd.f32 %v2323_v24, %v2322_v7 }
 0x307   : > { %v2314_v26 = vmul.f32 %v5198_v25, %v2288_v46  ;;  %v4715_v46 = vld [vmem:[#allocation9] ss:$0 sm:$0xff] }
 0x309   : > { %v2325_v8 = vsel %vm1343_vm1, %v2314_v26, 0.0 }
 0x30a   : > { %2308 = vbcast.lane.b32.xlu1 %v2306_v11, 256 }
 0x374   : > { %v2911_v31 = vpop.permute.xlu0 %2910 }
 0x375   : > { %v2913_v50 = vmul.f32 %v2911_v31, %v5855_v2 }
 0x377   : > { %v2914_v0 = vadd.f32 %v2913_v50, %v5855_v2  ;;  %v2701_v2 = vsel %vm1343_vm1, %v2690_v63, 0.0  ;;  %v2326_v50 = vadd.f32 %v2325_v8, %v2324_v42 }
 0x378   : > { %v2671_v10 = vpop.permute.xlu0 %2670  ;;  %v2702_v6 = vadd.f32 %v2701_v2, %v2700_v13 }
 0x379   : > { %v2691_v9 = vmul.f32 %v5195_v33, %v2671_v10  ;;  %4886 = vmatmul.mubr.msk.f32.vlgmr.msra.gmra.mrb[8].mxu1 %vm1390_vm12, %v2914_v0 }
 0x37a   : > { %5021 = vmatpush3.bf16.msra.mxu1 %v5017_v55  ;;  %4899 = vmatprep.mubr.msk.f32.mxu1 %vm5263_vm11, %v5261_v32 }
 0x37b   : > { %5025 = vmatprep.subr.bf16.mxu1 %v5262_v44  ;;  %v2703_v11 = vsel %vm1343_vm1, %v2691_v9, 0.0 }
 0x37c   : > { %v2678_v18 = vpop.permute.xlu0 %2677  ;;  %v2704_v45 = vadd.f32 %v2703_v11, %v2702_v6 }
 0x37d   : > { %v2692_v62 = vmul.f32 %v5197_v58, %v2678_v18  ;;  %v2918_v39 = vpop.permute.xlu1 %2917 }
 0x37e   : > { %v2920_v1 = vmul.f32 %v2918_v39, %v5866_v19 }
 0x37f   : > { %v2705_v20 = vsel %vm1343_vm1, %v2692_v62, 0.0 }
 0x380   : > { %v2921_v22 = vadd.f32 %v2920_v1, %v5866_v19  ;;  %v2685_v14 = vpop.permute.xlu0 %2684  ;;  %v2706_v36 = vadd.f32 %v2705_v20, %v2704_v45 }
 0x381   : > { %v2693_v23 = vmul.f32 %v5199_v30, %v2685_v14  ;;  %v2295_v12 = vpop.permute.xlu1 %2294 }
 0x382   : > { %v2315_v41 = vmul.f32 %v5200_v28, %v2295_v12  ;;  %4879 = vmatmul.mubr.msk.f32.vlgmr.msra.gmra.mrb[8].mxu0 %vm1390_vm12, %v2921_v22 }
 0x383   : > { %v2707_v34 = vsel %vm1343_vm1, %v2693_v23, 0.0  ;;  %5018 = vmatpush3.bf16.msra.mxu0 %v5017_v55  ;;  %4892 = vmatprep.mubr.msk.f32.mxu0 %vm5263_vm11, %v5261_v32 }
 0x384   : > { %v5997_v3 = vadd.f32 %v2707_v34, %v2706_v36  ;;  %5022 = vmatprep.subr.bf16.mxu0 %v5262_v44  ;;  %v2327_v49 = vsel %vm1343_vm1, %v2315_v41, 0.0 }
 0x385   : > { %v2302_v19 = vpop.permute.xlu1 %2301  ;;  %v2328_v51 = vadd.f32 %v2327_v49, %v2326_v50 }
 0x386   : > { %v2316_v31 = vmul.f32 %v5201_v35, %v2302_v19  ;;  %4893 = vmatmul.mubr.msk.f32.vlgmr.msra.gmra.mrb[10].mxu0 %vm1390_vm12, %v5997_v3 }
 0x387   : > { %4906 = vmatprep.mubr.msk.f32.mxu0 %vm5263_vm11, %v5261_v32 }
 0x388   : > { %v2329_v47 = vsel %vm1343_vm1, %v2316_v31, 0.0 }
 0x389   : > { %v2309_v40 = vpop.permute.xlu1 %2308  ;;  %v2330_v63 = vadd.f32 %v2329_v47, %v2328_v51 }
 0x38a   : > { %v2317_v21 = vmul.f32 %v5202_v61, %v2309_v40 }
 0x38c   : > { %v2331_v0 = vsel %vm1343_vm1, %v2317_v21, 0.0 }
 0x38d   : > { %v6007_v57 = vadd.f32 %v2331_v0, %v2330_v63  ;;  %v3289_v63 = vld [vmem:[%s5456_s30] sm:$0xff]  ;;  %v3290_v0 = vld [vmem:[%s5456_s30 + $0x8] sm:$0xff] }
 0x38f   : > { %4900 = vmatmul.mubr.msk.f32.vlgmr.msra.gmra.mrb[10].mxu1 %vm1390_vm12, %v6007_v57 }
 0x390   : > { %4913 = vmatprep.mubr.msk.f32.mxu1 %vm5263_vm11, %v5261_v32 }
 0x44c   : > { %v3068_v37 = vpop.f32.mrb[8].mxu1 }
 0x44d   : > { %v4887_v5 = vpop.f32.mrb[9].mxu1 }
 0x455   : > { %v2995_v27 = vpop.f32.mrb[8].mxu0 }
 0x456   : > { %v6013_v10 = vadd.f32 %v3068_v37, %v2995_v27  ;;  %v4880_v55 = vpop.f32.mrb[9].mxu0  ;;  %v5026_v37 = vpack.c.bf16 %v3290_v0, %v3289_v63 }
 0x457   : > { %v3291_v55 = vld [vmem:[%s5456_s30 + $0x10] sm:$0xff] }
 0x458   : > { %5027 = vmatpush3.bf16.msra.mxu1 %v5026_v37 }
 0x459   : > { %v3160_v33 = vpop.f32.mrb[10].mxu0  ;;  %5031 = vmatprep.subr.bf16.mxu1 %v5262_v44 }
 0x45a   : > { %v3161_v9 = vadd.f32 %v4715_v46, %v3160_v33  ;;  %v4894_v13 = vpop.f32.mrb[11].mxu0 }
 0x45b   : > { %v3449_v13 = vld [vmem:[%s6284_s15 + $0x8] sm:$0xff] }
 0x45c   : > { %v3237_v16 = vsel %vm2869_vm13, %v3161_v9, -inf }
 0x45d   : > { %v3238_v2 = vrot.slane %v3237_v16, 4 }
 0x45f   : > { %v3239_v52 = vmax.f32 %v3237_v16, %v3238_v2 }
 0x461   : > { %v3240_v17 = vrot.slane %v3239_v52, 2 }
 0x462   : > { %v3233_v53 = vpop.f32.mrb[10].mxu1 }
 0x463   : > { %v3241_v18 = vmax.f32 %v3239_v52, %v3240_v17  ;;  %v3234_v11 = vadd.f32 %v4715_v46, %v3233_v53  ;;  %v4901_v58 = vpop.f32.mrb[11].mxu1  ;;  %v3292_v46 = vld [vmem:[%s5456_s30 + $0x18] sm:$0xff]  ;;  %v3450_v53 = vld [vmem:[%s6284_s15 + $0x10] sm:$0xff] }
 0x464   : > { %v5023_v33 = vpack.c.bf16 %v3292_v46, %v3291_v55 }
 0x465   : > { %v3242_v62 = vrot.slane %v3241_v18, 1  ;;  %v3256_v39 = vsel %vm2869_vm13, %v3234_v11, -inf }
 0x466   : > { %v3257_v6 = vrot.slane %v3256_v39, 4  ;;  %5024 = vmatpush3.bf16.msra.mxu0 %v5023_v33 }
 0x467   : > { %v3243_v1 = vmax.f32 %v3241_v18, %v3242_v62  ;;  %5028 = vmatprep.subr.bf16.mxu0 %v5262_v44  ;;  %v3451_v18 = vld [vmem:[%s6284_s15 + $0x18] sm:$0xff]  ;;  %v5203_v62 = vld [vmem:[%s5497_s11] sm:$0x3]  ;;  %s6288_s11 = sld [smem:[#allocation36_spill]] }
 0x468   : > { %v3258_v7 = vmax.f32 %v3256_v39, %v3257_v6  ;;  %v5029_v39 = vpack.c.bf16 %v3451_v18, %v3450_v53 }
 0x469   : > { %v3244_v20 = vsub.f32 %v3161_v9, %v3243_v1  ;;  %v3448_v9 = vld [vmem:[%s6284_s15] sm:$0xff] }
 0x46a   : > { %v3259_v24 = vrot.slane %v3258_v7, 2  ;;  %v5032_v52 = vpack.c.bf16 %v3449_v13, %v3448_v9 }
 0x46b   : > { %v3245_v25 = vmul.f32 1.442695, %v3244_v20  ;;  %v3604_v20 = vld [vmem:[%s6286_s28 + $0x8] sm:$0xff] }
 0x46c   : > { %v3260_v26 = vmax.f32 %v3258_v7, %v3259_v24  ;;  %v3603_v7 = vld [vmem:[%s6286_s28] sm:$0xff]  ;;  %v3080_v24 = vstv %s6036_s2  ;;  %s6290_s2 = sld [smem:[#allocation20_spill]] }
 0x46d   : > { %5143 = vpow2.f32 %v3245_v25  ;;  %v5035_v25 = vpack.c.bf16 %v3604_v20, %v3603_v7  ;;  %v4158_v7 = vld [vmem:[%s6293_s18] sm:$0xff]  ;;  %v4159_v20 = vld [vmem:[%s6293_s18 + $0x8] sm:$0xff] }
 0x46e   : > { %v3261_v45 = vrot.slane %v3260_v26, 1 }
 0x470   : > { %v3262_v22 = vmax.f32 %v3260_v26, %v3261_v45  ;;  %v3711_v45 = vld [vmem:[%s6287_s23] sm:$0xff] }
 0x472   : > { %v3263_v14 = vsub.f32 %v3234_v11, %v3262_v22  ;;  %v4714_v11 = vld [vmem:[%s6285_s26] ss:$0 sm:$0xff]  ;;  %s6289_s26 = sld [smem:[#allocation22_spill]] }
 0x473   : > { %v3079_v6 = vadd.f32 %v4714_v11, %v6013_v10  ;;  %v3714_v10 = vld [vmem:[%s6287_s23 + $0x18] sm:$0xff] }
 0x474   : > { %v3264_v30 = vmul.f32 1.442695, %v3263_v14  ;;  %v3712_v14 = vld [vmem:[%s6287_s23 + $0x8] sm:$0xff] }
 0x475   : > { %v3081_v26 = vmul.f32 %v3080_v24, %v3079_v6 }
 0x476   : > { %5145 = vpow2.f32 %v3264_v30  ;;  %v5041_v30 = vpack.c.bf16 %v3712_v14, %v3711_v45 }
 0x477   : > { %v5144_v23 = vpop.eup %5143 }
 0x478   : > { %v3247_v12 = vsel %vm2869_vm13, %v5144_v23, 0.0 }
 0x479   : > { %v3248_v36 = vrot.slane %v3247_v12, 4 }
 0x47b   : > { %v3249_v28 = vadd.f32 %v3248_v36, %v3247_v12 }
 0x47d   : > { %v3250_v41 = vrot.slane %v3249_v28, 2 }
 0x47f   : > { %v3251_v42 = vadd.f32 %v3250_v41, %v3249_v28 }
 0x480   : > { %v5146_v34 = vpop.eup %5145 }
 0x481   : > { %v3266_v8 = vsel %vm2869_vm13, %v5146_v34, 0.0  ;;  %v3252_v19 = vrot.slane %v3251_v42, 1 }
 0x482   : > { %v3267_v49 = vrot.slane %v3266_v8, 4 }
 0x483   : > { %v3253_v35 = vadd.f32 %v3252_v19, %v3251_v42 }
 0x484   : > { %v3268_v31 = vadd.f32 %v3267_v49, %v3266_v8  ;;  %v3866_v49 = vld [vmem:[%s6289_s26] sm:$0xff] }
 0x485   : > { %5147 = vrcp.f32 %v3253_v35  ;;  %v3867_v35 = vld [vmem:[%s6289_s26 + $0x8] sm:$0xff] }
 0x486   : > { %v3269_v50 = vrot.slane %v3268_v31, 2 }
 0x488   : > { %v3270_v47 = vadd.f32 %v3269_v50, %v3268_v31 }
 0x48a   : > { %v3271_v51 = vrot.slane %v3270_v47, 1 }
 0x48c   : > { %v3272_v40 = vadd.f32 %v3271_v51, %v3270_v47  ;;  %v5044_v47 = vpack.c.bf16 %v3867_v35, %v3866_v49  ;;  %v4075_v49 = vld [vmem:[%s6297_s3] sm:$0xff]  ;;  %v4076_v35 = vld [vmem:[%s6297_s3 + $0x8] sm:$0xff]  ;;  %s6303_s3 = sld [smem:[#allocation29_spill]] }
 0x48e   : > { %5149 = vrcp.f32 %v3272_v40 }
 0x48f   : > { %v5148_v61 = vpop.eup %5147 }
 0x490   : > { %v3255_v21 = vmul.f32 %v5148_v61, %v5144_v23  ;;  %v5204_v23 = vld [vmem:[%s5501_s16] sm:$0x3]  ;;  %s6291_s16 = sld [smem:[#allocation19_spill]] }
 0x492   : > { %3277 = vperm.xlu1 %5118, %v3255_v21   ;;  %v4724_v21 = vld [vmem:[%s6290_s2] ss:$0 sm:$0xff]  ;;  %s6292_s2 = sld [smem:[#allocation24_spill]] }
 0x498   : > { %v5150_v5 = vpop.eup %5149 }
 0x499   : > { %v3274_v27 = vmul.f32 %v5150_v5, %v5146_v34  ;;  %v4720_v34 = vld [vmem:[%s6288_s11] ss:$0 sm:$0xff]  ;;  %s6236_s11 = smov 96  }
 0x49a   : > { %v4723_v5 = vld [vmem:[%s6291_s16] ss:$0 sm:$0xff]  ;;  %s6294_s16 = smov 96  }
 0x49b   : > { %3284 = vperm.xlu0 %5117, %v3274_v27  }
 0x511   : > { %v3278_v16 = vpop.permute.xlu1 %3277 }
 0x512   : > { %v3280_v2 = vmul.f32 %v3278_v16, %v5997_v3 }
 0x514   : > { %v3281_v17 = vadd.f32 %v3280_v2, %v5997_v3 }
 0x516   : > { %4914 = vmatmul.mubr.msk.f32.vlgmr.msra.gmra.mrb[12].mxu1 %vm1390_vm12, %v3281_v17 }
 0x517   : > { %5033 = vmatpush3.bf16.msra.mxu1 %v5032_v52  ;;  %4927 = vmatprep.mubr.msk.f32.mxu1 %vm5263_vm11, %v5261_v32 }
 0x518   : > { %5037 = vmatprep.subr.bf16.mxu1 %v5262_v44 }
 0x51a   : > { %v3285_v58 = vpop.permute.xlu0 %3284  ;;  %4928 = vmatmul.mubr.msk.f32.vlgmr.msra.gmra.mrb[14].mxu1 %vm1390_vm12, %v5203_v62 }
 0x51b   : > { %v3287_v3 = vmul.f32 %v3285_v58, %v6007_v57  ;;  %4941 = vmatprep.mubr.msk.f32.mxu1 %vm5263_vm11, %v5261_v32  ;;  %v4730_v58 = vld [vmem:[%s6292_s2] ss:$0 sm:$0xff]  ;;  %s6241_s2 = smov 112  }
 0x51d   : > { %v3288_v1 = vadd.f32 %v3287_v3, %v6007_v57  ;;  %v3713_v57 = vld [vmem:[%s6287_s23 + $0x10] sm:$0xff] }
 0x51e   : > { %v5038_v22 = vpack.c.bf16 %v3714_v10, %v3713_v57  ;;  %v4729_v57 = vld [vmem:[%s6295_s1] ss:$0 sm:$0xff]  ;;  %s6299_s1 = sld [smem:[#allocation12_spill]] }
 0x51f   : > { %4907 = vmatmul.mubr.msk.f32.vlgmr.msra.gmra.mrb[12].mxu0 %vm1390_vm12, %v3288_v1 }
 0x520   : > { %5030 = vmatpush3.bf16.msra.mxu0 %v5029_v39  ;;  %4920 = vmatprep.mubr.msk.f32.mxu0 %vm5263_vm11, %v5261_v32 }
 0x521   : > { %5034 = vmatprep.subr.bf16.mxu0 %v5262_v44  ;;  %5039 = vmatpush3.bf16.msra.mxu1 %v5038_v22 }
 0x522   : > { %5043 = vmatprep.subr.bf16.mxu1 %v5262_v44 }
 0x523   : > { %4921 = vmatmul.mubr.msk.f32.vlgmr.msra.gmra.mrb[14].mxu0 %vm1390_vm12, %v3081_v26 }
 0x524   : > { %5036 = vmatpush3.bf16.msra.mxu0 %v5035_v25  ;;  %4934 = vmatprep.mubr.msk.f32.mxu0 %vm5263_vm11, %v5261_v32  ;;  %v6093_v25 = vld [vmem:[#allocation6] sm:$0x3] }
 0x525   : > { %5040 = vmatprep.subr.bf16.mxu0 %v5262_v44 }
 0x527   : > { %4935 = vmatmul.mubr.msk.f32.vlgmr.msra.gmra.mrb[16].mxu0 %vm1390_vm12, %v5699_v4 }
 0x528   : > { %4948 = vmatprep.mubr.msk.f32.mxu0 %vm5263_vm11, %v5261_v32  ;;  %5042 = vmatpush3.bf16.msra.mxu0 %v5041_v30 }
 0x529   : > { %5046 = vmatprep.subr.bf16.mxu0 %v5262_v44 }
 0x52b   : > { %4949 = vmatmul.mubr.msk.f32.vlgmr.msra.gmra.mrb[18].mxu0 %vm1390_vm12, %v5204_v23 }
 0x52c   : > { %4962 = vmatprep.mubr.msk.f32.mxu0 %vm5263_vm11, %v5261_v32 }
 0x5e9   : > { %v3435_v12 = vpop.f32.mrb[12].mxu1 }
 0x5ea   : > { %v4915_v36 = vpop.f32.mrb[13].mxu1 }
 0x5ed   : > { %v3591_v28 = vpop.f32.mrb[14].mxu1 }
 0x5ee   : > { %v4929_v41 = vpop.f32.mrb[15].mxu1 }
 0x5f2   : > { %v3362_v42 = vpop.f32.mrb[12].mxu0 }
 0x5f3   : > { %v3436_v8 = vadd.f32 %v3435_v12, %v3362_v42  ;;  %v4908_v19 = vpop.f32.mrb[13].mxu0 }
 0x5f5   : > { %v3446_v31 = vadd.f32 %v4720_v34, %v3436_v8  ;;  %v6109_v34 = vld [vmem:[#allocation7] sm:$0x3] }
 0x5f6   : > { %v3521_v50 = vpop.f32.mrb[14].mxu0 }
 0x5f7   : > { %v3447_v51 = vmul.f32 %v3446_v31, %v3080_v24  ;;  %v3592_v40 = vadd.f32 %v3591_v28, %v3521_v50  ;;  %v4922_v61 = vpop.f32.mrb[15].mxu0  ;;  %v5050_v24 = vpack.c.bf16 %v4159_v20, %v4158_v7 }
 0x5f9   : > { %4942 = vmatmul.mubr.msk.f32.vlgmr.msra.gmra.mrb[16].mxu1 %vm1390_vm12, %v3447_v51  ;;  %v3602_v27 = vadd.f32 %v4723_v5, %v3592_v40 }
 0x5fa   : > { %5045 = vmatpush3.bf16.msra.mxu1 %v5044_v47  ;;  %v3678_v63 = vpop.f32.mrb[16].mxu0  ;;  %4955 = vmatprep.mubr.msk.f32.mxu1 %vm5263_vm11, %v5261_v32 }
 0x5fb   : > { %v3679_v0 = vadd.f32 %v4724_v21, %v3678_v63  ;;  %v4936_v37 = vpop.f32.mrb[17].mxu0  ;;  %5049 = vmatprep.subr.bf16.mxu1 %v5262_v44 }
 0x5fd   : > { %3690 = vrot.lane.b32.xlu1 %v3679_v0, %s6236_s11  ;;  %4956 = vmatmul.mubr.msk.f32.vlgmr.msra.gmra.mrb[18].mxu1 %vm1390_vm12, %v5730_v38  ;;  %v3682_v55 = vadd.f32 %v3679_v0, %v3602_v27  ;;  %s6238_s11 = smov 32   ;;  %v4695_v0 = vld [vmem:[%s6299_s1] ss:$0 sm:$0xff]  ;;  %s6309_s1 = smov 16  }
 0x5fe   : > { %4969 = vmatprep.mubr.msk.f32.mxu1 %vm5263_vm11, %v5261_v32  ;;  %v3854_v33 = vpop.f32.mrb[18].mxu0  ;;  %5051 = vmatpush3.bf16.msra.mxu1 %v5050_v24  ;;  %v1623_v37 = vadd.f32 %v4695_v0, %v5874_v29 }
 0x5ff   : > { %v4726_v46 = vmul.f32 -1.442695, %v3682_v55  ;;  %v4950_v9 = vpop.f32.mrb[19].mxu0  ;;  %5055 = vmatprep.subr.bf16.mxu1 %v5262_v44 }
 0x601   : > { %5151 = vpow2.f32 %v4726_v46  ;;  %4970 = vmatmul.mubr.msk.f32.vlgmr.msra.gmra.mrb[20].mxu1 %vm1390_vm12, %v6093_v25 }
 0x602   : > { %4983 = vmatprep.mubr.msk.f32.mxu1 %vm5263_vm11, %v5261_v32 }
 0x60b   : > { %v5152_v13 = vpop.eup %5151 }
 0x60c   : > { %v3686_v16 = vadd.f32 1.0, %v5152_v13 }
 0x60e   : > { %5153 = vrcp.f32 %v3686_v16 }
 0x618   : > { %v6085_v2 = vpop.eup %5153 }
 0x619   : > { %v3700_v51 = vsub.f32 1.0, %v6085_v2 }
 0x66f   : > { %v3691_v52 = vpop.permute.xlu1 %3690 }
 0x670   : > { %v3693_v17 = vmul.f32 %v6085_v2, %v3691_v52 }
 0x672   : > { %3695 = vrot.lane.b32.xlu1 %v3693_v17, %s6238_s11  ;;  %s6296_s11 = sld [smem:[#allocation30_spill]]  ;;  %v4270_v17 = vld [vmem:[%s6303_s3] sm:$0xff] }
 0x678   : > { %v4353_v28 = vld [vmem:[%s6296_s11] sm:$0xff]  ;;  %v4354_v41 = vld [vmem:[%s6296_s11 + $0x8] sm:$0xff] }
 0x679   : > { %v5056_v42 = vpack.c.bf16 %v4354_v41, %v4353_v28 }
 0x67b   : > { %5057 = vmatpush3.bf16.msra.mxu1 %v5056_v42 }
 0x67e   : > { %4984 = vmatmul.mubr.msk.f32.vlgmr.msra.gmra.mrb[22].mxu1 %vm1390_vm12, %v6109_v34 }
 0x6cc   : > { %v3784_v53 = vpop.f32.mrb[16].mxu1 }
 0x6cd   : > { %v3855_v18 = vadd.f32 %v3854_v33, %v3784_v53  ;;  %v4943_v11 = vpop.f32.mrb[17].mxu1  ;;  %v4271_v53 = vld [vmem:[%s6303_s3 + $0x8] sm:$0xff] }
 0x6cf   : > { %v3865_v10 = vadd.f32 %v4729_v57, %v3855_v18 }
 0x6d0   : > { %v3941_v62 = vpop.f32.mrb[18].mxu1 }
 0x6d1   : > { %v3942_v3 = vadd.f32 %v4730_v58, %v3941_v62  ;;  %v4957_v39 = vpop.f32.mrb[19].mxu1  ;;  %v5053_v62 = vpack.c.bf16 %v4271_v53, %v4270_v17 }
 0x6d3   : > { %3953 = vrot.lane.b32.xlu0 %v3942_v3, %s6294_s16  ;;  %v3945_v45 = vadd.f32 %v3942_v3, %v3865_v10 }
 0x6d5   : > { %v4732_v22 = vmul.f32 -1.442695, %v3945_v45 }
 0x6e4   : > { %v3696_v6 = vpop.permute.xlu1 %3695 }
 0x6e5   : > { %v3698_v1 = vadd.f32 %v3696_v6, %v3602_v27 }
 0x6e7   : > { %5155 = vtanh.f32 %v3698_v1 }
 0x6e8   : > { %5157 = vpow2.f32 %v4732_v22 }
 0x6f1   : > { %v5156_v26 = vpop.eup %5155 }
 0x6f2   : > { %3702 = vrot.lane.b32.xlu1 %v5156_v26, %s6241_s2  ;;  %v5158_v14 = vpop.eup %5157  ;;  %s6300_s2 = sld [smem:[#allocation28_spill]] }
 0x6f3   : > { %v3949_v30 = vadd.f32 1.0, %v5158_v14 }
 0x6f5   : > { %5159 = vrcp.f32 %v3949_v30 }
 0x6ff   : > { %v5160_v23 = vpop.eup %5159 }
 0x700   : > { %v3963_v52 = vsub.f32 1.0, %v5160_v23 }
 0x745   : > { %v3954_v12 = vpop.permute.xlu0 %3953 }
 0x746   : > { %v3956_v36 = vmul.f32 %v5160_v23, %v3954_v12 }
 0x748   : > { %3958 = vrot.lane.b32.xlu0 %v3956_v36, %s6298_s4 }
 0x74c   : > { %3706 = vrot.lane.b32.xlu0 %v5699_v4, %s6243_s5  ;;  %v5047_v4 = vpack.c.bf16 %v4076_v35, %v4075_v49 }
 0x74e   : > { %5048 = vmatpush3.bf16.msra.mxu0 %v5047_v4 }
 0x74f   : > { %5052 = vmatprep.subr.bf16.mxu0 %v5262_v44  ;;  %v4735_v44 = vld [vmem:[%s6300_s2] ss:$0 sm:$0xff]  ;;  %s6305_s2 = sld [smem:[#allocation32_spill]] }
 0x750   : > { %3969 = vrot.lane.b32.xlu0 %v5730_v38, %s6243_s5  ;;  %v4236_v38 = vpop.f32.mrb[20].mxu1  ;;  %s6301_s5 = sld [smem:[#allocation11_spill]] }
 0x751   : > { %v4971_v31 = vpop.f32.mrb[21].mxu1  ;;  %v4237_v5 = vadd.f32 %v4735_v44, %v4236_v38 }
 0x752   : > { %v4431_v13 = vpop.f32.mrb[22].mxu1 }
 0x753   : > { %v4985_v16 = vpop.f32.mrb[23].mxu1 }
 0x755   : > { %v4740_v6 = vld [vmem:[%s6305_s2] ss:$0 sm:$0xff]  ;;  %s6311_s2 = scalar_lea.vmem %s5471_s22, %s5493_s24 }
 0x756   : > { %v4694_v27 = vld [vmem:[%s6301_s5] ss:$0 sm:$0xff]  ;;  %s6306_s5 = sld [smem:[#allocation15_spill]]  ;;  %v4432_v26 = vadd.f32 %v4740_v6, %v4431_v13 }
 0x757   : > { %v1543_v55 = vadd.f32 %v4694_v27, %v5872_v15  ;;  %v4701_v15 = vld [vmem:[%s6304_s8] ss:$0 sm:$0xff]  ;;  %s6307_s8 = sld [smem:[#allocation27_spill]] }
 0x758   : > { %v1894_v1 = vadd.f32 %v4701_v15, %v5879_v48  ;;  %v5206_v15 = vld [vmem:[%s5750_s0] sm:$0x3] }
 0x759   : > { %v1626_v46 = vadd.f32 %v1623_v37, %v1543_v55 }
 0x75b   : > { %v4697_v33 = vmul.f32 -1.442695, %v1626_v46 }
 0x75c   : > { %v4700_v57 = vld [vmem:[%s6306_s5] ss:$0 sm:$0xff] }
 0x75d   : > { %v4733_v36 = vld [vmem:[%s6307_s8] ss:$0 sm:$0xff] }
 0x764   : > { %v3703_v47 = vpop.permute.xlu1 %3702 }
 0x765   : > { %v3705_v21 = vmul.f32 %v3703_v47, %v3700_v51 }
 0x7ba   : > { %v3959_v8 = vpop.permute.xlu0 %3958 }
 0x7bb   : > { %v3961_v19 = vadd.f32 %v3959_v8, %v3865_v10  ;;  %v1814_v10 = vadd.f32 %v4700_v57, %v5877_v43 }
 0x7bd   : > { %5161 = vtanh.f32 %v3961_v19 }
 0x7be   : > { %v3707_v50 = vpop.permute.xlu0 %3706  ;;  %5163 = vpow2.f32 %v4697_v33 }
 0x7bf   : > { %v3709_v40 = vmul.f32 %v6085_v2, %v3707_v50 }
 0x7c1   : > { %v6119_v63 = vadd.f32 %v3709_v40, %v3705_v21 }
 0x7c2   : > { %v3970_v29 = vpop.permute.xlu0 %3969 }
 0x7c3   : > { %v3972_v11 = vmul.f32 %v5160_v23, %v3970_v29 }
 0x7c7   : > { %v5162_v61 = vpop.eup %5161 }
 0x7c8   : > { %3965 = vrot.lane.b32.xlu1 %v5162_v61, %s6302_s7  ;;  %v5164_v9 = vpop.eup %5163 }
 0x7c9   : > { %v1630_v2 = vadd.f32 1.0, %v5164_v9  ;;  %v5269_v9 = vmov 1966171168  }
 0x7ca   : > { %v3980_v13 = vunpack.c.l.s4 %v5269_v9  ;;  %v5209_v9 = vld [vmem:[#allocation4] sm:$0x3] }
 0x7cb   : > { %5165 = vrcp.f32 %v1630_v2 }
 0x7cc   : > { %4084 = vrot.lane.b32.xlu1 %v6119_v63, %s6302_s7  ;;  %v3981_v16 = vunpack.c.0.s8 %v3980_v13 }
 0x7ce   : > { %v3984_v29 = vsub.s32 %v3981_v16, %v5601_v54 }
 0x7d0   : > { %1634 = vrot.lane.b32.xlu1 %v1623_v37, %s6294_s16 }
 0x7d4   : > { %4248 = vrot.lane.b32.xlu1 %v4237_v5, %s6294_s16 }
 0x7d5   : > { %v6142_v7 = vpop.eup %5165 }
 0x83a   : > { %v3966_v18 = vpop.permute.xlu1 %3965 }
 0x83b   : > { %v3968_v58 = vmul.f32 %v3966_v18, %v3963_v52  ;;  %v3985_v18 = vrot.slane %v6119_v63, %v3984_v29 }
 0x83d   : > { %v6132_v3 = vadd.f32 %v3972_v11, %v3968_v58  ;;  %v5205_v11 = vld [vmem:[%s5720_s10] sm:$0x3]  ;;  %v3986_v58 = vcombine.high %v3985_v18, %v3985_v18  ;;  %s6310_s10 = scalar_lea.vmem %s5466_s12, %s5493_s24 }
 0x83e   : > { %v4085_v39 = vpop.permute.xlu1 %4084 }
 0x83f   : > { %4963 = vmatmul.mubr.msk.f32.vlgmr.msra.gmra.mrb[20].mxu0 %vm1390_vm12, %v4085_v39  ;;  %4279 = vrot.lane.b32.xlu0 %v6132_v3, %s6302_s7  ;;  %v4000_v54 = vrot.slane %v3986_v58, %v3984_v29 }
 0x840   : > { %5054 = vmatpush3.bf16.msra.mxu0 %v5053_v62  ;;  %4976 = vmatprep.mubr.msk.f32.mxu0 %vm5263_vm11, %v5261_v32  ;;  %v1897_v32 = vadd.f32 %v1894_v1, %v1814_v10  ;;  %v4034_v62 = vrot.slane %v6132_v3, %v3984_v29 }
 0x841   : > { %v4008_v63 = vrot.slane %v4000_v54, %v5607_v56 }
 0x842   : > { %v1635_v20 = vpop.permute.xlu1 %1634  ;;  %v4703_v45 = vmul.f32 -1.442695, %v1897_v32  ;;  %v4035_v39 = vcombine.high %v4034_v62, %v4034_v62  ;;  %v3993_v32 = vrot.slane %v3985_v18, %v3984_v29 }
 0x843   : > { %v1637_v24 = vmul.f32 %v6142_v7, %v1635_v20  ;;  %1905 = vrot.lane.b32.xlu0 %v1894_v1, %s6294_s16  ;;  %v4012_v20 = vmul.f32 %v4008_v63, %v5680_v59 }
 0x844   : > { %5167 = vpow2.f32 %v4703_v45  ;;  %v4049_v1 = vrot.slane %v4035_v39, %v3984_v29 }
 0x845   : > { %1639 = vrot.lane.b32.xlu1 %v1637_v24, %s6298_s4 }
 0x846   : > { %v4249_v19 = vpop.permute.xlu1 %4248  ;;  %v4057_v3 = vrot.slane %v4049_v1, %v5607_v56 }
 0x847   : > { %4443 = vrot.lane.b32.xlu0 %v4432_v26, %s6294_s16  ;;  %s6308_s16 = sld [smem:[#allocation31_spill]] }
 0x848   : > { %v4061_v24 = vmul.f32 %v4057_v3, %v5680_v59 }
 0x84d   : > { %v4738_v0 = vld [vmem:[%s6308_s16] ss:$0 sm:$0xff] }
 0x84e   : > { %v5168_v48 = vpop.eup %5167 }
 0x84f   : > { %v1901_v22 = vadd.f32 1.0, %v5168_v48  ;;  %v4004_v48 = vrot.slane %v3993_v32, %v5607_v56 }
 0x851   : > { %5169 = vrcp.f32 %v1901_v22 }
 0x85b   : > { %v6151_v30 = vpop.eup %5169 }
 0x8b1   : > { %v4280_v14 = vpop.permute.xlu0 %4279 }
 0x8b2   : > { %4977 = vmatmul.mubr.msk.f32.vlgmr.msra.gmra.mrb[22].mxu0 %vm1390_vm12, %v4280_v14 }
 0x8b5   : > { %v1906_v23 = vpop.permute.xlu0 %1905 }
 0x8b6   : > { %v1908_v12 = vmul.f32 %v6151_v30, %v1906_v23 }
 0x8b7   : > { %v1640_v38 = vpop.permute.xlu1 %1639 }
 0x8b8   : > { %1910 = vrot.lane.b32.xlu0 %v1908_v12, %s6298_s4  ;;  %v1642_v31 = vadd.f32 %v1640_v38, %v1543_v55  ;;  %v3975_v12 = vsub.f32 1.0, %v5680_v59 }
 0x8b9   : > { %v4444_v4 = vpop.permute.xlu0 %4443 }
 0x912   : > { %v4154_v28 = vpop.f32.mrb[20].mxu0 }
 0x913   : > { %v4155_v41 = vadd.f32 %v4733_v36, %v4154_v28  ;;  %v4964_v43 = vpop.f32.mrb[21].mxu0 }
 0x915   : > { %v4240_v42 = vadd.f32 %v4237_v5, %v4155_v41 }
 0x917   : > { %v4737_v8 = vmul.f32 -1.442695, %v4240_v42 }
 0x919   : > { %5171 = vpow2.f32 %v4737_v8  ;;  %v5207_v8 = vld [vmem:[#allocation4 + $0x2] sm:$0x3] }
 0x923   : > { %v5172_v49 = vpop.eup %5171 }
 0x924   : > { %v4244_v35 = vadd.f32 1.0, %v5172_v49 }
 0x926   : > { %5173 = vrcp.f32 %v4244_v35 }
 0x927   : > { %5175 = vtanh.f32 %v1642_v31 }
 0x92a   : > { %v1911_v50 = vpop.permute.xlu0 %1910 }
 0x92b   : > { %v1913_v47 = vadd.f32 %v1911_v50, %v1814_v10  ;;  %v1644_v50 = vsub.f32 1.0, %v6142_v7 }
 0x92d   : > { %5177 = vtanh.f32 %v1913_v47 }
 0x930   : > { %v6156_v51 = vpop.eup %5173 }
 0x931   : > { %v4251_v40 = vmul.f32 %v6156_v51, %v4249_v19  ;;  %v5176_v61 = vpop.eup %5175  ;;  %v4258_v42 = vsub.f32 1.0, %v6156_v51  ;;  %v3977_v19 = vmul.f32 %v5207_v8, %v3975_v12 }
 0x933   : > { %4253 = vrot.lane.b32.xlu1 %v4251_v40, %s6298_s4 }
 0x937   : > { %1646 = vrot.lane.b32.xlu1 %v5176_v61, %s6302_s7  ;;  %v5178_v21 = vpop.eup %5177 }
 0x93b   : > { %1917 = vrot.lane.b32.xlu1 %v5178_v21, %s6302_s7 }
 0x985   : > { %v4349_v44 = vpop.f32.mrb[22].mxu0 }
 0x986   : > { %v4350_v37 = vadd.f32 %v4738_v0, %v4349_v44  ;;  %v4978_v5 = vpop.f32.mrb[23].mxu0 }
 0x988   : > { %v4435_v27 = vadd.f32 %v4432_v26, %v4350_v37 }
 0x98a   : > { %v4742_v55 = vmul.f32 -1.442695, %v4435_v27 }
 0x98c   : > { %5179 = vpow2.f32 %v4742_v55 }
 0x996   : > { %v5180_v46 = vpop.eup %5179 }
 0x997   : > { %v4439_v33 = vadd.f32 1.0, %v5180_v46 }
 0x999   : > { %5181 = vrcp.f32 %v4439_v33 }
 0x9a3   : > { %v6163_v2 = vpop.eup %5181 }
 0x9a4   : > { %v4446_v52 = vmul.f32 %v6163_v2, %v4444_v4  ;;  %v4453_v44 = vsub.f32 1.0, %v6163_v2 }
 0x9a5   : > { %v4254_v17 = vpop.permute.xlu1 %4253 }
 0x9a6   : > { %v4256_v53 = vadd.f32 %v4254_v17, %v4155_v41  ;;  %4448 = vrot.lane.b32.xlu0 %v4446_v52, %s6298_s4  ;;  %v4011_v41 = vmul.f32 %v4004_v48, %v5682_v60  ;;  %s4743_s4 = sshll.u32 %s5487_s20, 1 }
 0x9a7   : > { %s4479_s0 = scalar_lea.vmem [#allocation2], %s4743_s4 }
 0x9a8   : > { %5183 = vtanh.f32 %v4256_v53 }
 0x9a9   : > { %v1647_v10 = vpop.permute.xlu1 %1646 }
 0x9aa   : > { %1650 = vrot.lane.b32.xlu0 %v5205_v11, %s6309_s1  ;;  %v1649_v0 = vmul.f32 %v1647_v10, %v1644_v50 }
 0x9ad   : > { %v1918_v23 = vpop.permute.xlu1 %1917 }
 0x9ae   : > { %1921 = vrot.lane.b32.xlu0 %v5206_v15, %s6309_s1 }
 0x9b2   : > { %v5184_v6 = vpop.eup %5183  ;;  %4264 = vrot.lane.b32.xlu0 %v6093_v25, %s6309_s1 }
 0x9b3   : > { %4260 = vrot.lane.b32.xlu1 %v5184_v6, %s6302_s7 }
 0x9b6   : > { %4459 = vrot.lane.b32.xlu0 %v6109_v34, %s6309_s1  ;;  %v4042_v34 = vrot.slane %v4034_v62, %v3984_v29 }
 0x9b8   : > { %v4053_v36 = vrot.slane %v4042_v34, %v5607_v56  ;;  %v5208_v56 = vld [vmem:[#allocation5 + $0x2] sm:$0x3] }
 0x9b9   : > { %v4026_v59 = vmul.f32 %v5208_v56, %v3975_v12 }
 0x9ba   : > { %4017 = vrot.lane.b32.xlu0 %v4012_v20, %s6302_s7  ;;  %v4060_v38 = vmul.f32 %v4053_v36, %v5682_v60 }
 0x9be   : > { %4066 = vrot.lane.b32.xlu0 %v4061_v24, %s6302_s7 }
 0xa18   : > { %v4449_v26 = vpop.permute.xlu0 %4448 }
 0xa19   : > { %v4451_v25 = vadd.f32 %v4449_v26, %v4350_v37  ;;  %v3974_v37 = vsub.f32 1.0, %v5682_v60 }
 0xa1b   : > { %5185 = vtanh.f32 %v4451_v25  ;;  %v3976_v13 = vmul.f32 %v5209_v9, %v3974_v37 }
 0xa1c   : > { %v1651_v57 = vpop.permute.xlu0 %1650 }
 0xa1d   : > { %v1653_v47 = vmul.f32 %v6142_v7, %v1651_v57  ;;  %v1915_v7 = vsub.f32 1.0, %v6151_v30 }
 0xa1f   : > { %v1920_v29 = vmul.f32 %v1918_v23, %v1915_v7 }
 0xa20   : > { %v1922_v45 = vpop.permute.xlu0 %1921 }
 0xa21   : > { %v1924_v46 = vmul.f32 %v6151_v30, %v1922_v45 }
 0xa23   : > { %v1925_v60 = vadd.f32 %v1924_v46, %v1920_v29 }
 0xa24   : > { %v4265_v22 = vpop.permute.xlu0 %4264 }
 0xa25   : > { %v5186_v14 = vpop.eup %5185  ;;  %v4261_v43 = vpop.permute.xlu1 %4260  ;;  %v4267_v49 = vmul.f32 %v6156_v51, %v4265_v22  ;;  %v1654_v51 = vadd.f32 %v1653_v47, %v1649_v0 }
 0xa26   : > { %4455 = vrot.lane.b32.xlu1 %v5186_v14, %s6302_s7  ;;  %v4263_v35 = vmul.f32 %v4261_v43, %v4258_v42 }
 0xa28   : > { %v4460_v28 = vpop.permute.xlu0 %4459  ;;  %v4268_v40 = vadd.f32 %v4267_v49, %v4263_v35 }
 0xa29   : > { %v4462_v27 = vmul.f32 %v6163_v2, %v4460_v28  ;;  %v5210_v2 = vld [vmem:[#allocation5] sm:$0x3] }
 0xa2a   : > { %4015 = vrot.lane.b32.xlu1 %v4011_v41, %s6302_s7  ;;  %v4025_v17 = vmul.f32 %v5210_v2, %v3974_v37 }
 0xa2c   : > { %v4018_v4 = vpop.permute.xlu0 %4017 }
 0xa2d   : > { %v4022_v31 = vadd.f32 %v4018_v4, %v3977_v19 }
 0xa2e   : > { %4064 = vrot.lane.b32.xlu1 %v4060_v38, %s6302_s7 }
 0xa2f   : > { %4024 = vst.msk [vmem:[#allocation4 + $0x2] sm:$0x3] %vm1343_vm1, %v4022_v31 }
 0xa30   : > { %v4067_v61 = vpop.permute.xlu0 %4066 }
 0xa31   : > { %v4071_v21 = vadd.f32 %v4067_v61, %v4026_v59 }
 0xa32   : > { %4465 = vrot.lane.b32.xlu1 %v4268_v40, %s6302_s7 }
 0xa33   : > { %4073 = vst.msk [vmem:[#allocation5 + $0x2] sm:$0x3] %vm1343_vm1, %v4071_v21 }
 0xa36   : > { %4475 = vrot.lane.b32.xlu1 %v1654_v51, %s6302_s7 }
 0xa98   : > { %v4456_v5 = vpop.permute.xlu1 %4455 }
 0xa99   : > { %v4458_v55 = vmul.f32 %v4456_v5, %v4453_v44 }
 0xa9b   : > { %v4463_v33 = vadd.f32 %v4462_v27, %v4458_v55 }
 0xa9c   : > { %v4016_v16 = vpop.permute.xlu1 %4015 }
 0xa9d   : > { %v4021_v52 = vadd.f32 %v4016_v16, %v3976_v13  ;;  %4470 = vrot.lane.b32.xlu0 %v4463_v33, %s6302_s7 }
 0xa9f   : > { %4023 = vst.msk [vmem:[#allocation4] sm:$0x3] %vm1343_vm1, %v4021_v52 }
 0xaa0   : > { %v4065_v53 = vpop.permute.xlu1 %4064 }
 0xaa1   : > { %v4070_v30 = vadd.f32 %v4065_v53, %v4025_v17  ;;  %4482 = vrot.lane.b32.xlu0 %v1925_v60, %s6302_s7  ;;  %s4485_s7 = scalar_lea.vmem [#allocation3], %s4743_s4 }
 0xaa3   : > { %4072 = vst.msk [vmem:[#allocation5] sm:$0x3] %vm1343_vm1, %v4070_v30 }
 0xaa4   : > { %v4466_v18 = vpop.permute.xlu1 %4465 }
 0xaa5   : > { %4468 = vst.msk [vmem:[#allocation6] sm:$0x3] %vm1343_vm1, %v4466_v18  ;;  %4487 = vst.msk [vmem:[%s6310_s10] sm:$0x3] %vm1343_vm1, %v4466_v18 }
 0xaa8   : > { %v4476_v11 = vpop.permute.xlu1 %4475 }
 0xaa9   : > { %4480 = vst.msk [vmem:[%s4479_s0] sm:$0x3] %vm1343_vm1, %v4476_v11 }
 0xb0f   : > { %v4471_v58 = vpop.permute.xlu0 %4470 }
 0xb10   : > { %4473 = vst.msk [vmem:[#allocation7] sm:$0x3] %vm1343_vm1, %v4471_v58  ;;  %4488 = vst.msk [vmem:[%s6311_s2] sm:$0x3] %vm1343_vm1, %v4471_v58 }
 0xb13   : > { %v4483_v62 = vpop.permute.xlu0 %4482 }
 0xb14   : > { %4486 = vst.msk [vmem:[%s4485_s7] sm:$0x3] %vm1343_vm1, %v4483_v62 }
 0xb15 PF: > { %s98_s6 = sadd.s32 1, %s5217_s6  }
 0xb16   : > { %p95_p7 = scmp.ge.s32.totalorder %s98_s6, 10  }
 0xb18   :  { %97 = sbr.rel (!%p95_p7) target bundleno = 76 (0x4c), region = 285 }

// kernel: our_model_forward.11
= control target key start
LH: loop header
LB: loop body
LE: loop exit
PB: predicated region body
PF: predicated region fallthrough
CT: control target
= control target key end

     0   :  { %v577_v3 = vmov 0   ;;  %vm130_vm0 = vcmask 31744   ;;  %vm160_vm1 = vcmask 1043456   ;;  %vm339_vm2 = vcmask 56320   ;;  %s750_s1 = inlined_call_operand.vmem [shape: f32[128,4], index: 1, kind: input, shape index: {}]   ;;  %s751_s2 = inlined_call_operand.<no memory space> [shape: f32[1,1], index: 2, kind: input, shape index: {}]   ;;  %s752_s0 = inlined_call_operand.vmem [shape: f32[16,128], index: 0, kind: input, shape index: {}]   ;;  %s753_s3 = inlined_call_operand.vmem [shape: f32[4,128], index: 3, kind: input, shape index: {}]   ;;  %s754_s4 = inlined_call_operand.vmem [shape: f32[128,7], index: 4, kind: input, shape index: {}]   ;;  %s755_s5 = inlined_call_operand.vmem [shape: f32[1,7], index: 5, kind: input, shape index: {}]   ;;  %s756_s6 = inlined_call_operand.vmem [shape: f32[16,7], index: 6, kind: output, shape index: {}]  }
   0x1   :  { %v29_v0 = vld [vmem:[%s750_s1] sm:$0xff]  ;;  %v30_v1 = vld [vmem:[%s750_s1 + $0x8] sm:$0xff]  ;;  %v31_v2 = vld [vmem:[%s750_s1 + $0x10] sm:$0xff]  ;;  %556 = vset.pattern.permute.xlu0 %v577_v3  ;;  %v11_v4 = vstv %s751_s2 }
   0x2   :  { %v491_v5 = vpack.c.bf16 %v30_v1, %v29_v0  ;;  %v32_v6 = vld [vmem:[%s750_s1 + $0x18] sm:$0xff]  ;;  %12 = vst [vmem:[#allocation2] sm:$0x1] %v11_v4  ;;  %v33_v8 = vld [vmem:[%s750_s1 + $0x20] sm:$0xff]  ;;  %v34_v9 = vld [vmem:[%s750_s1 + $0x28] sm:$0xff] }
   0x3   :  { %v495_v7 = vpack.c.bf16 %v32_v6, %v31_v2  ;;  %v499_v10 = vpack.c.bf16 %v34_v9, %v33_v8  ;;  %v637_v11 = vld [vmem:[%s752_s0] sm:$0xff]  ;;  %v35_v12 = vld [vmem:[%s750_s1 + $0x30] sm:$0xff]  ;;  %v36_v13 = vld [vmem:[%s750_s1 + $0x38] sm:$0xff] }
   0x4   :  { %492 = vmatprep.subr.bf16.mxu0 %v491_v5  ;;  %557 = vtanh.f32 %v637_v11  ;;  %v503_v15 = vpack.c.bf16 %v36_v13, %v35_v12  ;;  %v37_v16 = vld [vmem:[%s750_s1 + $0x40] sm:$0xff]  ;;  %v38_v17 = vld [vmem:[%s750_s1 + $0x48] sm:$0xff]  ;;  %v39_v19 = vld [vmem:[%s750_s1 + $0x50] sm:$0xff] }
   0x5   :  { %494 = vmatpush3.bf16.msra.mxu0 %v491_v5  ;;  %v507_v18 = vpack.c.bf16 %v38_v17, %v37_v16  ;;  %v40_v20 = vld [vmem:[%s750_s1 + $0x58] sm:$0xff]  ;;  %v41_v23 = vld [vmem:[%s750_s1 + $0x60] sm:$0xff]  ;;  %v42_v24 = vld [vmem:[%s750_s1 + $0x68] sm:$0xff] }
   0x6   :  { %496 = vmatprep.subr.bf16.mxu0 %v495_v7  ;;  %v511_v22 = vpack.c.bf16 %v40_v20, %v39_v19  ;;  %v667_v25 = vld [vmem:[%s752_s0 + $0x8] sm:$0xff]  ;;  %v515_v26 = vpack.c.bf16 %v42_v24, %v41_v23  ;;  %v43_v27 = vld [vmem:[%s750_s1 + $0x70] sm:$0xff]  ;;  %v44_v28 = vld [vmem:[%s750_s1 + $0x78] sm:$0xff] }
   0x7   :  { %559 = vtanh.f32 %v667_v25  ;;  %v519_v29 = vpack.c.bf16 %v44_v28, %v43_v27  ;;  %v153_v48 = vld [vmem:[%s753_s3] sm:$0xf]  ;;  %v242_v50 = vld [vmem:[%s754_s4 + $0x8] sm:$0xff]  ;;  %v243_v56 = vld [vmem:[%s754_s4 + $0x10] sm:$0xff] }
   0x8   :  { %451 = vmatprep.subr.msk.mxu1 %vm160_vm1, %v153_v48  ;;  %v241_v49 = vld [vmem:[%s754_s4] sm:$0xff]  ;;  %v244_v57 = vld [vmem:[%s754_s4 + $0x18] sm:$0xff]  ;;  %v246_v62 = vld [vmem:[%s754_s4 + $0x28] sm:$0xff] }
   0x9   :  { %498 = vmatpush3.bf16.msra.mxu0 %v495_v7  ;;  %v372_v14 = vld [vmem:[#allocation2] ss:$0 sm:$0xff]  ;;  %452 = vmatpush3.msk.msra.mxu1 %vm160_vm1, %v153_v48  ;;  %v523_v51 = vpack.c.bf16 %v242_v50, %v241_v49  ;;  %v527_v60 = vpack.c.bf16 %v244_v57, %v243_v56  ;;  %v247_v0 = vld [vmem:[%s754_s4 + $0x30] sm:$0xff]  ;;  %v248_v1 = vld [vmem:[%s754_s4 + $0x38] sm:$0xff] }
   0xa   :  { %500 = vmatprep.subr.bf16.mxu0 %v499_v10  ;;  %52 = vperm.xlu0 %556, %v372_v14   ;;  %v245_v61 = vld [vmem:[%s754_s4 + $0x20] sm:$0xff]  ;;  %v535_v2 = vpack.c.bf16 %v248_v1, %v247_v0  ;;  %v250_v4 = vld [vmem:[%s754_s4 + $0x48] sm:$0xff]  ;;  %v251_v6 = vld [vmem:[%s754_s4 + $0x50] sm:$0xff] }
   0xb   :  { %524 = vmatprep.subr.bf16.mxu1 %v523_v51  ;;  %v531_v63 = vpack.c.bf16 %v246_v62, %v245_v61  ;;  %v249_v3 = vld [vmem:[%s754_s4 + $0x40] sm:$0xff]  ;;  %v252_v7 = vld [vmem:[%s754_s4 + $0x58] sm:$0xff]  ;;  %v255_v13 = vld [vmem:[%s754_s4 + $0x70] sm:$0xff] }
   0xc   :  { %v539_v5 = vpack.c.bf16 %v250_v4, %v249_v3  ;;  %v543_v8 = vpack.c.bf16 %v252_v7, %v251_v6  ;;  %v253_v9 = vld [vmem:[%s754_s4 + $0x60] sm:$0xff]  ;;  %v256_v14 = vld [vmem:[%s754_s4 + $0x78] sm:$0xff] }
   0xd   :  { %502 = vmatpush3.bf16.msra.mxu0 %v499_v10  ;;  %v254_v10 = vld [vmem:[%s754_s4 + $0x68] sm:$0xff]  ;;  %v376_v20 = vld [vmem:[%s755_s5] ss:$0 sm:$0xff] }
   0xe   :  { %504 = vmatprep.subr.bf16.mxu0 %v503_v15  ;;  %v558_v21 = vpop.eup %557  ;;  %v547_v12 = vpack.c.bf16 %v254_v10, %v253_v9 }
   0xf   :  { %448 = vmatprep.mubr.f32.mxu0 %v558_v21 }
  0x11   :  { %506 = vmatpush3.bf16.msra.mxu0 %v503_v15  ;;  %v560_v30 = vpop.eup %559  ;;  %v551_v15 = vpack.c.bf16 %v256_v14, %v255_v13 }
  0x12   :  { %508 = vmatprep.subr.bf16.mxu0 %v507_v18 }
  0x15   :  { %510 = vmatpush3.bf16.msra.mxu0 %v507_v18 }
  0x16   :  { %512 = vmatprep.subr.bf16.mxu0 %v511_v22 }
  0x19   :  { %514 = vmatpush3.bf16.msra.mxu0 %v511_v22 }
  0x1a   :  { %516 = vmatprep.subr.bf16.mxu0 %v515_v26 }
  0x1d   :  { %518 = vmatpush3.bf16.msra.mxu0 %v515_v26 }
  0x1e   :  { %520 = vmatprep.subr.bf16.mxu0 %v519_v29 }
  0x21   :  { %522 = vmatpush3.bf16.msra.mxu0 %v519_v29 }
  0x24   :  { %449 = vmatmul.mubr.f32.vlgmr.msra.gmra.mrb[0].mxu0 %v560_v30 }
  0x89   :  { %v53_v31 = vpop.permute.xlu0 %52 }
  0xf7   :  { %v450_v32 = vpop.f32.mrb[0].mxu0 }
  0xf8   :  { %v127_v33 = vadd.f32 %v450_v32, %v53_v31  ;;  %v121_v34 = vpop.f32.mrb[1].mxu0 }
  0xf9   :  { %v122_v35 = vadd.f32 %v121_v34, %v53_v31 }
  0xfa   :  { %v134_v36 = vsel %vm130_vm0, %v127_v33, -inf }
  0xfb   :  { %135 = vmax.xlane.f32.xlu1 %v134_v36  ;;  %v131_v37 = vsel %vm130_vm0, %v122_v35, -inf }
  0xfc   :  { %132 = vmax.xlane.f32.xlu0 %v131_v37 }
 0x188   :  { %v136_v38 = vpop.xlane.xlu1 %135 }
 0x189   :  { %v138_v39 = vsub.f32 %v127_v33, %v136_v38  ;;  %v133_v40 = vpop.xlane.xlu0 %132 }
 0x18a   :  { %v137_v41 = vsub.f32 %v122_v35, %v133_v40 }
 0x18b   :  { %v141_v42 = vmul.f32 1.442695, %v138_v39 }
 0x18c   :  { %v139_v43 = vmul.f32 1.442695, %v137_v41 }
 0x18e   :  { %561 = vpow2.f32 %v139_v43 }
 0x18f   :  { %563 = vpow2.f32 %v141_v42 }
 0x198   :  { %v562_v44 = vpop.eup %561 }
 0x199   :  { %v143_v45 = vsel %vm130_vm0, %v562_v44, 0.0  ;;  %v564_v46 = vpop.eup %563 }
 0x19a   :  { %144 = vadd.xlane.f32.xlu1 %v143_v45  ;;  %v146_v47 = vsel %vm130_vm0, %v564_v46, 0.0 }
 0x19e   :  { %147 = vadd.xlane.f32.xlu1 %v146_v47 }
 0x227   :  { %v145_v52 = vpop.xlane.xlu1 %144 }
 0x228   :  { %565 = vrcp.f32 %v145_v52 }
 0x22b   :  { %v148_v53 = vpop.xlane.xlu1 %147 }
 0x22c   :  { %567 = vrcp.f32 %v148_v53 }
 0x232   :  { %v566_v54 = vpop.eup %565 }
 0x233   :  { %v150_v55 = vmul.f32 %v566_v54, %v562_v44 }
 0x235   :  { %453 = vmatprep.mubr.msk.f32.mxu1 %vm130_vm0, %v150_v55 }
 0x236   :  { %v568_v58 = vpop.eup %567 }
 0x237   :  { %v152_v59 = vmul.f32 %v568_v58, %v564_v46 }
 0x239   :  { %454 = vmatmul.mubr.msk.f32.vlgmr.msra.gmra.mrb[0].mxu1 %vm130_vm0, %v152_v59 }
 0x23a   :  { %526 = vmatpush3.bf16.msra.mxu1 %v523_v51 }
 0x23b   :  { %528 = vmatprep.subr.bf16.mxu1 %v527_v60 }
 0x23e   :  { %530 = vmatpush3.bf16.msra.mxu1 %v527_v60 }
 0x23f   :  { %532 = vmatprep.subr.bf16.mxu1 %v531_v63 }
 0x242   :  { %534 = vmatpush3.bf16.msra.mxu1 %v531_v63 }
 0x243   :  { %536 = vmatprep.subr.bf16.mxu1 %v535_v2 }
 0x246   :  { %538 = vmatpush3.bf16.msra.mxu1 %v535_v2 }
 0x247   :  { %540 = vmatprep.subr.bf16.mxu1 %v539_v5 }
 0x24a   :  { %542 = vmatpush3.bf16.msra.mxu1 %v539_v5 }
 0x24b   :  { %544 = vmatprep.subr.bf16.mxu1 %v543_v8 }
 0x24e   :  { %546 = vmatpush3.bf16.msra.mxu1 %v543_v8 }
 0x24f   :  { %548 = vmatprep.subr.bf16.mxu1 %v547_v12 }
 0x252   :  { %550 = vmatpush3.bf16.msra.mxu1 %v547_v12 }
 0x253   :  { %552 = vmatprep.subr.bf16.mxu1 %v551_v15 }
 0x256   :  { %554 = vmatpush3.bf16.msra.mxu1 %v551_v15 }
 0x30c   :  { %v455_v16 = vpop.f32.mrb[0].mxu1 }
 0x30d   :  { %v230_v17 = vpop.f32.mrb[1].mxu1  ;;  %v240_v19 = vmul.f32 %v455_v16, %v667_v25 }
 0x30e   :  { %v239_v18 = vmul.f32 %v230_v17, %v637_v11 }
 0x310   :  { %488 = vmatprep.mubr.f32.mxu1 %v239_v18 }
 0x311   :  { %489 = vmatmul.mubr.f32.vlgmr.msra.gmra.mrb[2].mxu1 %v240_v19 }
 0x3e4   :  { %v490_v21 = vpop.f32.mrb[2].mxu1 }
 0x3e5   :  { %v330_v22 = vpop.f32.mrb[3].mxu1  ;;  %v336_v24 = vadd.f32 %v490_v21, %v376_v20 }
 0x3e6   :  { %v331_v23 = vadd.f32 %v376_v20, %v330_v22 }
 0x3e7   :  { %v343_v27 = vsel %vm339_vm2, %v336_v24, -inf }
 0x3e8   :  { %v340_v26 = vsel %vm339_vm2, %v331_v23, -inf }
 0x3e9   :  { %341 = vmax.xlane.f32.xlu1 %v340_v26 }
 0x3ed   :  { %344 = vmax.xlane.f32.xlu1 %v343_v27 }
 0x476   :  { %v342_v11 = vpop.xlane.xlu1 %341 }
 0x477   :  { %v346_v28 = vsub.f32 %v331_v23, %v342_v11 }
 0x479   :  { %v348_v25 = vmul.f32 1.442695, %v346_v28 }
 0x47a   :  { %v345_v29 = vpop.xlane.xlu1 %344 }
 0x47b   :  { %569 = vpow2.f32 %v348_v25  ;;  %v347_v30 = vsub.f32 %v336_v24, %v345_v29 }
 0x47d   :  { %v350_v31 = vmul.f32 1.442695, %v347_v30 }
 0x47f   :  { %571 = vpow2.f32 %v350_v31 }
 0x485   :  { %v570_v32 = vpop.eup %569 }
 0x486   :  { %v352_v33 = vsel %vm339_vm2, %v570_v32, 0.0 }
 0x487   :  { %353 = vadd.xlane.f32.xlu1 %v352_v33 }
 0x489   :  { %v572_v34 = vpop.eup %571 }
 0x48a   :  { %v355_v35 = vsel %vm339_vm2, %v572_v34, 0.0 }
 0x48b   :  { %356 = vadd.xlane.f32.xlu1 %v355_v35 }
 0x514   :  { %v354_v36 = vpop.xlane.xlu1 %353 }
 0x515   :  { %573 = vlog2.f32 %v354_v36 }
 0x518   :  { %v357_v37 = vpop.xlane.xlu1 %356 }
 0x519   :  { %575 = vlog2.f32 %v357_v37 }
 0x51f   :  { %v574_v38 = vpop.eup %573 }
 0x520   :  { %v359_v39 = vmul.f32 0.6931472, %v574_v38 }
 0x522   :  { %v362_v40 = vadd.f32 %v359_v39, %v342_v11 }
 0x523   :  { %v576_v41 = vpop.eup %575 }
 0x524   :  { %v364_v42 = vsub.f32 %v331_v23, %v362_v40  ;;  %v361_v43 = vmul.f32 0.6931472, %v576_v41 }
 0x526   :  { %366 = vst.msk [vmem:[%s756_s6] sm:$0xff] %vm339_vm2, %v364_v42  ;;  %v363_v44 = vadd.f32 %v361_v43, %v345_v29 }
 0x528   :  { %v365_v45 = vsub.f32 %v336_v24, %v363_v44 }
 0x52a   :  { %367 = vst.msk [vmem:[%s756_s6 + $0x8] sm:$0xff] %vm339_vm2, %v365_v45 }

// kernel: our_model_forward.6
= control target key start
LH: loop header
LB: loop body
LE: loop exit
PB: predicated region body
PF: predicated region fallthrough
CT: control target
= control target key end

     0   :  { %s5612_s6 = smov 1   ;;  %s5613_s10 = smov 2   ;;  %s6750_s0 = inlined_call_operand.smem [shape: u32[42], index: -1, kind: input, shape index: {}] }
   0x1   :  { %s5677_s5 = sld [smem:[%s6750_s0]]   ;;  %s5614_s14 = smov 3  }
   0x2   :  { %s5682_s9 = sld [smem:[%s6750_s0 + %s5612_s6]]   ;;  %s5615_s18 = smov 4  }
   0x3   :  { %s5687_s13 = sld [smem:[%s6750_s0 + %s5613_s10]]   ;;  %s5616_s22 = smov 5  }
   0x4   :  { %s5692_s17 = sld [smem:[%s6750_s0 + %s5614_s14]]   ;;  %s5617_s26 = smov 6  }
   0x5   :  { %s5697_s21 = sld [smem:[%s6750_s0 + %s5615_s18]]   ;;  %s5618_s30 = smov 7  }
   0x6   :  { %s5702_s25 = sld [smem:[%s6750_s0 + %s5616_s22]]   ;;  %s5619_s4 = smov 8  }
   0x7   :  { %6779 = sst [smem:[#allocation24_spill]] %s5677_s5  ;;  %s5620_s10 = smov 9  }
   0x8   :  { %s5707_s29 = sld [smem:[%s6750_s0 + %s5617_s26]]   ;;  %s5621_s15 = smov 10  }
   0x9   :  { %s5712_s3 = sld [smem:[%s6750_s0 + %s5618_s30]]   ;;  %s5622_s20 = smov 11  }
   0xa   :  { %s5717_s8 = sld [smem:[%s6750_s0 + %s5619_s4]]   ;;  %s5623_s26 = smov 12  }
   0xb   :  { %s5722_s14 = sld [smem:[%s6750_s0 + %s5620_s10]]   ;;  %s5624_s1 = smov 13  }
   0xc   :  { %6780 = sst [smem:[#allocation25_spill]] %s5702_s25  ;;  %s5625_s7 = smov 14  }
   0xd   :  { %s5727_s19 = sld [smem:[%s6750_s0 + %s5621_s15]]   ;;  %s5626_s15 = smov 15  }
   0xe   :  { %6781 = sst [smem:[#allocation26_spill]] %s5707_s29  ;;  %s5627_s22 = smov 16  }
   0xf   :  { %6782 = sst [smem:[#allocation27_spill]] %s5712_s3  ;;  %s5628_s28 = smov 17  }
  0x10   :  { %6783 = sst [smem:[#allocation28_spill]] %s5717_s8  ;;  %s5645_s10 = smov 35  }
  0x11   :  { %6784 = sst [smem:[#allocation29_spill]] %s5722_s14  ;;  %s5646_s16 = smov 36  }
  0x12   :  { %s5732_s24 = sld [smem:[%s6750_s0 + %s5622_s20]]   ;;  %s5647_s23 = smov 37  }
  0x13   :  { %6785 = sst [smem:[#allocation30_spill]] %s5727_s19 }
  0x14   :  { %s5737_s30 = sld [smem:[%s6750_s0 + %s5623_s26]]  }
  0x15   :  { %s5742_s6 = sld [smem:[%s6750_s0 + %s5624_s1]]   ;;  %s5644_s1 = smov 33  }
  0x16   :  { %s5747_s12 = sld [smem:[%s6750_s0 + %s5625_s7]]   ;;  %s5629_s7 = smov 18  }
  0x17   :  { %s5752_s20 = sld [smem:[%s6750_s0 + %s5626_s15]]   ;;  %s5630_s15 = smov 19  }
  0x18   :  { %6786 = sst [smem:[#allocation31_spill]] %s5732_s24 }
  0x19   :  { %s5757_s27 = sld [smem:[%s6750_s0 + %s5627_s22]]   ;;  %s5631_s22 = smov 20  }
  0x1a   :  { %6787 = sst [smem:[#allocation32_spill]] %s5737_s30 }
  0x1b   :  { %6788 = sst [smem:[#allocation33_spill]] %s5742_s6 }
  0x1c   :  { %6789 = sst [smem:[#allocation34_spill]] %s5747_s12 }
  0x1d   :  { %6790 = sst [smem:[#allocation35_spill]] %s5752_s20 }
  0x1e   :  { %s5762_s4 = sld [smem:[%s6750_s0 + %s5628_s28]]   ;;  %s5632_s28 = smov 21  }
  0x1f   :  { %6791 = sst [smem:[#allocation36_spill]] %s5757_s27 }
  0x20   :  { %s5767_s14 = sld [smem:[%s6750_s0 + %s5629_s7]]   ;;  %s5633_s7 = smov 22  }
  0x21   :  { %s5772_s19 = sld [smem:[%s6750_s0 + %s5630_s15]]   ;;  %s5634_s15 = smov 23  }
  0x22   :  { %s5777_s25 = sld [smem:[%s6750_s0 + %s5631_s22]]   ;;  %s5635_s22 = smov 24  }
  0x23   :  { %s5782_s29 = sld [smem:[%s6750_s0 + %s5632_s28]]   ;;  %s5636_s28 = smov 25  }
  0x24   :  { %6792 = sst [smem:[#allocation37_spill]] %s5762_s4 }
  0x25   :  { %s5787_s4 = sld [smem:[%s6750_s0 + %s5633_s7]]   ;;  %s5637_s7 = smov 26  }
  0x26   :  { %6793 = sst [smem:[#allocation38_spill]] %s5767_s14 }
  0x27   :  { %6794 = sst [smem:[#allocation39_spill]] %s5772_s19 }
  0x28   :  { %6795 = sst [smem:[#allocation40_spill]] %s5777_s25 }
  0x29   :  { %6796 = sst [smem:[#allocation41_spill]] %s5782_s29 }
  0x2a   :  { %s5792_s19 = sld [smem:[%s6750_s0 + %s5634_s15]]   ;;  %s5638_s15 = smov 27  }
  0x2b   :  { %6797 = sst [smem:[#allocation42_spill]] %s5787_s4 }
  0x2c   :  { %s5797_s25 = sld [smem:[%s6750_s0 + %s5635_s22]]   ;;  %s5639_s22 = smov 28  }
  0x2d   :  { %s5802_s29 = sld [smem:[%s6750_s0 + %s5636_s28]]   ;;  %s5640_s28 = smov 29  }
  0x2e   :  { %s5807_s4 = sld [smem:[%s6750_s0 + %s5637_s7]]   ;;  %s5641_s7 = smov 30  }
  0x2f   :  { %s5840_s12 = sld [smem:[%s6750_s0 + %s5644_s1]]   ;;  %s5648_s1 = smov 38  }
  0x30   :  { %6798 = sst [smem:[#allocation43_spill]] %s5792_s19 }
  0x31   :  { %s5812_s19 = sld [smem:[%s6750_s0 + %s5638_s15]]   ;;  %s5642_s15 = smov 31  }
  0x32   :  { %6799 = sst [smem:[#allocation44_spill]] %s5797_s25 }
  0x33   :  { %6800 = sst [smem:[#allocation45_spill]] %s5802_s29 }
  0x34   :  { %6801 = sst [smem:[#allocation46_spill]] %s5807_s4 }
  0x35   :  { %s5817_s25 = sld [smem:[%s6750_s0 + %s5639_s22]]   ;;  %s5643_s22 = smov 32  }
  0x36   :  { %s5822_s29 = sld [smem:[%s6750_s0 + %s5640_s28]]   ;;  %s5652_s28 = smov 34  }
  0x37   :  { %s5827_s4 = sld [smem:[%s6750_s0 + %s5641_s7]]  }
  0x38   :  { %s5832_s14 = sld [smem:[%s6750_s0 + %s5642_s15]]  }
  0x39   :  { %s4804_s6 = sld [smem:[%s6750_s0 + %s5643_s22]]  }
  0x3a   :  { %6803 = sst [smem:[#allocation48_spill]] %s5840_s12 }
  0x3b   :  { %s5845_s27 = sld [smem:[%s6750_s0 + %s5645_s10]]   ;;  %s5649_s10 = smov 39  }
  0x3c   :  { %s5850_s20 = sld [smem:[%s6750_s0 + %s5646_s16]]   ;;  %s5650_s16 = smov 40  }
  0x3d   :  { %6802 = sst [smem:[#allocation47_spill]] %s5827_s4 }
  0x3e   :  { %s5855_s30 = sld [smem:[%s6750_s0 + %s5647_s23]]   ;;  %s5651_s23 = smov 41  }
  0x3f   :  { %s5860_s24 = sld [smem:[%s6750_s0 + %s5648_s1]]   ;;  %v89_v0 = vstv %s4804_s6 }
  0x40   :  { %s5865_s12 = sld [smem:[%s6750_s0 + %s5649_s10]]   ;;  %90 = vst [vmem:[#allocation8] sm:$0x1] %v89_v0 }
  0x41   :  { %6804 = sst [smem:[#allocation49_spill]] %s5845_s27 }
  0x42   :  { %s5870_s22 = sld [smem:[%s6750_s0 + %s5650_s16]]  }
  0x43   :  { %s5875_s1 = sld [smem:[%s6750_s0 + %s5651_s23]]  }
  0x44   :  { %6805 = sst [smem:[#allocation50_spill]] %s5855_s30 }
  0x45   :  { %s4806_s10 = sld [smem:[%s6750_s0 + %s5652_s28]]  }
  0x49   :  { %6806 = sst [smem:[#allocation51_spill]] %s5875_s1 }
  0x4b   :  { %v91_v1 = vstv %s4806_s10 }
  0x4c   :  { %92 = vst [vmem:[#allocation9] sm:$0x1] %v91_v1 }
  0x4d   :  { %93 = vsyncpa [#allocation11], 0 }
  0x4e   :  { %94 = vsyncpa [#allocation13], 0 }
  0x4f   :  { %95 = vsyncpa [#allocation16], 0 }
  0x50   :  { %96 = vsyncpa [#allocation19], 0  ;;  %s5880_s6 = smov 0  }
  0x51 LB: > { %s6807_s8 = sld [smem:[#allocation28_spill]]  ;;  %s6808_s4 = sld [smem:[#allocation47_spill]]  ;;  %s5610_s6 = sphi %s5880_s6, %s102_s6  }
  0x52   : > { %s6809_s3 = sld [smem:[#allocation27_spill]]  ;;  %s5653_s30 = smov [#allocation12]  }
  0x53   : > { %s1115_s7 = sshll.u32 %s5653_s30, 4  ;;  %s5886_s27 = sadd.s32 4294967295, %s5610_s6   ;;  %s5892_s7 = int_to_ptr.vmem [resolvable:$true] %s1115_s7 }
  0x54   : > { %p4816_p0 = scmp.ge.s32.totalorder %s5610_s6, 1  ;;  %p1019_p1 = scmp.lt.s32.totalorder %s5610_s6, 9 }
  0x55   : > { %p6762_p3 = scmp.eq.s32.totalorder %s5886_s27, 0  ;;  %s5654_s11 = smov [#allocation15]  }
  0x56   : > { %p5894_p4 = pnand %p4816_p0, %p1019_p1  ;;  %s1137_s16 = sshll.u32 %s5654_s11, 4  ;;  %s5900_s16 = int_to_ptr.vmem [resolvable:$true] %s1137_s16 }
  0x57   : > { %s5655_s15 = smov [#allocation10]   ;;  %s5656_s26 = smov [#allocation14]  }
  0x58   : > { %s6810_s0 = scalar_select %p5894_p4, 1, 0 }
  0x59   : > { %p5230_p5 = pneg %p5894_p4  ;;  %s1104_s18 = sshll.u32 %s5655_s15, 4  ;;  %s5908_s18 = int_to_ptr.vmem [resolvable:$true] %s1104_s18 }
  0x5a   : > { %s1126_s28 = sshll.u32 %s5656_s26, 4  ;;  %s5420_s2 = scalar_lea.hbm %s5817_s25, 16  ;;  %s5910_s28 = int_to_ptr.vmem [resolvable:$true] %s1126_s28 }
  0x5b   : > { %p5904_p6 = pnand %p6762_p3, %p5230_p5  ;;  %p5421_p7 = scmp.ne.s32.totalorder %s5817_s25, %s5420_s2 }
  0x5c   : > { %p5427_p11 = scmp.lt.u32.totalorder %s5420_s2, %s5817_s25 }
  0x5d   : > { %p5916_p8 = pneg %p5904_p6 }
  0x5f   : > { %p5423_p9 = pnand %p5916_p8, %p5421_p7 }
  0x61   : > { %p5424_p10 = pneg %p5423_p9 }
  0x63   : > { %p5429_p12 = pnand %p5427_p11, %p5424_p10 }
  0x65   : > { %5432 = shalt.err (!%p5429_p12)
}
  0x66   : > { %s5433_s30 = scalar_lea.vmem %s5892_s7, 16  ;;  %s5440_s11 = scalar_lea.vmem %s5892_s7, 32 }
  0x67   : > { %p5434_p13 = scmp.ne.s32.totalorder %s5892_s7, %s5433_s30  ;;  %p5441_p5 = scmp.lt.s32.totalorder %s5892_s7, %s5892_s7 }
  0x68   : > { %p5442_p2 = scmp.lt.s32.totalorder %s5440_s11, %s5433_s30 }
  0x69   : > { %p5436_p0 = pnand %p5434_p13, %p5916_p8 }
  0x6a   : > { %p5443_p3 = por %p5442_p2, %p5441_p5 }
  0x6b   : > { %p5437_p1 = pneg %p5436_p0 }
  0x6d   : > { %p5444_p7 = pnand %p5443_p3, %p5437_p1 }
  0x6f   : > { %5447 = shalt.err (!%p5444_p7)
}
  0x70   : > { %5236 = dma.hbm_to_vmem [thread:$0]  (!%p5904_p6), %s5817_s25, 16, %s5892_s7, [#allocation13]  }
  0x71   : > { %s5448_s15 = scalar_lea.hbm %s6808_s4, 16 }
  0x72   : > { %p5449_p9 = scmp.ne.s32.totalorder %s6808_s4, %s5448_s15  ;;  %p5455_p12 = scmp.lt.u32.totalorder %s5448_s15, %s6808_s4 }
  0x74   : > { %p5451_p10 = pnand %p5449_p9, %p5916_p8 }
  0x76   : > { %p5452_p11 = pneg %p5451_p10 }
  0x78   : > { %p5457_p13 = pnand %p5455_p12, %p5452_p11 }
  0x7a   : > { %5460 = shalt.err (!%p5457_p13)
}
  0x7b   : > { %s5461_s26 = scalar_lea.vmem %s5900_s16, 16  ;;  %s5468_s2 = scalar_lea.vmem %s5900_s16, 32 }
  0x7c   : > { %p5462_p2 = scmp.ne.s32.totalorder %s5900_s16, %s5461_s26  ;;  %p5469_p1 = scmp.lt.s32.totalorder %s5900_s16, %s5900_s16 }
  0x7d   : > { %p5470_p5 = scmp.lt.s32.totalorder %s5468_s2, %s5461_s26 }
  0x7e   : > { %p5464_p3 = pnand %p5462_p2, %p5916_p8 }
  0x7f   : > { %p5471_p7 = por %p5470_p5, %p5469_p1 }
  0x80   : > { %p5465_p0 = pneg %p5464_p3 }
  0x82   : > { %p5472_p9 = pnand %p5471_p7, %p5465_p0 }
  0x84   : > { %5475 = shalt.err (!%p5472_p9)
}
  0x85   : > { %5242 = dma.hbm_to_vmem [thread:$0]  (!%p5904_p6), %s6808_s4, 16, %s5900_s16, [#allocation16]  }
  0x86   : > { %s5476_s7 = scalar_lea.hbm %s5812_s19, 16 }
  0x87   : > { %p5477_p10 = scmp.ne.s32.totalorder %s5812_s19, %s5476_s7  ;;  %p5483_p13 = scmp.lt.u32.totalorder %s5476_s7, %s5812_s19 }
  0x89   : > { %p5479_p11 = pnand %p5477_p10, %p5916_p8 }
  0x8b   : > { %p5480_p12 = pneg %p5479_p11 }
  0x8d   : > { %p5485_p2 = pnand %p5483_p13, %p5480_p12 }
  0x8f   : > { %5488 = shalt.err (!%p5485_p2)
}
  0x90   : > { %s5489_s30 = scalar_lea.vmem %s5908_s18, 16  ;;  %s5496_s11 = scalar_lea.vmem %s5908_s18, 32 }
  0x91   : > { %p5490_p3 = scmp.ne.s32.totalorder %s5908_s18, %s5489_s30  ;;  %p5497_p5 = scmp.lt.s32.totalorder %s5908_s18, %s5908_s18 }
  0x92   : > { %p5498_p7 = scmp.lt.s32.totalorder %s5496_s11, %s5489_s30 }
  0x93   : > { %p5492_p0 = pnand %p5490_p3, %p5916_p8 }
  0x94   : > { %p5499_p9 = por %p5498_p7, %p5497_p5 }
  0x95   : > { %p5493_p1 = pneg %p5492_p0 }
  0x97   : > { %p5500_p10 = pnand %p5499_p9, %p5493_p1 }
  0x99   : > { %5503 = shalt.err (!%p5500_p10)
}
  0x9a   : > { %5233 = dma.hbm_to_vmem [thread:$0]  (!%p5904_p6), %s5812_s19, 16, %s5908_s18, [#allocation11]  }
  0x9b   : > { %s5504_s16 = scalar_lea.hbm %s5822_s29, 16 }
  0x9c   : > { %p5505_p11 = scmp.ne.s32.totalorder %s5822_s29, %s5504_s16  ;;  %p5511_p2 = scmp.lt.u32.totalorder %s5504_s16, %s5822_s29 }
  0x9e   : > { %p5507_p12 = pnand %p5505_p11, %p5916_p8 }
  0xa0   : > { %p5508_p13 = pneg %p5507_p12 }
  0xa2   : > { %p5513_p3 = pnand %p5511_p2, %p5508_p13 }
  0xa4   : > { %5516 = shalt.err (!%p5513_p3)
}
  0xa5   : > { %s5517_s15 = scalar_lea.vmem %s5910_s28, 16  ;;  %s5524_s26 = scalar_lea.vmem %s5910_s28, 32 }
  0xa6   : > { %p5518_p0 = scmp.ne.s32.totalorder %s5910_s28, %s5517_s15  ;;  %p5525_p7 = scmp.lt.s32.totalorder %s5910_s28, %s5910_s28 }
  0xa7   : > { %p5526_p9 = scmp.lt.s32.totalorder %s5524_s26, %s5517_s15 }
  0xa8   : > { %p5520_p1 = pnand %p5518_p0, %p5916_p8 }
  0xa9   : > { %p5527_p10 = por %p5526_p9, %p5525_p7 }
  0xaa   : > { %p5521_p5 = pneg %p5520_p1 }
  0xac   : > { %p5528_p11 = pnand %p5527_p10, %p5521_p5 }
  0xae   : > { %5531 = shalt.err (!%p5528_p11)
}
  0xaf   : > { %5239 = dma.hbm_to_vmem [thread:$0]  (!%p5904_p6), %s5822_s29, 16, %s5910_s28, [#allocation13]  }
  0xb0   : > { %s5657_s18 = smov [#allocation17]   ;;  %s5658_s7 = smov [#allocation18]  }
  0xb1   : > { %s1163_s2 = sshll.u32 %s5657_s18, 4  ;;  %s1177_s30 = sshll.u32 %s5658_s7, 4  ;;  %s1164_s2 = int_to_ptr.vmem [resolvable:$true] %s1163_s2  ;;  %s1178_s30 = int_to_ptr.vmem [resolvable:$true] %s1177_s30 }
  0xb2   : > { %s5532_s11 = scalar_lea.hbm %s5850_s20, 16 }
  0xb3   : > { %p5533_p12 = scmp.ne.s32.totalorder %s5850_s20, %s5532_s11  ;;  %p5539_p3 = scmp.lt.u32.totalorder %s5532_s11, %s5850_s20 }
  0xb5   : > { %p5535_p13 = pnand %p5533_p12, %p5916_p8 }
  0xb7   : > { %p5536_p2 = pneg %p5535_p13 }
  0xb9   : > { %p5541_p0 = pnand %p5539_p3, %p5536_p2 }
  0xbb   : > { %5544 = shalt.err (!%p5541_p0)
}
  0xbc   : > { %s5545_s16 = scalar_lea.vmem %s1164_s2, 16  ;;  %s5552_s28 = scalar_lea.vmem %s1164_s2, 32 }
  0xbd   : > { %p5546_p1 = scmp.ne.s32.totalorder %s1164_s2, %s5545_s16  ;;  %p5553_p9 = scmp.lt.s32.totalorder %s1164_s2, %s1164_s2 }
  0xbe   : > { %p5554_p10 = scmp.lt.s32.totalorder %s5552_s28, %s5545_s16 }
  0xbf   : > { %p5548_p5 = pnand %p5546_p1, %p5916_p8 }
  0xc0   : > { %p5555_p11 = por %p5554_p10, %p5553_p9 }
  0xc1   : > { %p5549_p7 = pneg %p5548_p5 }
  0xc3   : > { %p5556_p4 = pnand %p5555_p11, %p5549_p7 }
  0xc5   : > { %5559 = shalt.err (!%p5556_p4)
}
  0xc6   : > { %5245 = dma.hbm_to_vmem [thread:$0]  (!%p5904_p6), %s5850_s20, 16, %s1164_s2, [#allocation16]  }
  0xc7   : > { %s5560_s15 = scalar_lea.hbm %s5860_s24, 16 }
  0xc8   : > { %p5561_p12 = scmp.ne.s32.totalorder %s5860_s24, %s5560_s15  ;;  %p5567_p3 = scmp.lt.u32.totalorder %s5560_s15, %s5860_s24 }
  0xca   : > { %p5563_p13 = pnand %p5561_p12, %p5916_p8 }
  0xcc   : > { %p5564_p2 = pneg %p5563_p13 }
  0xce   : > { %p5569_p0 = pnand %p5567_p3, %p5564_p2 }
  0xd0   : > { %5572 = shalt.err (!%p5569_p0)
}
  0xd1   : > { %s5573_s26 = scalar_lea.vmem %s1178_s30, 16  ;;  %s5580_s18 = scalar_lea.vmem %s1178_s30, 32 }
  0xd2   : > { %p5574_p4 = scmp.ne.s32.totalorder %s1178_s30, %s5573_s26  ;;  %p5581_p7 = scmp.lt.s32.totalorder %s1178_s30, %s1178_s30 }
  0xd3   : > { %p5582_p9 = scmp.lt.s32.totalorder %s5580_s18, %s5573_s26 }
  0xd4   : > { %p5576_p1 = pnand %p5574_p4, %p5916_p8 }
  0xd5   : > { %p5583_p10 = por %p5582_p9, %p5581_p7 }
  0xd6   : > { %p5577_p5 = pneg %p5576_p1 }
  0xd8   : > { %p5584_p11 = pnand %p5583_p10, %p5577_p5 }
  0xda   : > { %5587 = shalt.err (!%p5584_p11)
}
  0xdb   : > { %5248 = dma.hbm_to_vmem [thread:$0]  (!%p5904_p6), %s5860_s24, 16, %s1178_s30, [#allocation19]  }
  0xdc   : > { %p6813_p12 = scmp.ne.s32.totalorder %s6810_s0, 0 }
  0xdd   : > { %p6814_p13 = scmp.eq.s32.totalorder (!%p6813_p12), %s5886_s27, 0 }
  0xde   : > { %1211 = sbr.rel (%p6813_p12) target bundleno = 2989 (0xbad), region = 176 }
  0xe5   : > { %5593 = dma.done.wait (%p6814_p13), [#allocation11], 16   ;;  %p6815_p2 = pmov %p6814_p13 }
  0xe7   : > { %5595 = vsyncadd (%p6815_p2), [#allocation11], 4294967280  ;;  %p6816_p8 = pmov %p6815_p2 }
  0xe8   : > { %p6817_p3 = pmov %p6815_p2 }
  0xe9   : > { %5597 = dma.done.wait (%p6816_p8), [#allocation13], 32  }
  0xea   : > { %5599 = vsyncadd (%p6817_p3), [#allocation13], 4294967264  ;;  %p6818_p0 = pmov %p6815_p2 }
  0xec   : > { %5601 = dma.done.wait (%p6818_p0), [#allocation16], 32   ;;  %p6819_p6 = pmov %p6818_p0 }
  0xed   : > { %p6820_p4 = pmov %p6818_p0 }
  0xee   : > { %5603 = vsyncadd (%p6819_p6), [#allocation16], 4294967264 }
  0xef   : > { %5605 = dma.done.wait (%p6820_p4), [#allocation19], 16   ;;  %p6821_p1 = pmov %p6818_p0 }
  0xf0   : > { %s6822_s5 = sld [smem:[#allocation24_spill]]  ;;  %s6823_s1 = sld [smem:[#allocation51_spill]] }
  0xf1   : > { %5607 = vsyncadd (%p6821_p1), [#allocation19], 4294967280  ;;  %p1345_p5 = scmp.lt.s32.totalorder %s5886_s27, 7  ;;  %p6824_p7 = scmp.ne.s32.totalorder %s5886_s27, 0 }
  0xf2   : > { %vm1373_vm0 = vcmask (!%p6824_p7), 123904   ;;  %v5659_v2 = vmov (!%p6824_p7), 0.0  }
  0xf3   : > { %s1346_s0 = scalar_select %p1345_p5, %s5886_s27, 7 }
  0xf4   : > { %1372 = sbr.rel (%p6824_p7) target bundleno = 255 (0xff), region = 204  ;;  %1374 = vst.msk [vmem:[#allocation2] sm:$0x3] (!%p6824_p7), %vm1373_vm0, %v5659_v2  ;;  %1375 = vst.msk [vmem:[#allocation2 + $0x2] sm:$0x3] (!%p6824_p7), %vm1373_vm0, %v5659_v2 }
  0xf5   : > { %s6022_s23 = sshll.u32 %s1346_s0, 1  ;;  %s4836_s10 = sshll.u32 %s1346_s0, 3  ;;  %1376 = vst.msk [vmem:[#allocation2 + $0x4] sm:$0x3] (!%p6824_p7), %vm1373_vm0, %v5659_v2  ;;  %1377 = vst.msk [vmem:[#allocation2 + $0x6] sm:$0x3] (!%p6824_p7), %vm1373_vm0, %v5659_v2 }
  0xf6   : > { %s6026_s2 = scalar_lea.vmem %s6822_s5, %s6022_s23  ;;  %s6030_s7 = scalar_lea.vmem %s5682_s9, %s6022_s23  ;;  %1378 = vst.msk [vmem:[#allocation2 + $0x8] sm:$0x3] (!%p6824_p7), %vm1373_vm0, %v5659_v2  ;;  %1379 = vst.msk [vmem:[#allocation2 + $0xa] sm:$0x3] (!%p6824_p7), %vm1373_vm0, %v5659_v2 }
  0xf7   : > { %s1356_s30 = scalar_lea.vmem %s5687_s13, %s6022_s23  ;;  %s6039_s28 = scalar_lea.vmem %s6823_s1, %s4836_s10  ;;  %1380 = vst.msk [vmem:[#allocation2 + $0xc] sm:$0x3] (!%p6824_p7), %vm1373_vm0, %v5659_v2  ;;  %1381 = vst.msk [vmem:[#allocation2 + $0xe] sm:$0x3] (!%p6824_p7), %vm1373_vm0, %v5659_v2 }
  0xf8   : > { %1382 = vst.msk [vmem:[#allocation3] sm:$0x3] (!%p6824_p7), %vm1373_vm0, %v5659_v2  ;;  %1383 = vst.msk [vmem:[#allocation3 + $0x2] sm:$0x3] (!%p6824_p7), %vm1373_vm0, %v5659_v2 }
  0xf9   : > { %1384 = vst.msk [vmem:[#allocation3 + $0x4] sm:$0x3] (!%p6824_p7), %vm1373_vm0, %v5659_v2  ;;  %1385 = vst.msk [vmem:[#allocation3 + $0x6] sm:$0x3] (!%p6824_p7), %vm1373_vm0, %v5659_v2 }
  0xfa   : > { %1386 = vst.msk [vmem:[#allocation3 + $0x8] sm:$0x3] (!%p6824_p7), %vm1373_vm0, %v5659_v2  ;;  %1387 = vst.msk [vmem:[#allocation3 + $0xa] sm:$0x3] (!%p6824_p7), %vm1373_vm0, %v5659_v2 }
  0xfb   : > { %1388 = vst.msk [vmem:[#allocation3 + $0xc] sm:$0x3] %vm1373_vm0, %v5659_v2  ;;  %1389 = vst.msk [vmem:[#allocation3 + $0xe] sm:$0x3] %vm1373_vm0, %v5659_v2 }
  0xfc   : > { %1390 = vst.msk [vmem:[#allocation4] sm:$0x3] %vm1373_vm0, %v5659_v2  ;;  %1391 = vst.msk [vmem:[#allocation4 + $0x2] sm:$0x3] %vm1373_vm0, %v5659_v2 }
  0xfd   : > { %1392 = vst.msk [vmem:[#allocation5] sm:$0x3] %vm1373_vm0, %v5659_v2  ;;  %1393 = vst.msk [vmem:[#allocation5 + $0x2] sm:$0x3] %vm1373_vm0, %v5659_v2 }
  0xfe   : > { %1394 = vst.msk [vmem:[#allocation6] sm:$0x3] %vm1373_vm0, %v5659_v2  ;;  %1395 = vst.msk [vmem:[#allocation7] sm:$0x3] %vm1373_vm0, %v5659_v2 }
  0xff PF: > { %vm1419_vm1 = vcmask 123904   ;;  %v4855_v4 = vld [vmem:[#allocation14] ss:$0 sm:$0xff]  ;;  %v6068_v6 = vld [vmem:[#allocation2] sm:$0x3]  ;;  %v1399_v53 = vlaneseq  ;;  %vm1464_vm2 = vcmask 1041409  }
 0x100   : > { %v4853_v7 = vld [vmem:[#allocation10] ss:$0 sm:$0xff]  ;;  %v6074_v11 = vld [vmem:[#allocation2 + $0x2] sm:$0x3]  ;;  %v6080_v15 = vld [vmem:[#allocation2 + $0x4] sm:$0x3] }
 0x101   : > { %v2031_v9 = vmul.f32 %v4853_v7, %v6068_v6  ;;  %v2032_v14 = vmul.f32 %v4853_v7, %v6074_v11  ;;  %v2033_v20 = vmul.f32 %v4853_v7, %v6080_v15  ;;  %v6089_v22 = vld [vmem:[#allocation2 + $0x6] sm:$0x3]  ;;  %v6097_v28 = vld [vmem:[#allocation2 + $0x8] sm:$0x3]  ;;  %v6105_v34 = vld [vmem:[#allocation2 + $0xa] sm:$0x3] }
 0x102   : > { %v2034_v26 = vmul.f32 %v4853_v7, %v6089_v22  ;;  %v2035_v32 = vmul.f32 %v4853_v7, %v6097_v28  ;;  %v2036_v38 = vmul.f32 %v4853_v7, %v6105_v34  ;;  %v6113_v40 = vld [vmem:[#allocation2 + $0xc] sm:$0x3]  ;;  %v6121_v46 = vld [vmem:[#allocation2 + $0xe] sm:$0x3]  ;;  %v6129_v54 = vshrl.u32 %v1399_v53, 7  ;;  %s4838_s15 = sadd.s32 4294967295, %s5886_s27 }
 0x103   : > { %v6065_v3 = vld [vmem:[#allocation3] sm:$0x3]  ;;  %v6070_v8 = vld [vmem:[#allocation3 + $0x2] sm:$0x3]  ;;  %v2039_v16 = vsel %vm1419_vm1, %v2031_v9, 0.0  ;;  %v2042_v19 = vsel %vm1419_vm1, %v2032_v14, 0.0  ;;  %v2037_v44 = vmul.f32 %v4853_v7, %v6113_v40  ;;  %v2038_v50 = vmul.f32 %v4853_v7, %v6121_v46 }
 0x104   : > { %v2416_v5 = vmul.f32 %v4855_v4, %v6065_v3  ;;  %v2417_v10 = vmul.f32 %v4855_v4, %v6070_v8  ;;  %v6076_v12 = vld [vmem:[#allocation3 + $0x4] sm:$0x3]  ;;  %2040 = vadd.xlane.f32.xlu0 %v2039_v16  ;;  %v6087_v21 = vld [vmem:[#allocation3 + $0x6] sm:$0x3]  ;;  %v2045_v25 = vsel %vm1419_vm1, %v2033_v20, 0.0  ;;  %v2048_v31 = vsel %vm1419_vm1, %v2034_v26, 0.0 }
 0x105   : > { %v2418_v18 = vmul.f32 %v4855_v4, %v6076_v12  ;;  %v2419_v24 = vmul.f32 %v4855_v4, %v6087_v21  ;;  %v6095_v27 = vld [vmem:[#allocation3 + $0x8] sm:$0x3]  ;;  %v6103_v33 = vld [vmem:[#allocation3 + $0xa] sm:$0x3]  ;;  %v2051_v37 = vsel %vm1419_vm1, %v2035_v32, 0.0  ;;  %v2054_v43 = vsel %vm1419_vm1, %v2036_v38, 0.0 }
 0x106   : > { %v2424_v13 = vsel %vm1419_vm1, %v2416_v5, 0.0  ;;  %v2427_v17 = vsel %vm1419_vm1, %v2417_v10, 0.0  ;;  %v2420_v30 = vmul.f32 %v4855_v4, %v6095_v27  ;;  %v2421_v36 = vmul.f32 %v4855_v4, %v6103_v33  ;;  %v6111_v39 = vld [vmem:[#allocation3 + $0xc] sm:$0x3]  ;;  %v6119_v45 = vld [vmem:[#allocation3 + $0xe] sm:$0x3] }
 0x107   : > { %2425 = vadd.xlane.f32.xlu1 %v2424_v13  ;;  %v2430_v23 = vsel %vm1419_vm1, %v2418_v18, 0.0  ;;  %v2433_v29 = vsel %vm1419_vm1, %v2419_v24, 0.0  ;;  %v2422_v42 = vmul.f32 %v4855_v4, %v6111_v39  ;;  %v2423_v48 = vmul.f32 %v4855_v4, %v6119_v45  ;;  %v1398_v57 = vld [vmem:[%s1356_s30] sm:$0x3]  ;;  %p1451_p9 = scmp.gt.s32.totalorder %s4838_s15, 0  ;;  %s6827_s10 = sld [smem:[#allocation49_spill]] }
 0x108   : > { %2043 = vadd.xlane.f32.xlu0 %v2042_v19  ;;  %v2436_v35 = vsel %vm1419_vm1, %v2420_v30, 0.0  ;;  %v2439_v41 = vsel %vm1419_vm1, %v2421_v36, 0.0  ;;  %v2057_v49 = vsel %vm1419_vm1, %v2037_v44, 0.0  ;;  %v2060_v52 = vsel %vm1419_vm1, %v2038_v50, 0.0  ;;  %s6828_s30 = sld [smem:[#allocation48_spill]]  ;;  %p2788_p10 = scmp.gt.s32.totalorder %s5886_s27, 0 }
 0x109   : > { %v2442_v47 = vsel %vm1419_vm1, %v2422_v42, 0.0  ;;  %v2445_v51 = vsel %vm1419_vm1, %v2423_v48, 0.0  ;;  %v6132_v55 = vsub.s32 1, %v6129_v54  ;;  %v6135_v56 = vsub.s32 0, %v6129_v54  ;;  %s6857_s15 = smov (!%p1451_p9, %s4838_s15), 0  ;;  %s6832_s11 = sld [smem:[#allocation35_spill]] }
 0x10a   : > { %v2072_v4 = vand.u32 127, %v1399_v53  ;;  %vm2106_vm3 = vcmask 1042434   ;;  %vm2108_vm4 = vcmask 1043459   ;;  %vm2110_vm5 = vcmask 1044484   ;;  %s4839_s26 = sshll.u32 %s6857_s15, 1  ;;  %s6830_s15 = sld [smem:[#allocation31_spill]] }
 0x10b   : > { %2428 = vadd.xlane.f32.xlu1 %v2427_v17  ;;  %v1409_v58 = vrot.slane %v1398_v57, %v6132_v55  ;;  %v1402_v59 = vrot.slane %v1398_v57, %v6135_v56  ;;  %vm2112_vm6 = vcmask 1045509   ;;  %v2020_v36 = vstv %s5886_s27  ;;  %s6248_s18 = scalar_lea.vmem [#allocation2], %s4839_s26  ;;  %s6278_s0 = scalar_lea.vmem [#allocation3], %s4839_s26 }
 0x10c   : > { %2046 = vadd.xlane.f32.xlu0 %v2045_v25  ;;  %v6143_v9 = vsub.s32 %v2072_v4, %v6129_v54  ;;  %vm2114_vm7 = vcmask 1046534   ;;  %vm2116_vm8 = vcmask 1047559   ;;  %vm6170_vm9 = vcmp.lt.s32.totalorder %v6129_v54, %v2020_v36  ;;  %v1414_v36 = vld [vmem:[#allocation4 + $0x2] sm:$0x3]  ;;  %s6831_s26 = sld [smem:[#allocation32_spill]]  ;;  %s6765_s1 = smov 96  }
 0x10d   : > { %vm2120_vm10 = vcmask 15360   ;;  %vm5662_vm11 = vmmov 0   ;;  %vm1466_vm12 = vcmask 130048   ;;  %vm2945_vm13 = vcmask 1024   ;;  %s6562_s16 = scalar_select %p2788_p10, 1.0, 0.0 }
 0x10e   : > { %s6842_s4 = smov 32   ;;  %s6774_s5 = smov 16  }
 0x10f   : > { %2431 = vadd.xlane.f32.xlu1 %v2430_v23 }
 0x110   : > { %2049 = vadd.xlane.f32.xlu0 %v2048_v31 }
 0x113   : > { %2434 = vadd.xlane.f32.xlu1 %v2433_v29 }
 0x114   : > { %2052 = vadd.xlane.f32.xlu0 %v2051_v37 }
 0x117   : > { %2437 = vadd.xlane.f32.xlu1 %v2436_v35 }
 0x118   : > { %2055 = vadd.xlane.f32.xlu0 %v2054_v43 }
 0x11b   : > { %2440 = vadd.xlane.f32.xlu1 %v2439_v41 }
 0x11c   : > { %2058 = vadd.xlane.f32.xlu0 %v2057_v49 }
 0x11f   : > { %2443 = vadd.xlane.f32.xlu1 %v2442_v47 }
 0x120   : > { %2061 = vadd.xlane.f32.xlu0 %v2060_v52 }
 0x123   : > { %2446 = vadd.xlane.f32.xlu1 %v2445_v51 }
 0x134   : > { %1411 = vbcast.lane.b32.xlu1 %v1409_v58, 256 }
 0x136   : > { %1404 = vbcast.lane.b32.xlu0 %v1402_v59, 256 }
 0x191   : > { %v2041_v61 = vpop.xlane.xlu0 %2040 }
 0x192   : > { %v2076_v25 = vrot.slane %v2041_v61, %v6143_v9 }
 0x194   : > { %v2426_v60 = vpop.xlane.xlu1 %2425 }
 0x195   : > { %v2044_v63 = vpop.xlane.xlu0 %2043  ;;  %v2459_v13 = vrot.slane %v2426_v60, %v6143_v9 }
 0x196   : > { %v2080_v18 = vrot.slane %v2044_v63, %v6143_v9 }
 0x198   : > { %v2429_v62 = vpop.xlane.xlu1 %2428  ;;  %v2105_v37 = vsel %vm1464_vm2, %v2080_v18, %v2076_v25 }
 0x199   : > { %v2047_v1 = vpop.xlane.xlu0 %2046  ;;  %v2463_v14 = vrot.slane %v2429_v62, %v6143_v9 }
 0x19a   : > { %v2084_v23 = vrot.slane %v2047_v1, %v6143_v9 }
 0x19b   : > { %v2488_v20 = vsel %vm1464_vm2, %v2463_v14, %v2459_v13 }
 0x19c   : > { %v2432_v0 = vpop.xlane.xlu1 %2431  ;;  %v2107_v43 = vsel %vm2106_vm3, %v2084_v23, %v2105_v37  ;;  %v1416_v37 = vld [vmem:[#allocation5 + $0x2] sm:$0x3] }
 0x19d   : > { %v2050_v5 = vpop.xlane.xlu0 %2049  ;;  %v2467_v19 = vrot.slane %v2432_v0, %v6143_v9 }
 0x19e   : > { %v2088_v26 = vrot.slane %v2050_v5, %v6143_v9 }
 0x19f   : > { %v2489_v38 = vsel %vm2106_vm3, %v2467_v19, %v2488_v20 }
 0x1a0   : > { %v2435_v2 = vpop.xlane.xlu1 %2434  ;;  %v2109_v48 = vsel %vm2108_vm4, %v2088_v26, %v2107_v43  ;;  %v1413_v43 = vld [vmem:[#allocation4] sm:$0x3] }
 0x1a1   : > { %v2053_v10 = vpop.xlane.xlu0 %2052  ;;  %v2471_v24 = vrot.slane %v2435_v2, %v6143_v9 }
 0x1a2   : > { %v2092_v31 = vrot.slane %v2053_v10, %v6143_v9 }
 0x1a3   : > { %v2490_v44 = vsel %vm2108_vm4, %v2471_v24, %v2489_v38  ;;  %v1460_v38 = vld [vmem:[%s5692_s17 + $0x10] sm:$0xff] }
 0x1a4   : > { %v2438_v7 = vpop.xlane.xlu1 %2437  ;;  %v2111_v51 = vsel %vm2110_vm5, %v2092_v31, %v2109_v48  ;;  %v1458_v48 = vld [vmem:[%s5692_s17] sm:$0xff] }
 0x1a5   : > { %v2056_v17 = vpop.xlane.xlu0 %2055  ;;  %v2475_v29 = vrot.slane %v2438_v7, %v6143_v9 }
 0x1a6   : > { %v2096_v41 = vrot.slane %v2056_v17, %v6143_v9 }
 0x1a7   : > { %v2491_v49 = vsel %vm2110_vm5, %v2475_v29, %v2490_v44  ;;  %v5661_v44 = vmov 0.0|0.0  }
 0x1a8   : > { %v2441_v16 = vpop.xlane.xlu1 %2440  ;;  %v2113_v59 = vsel %vm2112_vm6, %v2096_v41, %v2111_v51  ;;  %v1461_v41 = vld [vmem:[%s5692_s17 + $0x18] sm:$0xff]  ;;  %5134 = vmatprep.subr.bf16.mxu0 %v5661_v44  ;;  %5137 = vmatprep.subr.bf16.mxu1 %v5661_v44 }
 0x1a9   : > { %v2479_v32 = vrot.slane %v2441_v16, %v6143_v9  ;;  %v2059_v35 = vpop.xlane.xlu0 %2058 }
 0x1aa   : > { %v2100_v47 = vrot.slane %v2059_v35, %v6143_v9 }
 0x1ab   : > { %v2492_v52 = vsel %vm2112_vm6, %v2479_v32, %v2491_v49  ;;  %v5660_v32 = vmov 0.0   ;;  %v1459_v49 = vld [vmem:[%s5692_s17 + $0x8] sm:$0xff] }
 0x1ac   : > { %v2444_v30 = vpop.xlane.xlu1 %2443  ;;  %v2115_v62 = vsel %vm2114_vm7, %v2100_v47, %v2113_v59  ;;  %v6190_v35 = vsel %vm6170_vm9, 1.0, %v5660_v32  ;;  %v5135_v47 = vpack.c.bf16 %v1461_v41, %v1460_v38  ;;  %4970 = vmatprep.mubr.msk.f32.mxu0 %vm5662_vm11, %v5660_v32  ;;  %4977 = vmatprep.mubr.msk.f32.mxu1 %vm5662_vm11, %v5660_v32 }
 0x1ad   : > { %v2483_v42 = vrot.slane %v2444_v30, %v6143_v9  ;;  %v2062_v58 = vpop.xlane.xlu0 %2061 }
 0x1ae   : > { %v2104_v61 = vrot.slane %v2062_v58, %v6143_v9  ;;  %5136 = vmatpush3.bf16.msra.mxu0 %v5135_v47 }
 0x1af   : > { %v2493_v60 = vsel %vm2114_vm7, %v2483_v42, %v2492_v52  ;;  %v1415_v52 = vld [vmem:[#allocation5] sm:$0x3]  ;;  %5140 = vmatprep.subr.bf16.mxu0 %v5661_v44 }
 0x1b0   : > { %v2447_v50 = vpop.xlane.xlu1 %2446  ;;  %v2117_v1 = vsel %vm2116_vm8, %v2104_v61, %v2115_v62 }
 0x1b1   : > { %v2487_v57 = vrot.slane %v2447_v50, %v6143_v9  ;;  %v2119_v4 = vsel %vm6170_vm9, %v2117_v1, -1e+09 }
 0x1b2   : > { %v2121_v7 = vsel %vm2120_vm10, %v2119_v4, -inf }
 0x1b3   : > { %v2494_v63 = vsel %vm2116_vm8, %v2487_v57, %v2493_v60  ;;  %v2122_v10 = vrot.slane %v2121_v7, 4  ;;  %v5138_v57 = vpack.c.bf16 %v1459_v49, %v1458_v48  ;;  %v6210_v60 = vpop.permute.xlu0 %1404 }
 0x1b4   : > { %v2496_v0 = vsel %vm6170_vm9, %v2494_v63, -1e+09  ;;  %v6208_v59 = vpop.permute.xlu1 %1411 }
 0x1b5   : > { %v2497_v2 = vsel %vm2120_vm10, %v2496_v0, -inf  ;;  %v2123_v14 = vmax.f32 %v2121_v7, %v2122_v10  ;;  %v1418_v62 = vmul.f32 %v1414_v36, %v6208_v59  ;;  %v1435_v63 = vmul.f32 %v1416_v37, %v6208_v59  ;;  %5139 = vmatpush3.bf16.msra.mxu1 %v5138_v57 }
 0x1b6   : > { %v2498_v5 = vrot.slane %v2497_v2, 4  ;;  %5143 = vmatprep.subr.bf16.mxu1 %v5661_v44 }
 0x1b7   : > { %v2124_v17 = vrot.slane %v2123_v14, 2  ;;  %v1427_v7 = vsel %vm1419_vm1, %v1418_v62, 0.0 }
 0x1b8   : > { %v2499_v13 = vmax.f32 %v2497_v2, %v2498_v5 }
 0x1b9   : > { %v2125_v19 = vmax.f32 %v2123_v14, %v2124_v17  ;;  %v1428_v14 = vrot.slane %v1427_v7, 4 }
 0x1ba   : > { %v2500_v16 = vrot.slane %v2499_v13, 2 }
 0x1bb   : > { %v2126_v23 = vrot.slane %v2125_v19, 1 }
 0x1bc   : > { %v2501_v18 = vmax.f32 %v2499_v13, %v2500_v16  ;;  %v1443_v16 = vsel %vm1419_vm1, %v1435_v63, 0.0 }
 0x1bd   : > { %v2127_v25 = vmax.f32 %v2125_v19, %v2126_v23  ;;  %v1429_v23 = vadd.f32 %v1428_v14, %v1427_v7  ;;  %v1621_v7 = vld [vmem:[%s5697_s21 + $0x8] sm:$0xff] }
 0x1be   : > { %v2502_v20 = vrot.slane %v2501_v18, 1 }
 0x1bf   : > { %v2128_v29 = vsub.f32 %v2119_v4, %v2127_v25  ;;  %v1434_v4 = vmul.f32 %v1415_v52, %v6210_v60  ;;  %v1430_v36 = vrot.slane %v1429_v23, 2 }
 0x1c0   : > { %v2503_v24 = vmax.f32 %v2501_v18, %v2502_v20 }
 0x1c1   : > { %v2129_v31 = vmul.f32 1.442695, %v2128_v29  ;;  %v1436_v19 = vsel %vm1419_vm1, %v1434_v4, 0.0 }
 0x1c2   : > { %v2504_v26 = vsub.f32 %v2496_v0, %v2503_v24  ;;  %v1417_v0 = vmul.f32 %v1413_v43, %v6210_v60  ;;  %v1437_v29 = vrot.slane %v1436_v19, 4 }
 0x1c4   : > { %v2505_v30 = vmul.f32 1.442695, %v2504_v26  ;;  %v1420_v10 = vsel %vm1419_vm1, %v1417_v0, 0.0  ;;  %v1444_v26 = vrot.slane %v1443_v16, 4  ;;  %v1438_v48 = vadd.f32 %v1437_v29, %v1436_v19 }
 0x1c5   : > { %v1421_v17 = vrot.slane %v1420_v10, 4 }
 0x1c6   : > { %5328 = vpow2.f32 %v2505_v30  ;;  %v1445_v47 = vadd.f32 %v1444_v26, %v1443_v16  ;;  %v1733_v16 = vld [vmem:[%s6809_s3 + $0x10] sm:$0xff]  ;;  %v1455_v26 = vld [vmem:[%s6248_s18] sm:$0x3] }
 0x1c7   : > { %5330 = vpow2.f32 %v2129_v31  ;;  %v1422_v24 = vadd.f32 %v1421_v17, %v1420_v10  ;;  %v1734_v17 = vld [vmem:[%s6809_s3 + $0x18] sm:$0xff] }
 0x1c8   : > { %v5144_v19 = vpack.c.bf16 %v1734_v17, %v1733_v16  ;;  %v2790_v16 = vld [vmem:[%s5832_s14] sm:$0xff]  ;;  %v2791_v17 = vld [vmem:[%s5832_s14 + $0x8] sm:$0xff] }
 0x1c9   : > { %v1423_v31 = vrot.slane %v1422_v24, 2 }
 0x1cb   : > { %v1424_v41 = vadd.f32 %v1423_v31, %v1422_v24  ;;  %v1731_v24 = vld [vmem:[%s6809_s3] sm:$0xff] }
 0x1d0   : > { %v5329_v42 = vpop.eup %5328 }
 0x1d1   : > { %v5331_v50 = vpop.eup %5330  ;;  %v6199_v51 = vmul.f32 %v5329_v42, %v6190_v35  ;;  %v1431_v42 = vadd.f32 %v1430_v36, %v1429_v23  ;;  %v1891_v36 = vld [vmem:[%s6807_s8] sm:$0xff] }
 0x1d2   : > { %v6206_v58 = vmul.f32 %v5331_v50, %v6190_v35  ;;  %v1425_v50 = vrot.slane %v1424_v41, 1 }
 0x1d3   : > { %v2508_v61 = vsel %vm2120_vm10, %v6199_v51, 0.0  ;;  %v1432_v52 = vrot.slane %v1431_v42, 1 }
 0x1d4   : > { %v2509_v1 = vrot.slane %v2508_v61, 4  ;;  %v2132_v2 = vsel %vm2120_vm10, %v6206_v58, 0.0  ;;  %v1426_v62 = vadd.f32 %v1425_v50, %v1424_v41 }
 0x1d5   : > { %v2133_v5 = vrot.slane %v2132_v2, 4  ;;  %v1433_v63 = vadd.f32 %v1432_v52, %v1431_v42  ;;  %v6274_v52 = vsub.s32 2, %v6129_v54 }
 0x1d6   : > { %v2510_v13 = vadd.f32 %v2509_v1, %v2508_v61  ;;  %v1446_v1 = vrot.slane %v1445_v47, 2 }
 0x1d7   : > { %v2134_v18 = vadd.f32 %v2133_v5, %v2132_v2  ;;  %v1439_v2 = vrot.slane %v1438_v48, 2  ;;  %v6227_v4 = vsel %vm1464_vm2, %v1433_v63, %v1426_v62  ;;  %v1620_v5 = vld [vmem:[%s5697_s21] sm:$0xff]  ;;  %v6289_v62 = vsub.s32 3, %v6129_v54 }
 0x1d8   : > { %v2511_v20 = vrot.slane %v2510_v13, 2  ;;  %4971 = vmatmul.mubr.msk.f32.vlgmr.msra.gmra.mrb[0].mxu0 %vm1466_vm12, %v6227_v4  ;;  %v5141_v10 = vpack.c.bf16 %v1621_v7, %v1620_v5  ;;  %v1447_v14 = vadd.f32 %v1446_v1, %v1445_v47  ;;  %v6296_v1 = vsub.s32 4, %v6129_v54 }
 0x1d9   : > { %v2135_v25 = vrot.slane %v2134_v18, 2  ;;  %4984 = vmatprep.mubr.msk.f32.mxu0 %vm5662_vm11, %v5660_v32  ;;  %v6301_v7 = vsub.s32 5, %v6129_v54 }
 0x1da   : > { %v2512_v30 = vadd.f32 %v2511_v20, %v2510_v13  ;;  %v1440_v13 = vadd.f32 %v1439_v2, %v1438_v48  ;;  %5142 = vmatpush3.bf16.msra.mxu0 %v5141_v10  ;;  %v1448_v23 = vrot.slane %v1447_v14, 1  ;;  %v1397_v48 = vld [vmem:[%s6030_s7] sm:$0x3] }
 0x1db   : > { %v2136_v37 = vadd.f32 %v2135_v25, %v2134_v18  ;;  %v1396_v18 = vld [vmem:[%s6026_s2] sm:$0x3]  ;;  %5146 = vmatprep.subr.bf16.mxu0 %v5661_v44  ;;  %v1732_v25 = vld [vmem:[%s6809_s3 + $0x8] sm:$0xff]  ;;  %s6839_s3 = sld [smem:[#allocation37_spill]] }
 0x1dc   : > { %v2513_v38 = vrot.slane %v2512_v30, 1  ;;  %v1441_v20 = vrot.slane %v1440_v13, 1  ;;  %4978 = vmatmul.mubr.msk.f32.vlgmr.msra.gmra.mrb[0].mxu1 %vm1466_vm12, %v1396_v18  ;;  %v5147_v29 = vpack.c.bf16 %v1732_v25, %v1731_v24  ;;  %v1449_v31 = vadd.f32 %v1448_v23, %v1447_v14 }
 0x1dd   : > { %v2137_v43 = vrot.slane %v2136_v37, 1  ;;  %5145 = vmatpush3.bf16.msra.mxu1 %v5144_v19  ;;  %4991 = vmatprep.mubr.msk.f32.mxu1 %vm5662_vm11, %v5660_v32  ;;  %v6306_v14 = vsub.s32 6, %v6129_v54  ;;  %v5153_v19 = vpack.c.bf16 %v2791_v17, %v2790_v16  ;;  %v6313_v23 = vsub.s32 7, %v6129_v54 }
 0x1de   : > { %v2514_v49 = vadd.f32 %v2513_v38, %v2512_v30  ;;  %v1442_v30 = vadd.f32 %v1441_v20, %v1440_v13  ;;  %4985 = vmatmul.mubr.msk.f32.vlgmr.msra.gmra.mrb[2].mxu0 %vm1466_vm12, %v1455_v26  ;;  %5149 = vmatprep.subr.bf16.mxu1 %v5661_v44 }
 0x1df   : > { %v2138_v57 = vadd.f32 %v2137_v43, %v2136_v37  ;;  %v1892_v37 = vld [vmem:[%s6807_s8 + $0x8] sm:$0xff]  ;;  %5148 = vmatpush3.bf16.msra.mxu0 %v5147_v29  ;;  %4998 = vmatprep.mubr.msk.f32.mxu0 %vm5662_vm11, %v5660_v32  ;;  %s6848_s8 = sld [smem:[#allocation30_spill]] }
 0x1e0   : > { %v2515_v61 = vmax.f32 %v2514_v49, 1e-20  ;;  %v6258_v38 = vsel %vm1464_vm2, %v1449_v31, %v1442_v30  ;;  %v5150_v41 = vpack.c.bf16 %v1892_v37, %v1891_v36  ;;  %5152 = vmatprep.subr.bf16.mxu0 %v5661_v44  ;;  %v4854_v31 = vld [vmem:[#allocation12] ss:$0 sm:$0xff]  ;;  %v4856_v37 = vld [vmem:[#allocation15] ss:$0 sm:$0xff] }
 0x1e1   : > { %v2139_v0 = vmax.f32 %v2138_v57, 1e-20  ;;  %4992 = vmatmul.mubr.msk.f32.vlgmr.msra.gmra.mrb[2].mxu1 %vm1466_vm12, %v6258_v38  ;;  %v2228_v36 = vmul.f32 %v4854_v31, %v6068_v6  ;;  %v2233_v16 = vmul.f32 %v4854_v31, %v6105_v34 }
 0x1e2   : > { %5332 = vrcp.f32 %v2515_v61  ;;  %5151 = vmatpush3.bf16.msra.mxu1 %v5150_v41  ;;  %5005 = vmatprep.mubr.msk.f32.mxu1 %vm5662_vm11, %v5660_v32 }
 0x1e3   : > { %5334 = vrcp.f32 %v2139_v0  ;;  %4999 = vmatmul.mubr.msk.f32.vlgmr.msra.gmra.mrb[4].mxu0 %vm1466_vm12, %v1397_v48  ;;  %5155 = vmatprep.subr.bf16.mxu1 %v5661_v44  ;;  %v2236_v41 = vsel %vm1419_vm1, %v2228_v36, 0.0  ;;  %v2605_v48 = vmul.f32 %v4856_v37, %v6070_v8  ;;  %v2610_v36 = vmul.f32 %v4856_v37, %v6111_v39 }
 0x1e4   : > { %5012 = vmatprep.mubr.msk.f32.mxu0 %vm5662_vm11, %v5660_v32  ;;  %5154 = vmatpush3.bf16.msra.mxu0 %v5153_v19 }
 0x1e5   : > { %5158 = vmatprep.subr.bf16.mxu0 %v5661_v44 }
 0x1ec   : > { %v5333_v42 = vpop.eup %5332 }
 0x1ed   : > { %v5335_v43 = vpop.eup %5334  ;;  %v2517_v47 = vmul.f32 %v5333_v42, %v6199_v51  ;;  %v1457_v51 = vld [vmem:[%s6278_s0] sm:$0x3]  ;;  %v2604_v42 = vmul.f32 %v4856_v37, %v6065_v3 }
 0x1ee   : > { %v2141_v49 = vmul.f32 %v5335_v43, %v6206_v58  ;;  %5006 = vmatmul.mubr.msk.f32.vlgmr.msra.gmra.mrb[4].mxu1 %vm1466_vm12, %v1457_v51 }
 0x1ef   : > { %v2521_v50 = vrot.slane %v2517_v47, %v6135_v56  ;;  %5019 = vmatprep.mubr.msk.f32.mxu1 %vm5662_vm11, %v5660_v32  ;;  %v2528_v2 = vrot.slane %v2517_v47, %v6132_v55  ;;  %v2535_v10 = vrot.slane %v2517_v47, %v6274_v52  ;;  %v2542_v18 = vrot.slane %v2517_v47, %v6289_v62 }
 0x1f0   : > { %v6283_v57 = vadd.f32 %v2517_v47, %v2141_v49  ;;  %v2145_v58 = vrot.slane %v2141_v49, %v6135_v56  ;;  %v2159_v61 = vrot.slane %v2141_v49, %v6274_v52  ;;  %v2152_v63 = vrot.slane %v2141_v49, %v6132_v55  ;;  %5157 = vmatpush3.bf16.msra.mxu1 %v5153_v19 }
 0x1f1   : > { %2523 = vbcast.lane.b32.xlu0 %v2521_v50, 256  ;;  %v2166_v0 = vrot.slane %v2141_v49, %v6289_v62  ;;  %v2173_v5 = vrot.slane %v2141_v49, %v6296_v1  ;;  %v2180_v13 = vrot.slane %v2141_v49, %v6301_v7  ;;  %v2187_v20 = vrot.slane %v2141_v49, %v6306_v14 }
 0x1f2   : > { %2147 = vbcast.lane.b32.xlu1 %v2145_v58, 256  ;;  %v2549_v24 = vrot.slane %v2517_v47, %v6296_v1  ;;  %5161 = vmatprep.subr.bf16.mxu1 %v5661_v44  ;;  %v2194_v25 = vrot.slane %v2141_v49, %v6313_v23  ;;  %v2556_v26 = vrot.slane %v2517_v47, %v6301_v7  ;;  %v2612_v43 = vsel %vm1419_vm1, %v2604_v42, 0.0 }
 0x1f3   : > { %v2563_v29 = vrot.slane %v2517_v47, %v6306_v14  ;;  %v2570_v30 = vrot.slane %v2517_v47, %v6313_v23  ;;  %v2615_v49 = vsel %vm1419_vm1, %v2605_v48, 0.0  ;;  %v2230_v50 = vmul.f32 %v4854_v31, %v6080_v15 }
 0x1f4   : > { %v2229_v47 = vmul.f32 %v4854_v31, %v6074_v11  ;;  %v2231_v58 = vmul.f32 %v4854_v31, %v6089_v22  ;;  %v2251_v19 = vsel %vm1419_vm1, %v2233_v16, 0.0  ;;  %v2630_v42 = vsel %vm1419_vm1, %v2610_v36, 0.0 }
 0x1f5   : > { %2161 = vbcast.lane.b32.xlu0 %v2159_v61, 256  ;;  %v2242_v51 = vsel %vm1419_vm1, %v2230_v50, 0.0 }
 0x1f6   : > { %2154 = vbcast.lane.b32.xlu1 %v2152_v63, 256  ;;  %v2239_v61 = vsel %vm1419_vm1, %v2229_v47, 0.0  ;;  %v2606_v63 = vmul.f32 %v4856_v37, %v6076_v12 }
 0x1f9   : > { %2168 = vbcast.lane.b32.xlu0 %v2166_v0, 256  ;;  %v2245_v0 = vsel %vm1419_vm1, %v2231_v58, 0.0 }
 0x1fa   : > { %2530 = vbcast.lane.b32.xlu1 %v2528_v2, 256  ;;  %v2232_v2 = vmul.f32 %v4854_v31, %v6097_v28 }
 0x1fd   : > { %2175 = vbcast.lane.b32.xlu0 %v2173_v5, 256  ;;  %v2618_v5 = vsel %vm1419_vm1, %v2606_v63, 0.0 }
 0x1fe   : > { %2537 = vbcast.lane.b32.xlu1 %v2535_v10, 256  ;;  %v2607_v10 = vmul.f32 %v4856_v37, %v6087_v21 }
 0x200   : > { %v2621_v17 = vsel %vm1419_vm1, %v2607_v10, 0.0 }
 0x201   : > { %2182 = vbcast.lane.b32.xlu0 %v2180_v13, 256  ;;  %v2248_v13 = vsel %vm1419_vm1, %v2232_v2, 0.0 }
 0x202   : > { %2544 = vbcast.lane.b32.xlu1 %v2542_v18, 256  ;;  %v2608_v18 = vmul.f32 %v4856_v37, %v6095_v27 }
 0x205   : > { %2189 = vbcast.lane.b32.xlu0 %v2187_v20, 256  ;;  %v2234_v20 = vmul.f32 %v4854_v31, %v6113_v40 }
 0x206   : > { %2551 = vbcast.lane.b32.xlu1 %v2549_v24, 256  ;;  %v2624_v24 = vsel %vm1419_vm1, %v2608_v18, 0.0 }
 0x209   : > { %2196 = vbcast.lane.b32.xlu0 %v2194_v25, 256  ;;  %v2609_v25 = vmul.f32 %v4856_v37, %v6103_v33 }
 0x20a   : > { %2558 = vbcast.lane.b32.xlu1 %v2556_v26, 256  ;;  %v2254_v26 = vsel %vm1419_vm1, %v2234_v20, 0.0 }
 0x20e   : > { %2565 = vbcast.lane.b32.xlu1 %v2563_v29, 256  ;;  %v2235_v29 = vmul.f32 %v4854_v31, %v6121_v46 }
 0x212   : > { %2572 = vbcast.lane.b32.xlu1 %v2570_v30, 256  ;;  %v2627_v30 = vsel %vm1419_vm1, %v2609_v25, 0.0 }
 0x228   : > { %2237 = vadd.xlane.f32.xlu0 %v2236_v41  ;;  %v2257_v41 = vsel %vm1419_vm1, %v2235_v29, 0.0 }
 0x22c   : > { %2613 = vadd.xlane.f32.xlu0 %v2612_v43  ;;  %v2611_v43 = vmul.f32 %v4856_v37, %v6119_v45 }
 0x22e   : > { %v2633_v48 = vsel %vm1419_vm1, %v2611_v43, 0.0 }
 0x230   : > { %2616 = vadd.xlane.f32.xlu0 %v2615_v49 }
 0x234   : > { %2243 = vadd.xlane.f32.xlu0 %v2242_v51 }
 0x236   : > { %2240 = vadd.xlane.f32.xlu1 %v2239_v61 }
 0x238   : > { %2246 = vadd.xlane.f32.xlu0 %v2245_v0 }
 0x23a   : > { %2619 = vadd.xlane.f32.xlu1 %v2618_v5 }
 0x23c   : > { %2249 = vadd.xlane.f32.xlu0 %v2248_v13 }
 0x23e   : > { %2622 = vadd.xlane.f32.xlu1 %v2621_v17 }
 0x240   : > { %2252 = vadd.xlane.f32.xlu0 %v2251_v19 }
 0x242   : > { %2625 = vadd.xlane.f32.xlu1 %v2624_v24 }
 0x244   : > { %2255 = vadd.xlane.f32.xlu0 %v2254_v26 }
 0x246   : > { %2628 = vadd.xlane.f32.xlu1 %v2627_v30 }
 0x248   : > { %2258 = vadd.xlane.f32.xlu0 %v2257_v41 }
 0x24a   : > { %2631 = vadd.xlane.f32.xlu1 %v2630_v42 }
 0x24e   : > { %2634 = vadd.xlane.f32.xlu1 %v2633_v48 }
 0x263   : > { %v2524_v49 = vpop.permute.xlu0 %2523 }
 0x264   : > { %v2148_v31 = vpop.permute.xlu1 %2147  ;;  %v2574_v26 = vmul.f32 %v2524_v49, %v6065_v3 }
 0x265   : > { %v2198_v58 = vmul.f32 %v2148_v31, %v6068_v6 }
 0x266   : > { %v2582_v48 = vsel %vm1419_vm1, %v2574_v26, 0.0 }
 0x267   : > { %v2162_v50 = vpop.permute.xlu0 %2161  ;;  %v2206_v2 = vsel %vm1419_vm1, %v2198_v58, 0.0 }
 0x268   : > { %v2155_v47 = vpop.permute.xlu1 %2154  ;;  %v2200_v37 = vmul.f32 %v2162_v50, %v6080_v15 }
 0x269   : > { %v2199_v51 = vmul.f32 %v2155_v47, %v6074_v11 }
 0x26a   : > { %v2209_v17 = vsel %vm1419_vm1, %v2200_v37, 0.0 }
 0x26b   : > { %v2169_v61 = vpop.permute.xlu0 %2168  ;;  %v2207_v63 = vsel %vm1419_vm1, %v2199_v51, 0.0 }
 0x26c   : > { %v2531_v0 = vpop.permute.xlu1 %2530  ;;  %v2208_v5 = vadd.f32 %v2207_v63, %v2206_v2  ;;  %v2201_v13 = vmul.f32 %v2169_v61, %v6089_v22 }
 0x26d   : > { %v2575_v25 = vmul.f32 %v2531_v0, %v6070_v8 }
 0x26e   : > { %v2210_v11 = vadd.f32 %v2209_v17, %v2208_v5  ;;  %v2211_v6 = vsel %vm1419_vm1, %v2201_v13, 0.0 }
 0x26f   : > { %v2176_v10 = vpop.permute.xlu0 %2175  ;;  %v2583_v42 = vsel %vm1419_vm1, %v2575_v25, 0.0 }
 0x270   : > { %v2538_v16 = vpop.permute.xlu1 %2537  ;;  %v2202_v18 = vmul.f32 %v2176_v10, %v6097_v28  ;;  %v2212_v29 = vadd.f32 %v2211_v6, %v2210_v11  ;;  %v2584_v50 = vadd.f32 %v2583_v42, %v2582_v48 }
 0x271   : > { %v2576_v22 = vmul.f32 %v2538_v16, %v6076_v12 }
 0x272   : > { %v2213_v15 = vsel %vm1419_vm1, %v2202_v18, 0.0 }
 0x273   : > { %v2183_v19 = vpop.permute.xlu0 %2182  ;;  %v2214_v43 = vadd.f32 %v2213_v15, %v2212_v29  ;;  %v2585_v3 = vsel %vm1419_vm1, %v2576_v22, 0.0 }
 0x274   : > { %v2545_v20 = vpop.permute.xlu1 %2544  ;;  %v2203_v24 = vmul.f32 %v2183_v19, %v6105_v34 }
 0x275   : > { %v2577_v34 = vmul.f32 %v2545_v20, %v6087_v21  ;;  %v2586_v21 = vadd.f32 %v2585_v3, %v2584_v50 }
 0x276   : > { %v2215_v36 = vsel %vm1419_vm1, %v2203_v24, 0.0 }
 0x277   : > { %v2190_v30 = vpop.permute.xlu0 %2189  ;;  %v2216_v49 = vadd.f32 %v2215_v36, %v2214_v43 }
 0x278   : > { %v2552_v28 = vpop.permute.xlu1 %2551  ;;  %v2204_v41 = vmul.f32 %v2190_v30, %v6113_v40  ;;  %v2587_v40 = vsel %vm1419_vm1, %v2577_v34, 0.0 }
 0x279   : > { %v2578_v12 = vmul.f32 %v2552_v28, %v6095_v27  ;;  %v2588_v37 = vadd.f32 %v2587_v40, %v2586_v21 }
 0x27a   : > { %v2217_v8 = vsel %vm1419_vm1, %v2204_v41, 0.0 }
 0x27b   : > { %v2197_v31 = vpop.permute.xlu0 %2196  ;;  %v2218_v58 = vadd.f32 %v2217_v8, %v2216_v49  ;;  %v2589_v0 = vsel %vm1419_vm1, %v2578_v12, 0.0 }
 0x27c   : > { %v2559_v47 = vpop.permute.xlu1 %2558  ;;  %v2205_v51 = vmul.f32 %v2197_v31, %v6121_v46  ;;  %v2590_v46 = vadd.f32 %v2589_v0, %v2588_v37 }
 0x27d   : > { %v2579_v61 = vmul.f32 %v2559_v47, %v6103_v33 }
 0x27e   : > { %v2219_v63 = vsel %vm1419_vm1, %v2205_v51, 0.0 }
 0x27f   : > { %v6381_v2 = vadd.f32 %v2219_v63, %v2218_v58  ;;  %v2591_v27 = vsel %vm1419_vm1, %v2579_v61, 0.0 }
 0x280   : > { %v2566_v5 = vpop.permute.xlu1 %2565  ;;  %v2592_v13 = vadd.f32 %v2591_v27, %v2590_v46 }
 0x281   : > { %v2580_v10 = vmul.f32 %v2566_v5, %v6111_v39  ;;  %5013 = vmatmul.mubr.msk.f32.vlgmr.msra.gmra.mrb[6].mxu0 %vm1466_vm12, %v6381_v2 }
 0x282   : > { %5026 = vmatprep.mubr.msk.f32.mxu0 %vm5662_vm11, %v5660_v32 }
 0x283   : > { %v2593_v33 = vsel %vm1419_vm1, %v2580_v10, 0.0 }
 0x284   : > { %v2573_v16 = vpop.permute.xlu1 %2572  ;;  %v2594_v18 = vadd.f32 %v2593_v33, %v2592_v13 }
 0x285   : > { %v2581_v17 = vmul.f32 %v2573_v16, %v6119_v45 }
 0x287   : > { %v2595_v11 = vsel %vm1419_vm1, %v2581_v17, 0.0 }
 0x288   : > { %v6392_v19 = vadd.f32 %v2595_v11, %v2594_v18 }
 0x28a   : > { %5020 = vmatmul.mubr.msk.f32.vlgmr.msra.gmra.mrb[6].mxu1 %vm1466_vm12, %v6392_v19 }
 0x28b   : > { %5033 = vmatprep.mubr.msk.f32.mxu1 %vm5662_vm11, %v5660_v32 }
 0x2ab   : > { %v1535_v6 = vpop.f32.mrb[0].mxu0 }
 0x2ac   : > { %v4972_v20 = vpop.f32.mrb[1].mxu0 }
 0x2af   : > { %v1608_v25 = vpop.f32.mrb[0].mxu1 }
 0x2b0   : > { %v6398_v15 = vadd.f32 %v1608_v25, %v1535_v6  ;;  %v4979_v26 = vpop.f32.mrb[1].mxu1 }
 0x2b1   : > { %v6400_v29 = vpop.f32.mrb[2].mxu0 }
 0x2b2   : > { %v4986_v22 = vpop.f32.mrb[3].mxu0 }
 0x2b4   : > { %v1806_v30 = vpop.f32.mrb[2].mxu1 }
 0x2b5   : > { %v2238_v39 = vpop.xlane.xlu0 %2237  ;;  %v4993_v36 = vpop.f32.mrb[3].mxu1 }
 0x2b6   : > { %v1879_v41 = vpop.f32.mrb[4].mxu0  ;;  %v2271_v42 = vrot.slane %v2238_v39, %v6143_v9 }
 0x2b7   : > { %v6403_v43 = vadd.f32 %v1879_v41, %v1806_v30  ;;  %v5000_v34 = vpop.f32.mrb[5].mxu0 }
 0x2b9   : > { %v2614_v24 = vpop.xlane.xlu0 %2613 }
 0x2ba   : > { %v2647_v51 = vrot.slane %v2614_v24, %v6143_v9 }
 0x2bd   : > { %v2617_v45 = vpop.xlane.xlu0 %2616 }
 0x2be   : > { %v2651_v40 = vrot.slane %v2617_v45, %v6143_v9 }
 0x2c0   : > { %v2676_v5 = vsel %vm1464_vm2, %v2651_v40, %v2647_v51 }
 0x2c1   : > { %v2244_v28 = vpop.xlane.xlu0 %2243  ;;  %v6405_v48 = vpop.f32.mrb[4].mxu1 }
 0x2c2   : > { %v5007_v49 = vpop.f32.mrb[5].mxu1  ;;  %v2279_v12 = vrot.slane %v2244_v28, %v6143_v9 }
 0x2c3   : > { %v2241_v8 = vpop.xlane.xlu1 %2240 }
 0x2c4   : > { %v2275_v3 = vrot.slane %v2241_v8, %v6143_v9 }
 0x2c5   : > { %v2247_v31 = vpop.xlane.xlu0 %2246 }
 0x2c6   : > { %v2300_v50 = vsel %vm1464_vm2, %v2275_v3, %v2271_v42  ;;  %v2283_v58 = vrot.slane %v2247_v31, %v6143_v9 }
 0x2c7   : > { %v2620_v47 = vpop.xlane.xlu1 %2619  ;;  %v2301_v61 = vsel %vm2106_vm3, %v2279_v12, %v2300_v50 }
 0x2c8   : > { %v2655_v63 = vrot.slane %v2620_v47, %v6143_v9  ;;  %v2302_v27 = vsel %vm2108_vm4, %v2283_v58, %v2301_v61 }
 0x2c9   : > { %v2250_v21 = vpop.xlane.xlu0 %2249 }
 0x2ca   : > { %v2287_v0 = vrot.slane %v2250_v21, %v6143_v9  ;;  %v2677_v13 = vsel %vm2106_vm3, %v2655_v63, %v2676_v5 }
 0x2cb   : > { %v2623_v37 = vpop.xlane.xlu1 %2622 }
 0x2cc   : > { %v2659_v46 = vrot.slane %v2623_v37, %v6143_v9  ;;  %v2303_v16 = vsel %vm2110_vm5, %v2287_v0, %v2302_v27 }
 0x2cd   : > { %v2253_v10 = vpop.xlane.xlu0 %2252 }
 0x2ce   : > { %v2291_v33 = vrot.slane %v2253_v10, %v6143_v9  ;;  %v2678_v39 = vsel %vm2108_vm4, %v2659_v46, %v2677_v13 }
 0x2cf   : > { %v2626_v17 = vpop.xlane.xlu1 %2625 }
 0x2d0   : > { %v2663_v18 = vrot.slane %v2626_v17, %v6143_v9  ;;  %v2304_v6 = vsel %vm2112_vm6, %v2291_v33, %v2303_v16 }
 0x2d1   : > { %v2256_v11 = vpop.xlane.xlu0 %2255 }
 0x2d2   : > { %v2295_v20 = vrot.slane %v2256_v11, %v6143_v9  ;;  %v2679_v26 = vsel %vm2110_vm5, %v2663_v18, %v2678_v39 }
 0x2d3   : > { %v2629_v24 = vpop.xlane.xlu1 %2628 }
 0x2d4   : > { %v2667_v25 = vrot.slane %v2629_v24, %v6143_v9  ;;  %v2305_v45 = vsel %vm2114_vm7, %v2295_v20, %v2304_v6 }
 0x2d5   : > { %v2259_v22 = vpop.xlane.xlu0 %2258 }
 0x2d6   : > { %v2299_v30 = vrot.slane %v2259_v22, %v6143_v9  ;;  %v2680_v28 = vsel %vm2112_vm6, %v2667_v25, %v2679_v26 }
 0x2d7   : > { %v2632_v36 = vpop.xlane.xlu1 %2631 }
 0x2d8   : > { %v2306_v41 = vsel %vm2116_vm8, %v2299_v30, %v2305_v45  ;;  %v2671_v42 = vrot.slane %v2632_v36, %v6143_v9  ;;  %v5663_v36 = vmov 0  }
 0x2d9   : > { %v2308_v34 = vsel %vm6170_vm9, %v2306_v41, -1e+09  ;;  %5326 = vset.pattern.permute.xlu0 %v5663_v36  ;;  %5327 = vset.pattern.permute.xlu1 %v5663_v36 }
 0x2da   : > { %v2309_v8 = vsel %vm2120_vm10, %v2308_v34, -inf  ;;  %v2681_v49 = vsel %vm2114_vm7, %v2671_v42, %v2680_v28 }
 0x2db   : > { %v2310_v3 = vrot.slane %v2309_v8, 4  ;;  %v2635_v12 = vpop.xlane.xlu1 %2634 }
 0x2dc   : > { %v2675_v31 = vrot.slane %v2635_v12, %v6143_v9 }
 0x2dd   : > { %v2311_v50 = vmax.f32 %v2309_v8, %v2310_v3 }
 0x2de   : > { %v2682_v47 = vsel %vm2116_vm8, %v2675_v31, %v2681_v49 }
 0x2df   : > { %v2312_v51 = vrot.slane %v2311_v50, 2  ;;  %v2684_v40 = vsel %vm6170_vm9, %v2682_v47, -1e+09 }
 0x2e0   : > { %v2685_v58 = vsel %vm2120_vm10, %v2684_v40, -inf }
 0x2e1   : > { %v2313_v61 = vmax.f32 %v2311_v50, %v2312_v51  ;;  %v2686_v21 = vrot.slane %v2685_v58, 4 }
 0x2e3   : > { %v2314_v63 = vrot.slane %v2313_v61, 1  ;;  %v2687_v0 = vmax.f32 %v2685_v58, %v2686_v21 }
 0x2e5   : > { %v2315_v37 = vmax.f32 %v2313_v61, %v2314_v63  ;;  %v2688_v5 = vrot.slane %v2687_v0, 2 }
 0x2e7   : > { %v2316_v27 = vsub.f32 %v2308_v34, %v2315_v37  ;;  %v2689_v10 = vmax.f32 %v2687_v0, %v2688_v5 }
 0x2e9   : > { %v2317_v46 = vmul.f32 1.442695, %v2316_v27  ;;  %v2690_v33 = vrot.slane %v2689_v10, 1 }
 0x2eb   : > { %5336 = vpow2.f32 %v2317_v46  ;;  %v2691_v9 = vmax.f32 %v2689_v10, %v2690_v33  ;;  %v4857_v10 = vld [vmem:[#allocation8] ss:$0 sm:$0xff] }
 0x2ed   : > { %v2692_v13 = vsub.f32 %v2684_v40, %v2691_v9 }
 0x2ef   : > { %v2693_v16 = vmul.f32 1.442695, %v2692_v13 }
 0x2f1   : > { %5338 = vpow2.f32 %v2693_v16 }
 0x2f5   : > { %v5337_v17 = vpop.eup %5336 }
 0x2f6   : > { %v2319_v53 = vmul.f32 %v5337_v17, %v6190_v35 }
 0x2f8   : > { %v2320_v18 = vsel %vm2120_vm10, %v2319_v53, 0.0 }
 0x2f9   : > { %v2321_v11 = vrot.slane %v2320_v18, 4 }
 0x2fb   : > { %v5339_v39 = vpop.eup %5338  ;;  %v2322_v6 = vadd.f32 %v2321_v11, %v2320_v18 }
 0x2fc   : > { %v2695_v20 = vmul.f32 %v5339_v39, %v6190_v35 }
 0x2fd   : > { %v2323_v24 = vrot.slane %v2322_v6, 2 }
 0x2fe   : > { %v2696_v25 = vsel %vm2120_vm10, %v2695_v20, 0.0 }
 0x2ff   : > { %v2324_v26 = vadd.f32 %v2323_v24, %v2322_v6  ;;  %v2697_v45 = vrot.slane %v2696_v25, 4 }
 0x301   : > { %v2325_v22 = vrot.slane %v2324_v26, 1  ;;  %v2698_v30 = vadd.f32 %v2697_v45, %v2696_v25 }
 0x303   : > { %v2326_v28 = vadd.f32 %v2325_v22, %v2324_v26  ;;  %v2699_v41 = vrot.slane %v2698_v30, 2 }
 0x305   : > { %v2327_v42 = vmax.f32 %v2326_v28, 1e-20  ;;  %v2700_v34 = vadd.f32 %v2699_v41, %v2698_v30 }
 0x307   : > { %5340 = vrcp.f32 %v2327_v42  ;;  %v2701_v8 = vrot.slane %v2700_v34, 1 }
 0x309   : > { %v2702_v3 = vadd.f32 %v2701_v8, %v2700_v34 }
 0x30b   : > { %v2703_v49 = vmax.f32 %v2702_v3, 1e-20 }
 0x30d   : > { %5342 = vrcp.f32 %v2703_v49 }
 0x311   : > { %v5341_v35 = vpop.eup %5340 }
 0x312   : > { %v6446_v12 = vmul.f32 %v5341_v35, %v2319_v53 }
 0x314   : > { %v2340_v31 = vrot.slane %v6446_v12, %v6132_v55  ;;  %v2333_v50 = vrot.slane %v6446_v12, %v6135_v56  ;;  %v2347_v47 = vrot.slane %v6446_v12, %v6274_v52  ;;  %v2786_v40 = vadd.f32 %v6283_v57, %v6446_v12 }
 0x315   : > { %v2354_v5 = vrot.slane %v6446_v12, %v6289_v62  ;;  %v2361_v27 = vrot.slane %v6446_v12, %v6296_v1 }
 0x316   : > { %2342 = vbcast.lane.b32.xlu1 %v2340_v31, 256  ;;  %2335 = vbcast.lane.b32.xlu0 %v2333_v50, 256 }
 0x317   : > { %v5343_v51 = vpop.eup %5342 }
 0x318   : > { %v6456_v58 = vmul.f32 %v5343_v51, %v2695_v20 }
 0x31a   : > { %v2787_v61 = vadd.f32 %v2786_v40, %v6456_v58  ;;  %v2709_v21 = vrot.slane %v6456_v58, %v6135_v56  ;;  %2349 = vbcast.lane.b32.xlu0 %v2347_v47, 256  ;;  %v2730_v63 = vrot.slane %v6456_v58, %v6289_v62  ;;  %v2716_v0 = vrot.slane %v6456_v58, %v6132_v55 }
 0x31b   : > { %v2737_v57 = vrot.slane %v6456_v58, %v6296_v1  ;;  %v2723_v37 = vrot.slane %v6456_v58, %v6274_v52 }
 0x31c   : > { %4565 = vst.msk [vmem:[%s6039_s28] sm:$0xff] %vm2120_vm10, %v2787_v61  ;;  %2711 = vbcast.lane.b32.xlu1 %v2709_v21, 256  ;;  %s6829_s28 = sld [smem:[#allocation50_spill]] }
 0x31e   : > { %2732 = vbcast.lane.b32.xlu0 %v2730_v63, 256 }
 0x320   : > { %2718 = vbcast.lane.b32.xlu1 %v2716_v0, 256 }
 0x322   : > { %2739 = vbcast.lane.b32.xlu0 %v2737_v57, 256 }
 0x324   : > { %2725 = vbcast.lane.b32.xlu1 %v2723_v37, 256 }
 0x328   : > { %2356 = vbcast.lane.b32.xlu1 %v2354_v5, 256  ;;  %v2744_v5 = vrot.slane %v6456_v58, %v6301_v7 }
 0x32c   : > { %2363 = vbcast.lane.b32.xlu1 %v2361_v27, 256  ;;  %v2998_v27 = vld [vmem:[%s6827_s10] sm:$0xff] }
 0x354   : > { %v2868_v55 = vpop.f32.mrb[6].mxu0 }
 0x355   : > { %v2869_v46 = vadd.f32 %v4857_v10, %v2868_v55  ;;  %v5014_v33 = vpop.f32.mrb[7].mxu0 }
 0x356   : > { %v2751_v33 = vrot.slane %v6456_v58, %v6306_v14 }
 0x357   : > { %v2946_v9 = vsel %vm2945_vm13, %v2869_v46, -inf }
 0x358   : > { %v2947_v13 = vrot.slane %v2946_v9, 4 }
 0x35a   : > { %v2948_v16 = vmax.f32 %v2946_v9, %v2947_v13  ;;  %v2758_v13 = vrot.slane %v6456_v58, %v6313_v23 }
 0x35c   : > { %v2949_v52 = vrot.slane %v2948_v16, 2 }
 0x35d   : > { %v2941_v17 = vpop.f32.mrb[6].mxu1 }
 0x35e   : > { %v2950_v53 = vmax.f32 %v2948_v16, %v2949_v52  ;;  %v2942_v18 = vadd.f32 %v4857_v10, %v2941_v17  ;;  %v5021_v11 = vpop.f32.mrb[7].mxu1  ;;  %v2999_v10 = vld [vmem:[%s6827_s10 + $0x8] sm:$0xff]  ;;  %v3000_v16 = vld [vmem:[%s6827_s10 + $0x10] sm:$0xff]  ;;  %v3001_v52 = vld [vmem:[%s6827_s10 + $0x18] sm:$0xff]  ;;  %v2368_v17 = vrot.slane %v6446_v12, %v6301_v7 }
 0x35f   : > { %v5162_v55 = vpack.c.bf16 %v2999_v10, %v2998_v27  ;;  %v2382_v11 = vrot.slane %v6446_v12, %v6313_v23 }
 0x360   : > { %v2951_v62 = vrot.slane %v2950_v53, 1  ;;  %v2965_v39 = vsel %vm2945_vm13, %v2942_v18, -inf }
 0x361   : > { %v2966_v6 = vrot.slane %v2965_v39, 4  ;;  %5163 = vmatpush3.bf16.msra.mxu1 %v5162_v55 }
 0x362   : > { %v2952_v1 = vmax.f32 %v2950_v53, %v2951_v62  ;;  %5167 = vmatprep.subr.bf16.mxu1 %v5661_v44  ;;  %v5159_v53 = vpack.c.bf16 %v3001_v52, %v3000_v16  ;;  %v5405_v52 = vld [vmem:[#allocation2 + $0x6] sm:$0x3] }
 0x363   : > { %v2967_v20 = vmax.f32 %v2965_v39, %v2966_v6 }
 0x364   : > { %v2953_v24 = vsub.f32 %v2869_v46, %v2952_v1  ;;  %5160 = vmatpush3.bf16.msra.mxu0 %v5159_v53 }
 0x365   : > { %v2968_v25 = vrot.slane %v2967_v20, 2  ;;  %5164 = vmatprep.subr.bf16.mxu0 %v5661_v44 }
 0x366   : > { %v2954_v26 = vmul.f32 1.442695, %v2953_v24 }
 0x367   : > { %v2969_v45 = vmax.f32 %v2967_v20, %v2968_v25  ;;  %v5396_v20 = vld [vmem:[#allocation3] sm:$0x3]  ;;  %v5397_v25 = vld [vmem:[#allocation3 + $0x2] sm:$0x3] }
 0x368   : > { %5344 = vpow2.f32 %v2954_v26 }
 0x369   : > { %v2970_v22 = vrot.slane %v2969_v45, 1 }
 0x36b   : > { %v2971_v30 = vmax.f32 %v2969_v45, %v2970_v22 }
 0x36d   : > { %v2972_v36 = vsub.f32 %v2942_v18, %v2971_v30  ;;  %v2375_v18 = vrot.slane %v6446_v12, %v6306_v14  ;;  %v5398_v30 = vld [vmem:[#allocation3 + $0x4] sm:$0x3] }
 0x36f   : > { %v2973_v28 = vmul.f32 1.442695, %v2972_v36 }
 0x371   : > { %5346 = vpow2.f32 %v2973_v28 }
 0x372   : > { %v5345_v41 = vpop.eup %5344 }
 0x373   : > { %v2956_v42 = vsel %vm2945_vm13, %v5345_v41, 0.0 }
 0x374   : > { %v2957_v34 = vrot.slane %v2956_v42, 4 }
 0x376   : > { %v2958_v8 = vadd.f32 %v2957_v34, %v2956_v42  ;;  %v5399_v42 = vld [vmem:[#allocation3 + $0x6] sm:$0x3] }
 0x378   : > { %v2959_v3 = vrot.slane %v2958_v8, 2 }
 0x37a   : > { %v2960_v49 = vadd.f32 %v2959_v3, %v2958_v8  ;;  %v5400_v8 = vld [vmem:[#allocation2 + $0x2] sm:$0x3] }
 0x37b   : > { %v5347_v35 = vpop.eup %5346 }
 0x37c   : > { %v2975_v31 = vsel %vm2945_vm13, %v5347_v35, 0.0  ;;  %v2961_v50 = vrot.slane %v2960_v49, 1 }
 0x37d   : > { %v2976_v47 = vrot.slane %v2975_v31, 4 }
 0x37e   : > { %v2962_v51 = vadd.f32 %v2961_v50, %v2960_v49  ;;  %v5401_v49 = vld [vmem:[#allocation2] sm:$0x3] }
 0x37f   : > { %v2977_v40 = vadd.f32 %v2976_v47, %v2975_v31  ;;  %v3158_v47 = vld [vmem:[%s6828_s30] sm:$0xff] }
 0x380   : > { %5348 = vrcp.f32 %v2962_v51  ;;  %v3159_v51 = vld [vmem:[%s6828_s30 + $0x8] sm:$0xff] }
 0x381   : > { %v2978_v61 = vrot.slane %v2977_v40, 2  ;;  %v5165_v55 = vpack.c.bf16 %v3159_v51, %v3158_v47 }
 0x383   : > { %v2979_v21 = vadd.f32 %v2978_v61, %v2977_v40 }
 0x385   : > { %v2980_v63 = vrot.slane %v2979_v21, 1 }
 0x387   : > { %v2981_v0 = vadd.f32 %v2980_v63, %v2979_v21  ;;  %v5402_v21 = vld [vmem:[#allocation3 + $0x8] sm:$0x3] }
 0x388   : > { %v2343_v58 = vpop.permute.xlu1 %2342  ;;  %v2336_v62 = vpop.permute.xlu0 %2335 }
 0x389   : > { %5350 = vrcp.f32 %v2981_v0  ;;  %v2387_v3 = vmul.f32 %v5400_v8, %v2343_v58  ;;  %v5406_v58 = vld [vmem:[#allocation3 + $0xc] sm:$0x3] }
 0x38a   : > { %v5349_v57 = vpop.eup %5348 }
 0x38b   : > { %v2964_v37 = vmul.f32 %v5349_v57, %v5345_v41  ;;  %v2395_v57 = vsel %vm1419_vm1, %v2387_v3, 0.0 }
 0x38c   : > { %v2350_v6 = vpop.permute.xlu0 %2349 }
 0x38d   : > { %2986 = vperm.xlu0 %5326, %v2964_v37  }
 0x38e   : > { %v2712_v39 = vpop.permute.xlu1 %2711 }
 0x38f   : > { %v2762_v24 = vmul.f32 %v5396_v20, %v2712_v39 }
 0x390   : > { %v2733_v7 = vpop.permute.xlu0 %2732 }
 0x391   : > { %2746 = vbcast.lane.b32.xlu0 %v2744_v5, 256  ;;  %v2770_v22 = vsel %vm1419_vm1, %v2762_v24, 0.0  ;;  %v2765_v34 = vmul.f32 %v5399_v42, %v2733_v7  ;;  %v5403_v5 = vld [vmem:[#allocation2 + $0x4] sm:$0x3] }
 0x392   : > { %v2719_v1 = vpop.permute.xlu1 %2718  ;;  %v2388_v27 = vmul.f32 %v5403_v5, %v2350_v6 }
 0x393   : > { %v5351_v46 = vpop.eup %5350  ;;  %v2763_v26 = vmul.f32 %v5397_v25, %v2719_v1  ;;  %v2775_v61 = vsel %vm1419_vm1, %v2765_v34, 0.0  ;;  %v5407_v25 = vld [vmem:[#allocation2 + $0x8] sm:$0x3] }
 0x394   : > { %v2983_v9 = vmul.f32 %v5351_v46, %v5347_v35  ;;  %v2740_v12 = vpop.permute.xlu0 %2739  ;;  %v2386_v35 = vmul.f32 %v5401_v49, %v2336_v62  ;;  %v2397_v53 = vsel %vm1419_vm1, %v2388_v27, 0.0 }
 0x395   : > { %2753 = vbcast.lane.b32.xlu0 %v2751_v33, 256  ;;  %v2771_v14 = vsel %vm1419_vm1, %v2763_v26, 0.0  ;;  %v2766_v63 = vmul.f32 %v5402_v21, %v2740_v12  ;;  %v5404_v33 = vld [vmem:[#allocation3 + $0xa] sm:$0x3] }
 0x396   : > { %2993 = vperm.xlu1 %5327, %v2983_v9   ;;  %v2726_v45 = vpop.permute.xlu1 %2725  ;;  %v2772_v36 = vadd.f32 %v2771_v14, %v2770_v22  ;;  %v2394_v37 = vsel %vm1419_vm1, %v2386_v35, 0.0  ;;  %v5410_v35 = vld [vmem:[#allocation2 + $0xc] sm:$0x3] }
 0x397   : > { %v2764_v23 = vmul.f32 %v5398_v30, %v2726_v45  ;;  %v2396_v16 = vadd.f32 %v2395_v57, %v2394_v37  ;;  %v5408_v30 = vld [vmem:[#allocation3 + $0xe] sm:$0x3] }
 0x399   : > { %2760 = vbcast.lane.b32.xlu0 %v2758_v13, 256  ;;  %v2773_v28 = vsel %vm1419_vm1, %v2764_v23, 0.0  ;;  %v2398_v7 = vadd.f32 %v2397_v53, %v2396_v16 }
 0x39a   : > { %2370 = vbcast.lane.b32.xlu1 %v2368_v17, 256  ;;  %v2357_v41 = vpop.permute.xlu1 %2356  ;;  %v2774_v40 = vadd.f32 %v2773_v28, %v2772_v36  ;;  %v5409_v28 = vld [vmem:[#allocation2 + $0xa] sm:$0x3] }
 0x39b   : > { %v2389_v17 = vmul.f32 %v5405_v52, %v2357_v41 }
 0x39c   : > { %v2776_v13 = vadd.f32 %v2775_v61, %v2774_v40  ;;  %v5411_v61 = vld [vmem:[#allocation2 + $0xe] sm:$0x3] }
 0x39d   : > { %v2399_v24 = vsel %vm1419_vm1, %v2389_v17, 0.0 }
 0x39e   : > { %2377 = vbcast.lane.b32.xlu1 %v2375_v18, 256  ;;  %v2364_v46 = vpop.permute.xlu1 %2363  ;;  %v2400_v42 = vadd.f32 %v2399_v24, %v2398_v7 }
 0x39f   : > { %v2390_v26 = vmul.f32 %v5407_v25, %v2364_v46  ;;  %v4863_v46 = vld [vmem:[#allocation9] ss:$0 sm:$0xff] }
 0x3a1   : > { %v2401_v8 = vsel %vm1419_vm1, %v2390_v26, 0.0 }
 0x3a2   : > { %2384 = vbcast.lane.b32.xlu1 %v2382_v11, 256 }
 0x40c   : > { %v2987_v31 = vpop.permute.xlu0 %2986 }
 0x40d   : > { %v2989_v50 = vmul.f32 %v2987_v31, %v6381_v2 }
 0x40f   : > { %v2990_v0 = vadd.f32 %v2989_v50, %v6381_v2  ;;  %v2777_v2 = vsel %vm1419_vm1, %v2766_v63, 0.0  ;;  %v2402_v50 = vadd.f32 %v2401_v8, %v2400_v42 }
 0x410   : > { %v2747_v10 = vpop.permute.xlu0 %2746  ;;  %v2778_v6 = vadd.f32 %v2777_v2, %v2776_v13 }
 0x411   : > { %v2767_v9 = vmul.f32 %v5404_v33, %v2747_v10  ;;  %5034 = vmatmul.mubr.msk.f32.vlgmr.msra.gmra.mrb[8].mxu1 %vm1466_vm12, %v2990_v0 }
 0x412   : > { %5169 = vmatpush3.bf16.msra.mxu1 %v5165_v55  ;;  %5047 = vmatprep.mubr.msk.f32.mxu1 %vm5662_vm11, %v5660_v32 }
 0x413   : > { %5173 = vmatprep.subr.bf16.mxu1 %v5661_v44  ;;  %v2779_v11 = vsel %vm1419_vm1, %v2767_v9, 0.0 }
 0x414   : > { %v2754_v18 = vpop.permute.xlu0 %2753  ;;  %v2780_v45 = vadd.f32 %v2779_v11, %v2778_v6 }
 0x415   : > { %v2768_v62 = vmul.f32 %v5406_v58, %v2754_v18  ;;  %v2994_v39 = vpop.permute.xlu1 %2993 }
 0x416   : > { %v2996_v1 = vmul.f32 %v2994_v39, %v6392_v19 }
 0x417   : > { %v2781_v20 = vsel %vm1419_vm1, %v2768_v62, 0.0 }
 0x418   : > { %v2997_v22 = vadd.f32 %v2996_v1, %v6392_v19  ;;  %v2761_v14 = vpop.permute.xlu0 %2760  ;;  %v2782_v36 = vadd.f32 %v2781_v20, %v2780_v45 }
 0x419   : > { %v2769_v23 = vmul.f32 %v5408_v30, %v2761_v14  ;;  %v2371_v12 = vpop.permute.xlu1 %2370 }
 0x41a   : > { %v2391_v41 = vmul.f32 %v5409_v28, %v2371_v12  ;;  %5027 = vmatmul.mubr.msk.f32.vlgmr.msra.gmra.mrb[8].mxu0 %vm1466_vm12, %v2997_v22 }
 0x41b   : > { %v2783_v34 = vsel %vm1419_vm1, %v2769_v23, 0.0  ;;  %5166 = vmatpush3.bf16.msra.mxu0 %v5165_v55  ;;  %5040 = vmatprep.mubr.msk.f32.mxu0 %vm5662_vm11, %v5660_v32 }
 0x41c   : > { %v6523_v3 = vadd.f32 %v2783_v34, %v2782_v36  ;;  %5170 = vmatprep.subr.bf16.mxu0 %v5661_v44  ;;  %v2403_v49 = vsel %vm1419_vm1, %v2391_v41, 0.0 }
 0x41d   : > { %v2378_v19 = vpop.permute.xlu1 %2377  ;;  %v2404_v51 = vadd.f32 %v2403_v49, %v2402_v50 }
 0x41e   : > { %v2392_v31 = vmul.f32 %v5410_v35, %v2378_v19  ;;  %5041 = vmatmul.mubr.msk.f32.vlgmr.msra.gmra.mrb[10].mxu0 %vm1466_vm12, %v6523_v3 }
 0x41f   : > { %5054 = vmatprep.mubr.msk.f32.mxu0 %vm5662_vm11, %v5660_v32 }
 0x420   : > { %v2405_v47 = vsel %vm1419_vm1, %v2392_v31, 0.0 }
 0x421   : > { %v2385_v40 = vpop.permute.xlu1 %2384  ;;  %v2406_v63 = vadd.f32 %v2405_v47, %v2404_v51 }
 0x422   : > { %v2393_v21 = vmul.f32 %v5411_v61, %v2385_v40 }
 0x424   : > { %v2407_v0 = vsel %vm1419_vm1, %v2393_v21, 0.0 }
 0x425   : > { %v6533_v57 = vadd.f32 %v2407_v0, %v2406_v63  ;;  %v3365_v63 = vld [vmem:[%s6829_s28] sm:$0xff]  ;;  %v3366_v0 = vld [vmem:[%s6829_s28 + $0x8] sm:$0xff] }
 0x427   : > { %5048 = vmatmul.mubr.msk.f32.vlgmr.msra.gmra.mrb[10].mxu1 %vm1466_vm12, %v6533_v57 }
 0x428   : > { %5061 = vmatprep.mubr.msk.f32.mxu1 %vm5662_vm11, %v5660_v32 }
 0x4e4   : > { %v3144_v37 = vpop.f32.mrb[8].mxu1 }
 0x4e5   : > { %v5035_v5 = vpop.f32.mrb[9].mxu1 }
 0x4ed   : > { %v3071_v27 = vpop.f32.mrb[8].mxu0 }
 0x4ee   : > { %v6539_v10 = vadd.f32 %v3144_v37, %v3071_v27  ;;  %v5028_v55 = vpop.f32.mrb[9].mxu0  ;;  %v5174_v37 = vpack.c.bf16 %v3366_v0, %v3365_v63 }
 0x4ef   : > { %v3367_v55 = vld [vmem:[%s6829_s28 + $0x10] sm:$0xff] }
 0x4f0   : > { %5175 = vmatpush3.bf16.msra.mxu1 %v5174_v37 }
 0x4f1   : > { %v3236_v33 = vpop.f32.mrb[10].mxu0  ;;  %5179 = vmatprep.subr.bf16.mxu1 %v5661_v44 }
 0x4f2   : > { %v3237_v9 = vadd.f32 %v4863_v46, %v3236_v33  ;;  %v5042_v13 = vpop.f32.mrb[11].mxu0 }
 0x4f3   : > { %v3525_v13 = vld [vmem:[%s6830_s15 + $0x8] sm:$0xff] }
 0x4f4   : > { %v3313_v16 = vsel %vm2945_vm13, %v3237_v9, -inf }
 0x4f5   : > { %v3314_v2 = vrot.slane %v3313_v16, 4 }
 0x4f7   : > { %v3315_v52 = vmax.f32 %v3313_v16, %v3314_v2 }
 0x4f9   : > { %v3316_v17 = vrot.slane %v3315_v52, 2 }
 0x4fa   : > { %v3309_v53 = vpop.f32.mrb[10].mxu1 }
 0x4fb   : > { %v3317_v18 = vmax.f32 %v3315_v52, %v3316_v17  ;;  %v3310_v11 = vadd.f32 %v4863_v46, %v3309_v53  ;;  %v5049_v58 = vpop.f32.mrb[11].mxu1  ;;  %v3368_v46 = vld [vmem:[%s6829_s28 + $0x18] sm:$0xff]  ;;  %v3526_v53 = vld [vmem:[%s6830_s15 + $0x10] sm:$0xff] }
 0x4fc   : > { %v5171_v33 = vpack.c.bf16 %v3368_v46, %v3367_v55 }
 0x4fd   : > { %v3318_v62 = vrot.slane %v3317_v18, 1  ;;  %v3332_v39 = vsel %vm2945_vm13, %v3310_v11, -inf }
 0x4fe   : > { %v3333_v6 = vrot.slane %v3332_v39, 4  ;;  %5172 = vmatpush3.bf16.msra.mxu0 %v5171_v33 }
 0x4ff   : > { %v3319_v1 = vmax.f32 %v3317_v18, %v3318_v62  ;;  %5176 = vmatprep.subr.bf16.mxu0 %v5661_v44  ;;  %v3527_v18 = vld [vmem:[%s6830_s15 + $0x18] sm:$0xff]  ;;  %v5412_v62 = vld [vmem:[%s6026_s2] sm:$0x3]  ;;  %s6833_s2 = sld [smem:[#allocation36_spill]] }
 0x500   : > { %v3334_v7 = vmax.f32 %v3332_v39, %v3333_v6  ;;  %v5177_v39 = vpack.c.bf16 %v3527_v18, %v3526_v53 }
 0x501   : > { %v3320_v20 = vsub.f32 %v3237_v9, %v3319_v1  ;;  %v3524_v9 = vld [vmem:[%s6830_s15] sm:$0xff] }
 0x502   : > { %v3335_v24 = vrot.slane %v3334_v7, 2  ;;  %v5180_v52 = vpack.c.bf16 %v3525_v13, %v3524_v9 }
 0x503   : > { %v3321_v25 = vmul.f32 1.442695, %v3320_v20  ;;  %v3680_v20 = vld [vmem:[%s6831_s26 + $0x8] sm:$0xff] }
 0x504   : > { %v3336_v26 = vmax.f32 %v3334_v7, %v3335_v24  ;;  %v3679_v7 = vld [vmem:[%s6831_s26] sm:$0xff]  ;;  %v3156_v24 = vstv %s6562_s16  ;;  %s6834_s16 = sld [smem:[#allocation34_spill]] }
 0x505   : > { %5352 = vpow2.f32 %v3321_v25  ;;  %v5183_v25 = vpack.c.bf16 %v3680_v20, %v3679_v7 }
 0x506   : > { %v3337_v45 = vrot.slane %v3336_v26, 1 }
 0x508   : > { %v3338_v22 = vmax.f32 %v3336_v26, %v3337_v45  ;;  %v3787_v45 = vld [vmem:[%s6832_s11] sm:$0xff] }
 0x50a   : > { %v3339_v14 = vsub.f32 %v3310_v11, %v3338_v22  ;;  %v4862_v11 = vld [vmem:[#allocation17] ss:$0 sm:$0xff] }
 0x50b   : > { %v3155_v6 = vadd.f32 %v4862_v11, %v6539_v10  ;;  %v3790_v10 = vld [vmem:[%s6832_s11 + $0x18] sm:$0xff] }
 0x50c   : > { %v3340_v30 = vmul.f32 1.442695, %v3339_v14  ;;  %v3788_v14 = vld [vmem:[%s6832_s11 + $0x8] sm:$0xff] }
 0x50d   : > { %v3157_v26 = vmul.f32 %v3156_v24, %v3155_v6 }
 0x50e   : > { %5354 = vpow2.f32 %v3340_v30  ;;  %v5189_v30 = vpack.c.bf16 %v3788_v14, %v3787_v45 }
 0x50f   : > { %v5353_v23 = vpop.eup %5352 }
 0x510   : > { %v3323_v12 = vsel %vm2945_vm13, %v5353_v23, 0.0 }
 0x511   : > { %v3324_v36 = vrot.slane %v3323_v12, 4 }
 0x513   : > { %v3325_v28 = vadd.f32 %v3324_v36, %v3323_v12 }
 0x515   : > { %v3326_v41 = vrot.slane %v3325_v28, 2 }
 0x517   : > { %v3327_v42 = vadd.f32 %v3326_v41, %v3325_v28 }
 0x518   : > { %v5355_v34 = vpop.eup %5354 }
 0x519   : > { %v3342_v8 = vsel %vm2945_vm13, %v5355_v34, 0.0  ;;  %v3328_v19 = vrot.slane %v3327_v42, 1 }
 0x51a   : > { %v3343_v49 = vrot.slane %v3342_v8, 4 }
 0x51b   : > { %v3329_v35 = vadd.f32 %v3328_v19, %v3327_v42 }
 0x51c   : > { %v3344_v31 = vadd.f32 %v3343_v49, %v3342_v8  ;;  %v3942_v49 = vld [vmem:[%s6833_s2] sm:$0xff] }
 0x51d   : > { %5356 = vrcp.f32 %v3329_v35  ;;  %v3943_v35 = vld [vmem:[%s6833_s2 + $0x8] sm:$0xff]  ;;  %s6837_s2 = sld [smem:[#allocation40_spill]] }
 0x51e   : > { %v3345_v50 = vrot.slane %v3344_v31, 2 }
 0x520   : > { %v3346_v47 = vadd.f32 %v3345_v50, %v3344_v31 }
 0x522   : > { %v3347_v51 = vrot.slane %v3346_v47, 1 }
 0x523   : > { %v4234_v7 = vld [vmem:[%s6837_s2] sm:$0xff]  ;;  %v4235_v20 = vld [vmem:[%s6837_s2 + $0x8] sm:$0xff]  ;;  %s6841_s2 = sld [smem:[#allocation39_spill]] }
 0x524   : > { %v3348_v40 = vadd.f32 %v3347_v51, %v3346_v47  ;;  %v5192_v47 = vpack.c.bf16 %v3943_v35, %v3942_v49 }
 0x526   : > { %5358 = vrcp.f32 %v3348_v40 }
 0x527   : > { %v5357_v61 = vpop.eup %5356 }
 0x528   : > { %v3331_v21 = vmul.f32 %v5357_v61, %v5353_v23  ;;  %v5413_v23 = vld [vmem:[%s6030_s7] sm:$0x3]  ;;  %s6835_s7 = sld [smem:[#allocation33_spill]] }
 0x529   : > { %v4151_v49 = vld [vmem:[%s6841_s2] sm:$0xff]  ;;  %v4152_v35 = vld [vmem:[%s6841_s2 + $0x8] sm:$0xff]  ;;  %s6847_s2 = sld [smem:[#allocation43_spill]] }
 0x52a   : > { %3353 = vperm.xlu1 %5327, %v3331_v21   ;;  %v4872_v21 = vld [vmem:[%s6834_s16] ss:$0 sm:$0xff]  ;;  %s6836_s16 = sld [smem:[#allocation38_spill]] }
 0x530   : > { %v5359_v5 = vpop.eup %5358 }
 0x531   : > { %v3350_v27 = vmul.f32 %v5359_v5, %v5355_v34  ;;  %v4868_v34 = vld [vmem:[#allocation18] ss:$0 sm:$0xff]  ;;  %v4871_v5 = vld [vmem:[%s6835_s7] ss:$0 sm:$0xff]  ;;  %s6838_s7 = smov 96  }
 0x533   : > { %3360 = vperm.xlu0 %5326, %v3350_v27  }
 0x5a9   : > { %v3354_v16 = vpop.permute.xlu1 %3353 }
 0x5aa   : > { %v3356_v2 = vmul.f32 %v3354_v16, %v6523_v3 }
 0x5ac   : > { %v3357_v17 = vadd.f32 %v3356_v2, %v6523_v3 }
 0x5ae   : > { %5062 = vmatmul.mubr.msk.f32.vlgmr.msra.gmra.mrb[12].mxu1 %vm1466_vm12, %v3357_v17 }
 0x5af   : > { %5181 = vmatpush3.bf16.msra.mxu1 %v5180_v52  ;;  %5075 = vmatprep.mubr.msk.f32.mxu1 %vm5662_vm11, %v5660_v32 }
 0x5b0   : > { %5185 = vmatprep.subr.bf16.mxu1 %v5661_v44 }
 0x5b2   : > { %v3361_v58 = vpop.permute.xlu0 %3360  ;;  %5076 = vmatmul.mubr.msk.f32.vlgmr.msra.gmra.mrb[14].mxu1 %vm1466_vm12, %v5412_v62 }
 0x5b3   : > { %v3363_v3 = vmul.f32 %v3361_v58, %v6533_v57  ;;  %5089 = vmatprep.mubr.msk.f32.mxu1 %vm5662_vm11, %v5660_v32  ;;  %v4878_v58 = vld [vmem:[%s6836_s16] ss:$0 sm:$0xff]  ;;  %s6772_s16 = smov 112  }
 0x5b5   : > { %v3364_v1 = vadd.f32 %v3363_v3, %v6533_v57  ;;  %v3789_v57 = vld [vmem:[%s6832_s11 + $0x10] sm:$0xff] }
 0x5b6   : > { %v5186_v22 = vpack.c.bf16 %v3790_v10, %v3789_v57  ;;  %v4877_v57 = vld [vmem:[%s6839_s3] ss:$0 sm:$0xff]  ;;  %s6843_s3 = sld [smem:[#allocation26_spill]] }
 0x5b7   : > { %5055 = vmatmul.mubr.msk.f32.vlgmr.msra.gmra.mrb[12].mxu0 %vm1466_vm12, %v3364_v1 }
 0x5b8   : > { %5178 = vmatpush3.bf16.msra.mxu0 %v5177_v39  ;;  %5068 = vmatprep.mubr.msk.f32.mxu0 %vm5662_vm11, %v5660_v32 }
 0x5b9   : > { %5182 = vmatprep.subr.bf16.mxu0 %v5661_v44  ;;  %5187 = vmatpush3.bf16.msra.mxu1 %v5186_v22 }
 0x5ba   : > { %5191 = vmatprep.subr.bf16.mxu1 %v5661_v44 }
 0x5bb   : > { %5069 = vmatmul.mubr.msk.f32.vlgmr.msra.gmra.mrb[14].mxu0 %vm1466_vm12, %v3157_v26 }
 0x5bc   : > { %5184 = vmatpush3.bf16.msra.mxu0 %v5183_v25  ;;  %5082 = vmatprep.mubr.msk.f32.mxu0 %vm5662_vm11, %v5660_v32  ;;  %v6617_v25 = vld [vmem:[#allocation6] sm:$0x3] }
 0x5bd   : > { %5188 = vmatprep.subr.bf16.mxu0 %v5661_v44 }
 0x5bf   : > { %5083 = vmatmul.mubr.msk.f32.vlgmr.msra.gmra.mrb[16].mxu0 %vm1466_vm12, %v6227_v4 }
 0x5c0   : > { %5096 = vmatprep.mubr.msk.f32.mxu0 %vm5662_vm11, %v5660_v32  ;;  %5190 = vmatpush3.bf16.msra.mxu0 %v5189_v30 }
 0x5c1   : > { %5194 = vmatprep.subr.bf16.mxu0 %v5661_v44 }
 0x5c3   : > { %5097 = vmatmul.mubr.msk.f32.vlgmr.msra.gmra.mrb[18].mxu0 %vm1466_vm12, %v5413_v23 }
 0x5c4   : > { %5110 = vmatprep.mubr.msk.f32.mxu0 %vm5662_vm11, %v5660_v32 }
 0x681   : > { %v3511_v12 = vpop.f32.mrb[12].mxu1 }
 0x682   : > { %v5063_v36 = vpop.f32.mrb[13].mxu1 }
 0x685   : > { %v3667_v28 = vpop.f32.mrb[14].mxu1 }
 0x686   : > { %v5077_v41 = vpop.f32.mrb[15].mxu1 }
 0x68a   : > { %v3438_v42 = vpop.f32.mrb[12].mxu0 }
 0x68b   : > { %v3512_v8 = vadd.f32 %v3511_v12, %v3438_v42  ;;  %v5056_v19 = vpop.f32.mrb[13].mxu0 }
 0x68d   : > { %v3522_v31 = vadd.f32 %v4868_v34, %v3512_v8  ;;  %v6633_v34 = vld [vmem:[#allocation7] sm:$0x3] }
 0x68e   : > { %v3597_v50 = vpop.f32.mrb[14].mxu0 }
 0x68f   : > { %v3523_v51 = vmul.f32 %v3522_v31, %v3156_v24  ;;  %v3668_v40 = vadd.f32 %v3667_v28, %v3597_v50  ;;  %v5070_v61 = vpop.f32.mrb[15].mxu0  ;;  %v5198_v24 = vpack.c.bf16 %v4235_v20, %v4234_v7 }
 0x691   : > { %5090 = vmatmul.mubr.msk.f32.vlgmr.msra.gmra.mrb[16].mxu1 %vm1466_vm12, %v3523_v51  ;;  %v3678_v27 = vadd.f32 %v4871_v5, %v3668_v40 }
 0x692   : > { %5193 = vmatpush3.bf16.msra.mxu1 %v5192_v47  ;;  %v3754_v63 = vpop.f32.mrb[16].mxu0  ;;  %5103 = vmatprep.mubr.msk.f32.mxu1 %vm5662_vm11, %v5660_v32 }
 0x693   : > { %v3755_v0 = vadd.f32 %v4872_v21, %v3754_v63  ;;  %v5084_v37 = vpop.f32.mrb[17].mxu0  ;;  %5197 = vmatprep.subr.bf16.mxu1 %v5661_v44 }
 0x695   : > { %3766 = vrot.lane.b32.xlu1 %v3755_v0, %s6765_s1  ;;  %5104 = vmatmul.mubr.msk.f32.vlgmr.msra.gmra.mrb[18].mxu1 %vm1466_vm12, %v6258_v38  ;;  %v3758_v55 = vadd.f32 %v3755_v0, %v3678_v27  ;;  %s6768_s1 = smov 32   ;;  %v4843_v0 = vld [vmem:[%s6843_s3] ss:$0 sm:$0xff]  ;;  %s6853_s3 = smov 16  }
 0x696   : > { %5117 = vmatprep.mubr.msk.f32.mxu1 %vm5662_vm11, %v5660_v32  ;;  %v3930_v33 = vpop.f32.mrb[18].mxu0  ;;  %5199 = vmatpush3.bf16.msra.mxu1 %v5198_v24  ;;  %v1699_v37 = vadd.f32 %v4843_v0, %v6400_v29 }
 0x697   : > { %v4874_v46 = vmul.f32 -1.442695, %v3758_v55  ;;  %v5098_v9 = vpop.f32.mrb[19].mxu0  ;;  %5203 = vmatprep.subr.bf16.mxu1 %v5661_v44 }
 0x699   : > { %5360 = vpow2.f32 %v4874_v46  ;;  %5118 = vmatmul.mubr.msk.f32.vlgmr.msra.gmra.mrb[20].mxu1 %vm1466_vm12, %v6617_v25 }
 0x69a   : > { %5131 = vmatprep.mubr.msk.f32.mxu1 %vm5662_vm11, %v5660_v32 }
 0x6a3   : > { %v5361_v13 = vpop.eup %5360 }
 0x6a4   : > { %v3762_v16 = vadd.f32 1.0, %v5361_v13 }
 0x6a6   : > { %5362 = vrcp.f32 %v3762_v16 }
 0x6b0   : > { %v6609_v2 = vpop.eup %5362 }
 0x6b1   : > { %v3776_v51 = vsub.f32 1.0, %v6609_v2 }
 0x707   : > { %v3767_v52 = vpop.permute.xlu1 %3766 }
 0x708   : > { %v3769_v17 = vmul.f32 %v6609_v2, %v3767_v52 }
 0x70a   : > { %3771 = vrot.lane.b32.xlu1 %v3769_v17, %s6768_s1  ;;  %s6840_s1 = sld [smem:[#allocation44_spill]]  ;;  %v4346_v17 = vld [vmem:[%s6847_s2] sm:$0xff] }
 0x710   : > { %v4429_v28 = vld [vmem:[%s6840_s1] sm:$0xff]  ;;  %v4430_v41 = vld [vmem:[%s6840_s1 + $0x8] sm:$0xff]  ;;  %s6846_s1 = smov 112  }
 0x711   : > { %v5204_v42 = vpack.c.bf16 %v4430_v41, %v4429_v28 }
 0x713   : > { %5205 = vmatpush3.bf16.msra.mxu1 %v5204_v42 }
 0x716   : > { %5132 = vmatmul.mubr.msk.f32.vlgmr.msra.gmra.mrb[22].mxu1 %vm1466_vm12, %v6633_v34 }
 0x764   : > { %v3860_v53 = vpop.f32.mrb[16].mxu1 }
 0x765   : > { %v3931_v18 = vadd.f32 %v3930_v33, %v3860_v53  ;;  %v5091_v11 = vpop.f32.mrb[17].mxu1  ;;  %v4347_v53 = vld [vmem:[%s6847_s2 + $0x8] sm:$0xff] }
 0x767   : > { %v3941_v10 = vadd.f32 %v4877_v57, %v3931_v18 }
 0x768   : > { %v4017_v62 = vpop.f32.mrb[18].mxu1 }
 0x769   : > { %v4018_v3 = vadd.f32 %v4878_v58, %v4017_v62  ;;  %v5105_v39 = vpop.f32.mrb[19].mxu1  ;;  %v5201_v62 = vpack.c.bf16 %v4347_v53, %v4346_v17 }
 0x76b   : > { %4029 = vrot.lane.b32.xlu0 %v4018_v3, %s6838_s7  ;;  %v4021_v45 = vadd.f32 %v4018_v3, %v3941_v10 }
 0x76d   : > { %v4880_v22 = vmul.f32 -1.442695, %v4021_v45 }
 0x77c   : > { %v3772_v6 = vpop.permute.xlu1 %3771 }
 0x77d   : > { %v3774_v1 = vadd.f32 %v3772_v6, %v3678_v27 }
 0x77f   : > { %5364 = vtanh.f32 %v3774_v1 }
 0x780   : > { %5366 = vpow2.f32 %v4880_v22 }
 0x789   : > { %v5365_v26 = vpop.eup %5364 }
 0x78a   : > { %3778 = vrot.lane.b32.xlu1 %v5365_v26, %s6772_s16  ;;  %v5367_v14 = vpop.eup %5366  ;;  %s6844_s16 = sld [smem:[#allocation42_spill]] }
 0x78b   : > { %v4025_v30 = vadd.f32 1.0, %v5367_v14 }
 0x78d   : > { %5368 = vrcp.f32 %v4025_v30 }
 0x797   : > { %v5369_v23 = vpop.eup %5368 }
 0x798   : > { %v4039_v52 = vsub.f32 1.0, %v5369_v23 }
 0x7dd   : > { %v4030_v12 = vpop.permute.xlu0 %4029 }
 0x7de   : > { %v4032_v36 = vmul.f32 %v5369_v23, %v4030_v12 }
 0x7e0   : > { %4034 = vrot.lane.b32.xlu0 %v4032_v36, %s6842_s4 }
 0x7e4   : > { %3782 = vrot.lane.b32.xlu0 %v6227_v4, %s6774_s5  ;;  %v5195_v4 = vpack.c.bf16 %v4152_v35, %v4151_v49 }
 0x7e6   : > { %5196 = vmatpush3.bf16.msra.mxu0 %v5195_v4 }
 0x7e7   : > { %5200 = vmatprep.subr.bf16.mxu0 %v5661_v44  ;;  %v4883_v44 = vld [vmem:[%s6844_s16] ss:$0 sm:$0xff]  ;;  %s6849_s16 = sld [smem:[#allocation46_spill]] }
 0x7e8   : > { %4045 = vrot.lane.b32.xlu0 %v6258_v38, %s6774_s5  ;;  %v4312_v38 = vpop.f32.mrb[20].mxu1  ;;  %s6845_s5 = sld [smem:[#allocation25_spill]] }
 0x7e9   : > { %v5119_v31 = vpop.f32.mrb[21].mxu1  ;;  %v4313_v5 = vadd.f32 %v4883_v44, %v4312_v38 }
 0x7ea   : > { %v4507_v13 = vpop.f32.mrb[22].mxu1 }
 0x7eb   : > { %v5133_v16 = vpop.f32.mrb[23].mxu1 }
 0x7ed   : > { %v4888_v6 = vld [vmem:[%s6849_s16] ss:$0 sm:$0xff]  ;;  %s6855_s16 = scalar_lea.vmem %s5870_s22, %s6022_s23 }
 0x7ee   : > { %v4842_v27 = vld [vmem:[%s6845_s5] ss:$0 sm:$0xff]  ;;  %s6850_s5 = sld [smem:[#allocation29_spill]]  ;;  %v4508_v26 = vadd.f32 %v4888_v6, %v4507_v13 }
 0x7ef   : > { %v1619_v55 = vadd.f32 %v4842_v27, %v6398_v15  ;;  %v4849_v15 = vld [vmem:[%s6848_s8] ss:$0 sm:$0xff]  ;;  %s6851_s8 = sld [smem:[#allocation41_spill]] }
 0x7f0   : > { %v1970_v1 = vadd.f32 %v4849_v15, %v6405_v48  ;;  %v5415_v15 = vld [vmem:[%s6278_s0] sm:$0x3] }
 0x7f1   : > { %v1702_v46 = vadd.f32 %v1699_v37, %v1619_v55 }
 0x7f3   : > { %v4845_v33 = vmul.f32 -1.442695, %v1702_v46 }
 0x7f4   : > { %v4848_v57 = vld [vmem:[%s6850_s5] ss:$0 sm:$0xff] }
 0x7f5   : > { %v4881_v36 = vld [vmem:[%s6851_s8] ss:$0 sm:$0xff] }
 0x7fc   : > { %v3779_v47 = vpop.permute.xlu1 %3778 }
 0x7fd   : > { %v3781_v21 = vmul.f32 %v3779_v47, %v3776_v51 }
 0x852   : > { %v4035_v8 = vpop.permute.xlu0 %4034 }
 0x853   : > { %v4037_v19 = vadd.f32 %v4035_v8, %v3941_v10  ;;  %v1890_v10 = vadd.f32 %v4848_v57, %v6403_v43 }
 0x855   : > { %5370 = vtanh.f32 %v4037_v19 }
 0x856   : > { %v3783_v50 = vpop.permute.xlu0 %3782  ;;  %5372 = vpow2.f32 %v4845_v33 }
 0x857   : > { %v3785_v40 = vmul.f32 %v6609_v2, %v3783_v50 }
 0x859   : > { %v6643_v63 = vadd.f32 %v3785_v40, %v3781_v21 }
 0x85a   : > { %v4046_v29 = vpop.permute.xlu0 %4045 }
 0x85b   : > { %v4048_v11 = vmul.f32 %v5369_v23, %v4046_v29 }
 0x85f   : > { %v5371_v61 = vpop.eup %5370 }
 0x860   : > { %4041 = vrot.lane.b32.xlu1 %v5371_v61, %s6846_s1  ;;  %v5373_v9 = vpop.eup %5372 }
 0x861   : > { %v1706_v2 = vadd.f32 1.0, %v5373_v9  ;;  %v5668_v9 = vmov 1966171168  }
 0x862   : > { %v4056_v13 = vunpack.c.l.s4 %v5668_v9  ;;  %v5418_v9 = vld [vmem:[#allocation4] sm:$0x3] }
 0x863   : > { %5374 = vrcp.f32 %v1706_v2 }
 0x864   : > { %4160 = vrot.lane.b32.xlu1 %v6643_v63, %s6846_s1  ;;  %v4057_v16 = vunpack.c.0.s8 %v4056_v13 }
 0x866   : > { %v4060_v29 = vsub.s32 %v4057_v16, %v6129_v54 }
 0x868   : > { %1710 = vrot.lane.b32.xlu1 %v1699_v37, %s6838_s7 }
 0x86c   : > { %4324 = vrot.lane.b32.xlu1 %v4313_v5, %s6838_s7 }
 0x86d   : > { %v6666_v7 = vpop.eup %5374 }
 0x8d2   : > { %v4042_v18 = vpop.permute.xlu1 %4041 }
 0x8d3   : > { %v4044_v58 = vmul.f32 %v4042_v18, %v4039_v52  ;;  %v4061_v18 = vrot.slane %v6643_v63, %v4060_v29 }
 0x8d5   : > { %v6656_v3 = vadd.f32 %v4048_v11, %v4044_v58  ;;  %v5414_v11 = vld [vmem:[%s6248_s18] sm:$0x3]  ;;  %v4062_v58 = vcombine.high %v4061_v18, %v4061_v18  ;;  %s6854_s18 = scalar_lea.vmem %s5865_s12, %s6022_s23 }
 0x8d6   : > { %v4161_v39 = vpop.permute.xlu1 %4160 }
 0x8d7   : > { %5111 = vmatmul.mubr.msk.f32.vlgmr.msra.gmra.mrb[20].mxu0 %vm1466_vm12, %v4161_v39  ;;  %4355 = vrot.lane.b32.xlu0 %v6656_v3, %s6846_s1  ;;  %v4076_v54 = vrot.slane %v4062_v58, %v4060_v29 }
 0x8d8   : > { %5202 = vmatpush3.bf16.msra.mxu0 %v5201_v62  ;;  %5124 = vmatprep.mubr.msk.f32.mxu0 %vm5662_vm11, %v5660_v32  ;;  %v1973_v32 = vadd.f32 %v1970_v1, %v1890_v10  ;;  %v4110_v62 = vrot.slane %v6656_v3, %v4060_v29 }
 0x8d9   : > { %v4084_v63 = vrot.slane %v4076_v54, %v6135_v56 }
 0x8da   : > { %v1711_v20 = vpop.permute.xlu1 %1710  ;;  %v4851_v45 = vmul.f32 -1.442695, %v1973_v32  ;;  %v4111_v39 = vcombine.high %v4110_v62, %v4110_v62  ;;  %v4069_v32 = vrot.slane %v4061_v18, %v4060_v29 }
 0x8db   : > { %v1713_v24 = vmul.f32 %v6666_v7, %v1711_v20  ;;  %1981 = vrot.lane.b32.xlu0 %v1970_v1, %s6838_s7  ;;  %v4088_v20 = vmul.f32 %v4084_v63, %v6208_v59 }
 0x8dc   : > { %5376 = vpow2.f32 %v4851_v45  ;;  %v4125_v1 = vrot.slane %v4111_v39, %v4060_v29 }
 0x8dd   : > { %1715 = vrot.lane.b32.xlu1 %v1713_v24, %s6842_s4 }
 0x8de   : > { %v4325_v19 = vpop.permute.xlu1 %4324  ;;  %v4133_v3 = vrot.slane %v4125_v1, %v6135_v56 }
 0x8df   : > { %4519 = vrot.lane.b32.xlu0 %v4508_v26, %s6838_s7  ;;  %s6852_s7 = sld [smem:[#allocation45_spill]] }
 0x8e0   : > { %v4137_v24 = vmul.f32 %v4133_v3, %v6208_v59 }
 0x8e5   : > { %v4886_v0 = vld [vmem:[%s6852_s7] ss:$0 sm:$0xff] }
 0x8e6   : > { %v5377_v48 = vpop.eup %5376 }
 0x8e7   : > { %v1977_v22 = vadd.f32 1.0, %v5377_v48  ;;  %v4080_v48 = vrot.slane %v4069_v32, %v6135_v56 }
 0x8e9   : > { %5378 = vrcp.f32 %v1977_v22 }
 0x8f3   : > { %v6675_v30 = vpop.eup %5378 }
 0x949   : > { %v4356_v14 = vpop.permute.xlu0 %4355 }
 0x94a   : > { %5125 = vmatmul.mubr.msk.f32.vlgmr.msra.gmra.mrb[22].mxu0 %vm1466_vm12, %v4356_v14 }
 0x94d   : > { %v1982_v23 = vpop.permute.xlu0 %1981 }
 0x94e   : > { %v1984_v12 = vmul.f32 %v6675_v30, %v1982_v23 }
 0x94f   : > { %v1716_v38 = vpop.permute.xlu1 %1715 }
 0x950   : > { %1986 = vrot.lane.b32.xlu0 %v1984_v12, %s6842_s4  ;;  %v1718_v31 = vadd.f32 %v1716_v38, %v1619_v55  ;;  %v4051_v12 = vsub.f32 1.0, %v6208_v59 }
 0x951   : > { %v4520_v4 = vpop.permute.xlu0 %4519 }
 0x9aa   : > { %v4230_v28 = vpop.f32.mrb[20].mxu0 }
 0x9ab   : > { %v4231_v41 = vadd.f32 %v4881_v36, %v4230_v28  ;;  %v5112_v43 = vpop.f32.mrb[21].mxu0 }
 0x9ad   : > { %v4316_v42 = vadd.f32 %v4313_v5, %v4231_v41 }
 0x9af   : > { %v4885_v8 = vmul.f32 -1.442695, %v4316_v42 }
 0x9b1   : > { %5380 = vpow2.f32 %v4885_v8  ;;  %v5416_v8 = vld [vmem:[#allocation4 + $0x2] sm:$0x3] }
 0x9bb   : > { %v5381_v49 = vpop.eup %5380 }
 0x9bc   : > { %v4320_v35 = vadd.f32 1.0, %v5381_v49 }
 0x9be   : > { %5382 = vrcp.f32 %v4320_v35 }
 0x9bf   : > { %5384 = vtanh.f32 %v1718_v31 }
 0x9c2   : > { %v1987_v50 = vpop.permute.xlu0 %1986 }
 0x9c3   : > { %v1989_v47 = vadd.f32 %v1987_v50, %v1890_v10  ;;  %v1720_v50 = vsub.f32 1.0, %v6666_v7 }
 0x9c5   : > { %5386 = vtanh.f32 %v1989_v47 }
 0x9c8   : > { %v6680_v51 = vpop.eup %5382 }
 0x9c9   : > { %v4327_v40 = vmul.f32 %v6680_v51, %v4325_v19  ;;  %v5385_v61 = vpop.eup %5384  ;;  %v4334_v42 = vsub.f32 1.0, %v6680_v51  ;;  %v4053_v19 = vmul.f32 %v5416_v8, %v4051_v12 }
 0x9cb   : > { %4329 = vrot.lane.b32.xlu1 %v4327_v40, %s6842_s4 }
 0x9cf   : > { %1722 = vrot.lane.b32.xlu1 %v5385_v61, %s6846_s1  ;;  %v5387_v21 = vpop.eup %5386 }
 0x9d3   : > { %1993 = vrot.lane.b32.xlu1 %v5387_v21, %s6846_s1 }
 0xa1d   : > { %v4425_v44 = vpop.f32.mrb[22].mxu0 }
 0xa1e   : > { %v4426_v37 = vadd.f32 %v4886_v0, %v4425_v44  ;;  %v5126_v5 = vpop.f32.mrb[23].mxu0 }
 0xa20   : > { %v4511_v27 = vadd.f32 %v4508_v26, %v4426_v37 }
 0xa22   : > { %v4890_v55 = vmul.f32 -1.442695, %v4511_v27 }
 0xa24   : > { %5388 = vpow2.f32 %v4890_v55 }
 0xa2e   : > { %v5389_v46 = vpop.eup %5388 }
 0xa2f   : > { %v4515_v33 = vadd.f32 1.0, %v5389_v46 }
 0xa31   : > { %5390 = vrcp.f32 %v4515_v33 }
 0xa3b   : > { %v6687_v2 = vpop.eup %5390 }
 0xa3c   : > { %v4522_v52 = vmul.f32 %v6687_v2, %v4520_v4  ;;  %v4529_v44 = vsub.f32 1.0, %v6687_v2 }
 0xa3d   : > { %v4330_v17 = vpop.permute.xlu1 %4329 }
 0xa3e   : > { %v4332_v53 = vadd.f32 %v4330_v17, %v4231_v41  ;;  %4524 = vrot.lane.b32.xlu0 %v4522_v52, %s6842_s4  ;;  %v4087_v41 = vmul.f32 %v4080_v48, %v6210_v60  ;;  %s4891_s4 = sshll.u32 %s5886_s27, 1 }
 0xa3f   : > { %s4555_s0 = scalar_lea.vmem [#allocation2], %s4891_s4 }
 0xa40   : > { %5392 = vtanh.f32 %v4332_v53 }
 0xa41   : > { %v1723_v10 = vpop.permute.xlu1 %1722 }
 0xa42   : > { %1726 = vrot.lane.b32.xlu0 %v5414_v11, %s6853_s3  ;;  %v1725_v0 = vmul.f32 %v1723_v10, %v1720_v50 }
 0xa45   : > { %v1994_v23 = vpop.permute.xlu1 %1993 }
 0xa46   : > { %1997 = vrot.lane.b32.xlu0 %v5415_v15, %s6853_s3 }
 0xa4a   : > { %v5393_v6 = vpop.eup %5392  ;;  %4340 = vrot.lane.b32.xlu0 %v6617_v25, %s6853_s3 }
 0xa4b   : > { %4336 = vrot.lane.b32.xlu1 %v5393_v6, %s6846_s1 }
 0xa4e   : > { %4535 = vrot.lane.b32.xlu0 %v6633_v34, %s6853_s3  ;;  %v4118_v34 = vrot.slane %v4110_v62, %v4060_v29 }
 0xa50   : > { %v4129_v36 = vrot.slane %v4118_v34, %v6135_v56  ;;  %v5417_v56 = vld [vmem:[#allocation5 + $0x2] sm:$0x3] }
 0xa51   : > { %v4102_v59 = vmul.f32 %v5417_v56, %v4051_v12 }
 0xa52   : > { %4093 = vrot.lane.b32.xlu0 %v4088_v20, %s6846_s1  ;;  %v4136_v38 = vmul.f32 %v4129_v36, %v6210_v60 }
 0xa56   : > { %4142 = vrot.lane.b32.xlu0 %v4137_v24, %s6846_s1 }
 0xab0   : > { %v4525_v26 = vpop.permute.xlu0 %4524 }
 0xab1   : > { %v4527_v25 = vadd.f32 %v4525_v26, %v4426_v37  ;;  %v4050_v37 = vsub.f32 1.0, %v6210_v60 }
 0xab3   : > { %5394 = vtanh.f32 %v4527_v25  ;;  %v4052_v13 = vmul.f32 %v5418_v9, %v4050_v37 }
 0xab4   : > { %v1727_v57 = vpop.permute.xlu0 %1726 }
 0xab5   : > { %v1729_v47 = vmul.f32 %v6666_v7, %v1727_v57  ;;  %v1991_v7 = vsub.f32 1.0, %v6675_v30 }
 0xab7   : > { %v1996_v29 = vmul.f32 %v1994_v23, %v1991_v7 }
 0xab8   : > { %v1998_v45 = vpop.permute.xlu0 %1997 }
 0xab9   : > { %v2000_v46 = vmul.f32 %v6675_v30, %v1998_v45 }
 0xabb   : > { %v2001_v60 = vadd.f32 %v2000_v46, %v1996_v29 }
 0xabc   : > { %v4341_v22 = vpop.permute.xlu0 %4340 }
 0xabd   : > { %v5395_v14 = vpop.eup %5394  ;;  %v4337_v43 = vpop.permute.xlu1 %4336  ;;  %v4343_v49 = vmul.f32 %v6680_v51, %v4341_v22  ;;  %v1730_v51 = vadd.f32 %v1729_v47, %v1725_v0 }
 0xabe   : > { %4531 = vrot.lane.b32.xlu1 %v5395_v14, %s6846_s1  ;;  %v4339_v35 = vmul.f32 %v4337_v43, %v4334_v42 }
 0xac0   : > { %v4536_v28 = vpop.permute.xlu0 %4535  ;;  %v4344_v40 = vadd.f32 %v4343_v49, %v4339_v35 }
 0xac1   : > { %v4538_v27 = vmul.f32 %v6687_v2, %v4536_v28  ;;  %v5419_v2 = vld [vmem:[#allocation5] sm:$0x3] }
 0xac2   : > { %4091 = vrot.lane.b32.xlu1 %v4087_v41, %s6846_s1  ;;  %v4101_v17 = vmul.f32 %v5419_v2, %v4050_v37 }
 0xac4   : > { %v4094_v4 = vpop.permute.xlu0 %4093 }
 0xac5   : > { %v4098_v31 = vadd.f32 %v4094_v4, %v4053_v19 }
 0xac6   : > { %4140 = vrot.lane.b32.xlu1 %v4136_v38, %s6846_s1 }
 0xac7   : > { %4100 = vst.msk [vmem:[#allocation4 + $0x2] sm:$0x3] %vm1419_vm1, %v4098_v31 }
 0xac8   : > { %v4143_v61 = vpop.permute.xlu0 %4142 }
 0xac9   : > { %v4147_v21 = vadd.f32 %v4143_v61, %v4102_v59 }
 0xaca   : > { %4541 = vrot.lane.b32.xlu1 %v4344_v40, %s6846_s1 }
 0xacb   : > { %4149 = vst.msk [vmem:[#allocation5 + $0x2] sm:$0x3] %vm1419_vm1, %v4147_v21 }
 0xace   : > { %4551 = vrot.lane.b32.xlu1 %v1730_v51, %s6846_s1 }
 0xb30   : > { %v4532_v5 = vpop.permute.xlu1 %4531 }
 0xb31   : > { %v4534_v55 = vmul.f32 %v4532_v5, %v4529_v44 }
 0xb33   : > { %v4539_v33 = vadd.f32 %v4538_v27, %v4534_v55 }
 0xb34   : > { %v4092_v16 = vpop.permute.xlu1 %4091 }
 0xb35   : > { %v4097_v52 = vadd.f32 %v4092_v16, %v4052_v13  ;;  %4546 = vrot.lane.b32.xlu0 %v4539_v33, %s6846_s1 }
 0xb37   : > { %4099 = vst.msk [vmem:[#allocation4] sm:$0x3] %vm1419_vm1, %v4097_v52 }
 0xb38   : > { %v4141_v53 = vpop.permute.xlu1 %4140 }
 0xb39   : > { %v4146_v30 = vadd.f32 %v4141_v53, %v4101_v17  ;;  %4558 = vrot.lane.b32.xlu0 %v2001_v60, %s6846_s1  ;;  %s4561_s1 = scalar_lea.vmem [#allocation3], %s4891_s4 }
 0xb3b   : > { %4148 = vst.msk [vmem:[#allocation5] sm:$0x3] %vm1419_vm1, %v4146_v30 }
 0xb3c   : > { %v4542_v18 = vpop.permute.xlu1 %4541 }
 0xb3d   : > { %4544 = vst.msk [vmem:[#allocation6] sm:$0x3] %vm1419_vm1, %v4542_v18  ;;  %4563 = vst.msk [vmem:[%s6854_s18] sm:$0x3] %vm1419_vm1, %v4542_v18 }
 0xb40   : > { %v4552_v11 = vpop.permute.xlu1 %4551 }
 0xb41   : > { %4556 = vst.msk [vmem:[%s4555_s0] sm:$0x3] %vm1419_vm1, %v4552_v11 }
 0xba7   : > { %v4547_v58 = vpop.permute.xlu0 %4546 }
 0xba8   : > { %4549 = vst.msk [vmem:[#allocation7] sm:$0x3] %vm1419_vm1, %v4547_v58  ;;  %4564 = vst.msk [vmem:[%s6855_s16] sm:$0x3] %vm1419_vm1, %v4547_v58 }
 0xbab   : > { %v4559_v62 = vpop.permute.xlu0 %4558 }
 0xbac   : > { %4562 = vst.msk [vmem:[%s4561_s1] sm:$0x3] %vm1419_vm1, %v4559_v62 }
 0xbad PF: > { %s102_s6 = sadd.s32 1, %s5610_s6  }
 0xbae   : > { %p99_p11 = scmp.ge.s32.totalorder %s102_s6, 10  }
 0xbb0   :  { %101 = sbr.rel (!%p99_p11) target bundleno = 81 (0x51), region = 310 }
 0xbb7   :  { %4613 = vsyncpa [#allocation11], 1 }
 0xbb8   :  { %4615 = vsyncpa [#allocation11 + $0x1], 1 }
 0xbb9   :  { %4616 = vsyncpa [#allocation13], 1 }
 0xbba   :  { %4617 = vsyncpa [#allocation16], 1 }
 0xbbb   :  { %4618 = vsyncpa [#allocation19], 1 }

</bundles_post_ra>
